<compile_context>
chip_gen: v7x
topology: tpu7x:2x2x1
jax: 0.10.0
libtpu: 0.0.40
codegen_flags: <defaults>
</compile_context>

<pallas_src>
import jax
import jax.numpy as jnp
from jax.experimental import pallas as pl
from jax.experimental.pallas import tpu as pltpu

_EPS = 1e-5
_XOFF = 2   # interior column offset inside padded scratch (even offset keeps
            # bf16 packed-pair stores along the W (sublane) dim aligned)


def _make_resblock_kernel(N, H, W, Cin, Cout, has_identity):
    HW = H * W
    P = N * HW
    inv_p = 1.0 / P
    Wp = W + 4          # [dummy, left-pad, W interior cols, right-pad, dummy]

    def batchnorm(t, g_ref, be_ref):
        # Fused single-pass training-mode BN: sum & sum-of-squares together,
        # folded per-channel scale/shift, one FMA over the block (all f32).
        s1 = jnp.sum(t, axis=0, keepdims=True)
        s2 = jnp.sum(t * t, axis=0, keepdims=True)
        m = s1 * inv_p
        var = jnp.maximum(s2 * inv_p - m * m, 0.0)
        scale = g_ref[...] * jax.lax.rsqrt(var + _EPS)
        shift = be_ref[...] - m * scale
        return t * scale + shift

    def fill_pad(pad_ref, interior_bf16, c):
        # Interior written exactly once at an aligned even column offset; only
        # the border (+ adjacent dummy) columns and top/bottom rows are zeroed.
        pad_ref[:, 1:1 + H, _XOFF:_XOFF + W, :] = interior_bf16
        zrow = jnp.zeros((N, 1, Wp, c), jnp.bfloat16)
        pad_ref[:, 0:1, :, :] = zrow
        pad_ref[:, H + 1:H + 2, :, :] = zrow
        zcol = jnp.zeros((N, H, 2, c), jnp.bfloat16)
        pad_ref[:, 1:1 + H, 0:2, :] = zcol               # dummy + left pad
        pad_ref[:, 1:1 + H, W + 2:W + 4, :] = zcol       # right pad + dummy

    def fill_patch(patch_ref, pad_ref, c):
        # im2col assembly via 9 static-offset scratch stores (no lane concat);
        # the patch stays bf16 for the single K=9*c MXU matmul.
        for dy in range(3):
            for dx in range(3):
                t = dy * 3 + dx
                patch_ref[:, t * c:(t + 1) * c] = (
                    pad_ref[:, dy:dy + H, 1 + dx:1 + dx + W, :].reshape(P, c))

    def kernel(*refs):
        if has_identity:
            (x_ref, w1_ref, g1_ref, be1_ref,
             w2_ref, g2_ref, be2_ref, bi_ref,
             f1w_ref, f1b_ref, f2w_ref, f2b_ref,
             out_ref, pad1_ref, pad2_ref, patch1_ref, patch2_ref) = refs
        else:
            (x_ref, w1_ref, g1_ref, be1_ref,
             w2_ref, g2_ref, be2_ref,
             f1w_ref, f1b_ref, f2w_ref, f2b_ref,
             out_ref, pad1_ref, pad2_ref, patch1_ref, patch2_ref) = refs
            bi_ref = None

        # ---- conv1 (+ fused 1x1 identity projection when c_in != c_out) ----
        fill_pad(pad1_ref, x_ref[...].astype(jnp.bfloat16), Cin)
        fill_patch(patch1_ref, pad1_ref, Cin)
        z1 = jnp.dot(patch1_ref[...], w1_ref[...],
                     preferred_element_type=jnp.float32)
        if has_identity:
            x1pre = z1[:, :Cout]
            # identity projection came out of the same matmul (center-tap rows)
            y3 = (z1[:, Cout:2 * Cout] + bi_ref[...]).reshape(N, HW, Cout)
        else:
            x1pre = z1
            y3 = x_ref[...].reshape(N, HW, Cin)          # residual, f32

        # conv biases b1/b2 intentionally absent: cancelled exactly by the
        # training-mode BN mean subtraction.
        x1 = jnp.maximum(batchnorm(x1pre, g1_ref, be1_ref), 0.0)

        # ---- conv2 -> bn2 ----------------------------------------------------
        fill_pad(pad2_ref, x1.reshape(N, H, W, Cout).astype(jnp.bfloat16), Cout)
        fill_patch(patch2_ref, pad2_ref, Cout)
        x2 = batchnorm(
            jnp.dot(patch2_ref[...], w2_ref[...],
                    preferred_element_type=jnp.float32),
            g2_ref, be2_ref)

        # ---- squeeze-excite: per-sample mean over HW, two tiny FC layers -----
        x2_3 = x2.reshape(N, HW, Cout)
        x_sq = jnp.mean(x2_3, axis=1)                     # (N, Cout)
        hfc = jnp.maximum(
            jnp.dot(x_sq, f1w_ref[...], preferred_element_type=jnp.float32)
            + f1b_ref[...], 0.0)
        s = jax.nn.sigmoid(
            jnp.dot(hfc, f2w_ref[...], preferred_element_type=jnp.float32)
            + f2b_ref[...])                               # (N, Cout)

        # ---- channel scale, residual add, ReLU; ONE lane-dense store ---------
        final = jnp.maximum(x2_3 * s[:, None, :] + y3, 0.0)     # (N, HW, Cout)
        f4 = final.reshape(N * H, W, Cout)
        out_ref[...] = jnp.concatenate([f4[:, w, :] for w in range(W)], axis=-1)

    return kernel


def resblock_sq(x_nchw, params, bdown=False):
    # TODO(synk): stride-2 (bdown=True) conv1 / strided 1x1 identity path is
    # not implemented; only the stride-1 ResBlock_Sq configuration is handled.
    assert not bdown, "stride-2 path not implemented"

    x = jnp.transpose(x_nchw, (0, 2, 3, 1)).astype(jnp.float32)   # NCHW -> NHWC
    N, H, W, Cin = x.shape
    Cout = params['w1'].shape[-1]
    has_identity = 'wi' in params
    P = N * H * W

    # im2col weight layout (9*C, Cout), bf16 MXU operands; conv biases b1/b2
    # are not passed (cancelled by training-mode BN).  The 1x1 identity
    # projection is fused into conv1's weight along the output dim.
    w1 = params['w1'].reshape(9 * Cin, Cout)
    if has_identity:
        wi_full = jnp.zeros((9 * Cin, Cout), jnp.float32)
        wi_full = wi_full.at[4 * Cin:5 * Cin, :].set(params['wi'])  # center tap
        w1 = jnp.concatenate([w1, wi_full], axis=1)                 # (9Cin,2Cout)
    w1 = w1.astype(jnp.bfloat16)
    w2 = params['w2'].reshape(9 * Cout, Cout).astype(jnp.bfloat16)

    args = [x, w1, params['g1'], params['be1'], w2, params['g2'], params['be2']]
    if has_identity:
        args += [params['bi']]
    args += [params['f1w'], params['f1b'], params['f2w'], params['f2b']]

    Wp = W + 4
    scratch_shapes = [
        pltpu.VMEM((N, H + 2, Wp, Cin), jnp.bfloat16),    # pad1 (bf16)
        pltpu.VMEM((N, H + 2, Wp, Cout), jnp.bfloat16),   # pad2 (bf16)
        pltpu.VMEM((P, 9 * Cin), jnp.bfloat16),           # im2col patch, conv1
        pltpu.VMEM((P, 9 * Cout), jnp.bfloat16),          # im2col patch, conv2
    ]

    # VMEM budget: inputs + output + scratches + dominant live f32 temporaries
    # (fused conv1 output, x1/x2 blocks, residual, final).
    est_bytes = sum(int(a.size) * a.dtype.itemsize for a in args)
    est_bytes += 4 * P * Cout                                      # output
    est_bytes += 2 * N * (H + 2) * Wp * (Cin + Cout)               # pad scratch
    est_bytes += 2 * P * 9 * (Cin + Cout)                          # im2col
    est_bytes += 4 * P * (2 * Cout if has_identity else Cout)      # z1
    est_bytes += 4 * 4 * P * Cout                                  # x1/x2/y/out
    try:
        vmem_cap = int(pltpu.get_tpu_info().vmem_capacity_bytes)
    except Exception:
        vmem_cap = 64 * 1024 * 1024                                # conservative
    vmem_limit = int(min(int(0.75 * vmem_cap),
                         max(32 * 1024 * 1024, 4 * est_bytes)))

    kernel = _make_resblock_kernel(N, H, W, Cin, Cout, has_identity)
    out = pl.pallas_call(
        kernel,
        out_shape=jax.ShapeDtypeStruct((N * H, W * Cout), jnp.float32),
        in_specs=[pl.BlockSpec(memory_space=pltpu.MemorySpace.VMEM)] * len(args),
        out_specs=pl.BlockSpec(memory_space=pltpu.MemorySpace.VMEM),
        scratch_shapes=scratch_shapes,
        compiler_params=pltpu.CompilerParams(vmem_limit_bytes=vmem_limit),
    )(*args)

    out = out.reshape(N, H, W, Cout)
    return jnp.transpose(out, (0, 3, 1, 2))                        # back to NCHW


def resblock_sq_ref(x_nchw, p):
    """Pure-JAX f32 reference (same math as the PyTorch module)."""
    x = jnp.transpose(x_nchw, (0, 2, 3, 1)).astype(jnp.float32)

    def conv3(t, w, b):
        return jax.lax.conv_general_dilated(
            t, w, window_strides=(1, 1), padding=((1, 1), (1, 1)),
            dimension_numbers=('NHWC', 'HWIO', 'NHWC')) + b.reshape(1, 1, 1, -1)

    def bn(t, g, be):
        m = jnp.mean(t, axis=(0, 1, 2), keepdims=True)
        v = jnp.mean((t - m) ** 2, axis=(0, 1, 2), keepdims=True)
        return ((t - m) * jax.lax.rsqrt(v + _EPS) * g.reshape(1, 1, 1, -1)
                + be.reshape(1, 1, 1, -1))

    h = jax.nn.relu(bn(conv3(x, p['w1'], p['b1']), p['g1'], p['be1']))
    h = bn(conv3(h, p['w2'], p['b2']), p['g2'], p['be2'])
    sq = jnp.mean(h, axis=(1, 2))
    sq = jax.nn.relu(sq @ p['f1w'] + p['f1b'])
    sq = jax.nn.sigmoid(sq @ p['f2w'] + p['f2b'])
    h = h * sq[:, None, None, :]
    if 'wi' in p:
        y = jnp.einsum('nhwc,co->nhwo', x, p['wi']) + p['bi'].reshape(1, 1, 1, -1)
    else:
        y = x
    return jnp.transpose(jax.nn.relu(h + y), (0, 3, 1, 2))


def init_params(key, c_in, c_out):
    hid = max(c_out // 16, 1)
    ks = jax.random.split(key, 14)

    def u(k, shape, fan_in):
        bound = 1.0 / (fan_in ** 0.5)
        return jax.random.uniform(k, shape, jnp.float32, -bound, bound)

    p = {
        'w1': u(ks[0], (3, 3, c_in, c_out), 9 * c_in),
        'b1': u(ks[1], (1, c_out), 9 * c_in),
        'g1': 1.0 + 0.1 * jax.random.normal(ks[2], (1, c_out), jnp.float32),
        'be1': 0.1 * jax.random.normal(ks[3], (1, c_out), jnp.float32),
        'w2': u(ks[4], (3, 3, c_out, c_out), 9 * c_out),
        'b2': u(ks[5], (1, c_out), 9 * c_out),
        'g2': 1.0 + 0.1 * jax.random.normal(ks[6], (1, c_out), jnp.float32),
        'be2': 0.1 * jax.random.normal(ks[7], (1, c_out), jnp.float32),
        'f1w': u(ks[8], (c_out, hid), c_out),
        'f1b': u(ks[9], (1, hid), c_out),
        'f2w': u(ks[10], (hid, c_out), hid),
        'f2b': u(ks[11], (1, c_out), hid),
    }
    if c_in != c_out:   # PyTorch only creates the 1x1 identity conv in this case
        p['wi'] = u(ks[12], (c_in, c_out), c_in)
        p['bi'] = u(ks[13], (1, c_out), c_in)
    return p


def _check(out, ref, shape, name):
    assert out.shape == shape, f"{name}: bad shape {out.shape}"
    assert bool(jnp.isfinite(out).all()), f"{name}: non-finite output"
    max_err = float(jnp.max(jnp.abs(out - ref)))
    tol = max(1e-1, 2.5e-2 * float(jnp.max(jnp.abs(ref))))
    assert max_err < tol, f"{name}: mismatch vs reference, {max_err} >= {tol}"


if __name__ == "__main__":
    key = jax.random.PRNGKey(0)
    k1, k2, k3, k4 = jax.random.split(key, 4)

    N, H, W = 2, 8, 8

    # Case A: c_in != c_out (1x1 projection fused into conv1's matmul).
    C_IN_A, C_OUT_A = 32, 64
    xA = jax.random.normal(k1, (N, C_IN_A, H, W), jnp.float32)    # NCHW
    pA = init_params(k2, C_IN_A, C_OUT_A)
    outA = jax.block_until_ready(resblock_sq(xA, pA))
    refA = jax.block_until_ready(resblock_sq_ref(xA, pA))
    _check(outA, refA, (N, C_OUT_A, H, W), "caseA")

    # Case B: c_in == c_out (no projection; residual read straight from x).
    C_B = 64
    xB = jax.random.normal(k3, (N, C_B, H, W), jnp.float32)
    pB = init_params(k4, C_B, C_B)
    outB = jax.block_until_ready(resblock_sq(xB, pB))
    refB = jax.block_until_ready(resblock_sq_ref(xB, pB))
    _check(outB, refB, (N, C_B, H, W), "caseB")

    print("KERNEL_OK")
</pallas_src>

<mosaic_0001>
module attributes {stable_mosaic.version = 11 : i64} {
  func.func @kernel(%arg0: memref<2x8x8x32xf32, #tpu.memory_space<vmem>>, %arg1: memref<288x128xbf16, #tpu.memory_space<vmem>>, %arg2: memref<1x64xf32, #tpu.memory_space<vmem>>, %arg3: memref<1x64xf32, #tpu.memory_space<vmem>>, %arg4: memref<576x64xbf16, #tpu.memory_space<vmem>>, %arg5: memref<1x64xf32, #tpu.memory_space<vmem>>, %arg6: memref<1x64xf32, #tpu.memory_space<vmem>>, %arg7: memref<1x64xf32, #tpu.memory_space<vmem>>, %arg8: memref<64x4xf32, #tpu.memory_space<vmem>>, %arg9: memref<1x4xf32, #tpu.memory_space<vmem>>, %arg10: memref<4x64xf32, #tpu.memory_space<vmem>>, %arg11: memref<1x64xf32, #tpu.memory_space<vmem>>, %arg12: memref<16x512xf32, #tpu.memory_space<vmem>>, %arg13: memref<2x10x12x32xbf16, #tpu.memory_space<vmem>>, %arg14: memref<2x10x12x64xbf16, #tpu.memory_space<vmem>>, %arg15: memref<128x288xbf16, #tpu.memory_space<vmem>>, %arg16: memref<128x576xbf16, #tpu.memory_space<vmem>>) attributes {dimension_semantics = [], scalar_prefetch = 0 : i64, scratch_operands = 4 : i64, tpu.core_type = #tpu.core_type<tc>} {
    %c0 = arith.constant 0 : index
    %c0_0 = arith.constant 0 : index
    %c0_1 = arith.constant 0 : index
    %c0_2 = arith.constant 0 : index
    %0 = vector.load %arg0[%c0, %c0_0, %c0_1, %c0_2] : memref<2x8x8x32xf32, #tpu.memory_space<vmem>>, vector<2x8x8x32xf32>
    %1 = arith.truncf %0 : vector<2x8x8x32xf32> to vector<2x8x8x32xbf16>
    %c0_3 = arith.constant 0 : index
    %c1 = arith.constant 1 : index
    %c2 = arith.constant 2 : index
    %c0_4 = arith.constant 0 : index
    %2 = vector.load %arg13[%c0_3, %c1, %c2, %c0_4] : memref<2x10x12x32xbf16, #tpu.memory_space<vmem>>, vector<2x8x8x32xbf16>
    tpu.vector_store %arg13[%c0_3, %c1, %c2, %c0_4], %1 {strides = array<i32>} : memref<2x10x12x32xbf16, #tpu.memory_space<vmem>>, vector<2x8x8x32xbf16>,
    %cst = arith.constant 0.000000e+00 : bf16
    %3 = vector.broadcast %cst : bf16 to vector<2x1x12x32xbf16>
    %c0_5 = arith.constant 0 : index
    %c0_6 = arith.constant 0 : index
    %c0_7 = arith.constant 0 : index
    %c0_8 = arith.constant 0 : index
    %4 = vector.load %arg13[%c0_5, %c0_6, %c0_7, %c0_8] : memref<2x10x12x32xbf16, #tpu.memory_space<vmem>>, vector<2x1x12x32xbf16>
    tpu.vector_store %arg13[%c0_5, %c0_6, %c0_7, %c0_8], %3 {strides = array<i32>} : memref<2x10x12x32xbf16, #tpu.memory_space<vmem>>, vector<2x1x12x32xbf16>,
    %c0_9 = arith.constant 0 : index
    %c9 = arith.constant 9 : index
    %c0_10 = arith.constant 0 : index
    %c0_11 = arith.constant 0 : index
    %5 = vector.load %arg13[%c0_9, %c9, %c0_10, %c0_11] : memref<2x10x12x32xbf16, #tpu.memory_space<vmem>>, vector<2x1x12x32xbf16>
    tpu.vector_store %arg13[%c0_9, %c9, %c0_10, %c0_11], %3 {strides = array<i32>} : memref<2x10x12x32xbf16, #tpu.memory_space<vmem>>, vector<2x1x12x32xbf16>,
    %cst_12 = arith.constant 0.000000e+00 : bf16
    %6 = vector.broadcast %cst_12 : bf16 to vector<2x8x2x32xbf16>
    %c0_13 = arith.constant 0 : index
    %c1_14 = arith.constant 1 : index
    %c0_15 = arith.constant 0 : index
    %c0_16 = arith.constant 0 : index
    %7 = vector.load %arg13[%c0_13, %c1_14, %c0_15, %c0_16] : memref<2x10x12x32xbf16, #tpu.memory_space<vmem>>, vector<2x8x2x32xbf16>
    tpu.vector_store %arg13[%c0_13, %c1_14, %c0_15, %c0_16], %6 {strides = array<i32>} : memref<2x10x12x32xbf16, #tpu.memory_space<vmem>>, vector<2x8x2x32xbf16>,
    %c0_17 = arith.constant 0 : index
    %c1_18 = arith.constant 1 : index
    %c10 = arith.constant 10 : index
    %c0_19 = arith.constant 0 : index
    %8 = vector.load %arg13[%c0_17, %c1_18, %c10, %c0_19] : memref<2x10x12x32xbf16, #tpu.memory_space<vmem>>, vector<2x8x2x32xbf16>
    tpu.vector_store %arg13[%c0_17, %c1_18, %c10, %c0_19], %6 {strides = array<i32>} : memref<2x10x12x32xbf16, #tpu.memory_space<vmem>>, vector<2x8x2x32xbf16>,
    %c0_20 = arith.constant 0 : index
    %c0_21 = arith.constant 0 : index
    %c1_22 = arith.constant 1 : index
    %c0_23 = arith.constant 0 : index
    %9 = vector.load %arg13[%c0_20, %c0_21, %c1_22, %c0_23] : memref<2x10x12x32xbf16, #tpu.memory_space<vmem>>, vector<2x8x8x32xbf16>
    %10 = vector.shape_cast %9 : vector<2x8x8x32xbf16> to vector<128x32xbf16>
    %c0_24 = arith.constant 0 : index
    %c0_25 = arith.constant 0 : index
    %11 = vector.load %arg15[%c0_24, %c0_25] : memref<128x288xbf16, #tpu.memory_space<vmem>>, vector<128x32xbf16>
    tpu.vector_store %arg15[%c0_24, %c0_25], %10 {strides = array<i32>} : memref<128x288xbf16, #tpu.memory_space<vmem>>, vector<128x32xbf16>,
    %c0_26 = arith.constant 0 : index
    %c0_27 = arith.constant 0 : index
    %c2_28 = arith.constant 2 : index
    %c0_29 = arith.constant 0 : index
    %12 = vector.load %arg13[%c0_26, %c0_27, %c2_28, %c0_29] : memref<2x10x12x32xbf16, #tpu.memory_space<vmem>>, vector<2x8x8x32xbf16>
    %13 = vector.shape_cast %12 : vector<2x8x8x32xbf16> to vector<128x32xbf16>
    %c0_30 = arith.constant 0 : index
    %c32 = arith.constant 32 : index
    %14 = vector.load %arg15[%c0_30, %c32] : memref<128x288xbf16, #tpu.memory_space<vmem>>, vector<128x32xbf16>
    tpu.vector_store %arg15[%c0_30, %c32], %13 {strides = array<i32>} : memref<128x288xbf16, #tpu.memory_space<vmem>>, vector<128x32xbf16>,
    %c0_31 = arith.constant 0 : index
    %c0_32 = arith.constant 0 : index
    %c3 = arith.constant 3 : index
    %c0_33 = arith.constant 0 : index
    %15 = vector.load %arg13[%c0_31, %c0_32, %c3, %c0_33] : memref<2x10x12x32xbf16, #tpu.memory_space<vmem>>, vector<2x8x8x32xbf16>
    %16 = vector.shape_cast %15 : vector<2x8x8x32xbf16> to vector<128x32xbf16>
    %c0_34 = arith.constant 0 : index
    %c64 = arith.constant 64 : index
    %17 = vector.load %arg15[%c0_34, %c64] : memref<128x288xbf16, #tpu.memory_space<vmem>>, vector<128x32xbf16>
    tpu.vector_store %arg15[%c0_34, %c64], %16 {strides = array<i32>} : memref<128x288xbf16, #tpu.memory_space<vmem>>, vector<128x32xbf16>,
    %c0_35 = arith.constant 0 : index
    %c1_36 = arith.constant 1 : index
    %c1_37 = arith.constant 1 : index
    %c0_38 = arith.constant 0 : index
    %18 = vector.load %arg13[%c0_35, %c1_36, %c1_37, %c0_38] : memref<2x10x12x32xbf16, #tpu.memory_space<vmem>>, vector<2x8x8x32xbf16>
    %19 = vector.shape_cast %18 : vector<2x8x8x32xbf16> to vector<128x32xbf16>
    %c0_39 = arith.constant 0 : index
    %c96 = arith.constant 96 : index
    %20 = vector.load %arg15[%c0_39, %c96] : memref<128x288xbf16, #tpu.memory_space<vmem>>, vector<128x32xbf16>
    tpu.vector_store %arg15[%c0_39, %c96], %19 {strides = array<i32>} : memref<128x288xbf16, #tpu.memory_space<vmem>>, vector<128x32xbf16>,
    %c0_40 = arith.constant 0 : index
    %c1_41 = arith.constant 1 : index
    %c2_42 = arith.constant 2 : index
    %c0_43 = arith.constant 0 : index
    %21 = vector.load %arg13[%c0_40, %c1_41, %c2_42, %c0_43] : memref<2x10x12x32xbf16, #tpu.memory_space<vmem>>, vector<2x8x8x32xbf16>
    %22 = vector.shape_cast %21 : vector<2x8x8x32xbf16> to vector<128x32xbf16>
    %c0_44 = arith.constant 0 : index
    %c128 = arith.constant 128 : index
    %23 = vector.load %arg15[%c0_44, %c128] : memref<128x288xbf16, #tpu.memory_space<vmem>>, vector<128x32xbf16>
    tpu.vector_store %arg15[%c0_44, %c128], %22 {strides = array<i32>} : memref<128x288xbf16, #tpu.memory_space<vmem>>, vector<128x32xbf16>,
    %c0_45 = arith.constant 0 : index
    %c1_46 = arith.constant 1 : index
    %c3_47 = arith.constant 3 : index
    %c0_48 = arith.constant 0 : index
    %24 = vector.load %arg13[%c0_45, %c1_46, %c3_47, %c0_48] : memref<2x10x12x32xbf16, #tpu.memory_space<vmem>>, vector<2x8x8x32xbf16>
    %25 = vector.shape_cast %24 : vector<2x8x8x32xbf16> to vector<128x32xbf16>
    %c0_49 = arith.constant 0 : index
    %c160 = arith.constant 160 : index
    %26 = vector.load %arg15[%c0_49, %c160] : memref<128x288xbf16, #tpu.memory_space<vmem>>, vector<128x32xbf16>
    tpu.vector_store %arg15[%c0_49, %c160], %25 {strides = array<i32>} : memref<128x288xbf16, #tpu.memory_space<vmem>>, vector<128x32xbf16>,
    %c0_50 = arith.constant 0 : index
    %c2_51 = arith.constant 2 : index
    %c1_52 = arith.constant 1 : index
    %c0_53 = arith.constant 0 : index
    %27 = vector.load %arg13[%c0_50, %c2_51, %c1_52, %c0_53] : memref<2x10x12x32xbf16, #tpu.memory_space<vmem>>, vector<2x8x8x32xbf16>
    %28 = vector.shape_cast %27 : vector<2x8x8x32xbf16> to vector<128x32xbf16>
    %c0_54 = arith.constant 0 : index
    %c192 = arith.constant 192 : index
    %29 = vector.load %arg15[%c0_54, %c192] : memref<128x288xbf16, #tpu.memory_space<vmem>>, vector<128x32xbf16>
    tpu.vector_store %arg15[%c0_54, %c192], %28 {strides = array<i32>} : memref<128x288xbf16, #tpu.memory_space<vmem>>, vector<128x32xbf16>,
    %c0_55 = arith.constant 0 : index
    %c2_56 = arith.constant 2 : index
    %c2_57 = arith.constant 2 : index
    %c0_58 = arith.constant 0 : index
    %30 = vector.load %arg13[%c0_55, %c2_56, %c2_57, %c0_58] : memref<2x10x12x32xbf16, #tpu.memory_space<vmem>>, vector<2x8x8x32xbf16>
    %31 = vector.shape_cast %30 : vector<2x8x8x32xbf16> to vector<128x32xbf16>
    %c0_59 = arith.constant 0 : index
    %c224 = arith.constant 224 : index
    %32 = vector.load %arg15[%c0_59, %c224] : memref<128x288xbf16, #tpu.memory_space<vmem>>, vector<128x32xbf16>
    tpu.vector_store %arg15[%c0_59, %c224], %31 {strides = array<i32>} : memref<128x288xbf16, #tpu.memory_space<vmem>>, vector<128x32xbf16>,
    %c0_60 = arith.constant 0 : index
    %c2_61 = arith.constant 2 : index
    %c3_62 = arith.constant 3 : index
    %c0_63 = arith.constant 0 : index
    %33 = vector.load %arg13[%c0_60, %c2_61, %c3_62, %c0_63] : memref<2x10x12x32xbf16, #tpu.memory_space<vmem>>, vector<2x8x8x32xbf16>
    %34 = vector.shape_cast %33 : vector<2x8x8x32xbf16> to vector<128x32xbf16>
    %c0_64 = arith.constant 0 : index
    %c256 = arith.constant 256 : index
    %35 = vector.load %arg15[%c0_64, %c256] : memref<128x288xbf16, #tpu.memory_space<vmem>>, vector<128x32xbf16>
    tpu.vector_store %arg15[%c0_64, %c256], %34 {strides = array<i32>} : memref<128x288xbf16, #tpu.memory_space<vmem>>, vector<128x32xbf16>,
    %c0_65 = arith.constant 0 : index
    %c0_66 = arith.constant 0 : index
    %36 = vector.load %arg15[%c0_65, %c0_66] : memref<128x288xbf16, #tpu.memory_space<vmem>>, vector<128x288xbf16>
    %c0_67 = arith.constant 0 : index
    %c0_68 = arith.constant 0 : index
    %37 = vector.load %arg1[%c0_67, %c0_68] : memref<288x128xbf16, #tpu.memory_space<vmem>>, vector<288x128xbf16>
    %cst_69 = arith.constant dense<0.000000e+00> : vector<128x128xf32>
    %38 = tpu.matmul %36, %37, %cst_69 {dimension_numbers = #tpu.dot_dimension_numbers<[1], [0], [0], [1], [0, 0, 1, 1], [], []>} : vector<128x288xbf16>, vector<288x128xbf16>, vector<128x128xf32> -> vector<128x128xf32>
    %39 = vector.extract_strided_slice %38 {offsets = [0, 0], sizes = [128, 64], strides = [1, 1]} : vector<128x128xf32> to vector<128x64xf32>
    %40 = vector.extract_strided_slice %38 {offsets = [0, 64], sizes = [128, 64], strides = [1, 1]} : vector<128x128xf32> to vector<128x64xf32>
    %c0_70 = arith.constant 0 : index
    %c0_71 = arith.constant 0 : index
    %41 = vector.load %arg7[%c0_70, %c0_71] : memref<1x64xf32, #tpu.memory_space<vmem>>, vector<1x64xf32>
    %42 = vector.broadcast %41 : vector<1x64xf32> to vector<128x64xf32>
    %43 = arith.addf %40, %42 : vector<128x64xf32>
    %44 = vector.shape_cast %43 : vector<128x64xf32> to vector<2x64x64xf32>
    %cst_72 = arith.constant dense<0.000000e+00> : vector<64xf32>
    %45 = vector.multi_reduction <add>, %39, %cst_72 [0] : vector<128x64xf32> to vector<64xf32>
    %46 = vector.shape_cast %45 : vector<64xf32> to vector<1x64xf32>
    %47 = arith.mulf %39, %39 : vector<128x64xf32>
    %cst_73 = arith.constant dense<0.000000e+00> : vector<64xf32>
    %48 = vector.multi_reduction <add>, %47, %cst_73 [0] : vector<128x64xf32> to vector<64xf32>
    %49 = vector.shape_cast %48 : vector<64xf32> to vector<1x64xf32>
    %cst_74 = arith.constant 7.812500e-03 : f32
    %50 = vector.broadcast %cst_74 : f32 to vector<1x64xf32>
    %51 = arith.mulf %46, %50 : vector<1x64xf32>
    %cst_75 = arith.constant 7.812500e-03 : f32
    %52 = vector.broadcast %cst_75 : f32 to vector<1x64xf32>
    %53 = arith.mulf %49, %52 : vector<1x64xf32>
    %54 = arith.mulf %51, %51 : vector<1x64xf32>
    %55 = arith.subf %53, %54 : vector<1x64xf32>
    %cst_76 = arith.constant 0.000000e+00 : f32
    %56 = vector.broadcast %cst_76 : f32 to vector<1x64xf32>
    %57 = arith.maximumf %55, %56 : vector<1x64xf32>
    %c0_77 = arith.constant 0 : index
    %c0_78 = arith.constant 0 : index
    %58 = vector.load %arg2[%c0_77, %c0_78] : memref<1x64xf32, #tpu.memory_space<vmem>>, vector<1x64xf32>
    %cst_79 = arith.constant 9.99999974E-6 : f32
    %59 = vector.broadcast %cst_79 : f32 to vector<1x64xf32>
    %60 = arith.addf %57, %59 : vector<1x64xf32>
    %61 = math.rsqrt %60 : vector<1x64xf32>
    %62 = arith.mulf %58, %61 : vector<1x64xf32>
    %c0_80 = arith.constant 0 : index
    %c0_81 = arith.constant 0 : index
    %63 = vector.load %arg3[%c0_80, %c0_81] : memref<1x64xf32, #tpu.memory_space<vmem>>, vector<1x64xf32>
    %64 = arith.mulf %51, %62 : vector<1x64xf32>
    %65 = arith.subf %63, %64 : vector<1x64xf32>
    %66 = vector.broadcast %62 : vector<1x64xf32> to vector<128x64xf32>
    %67 = arith.mulf %39, %66 : vector<128x64xf32>
    %68 = vector.broadcast %65 : vector<1x64xf32> to vector<128x64xf32>
    %69 = arith.addf %67, %68 : vector<128x64xf32>
    %cst_82 = arith.constant 0.000000e+00 : f32
    %70 = vector.broadcast %cst_82 : f32 to vector<128x64xf32>
    %71 = arith.maximumf %69, %70 : vector<128x64xf32>
    %72 = vector.shape_cast %71 : vector<128x64xf32> to vector<2x8x8x64xf32>
    %73 = arith.truncf %72 : vector<2x8x8x64xf32> to vector<2x8x8x64xbf16>
    %c0_83 = arith.constant 0 : index
    %c1_84 = arith.constant 1 : index
    %c2_85 = arith.constant 2 : index
    %c0_86 = arith.constant 0 : index
    %74 = vector.load %arg14[%c0_83, %c1_84, %c2_85, %c0_86] : memref<2x10x12x64xbf16, #tpu.memory_space<vmem>>, vector<2x8x8x64xbf16>
    tpu.vector_store %arg14[%c0_83, %c1_84, %c2_85, %c0_86], %73 {strides = array<i32>} : memref<2x10x12x64xbf16, #tpu.memory_space<vmem>>, vector<2x8x8x64xbf16>,
    %cst_87 = arith.constant 0.000000e+00 : bf16
    %75 = vector.broadcast %cst_87 : bf16 to vector<2x1x12x64xbf16>
    %c0_88 = arith.constant 0 : index
    %c0_89 = arith.constant 0 : index
    %c0_90 = arith.constant 0 : index
    %c0_91 = arith.constant 0 : index
    %76 = vector.load %arg14[%c0_88, %c0_89, %c0_90, %c0_91] : memref<2x10x12x64xbf16, #tpu.memory_space<vmem>>, vector<2x1x12x64xbf16>
    tpu.vector_store %arg14[%c0_88, %c0_89, %c0_90, %c0_91], %75 {strides = array<i32>} : memref<2x10x12x64xbf16, #tpu.memory_space<vmem>>, vector<2x1x12x64xbf16>,
    %c0_92 = arith.constant 0 : index
    %c9_93 = arith.constant 9 : index
    %c0_94 = arith.constant 0 : index
    %c0_95 = arith.constant 0 : index
    %77 = vector.load %arg14[%c0_92, %c9_93, %c0_94, %c0_95] : memref<2x10x12x64xbf16, #tpu.memory_space<vmem>>, vector<2x1x12x64xbf16>
    tpu.vector_store %arg14[%c0_92, %c9_93, %c0_94, %c0_95], %75 {strides = array<i32>} : memref<2x10x12x64xbf16, #tpu.memory_space<vmem>>, vector<2x1x12x64xbf16>,
    %cst_96 = arith.constant 0.000000e+00 : bf16
    %78 = vector.broadcast %cst_96 : bf16 to vector<2x8x2x64xbf16>
    %c0_97 = arith.constant 0 : index
    %c1_98 = arith.constant 1 : index
    %c0_99 = arith.constant 0 : index
    %c0_100 = arith.constant 0 : index
    %79 = vector.load %arg14[%c0_97, %c1_98, %c0_99, %c0_100] : memref<2x10x12x64xbf16, #tpu.memory_space<vmem>>, vector<2x8x2x64xbf16>
    tpu.vector_store %arg14[%c0_97, %c1_98, %c0_99, %c0_100], %78 {strides = array<i32>} : memref<2x10x12x64xbf16, #tpu.memory_space<vmem>>, vector<2x8x2x64xbf16>,
    %c0_101 = arith.constant 0 : index
    %c1_102 = arith.constant 1 : index
    %c10_103 = arith.constant 10 : index
    %c0_104 = arith.constant 0 : index
    %80 = vector.load %arg14[%c0_101, %c1_102, %c10_103, %c0_104] : memref<2x10x12x64xbf16, #tpu.memory_space<vmem>>, vector<2x8x2x64xbf16>
    tpu.vector_store %arg14[%c0_101, %c1_102, %c10_103, %c0_104], %78 {strides = array<i32>} : memref<2x10x12x64xbf16, #tpu.memory_space<vmem>>, vector<2x8x2x64xbf16>,
    %c0_105 = arith.constant 0 : index
    %c0_106 = arith.constant 0 : index
    %c1_107 = arith.constant 1 : index
    %c0_108 = arith.constant 0 : index
    %81 = vector.load %arg14[%c0_105, %c0_106, %c1_107, %c0_108] : memref<2x10x12x64xbf16, #tpu.memory_space<vmem>>, vector<2x8x8x64xbf16>
    %82 = vector.shape_cast %81 : vector<2x8x8x64xbf16> to vector<128x64xbf16>
    %c0_109 = arith.constant 0 : index
    %c0_110 = arith.constant 0 : index
    %83 = vector.load %arg16[%c0_109, %c0_110] : memref<128x576xbf16, #tpu.memory_space<vmem>>, vector<128x64xbf16>
    tpu.vector_store %arg16[%c0_109, %c0_110], %82 {strides = array<i32>} : memref<128x576xbf16, #tpu.memory_space<vmem>>, vector<128x64xbf16>,
    %c0_111 = arith.constant 0 : index
    %c0_112 = arith.constant 0 : index
    %c2_113 = arith.constant 2 : index
    %c0_114 = arith.constant 0 : index
    %84 = vector.load %arg14[%c0_111, %c0_112, %c2_113, %c0_114] : memref<2x10x12x64xbf16, #tpu.memory_space<vmem>>, vector<2x8x8x64xbf16>
    %85 = vector.shape_cast %84 : vector<2x8x8x64xbf16> to vector<128x64xbf16>
    %c0_115 = arith.constant 0 : index
    %c64_116 = arith.constant 64 : index
    %86 = vector.load %arg16[%c0_115, %c64_116] : memref<128x576xbf16, #tpu.memory_space<vmem>>, vector<128x64xbf16>
    tpu.vector_store %arg16[%c0_115, %c64_116], %85 {strides = array<i32>} : memref<128x576xbf16, #tpu.memory_space<vmem>>, vector<128x64xbf16>,
    %c0_117 = arith.constant 0 : index
    %c0_118 = arith.constant 0 : index
    %c3_119 = arith.constant 3 : index
    %c0_120 = arith.constant 0 : index
    %87 = vector.load %arg14[%c0_117, %c0_118, %c3_119, %c0_120] : memref<2x10x12x64xbf16, #tpu.memory_space<vmem>>, vector<2x8x8x64xbf16>
    %88 = vector.shape_cast %87 : vector<2x8x8x64xbf16> to vector<128x64xbf16>
    %c0_121 = arith.constant 0 : index
    %c128_122 = arith.constant 128 : index
    %89 = vector.load %arg16[%c0_121, %c128_122] : memref<128x576xbf16, #tpu.memory_space<vmem>>, vector<128x64xbf16>
    tpu.vector_store %arg16[%c0_121, %c128_122], %88 {strides = array<i32>} : memref<128x576xbf16, #tpu.memory_space<vmem>>, vector<128x64xbf16>,
    %c0_123 = arith.constant 0 : index
    %c1_124 = arith.constant 1 : index
    %c1_125 = arith.constant 1 : index
    %c0_126 = arith.constant 0 : index
    %90 = vector.load %arg14[%c0_123, %c1_124, %c1_125, %c0_126] : memref<2x10x12x64xbf16, #tpu.memory_space<vmem>>, vector<2x8x8x64xbf16>
    %91 = vector.shape_cast %90 : vector<2x8x8x64xbf16> to vector<128x64xbf16>
    %c0_127 = arith.constant 0 : index
    %c192_128 = arith.constant 192 : index
    %92 = vector.load %arg16[%c0_127, %c192_128] : memref<128x576xbf16, #tpu.memory_space<vmem>>, vector<128x64xbf16>
    tpu.vector_store %arg16[%c0_127, %c192_128], %91 {strides = array<i32>} : memref<128x576xbf16, #tpu.memory_space<vmem>>, vector<128x64xbf16>,
    %c0_129 = arith.constant 0 : index
    %c1_130 = arith.constant 1 : index
    %c2_131 = arith.constant 2 : index
    %c0_132 = arith.constant 0 : index
    %93 = vector.load %arg14[%c0_129, %c1_130, %c2_131, %c0_132] : memref<2x10x12x64xbf16, #tpu.memory_space<vmem>>, vector<2x8x8x64xbf16>
    %94 = vector.shape_cast %93 : vector<2x8x8x64xbf16> to vector<128x64xbf16>
    %c0_133 = arith.constant 0 : index
    %c256_134 = arith.constant 256 : index
    %95 = vector.load %arg16[%c0_133, %c256_134] : memref<128x576xbf16, #tpu.memory_space<vmem>>, vector<128x64xbf16>
    tpu.vector_store %arg16[%c0_133, %c256_134], %94 {strides = array<i32>} : memref<128x576xbf16, #tpu.memory_space<vmem>>, vector<128x64xbf16>,
    %c0_135 = arith.constant 0 : index
    %c1_136 = arith.constant 1 : index
    %c3_137 = arith.constant 3 : index
    %c0_138 = arith.constant 0 : index
    %96 = vector.load %arg14[%c0_135, %c1_136, %c3_137, %c0_138] : memref<2x10x12x64xbf16, #tpu.memory_space<vmem>>, vector<2x8x8x64xbf16>
    %97 = vector.shape_cast %96 : vector<2x8x8x64xbf16> to vector<128x64xbf16>
    %c0_139 = arith.constant 0 : index
    %c320 = arith.constant 320 : index
    %98 = vector.load %arg16[%c0_139, %c320] : memref<128x576xbf16, #tpu.memory_space<vmem>>, vector<128x64xbf16>
    tpu.vector_store %arg16[%c0_139, %c320], %97 {strides = array<i32>} : memref<128x576xbf16, #tpu.memory_space<vmem>>, vector<128x64xbf16>,
    %c0_140 = arith.constant 0 : index
    %c2_141 = arith.constant 2 : index
    %c1_142 = arith.constant 1 : index
    %c0_143 = arith.constant 0 : index
    %99 = vector.load %arg14[%c0_140, %c2_141, %c1_142, %c0_143] : memref<2x10x12x64xbf16, #tpu.memory_space<vmem>>, vector<2x8x8x64xbf16>
    %100 = vector.shape_cast %99 : vector<2x8x8x64xbf16> to vector<128x64xbf16>
    %c0_144 = arith.constant 0 : index
    %c384 = arith.constant 384 : index
    %101 = vector.load %arg16[%c0_144, %c384] : memref<128x576xbf16, #tpu.memory_space<vmem>>, vector<128x64xbf16>
    tpu.vector_store %arg16[%c0_144, %c384], %100 {strides = array<i32>} : memref<128x576xbf16, #tpu.memory_space<vmem>>, vector<128x64xbf16>,
    %c0_145 = arith.constant 0 : index
    %c2_146 = arith.constant 2 : index
    %c2_147 = arith.constant 2 : index
    %c0_148 = arith.constant 0 : index
    %102 = vector.load %arg14[%c0_145, %c2_146, %c2_147, %c0_148] : memref<2x10x12x64xbf16, #tpu.memory_space<vmem>>, vector<2x8x8x64xbf16>
    %103 = vector.shape_cast %102 : vector<2x8x8x64xbf16> to vector<128x64xbf16>
    %c0_149 = arith.constant 0 : index
    %c448 = arith.constant 448 : index
    %104 = vector.load %arg16[%c0_149, %c448] : memref<128x576xbf16, #tpu.memory_space<vmem>>, vector<128x64xbf16>
    tpu.vector_store %arg16[%c0_149, %c448], %103 {strides = array<i32>} : memref<128x576xbf16, #tpu.memory_space<vmem>>, vector<128x64xbf16>,
    %c0_150 = arith.constant 0 : index
    %c2_151 = arith.constant 2 : index
    %c3_152 = arith.constant 3 : index
    %c0_153 = arith.constant 0 : index
    %105 = vector.load %arg14[%c0_150, %c2_151, %c3_152, %c0_153] : memref<2x10x12x64xbf16, #tpu.memory_space<vmem>>, vector<2x8x8x64xbf16>
    %106 = vector.shape_cast %105 : vector<2x8x8x64xbf16> to vector<128x64xbf16>
    %c0_154 = arith.constant 0 : index
    %c512 = arith.constant 512 : index
    %107 = vector.load %arg16[%c0_154, %c512] : memref<128x576xbf16, #tpu.memory_space<vmem>>, vector<128x64xbf16>
    tpu.vector_store %arg16[%c0_154, %c512], %106 {strides = array<i32>} : memref<128x576xbf16, #tpu.memory_space<vmem>>, vector<128x64xbf16>,
    %c0_155 = arith.constant 0 : index
    %c0_156 = arith.constant 0 : index
    %108 = vector.load %arg16[%c0_155, %c0_156] : memref<128x576xbf16, #tpu.memory_space<vmem>>, vector<128x576xbf16>
    %c0_157 = arith.constant 0 : index
    %c0_158 = arith.constant 0 : index
    %109 = vector.load %arg4[%c0_157, %c0_158] : memref<576x64xbf16, #tpu.memory_space<vmem>>, vector<576x64xbf16>
    %cst_159 = arith.constant dense<0.000000e+00> : vector<128x64xf32>
    %110 = tpu.matmul %108, %109, %cst_159 {dimension_numbers = #tpu.dot_dimension_numbers<[1], [0], [0], [1], [0, 0, 1, 1], [], []>} : vector<128x576xbf16>, vector<576x64xbf16>, vector<128x64xf32> -> vector<128x64xf32>
    %cst_160 = arith.constant dense<0.000000e+00> : vector<64xf32>
    %111 = vector.multi_reduction <add>, %110, %cst_160 [0] : vector<128x64xf32> to vector<64xf32>
    %112 = vector.shape_cast %111 : vector<64xf32> to vector<1x64xf32>
    %113 = arith.mulf %110, %110 : vector<128x64xf32>
    %cst_161 = arith.constant dense<0.000000e+00> : vector<64xf32>
    %114 = vector.multi_reduction <add>, %113, %cst_161 [0] : vector<128x64xf32> to vector<64xf32>
    %115 = vector.shape_cast %114 : vector<64xf32> to vector<1x64xf32>
    %cst_162 = arith.constant 7.812500e-03 : f32
    %116 = vector.broadcast %cst_162 : f32 to vector<1x64xf32>
    %117 = arith.mulf %112, %116 : vector<1x64xf32>
    %cst_163 = arith.constant 7.812500e-03 : f32
    %118 = vector.broadcast %cst_163 : f32 to vector<1x64xf32>
    %119 = arith.mulf %115, %118 : vector<1x64xf32>
    %120 = arith.mulf %117, %117 : vector<1x64xf32>
    %121 = arith.subf %119, %120 : vector<1x64xf32>
    %cst_164 = arith.constant 0.000000e+00 : f32
    %122 = vector.broadcast %cst_164 : f32 to vector<1x64xf32>
    %123 = arith.maximumf %121, %122 : vector<1x64xf32>
    %c0_165 = arith.constant 0 : index
    %c0_166 = arith.constant 0 : index
    %124 = vector.load %arg5[%c0_165, %c0_166] : memref<1x64xf32, #tpu.memory_space<vmem>>, vector<1x64xf32>
    %cst_167 = arith.constant 9.99999974E-6 : f32
    %125 = vector.broadcast %cst_167 : f32 to vector<1x64xf32>
    %126 = arith.addf %123, %125 : vector<1x64xf32>
    %127 = math.rsqrt %126 : vector<1x64xf32>
    %128 = arith.mulf %124, %127 : vector<1x64xf32>
    %c0_168 = arith.constant 0 : index
    %c0_169 = arith.constant 0 : index
    %129 = vector.load %arg6[%c0_168, %c0_169] : memref<1x64xf32, #tpu.memory_space<vmem>>, vector<1x64xf32>
    %130 = arith.mulf %117, %128 : vector<1x64xf32>
    %131 = arith.subf %129, %130 : vector<1x64xf32>
    %132 = vector.broadcast %128 : vector<1x64xf32> to vector<128x64xf32>
    %133 = arith.mulf %110, %132 : vector<128x64xf32>
    %134 = vector.broadcast %131 : vector<1x64xf32> to vector<128x64xf32>
    %135 = arith.addf %133, %134 : vector<128x64xf32>
    %136 = vector.shape_cast %135 : vector<128x64xf32> to vector<2x64x64xf32>
    %cst_170 = arith.constant dense<0.000000e+00> : vector<2x64xf32>
    %137 = vector.multi_reduction <add>, %136, %cst_170 [1] : vector<2x64x64xf32> to vector<2x64xf32>
    %cst_171 = arith.constant 6.400000e+01 : f32
    %138 = vector.broadcast %cst_171 : f32 to vector<2x64xf32>
    %139 = arith.divf %137, %138 : vector<2x64xf32>
    %c0_172 = arith.constant 0 : index
    %c0_173 = arith.constant 0 : index
    %140 = vector.load %arg8[%c0_172, %c0_173] : memref<64x4xf32, #tpu.memory_space<vmem>>, vector<64x4xf32>
    %cst_174 = arith.constant dense<0.000000e+00> : vector<2x4xf32>
    %141 = tpu.matmul %139, %140, %cst_174 {dimension_numbers = #tpu.dot_dimension_numbers<[1], [0], [0], [1], [0, 0, 1, 1], [], []>} : vector<2x64xf32>, vector<64x4xf32>, vector<2x4xf32> -> vector<2x4xf32>
    %c0_175 = arith.constant 0 : index
    %c0_176 = arith.constant 0 : index
    %142 = vector.load %arg9[%c0_175, %c0_176] : memref<1x4xf32, #tpu.memory_space<vmem>>, vector<1x4xf32>
    %143 = vector.broadcast %142 : vector<1x4xf32> to vector<2x4xf32>
    %144 = arith.addf %141, %143 : vector<2x4xf32>
    %cst_177 = arith.constant 0.000000e+00 : f32
    %145 = vector.broadcast %cst_177 : f32 to vector<2x4xf32>
    %146 = arith.maximumf %144, %145 : vector<2x4xf32>
    %c0_178 = arith.constant 0 : index
    %c0_179 = arith.constant 0 : index
    %147 = vector.load %arg10[%c0_178, %c0_179] : memref<4x64xf32, #tpu.memory_space<vmem>>, vector<4x64xf32>
    %cst_180 = arith.constant dense<0.000000e+00> : vector<2x64xf32>
    %148 = tpu.matmul %146, %147, %cst_180 {dimension_numbers = #tpu.dot_dimension_numbers<[1], [0], [0], [1], [0, 0, 1, 1], [], []>} : vector<2x4xf32>, vector<4x64xf32>, vector<2x64xf32> -> vector<2x64xf32>
    %c0_181 = arith.constant 0 : index
    %c0_182 = arith.constant 0 : index
    %149 = vector.load %arg11[%c0_181, %c0_182] : memref<1x64xf32, #tpu.memory_space<vmem>>, vector<1x64xf32>
    %150 = vector.broadcast %149 : vector<1x64xf32> to vector<2x64xf32>
    %151 = arith.addf %148, %150 : vector<2x64xf32>
    %152 = arith.negf %151 : vector<2x64xf32>
    %153 = math.exp %152 : vector<2x64xf32>
    %cst_183 = arith.constant 1.000000e+00 : f32
    %154 = vector.broadcast %cst_183 : f32 to vector<2x64xf32>
    %155 = arith.addf %154, %153 : vector<2x64xf32>
    %156 = arith.divf %154, %155 : vector<2x64xf32>
    %157 = vector.shape_cast %156 : vector<2x64xf32> to vector<2x1x64xf32>
    %158 = vector.broadcast %157 : vector<2x1x64xf32> to vector<2x64x64xf32>
    %159 = arith.mulf %136, %158 : vector<2x64x64xf32>
    %160 = arith.addf %159, %44 : vector<2x64x64xf32>
    %cst_184 = arith.constant 0.000000e+00 : f32
    %161 = vector.broadcast %cst_184 : f32 to vector<2x64x64xf32>
    %162 = arith.maximumf %160, %161 : vector<2x64x64xf32>
    %163 = vector.shape_cast %162 : vector<2x64x64xf32> to vector<16x8x64xf32>
    %164 = vector.extract_strided_slice %163 {offsets = [0, 0, 0], sizes = [16, 1, 64], strides = [1, 1, 1]} : vector<16x8x64xf32> to vector<16x1x64xf32>
    %165 = vector.shape_cast %164 : vector<16x1x64xf32> to vector<16x64xf32>
    %166 = vector.extract_strided_slice %163 {offsets = [0, 1, 0], sizes = [16, 1, 64], strides = [1, 1, 1]} : vector<16x8x64xf32> to vector<16x1x64xf32>
    %167 = vector.shape_cast %166 : vector<16x1x64xf32> to vector<16x64xf32>
    %168 = vector.extract_strided_slice %163 {offsets = [0, 2, 0], sizes = [16, 1, 64], strides = [1, 1, 1]} : vector<16x8x64xf32> to vector<16x1x64xf32>
    %169 = vector.shape_cast %168 : vector<16x1x64xf32> to vector<16x64xf32>
    %170 = vector.extract_strided_slice %163 {offsets = [0, 3, 0], sizes = [16, 1, 64], strides = [1, 1, 1]} : vector<16x8x64xf32> to vector<16x1x64xf32>
    %171 = vector.shape_cast %170 : vector<16x1x64xf32> to vector<16x64xf32>
    %172 = vector.extract_strided_slice %163 {offsets = [0, 4, 0], sizes = [16, 1, 64], strides = [1, 1, 1]} : vector<16x8x64xf32> to vector<16x1x64xf32>
    %173 = vector.shape_cast %172 : vector<16x1x64xf32> to vector<16x64xf32>
    %174 = vector.extract_strided_slice %163 {offsets = [0, 5, 0], sizes = [16, 1, 64], strides = [1, 1, 1]} : vector<16x8x64xf32> to vector<16x1x64xf32>
    %175 = vector.shape_cast %174 : vector<16x1x64xf32> to vector<16x64xf32>
    %176 = vector.extract_strided_slice %163 {offsets = [0, 6, 0], sizes = [16, 1, 64], strides = [1, 1, 1]} : vector<16x8x64xf32> to vector<16x1x64xf32>
    %177 = vector.shape_cast %176 : vector<16x1x64xf32> to vector<16x64xf32>
    %178 = vector.extract_strided_slice %163 {offsets = [0, 7, 0], sizes = [16, 1, 64], strides = [1, 1, 1]} : vector<16x8x64xf32> to vector<16x1x64xf32>
    %179 = vector.shape_cast %178 : vector<16x1x64xf32> to vector<16x64xf32>
    %180 = tpu.concatenate %165, %167, %169, %171, %173, %175, %177, %179 in 1 : vector<16x64xf32>, vector<16x64xf32>, vector<16x64xf32>, vector<16x64xf32>, vector<16x64xf32>, vector<16x64xf32>, vector<16x64xf32>, vector<16x64xf32> -> vector<16x512xf32>
    %c0_185 = arith.constant 0 : index
    %c0_186 = arith.constant 0 : index
    %181 = vector.load %arg12[%c0_185, %c0_186] : memref<16x512xf32, #tpu.memory_space<vmem>>, vector<16x512xf32>
    tpu.vector_store %arg12[%c0_185, %c0_186], %180 {strides = array<i32>} : memref<16x512xf32, #tpu.memory_space<vmem>>, vector<16x512xf32>,
    return
  }
}

</mosaic_0001>

<bundles_post_ra>
// kernel: tpu_custom_call.1
= control target key start
LH: loop header
LB: loop body
LE: loop exit
PB: predicated region body
PF: predicated region fallthrough
CT: control target
= control target key end

     0   :  { %vm190_vm0 = vcmask 253952   ;;  %vm222_vm1 = vcmask 257024   ;;  %vm188_vm2 = vcmask 257025   ;;  %v8422_v7 = vmov 0   ;;  %s8423_s21 = smov 32   ;;  %s8424_s22 = smov 96   ;;  %s10932_s0 = inlined_call_operand.vmem [shape: f32[2,8,8,32], index: 0, kind: input, shape index: {}]   ;;  %s10933_s1 = inlined_call_operand.vmem [shape: bf16[288,128], index: 1, kind: input, shape index: {}]   ;;  %s10934_s2 = inlined_call_operand.vmem [shape: f32[1,64], index: 2, kind: input, shape index: {}]   ;;  %s10935_s3 = inlined_call_operand.vmem [shape: f32[1,64], index: 3, kind: input, shape index: {}]   ;;  %s10936_s4 = inlined_call_operand.vmem [shape: bf16[576,64], index: 4, kind: input, shape index: {}]   ;;  %s10937_s5 = inlined_call_operand.vmem [shape: f32[1,64], index: 5, kind: input, shape index: {}]   ;;  %s10938_s6 = inlined_call_operand.vmem [shape: f32[1,64], index: 6, kind: input, shape index: {}]   ;;  %s10939_s7 = inlined_call_operand.vmem [shape: f32[1,64], index: 7, kind: input, shape index: {}]   ;;  %s10940_s8 = inlined_call_operand.vmem [shape: f32[64,4], index: 8, kind: input, shape index: {}]   ;;  %s10941_s9 = inlined_call_operand.vmem [shape: f32[1,4], index: 9, kind: input, shape index: {}]   ;;  %s10942_s10 = inlined_call_operand.vmem [shape: f32[4,64], index: 10, kind: input, shape index: {}]   ;;  %s10943_s11 = inlined_call_operand.vmem [shape: f32[1,64], index: 11, kind: input, shape index: {}]   ;;  %s10944_s12 = inlined_call_operand.hbm [shape: f32[16,512], index: 12, kind: output, shape index: {}]  }
   0x1   :  { %v44_v0 = vld [vmem:[%s10932_s0 + $0x8] sm:$0xff]  ;;  %v45_v1 = vld [vmem:[%s10932_s0 + $0x10] sm:$0xff]  ;;  %v43_v4 = vld [vmem:[%s10932_s0] sm:$0xff]  ;;  %223 = vst.msk [vmem:[#allocation2] sm:$0xf] %vm222_vm1, %v8422_v7  ;;  %vm224_vm3 = vcmask 254976  }
   0x2   :  { %v7990_v2 = vpack.c.bf16 %v44_v0, %v44_v0  ;;  %v7991_v3 = vpack.c.bf16 %v45_v1, %v45_v1  ;;  %v46_v5 = vld [vmem:[%s10932_s0 + $0x18] sm:$0xff]  ;;  %v7989_v6 = vpack.c.bf16 %v43_v4, %v43_v4  ;;  %226 = vst.msk [vmem:[#allocation2 + $0x50] sm:$0xf] %vm222_vm1, %v8422_v7  ;;  %229 = vst.msk [vmem:[#allocation2 + $0x48] sm:$0xf] %vm222_vm1, %v8422_v7  ;;  %v47_v8 = vld [vmem:[%s10932_s0 + $0x20] sm:$0xff] }
   0x3   :  { %231 = vst.msk [vmem:[#allocation2 + $0x98] sm:$0xf] %vm222_vm1, %v8422_v7  ;;  %v7992_v9 = vpack.c.bf16 %v46_v5, %v46_v5  ;;  %v7993_v12 = vpack.c.bf16 %v47_v8, %v47_v8  ;;  %v48_v13 = vld [vmem:[%s10932_s0 + $0x28] sm:$0xff]  ;;  %v49_v14 = vld [vmem:[%s10932_s0 + $0x30] sm:$0xff]  ;;  %vm249_vm4 = vcmask 254977   ;;  %v50_v17 = vld [vmem:[%s10932_s0 + $0x38] sm:$0xff] }
   0x4   :  { %233 = vst.msk [vmem:[#allocation2 + $0x8] sm:$0x1] %vm190_vm0, %v8422_v7  ;;  %234 = vst.msk [vmem:[#allocation2 + $0x10] sm:$0x1] %vm190_vm0, %v8422_v7  ;;  %v125_v10 = vrot.slane %v7990_v2, 7  ;;  %v127_v11 = vrot.slane %v7991_v3, 7  ;;  %v7994_v24 = vpack.c.bf16 %v48_v13, %v48_v13  ;;  %v7995_v25 = vpack.c.bf16 %v49_v14, %v49_v14 }
   0x5   :  { %235 = vst.msk [vmem:[#allocation2 + $0x18] sm:$0x1] %vm190_vm0, %v8422_v7  ;;  %236 = vst.msk [vmem:[#allocation2 + $0x20] sm:$0x1] %vm190_vm0, %v8422_v7  ;;  %v123_v15 = vrot.slane %v7989_v6, 7  ;;  %v129_v16 = vrot.slane %v7992_v9, 7  ;;  %v7996_v27 = vpack.c.bf16 %v50_v17, %v50_v17 }
   0x6   :  { %237 = vst.msk [vmem:[#allocation2 + $0x28] sm:$0x1] %vm190_vm0, %v8422_v7  ;;  %238 = vst.msk [vmem:[#allocation2 + $0x30] sm:$0x1] %vm190_vm0, %v8422_v7  ;;  %v51_v18 = vld [vmem:[%s10932_s0 + $0x40] sm:$0xff]  ;;  %v126_v19 = vrot.slane %v125_v10, 4 }
   0x7   :  { %239 = vst.msk [vmem:[#allocation2 + $0x38] sm:$0x1] %vm190_vm0, %v8422_v7  ;;  %240 = vst.msk [vmem:[#allocation2 + $0x40] sm:$0x1] %vm190_vm0, %v8422_v7  ;;  %v128_v20 = vrot.slane %v127_v11, 4  ;;  %v131_v21 = vrot.slane %v7993_v12, 7  ;;  %v7997_v28 = vpack.c.bf16 %v51_v18, %v51_v18 }
   0x8   :  { %241 = vst.msk [vmem:[#allocation2 + $0x58] sm:$0x1] %vm190_vm0, %v8422_v7  ;;  %242 = vst.msk [vmem:[#allocation2 + $0x60] sm:$0x1] %vm190_vm0, %v8422_v7  ;;  %v124_v22 = vrot.slane %v123_v15, 4  ;;  %v130_v23 = vrot.slane %v129_v16, 4 }
   0x9   :  { %243 = vst.msk [vmem:[#allocation2 + $0x68] sm:$0x1] %vm190_vm0, %v8422_v7  ;;  %244 = vst.msk [vmem:[#allocation2 + $0x70] sm:$0x1] %vm190_vm0, %v8422_v7  ;;  %v132_v26 = vrot.slane %v131_v21, 4  ;;  %v8609_v29 = vrot.slane %v7994_v24, 7 }
   0xa   :  { %245 = vst.msk [vmem:[#allocation2 + $0x78] sm:$0x1] %vm190_vm0, %v8422_v7  ;;  %246 = vst.msk [vmem:[#allocation2 + $0x80] sm:$0x1] %vm190_vm0, %v8422_v7  ;;  %v8611_v30 = vrot.slane %v7995_v25, 7  ;;  %v8616_v33 = vrot.slane %v7996_v27, 7 }
   0xb   :  { %247 = vst.msk [vmem:[#allocation2 + $0x88] sm:$0x1] %vm190_vm0, %v8422_v7  ;;  %248 = vst.msk [vmem:[#allocation2 + $0x90] sm:$0x1] %vm190_vm0, %v8422_v7  ;;  %v566_v31 = vld [vmem:[#allocation2] sm:$0xe] }
   0xc   :  { %225 = vst.msk [vmem:[#allocation2 + $0x4] sm:$0x3] %vm224_vm3, %v8422_v7  ;;  %227 = vst.msk [vmem:[#allocation2 + $0x54] sm:$0x3] %vm224_vm3, %v8422_v7  ;;  %v8614_v32 = vld [vmem:[#allocation2] sm:$0xe] }
   0xd   :  { %230 = vst.msk [vmem:[#allocation2 + $0x4c] sm:$0x3] %vm224_vm3, %v8422_v7  ;;  %232 = vst.msk [vmem:[#allocation2 + $0x9c] sm:$0x3] %vm224_vm3, %v8422_v7  ;;  %v8618_v34 = vrot.slane %v7997_v28, 7  ;;  %vm630_vm5 = vcmask 1042432  }
   0xe   :  { %192 = vst.msk [vmem:[#allocation2 + $0x10] sm:$0xe] %vm188_vm2, %v125_v10  ;;  %194 = vst.msk [vmem:[#allocation2 + $0x18] sm:$0xe] %vm188_vm2, %v127_v11  ;;  %vm631_vm6 = vcmask 1046532   ;;  %v7664_v37 = vrot.slane %v566_v31, 9 }
   0xf   :  { %250 = vst.msk [vmem:[#allocation2 + $0xc] sm:$0x2] %vm249_vm4, %v8422_v7  ;;  %251 = vst.msk [vmem:[#allocation2 + $0x14] sm:$0x2] %vm249_vm4, %v8422_v7  ;;  %v790_v39 = vshrl.u32 %v8614_v32, 16  ;;  %v793_v42 = vshll.u32 %v8614_v32, 16 }
  0x10   :  { %252 = vst.msk [vmem:[#allocation2 + $0x1c] sm:$0x2] %vm249_vm4, %v8422_v7  ;;  %253 = vst.msk [vmem:[#allocation2 + $0x24] sm:$0x2] %vm249_vm4, %v8422_v7  ;;  %vm298_vm8 = vsmask.f32 3328 }
  0x11   :  { %254 = vst.msk [vmem:[#allocation2 + $0x2c] sm:$0x2] %vm249_vm4, %v8422_v7  ;;  %255 = vst.msk [vmem:[#allocation2 + $0x34] sm:$0x2] %vm249_vm4, %v8422_v7  ;;  %vm299_vm9 = vsmask.f32 7440 }
  0x12   :  { %256 = vst.msk [vmem:[#allocation2 + $0x3c] sm:$0x2] %vm249_vm4, %v8422_v7  ;;  %257 = vst.msk [vmem:[#allocation2 + $0x44] sm:$0x2] %vm249_vm4, %v8422_v7  ;;  %vm786_vm10 = vsmask.f32 2304 }
  0x13   :  { %258 = vst.msk [vmem:[#allocation2 + $0x5c] sm:$0x2] %vm249_vm4, %v8422_v7  ;;  %259 = vst.msk [vmem:[#allocation2 + $0x64] sm:$0x2] %vm249_vm4, %v8422_v7  ;;  %v567_v35 = vld [vmem:[#allocation2 + $0x4] sm:$0x1] }
  0x14   :  { %260 = vst.msk [vmem:[#allocation2 + $0x6c] sm:$0x2] %vm249_vm4, %v8422_v7  ;;  %261 = vst.msk [vmem:[#allocation2 + $0x74] sm:$0x2] %vm249_vm4, %v8422_v7  ;;  %v8620_v36 = vld [vmem:[#allocation2 + $0x4] sm:$0x3] }
  0x15   :  { %262 = vst.msk [vmem:[#allocation2 + $0x7c] sm:$0x2] %vm249_vm4, %v8422_v7  ;;  %263 = vst.msk [vmem:[#allocation2 + $0x84] sm:$0x2] %vm249_vm4, %v8422_v7  ;;  %v635_v38 = vrot.slane %v567_v35, 5  ;;  %v799_v43 = vshrl.u32 %v8620_v36, 16 }
  0x16   :  { %264 = vst.msk [vmem:[#allocation2 + $0x8c] sm:$0x2] %vm249_vm4, %v8422_v7  ;;  %265 = vst.msk [vmem:[#allocation2 + $0x94] sm:$0x2] %vm249_vm4, %v8422_v7  ;;  %v570_v40 = vld [vmem:[#allocation2 + $0x10] sm:$0xe] }
  0x17   :  { %189 = vst.msk [vmem:[#allocation2 + $0x8] sm:$0xe] %vm188_vm2, %v123_v15  ;;  %196 = vst.msk [vmem:[#allocation2 + $0x20] sm:$0xe] %vm188_vm2, %v129_v16  ;;  %v572_v41 = vld [vmem:[#allocation2 + $0x18] sm:$0xe] }
  0x18   :  { %193 = vst.msk [vmem:[#allocation2 + $0x14] sm:$0x1] %vm190_vm0, %v126_v19  ;;  %195 = vst.msk [vmem:[#allocation2 + $0x1c] sm:$0x1] %vm190_vm0, %v128_v20  ;;  %v7666_v45 = vrot.slane %v570_v40, 9  ;;  %v7667_v46 = vrot.slane %v572_v41, 9 }
  0x19   :  { %198 = vst.msk [vmem:[#allocation2 + $0x28] sm:$0xe] %vm188_vm2, %v131_v21  ;;  %200 = vst.msk [vmem:[#allocation2 + $0x30] sm:$0xe] %vm188_vm2, %v8609_v29  ;;  %v2304_v49 = vld [vmem:[#allocation2 + $0x10] sm:$0xe] }
  0x1a   :  { %191 = vst.msk [vmem:[#allocation2 + $0xc] sm:$0x1] %vm190_vm0, %v124_v22  ;;  %197 = vst.msk [vmem:[#allocation2 + $0x24] sm:$0x1] %vm190_vm0, %v130_v23  ;;  %v2306_v4 = vld [vmem:[#allocation2 + $0x18] sm:$0xe] }
  0x1b   :  { %199 = vst.msk [vmem:[#allocation2 + $0x2c] sm:$0x1] %vm190_vm0, %v132_v26  ;;  %vm8634_vm7 = vmor %vm630_vm5, %vm631_vm6  ;;  %v7744_v10 = vrot.slane %v2304_v49, 9  ;;  %v1992_v11 = vld [vmem:[#allocation2 + $0x10] sm:$0xf]  ;;  %v7745_v15 = vrot.slane %v2306_v4, 9 }
  0x1c   :  { %202 = vst.msk [vmem:[#allocation2 + $0x38] sm:$0xe] %vm188_vm2, %v8611_v30  ;;  %204 = vst.msk [vmem:[#allocation2 + $0x40] sm:$0xe] %vm188_vm2, %v8616_v33  ;;  %v636_v58 = vsel %vm8634_vm7, %v7664_v37, %v635_v38  ;;  %vm787_vm11 = vsmask.f32 6416 }
  0x1d   :  { %206 = vst.msk [vmem:[#allocation2 + $0x58] sm:$0xe] %vm188_vm2, %v8618_v34  ;;  %v1994_v17 = vld [vmem:[#allocation2 + $0x18] sm:$0xf]  ;;  %v2025_v21 = vshrl.u32 %v1992_v11, 16  ;;  %v2028_v22 = vshll.u32 %v1992_v11, 16  ;;  %vm8661_vm12 = vmor %vm298_vm8, %vm299_vm9 }
  0x1e   :  { %v568_v47 = vld [vmem:[#allocation2 + $0x8] sm:$0xe]  ;;  %v574_v48 = vld [vmem:[#allocation2 + $0x20] sm:$0xe]  ;;  %v2039_v25 = vshrl.u32 %v1994_v17, 16  ;;  %v2042_v26 = vshll.u32 %v1994_v17, 16  ;;  %vm8681_vm13 = vmor %vm786_vm10, %vm787_vm11 }
  0x1f   :  { %v571_v50 = vld [vmem:[#allocation2 + $0x14] sm:$0x1]  ;;  %v573_v51 = vld [vmem:[#allocation2 + $0x1c] sm:$0x1]  ;;  %v7665_v52 = vrot.slane %v568_v47, 9  ;;  %v7668_v53 = vrot.slane %v574_v48, 9 }
  0x20   :  { %v643_v54 = vrot.slane %v571_v50, 5  ;;  %v647_v55 = vrot.slane %v573_v51, 5  ;;  %v576_v60 = vld [vmem:[#allocation2 + $0x28] sm:$0xe]  ;;  %v2305_v3 = vld [vmem:[#allocation2 + $0x14] sm:$0x1] }
  0x21   :  { %v569_v56 = vld [vmem:[#allocation2 + $0xc] sm:$0x1]  ;;  %v575_v57 = vld [vmem:[#allocation2 + $0x24] sm:$0x1]  ;;  %v7669_v1 = vrot.slane %v576_v60, 9  ;;  %v2370_v14 = vrot.slane %v2305_v3, 5 }
  0x22   :  { %v639_v59 = vrot.slane %v569_v56, 5  ;;  %v577_v61 = vld [vmem:[#allocation2 + $0x2c] sm:$0x1]  ;;  %v651_v62 = vrot.slane %v575_v57, 5  ;;  %v644_v63 = vsel %vm8634_vm7, %v7666_v45, %v643_v54  ;;  %v648_v0 = vsel %vm8634_vm7, %v7667_v46, %v647_v55  ;;  %v2307_v9 = vld [vmem:[#allocation2 + $0x1c] sm:$0x1] }
  0x23   :  { %v655_v2 = vrot.slane %v577_v61, 5  ;;  %v7681_v5 = vcombine.low %v644_v63, %v648_v0  ;;  %v1993_v16 = vld [vmem:[#allocation2 + $0x14] sm:$0x1]  ;;  %v2374_v19 = vrot.slane %v2307_v9, 5  ;;  %v1995_v20 = vld [vmem:[#allocation2 + $0x1c] sm:$0x1]  ;;  %v2371_v23 = vsel %vm8634_vm7, %v7744_v10, %v2370_v14 }
  0x24   :  { %v640_v6 = vsel %vm8634_vm7, %v7665_v52, %v639_v59  ;;  %v652_v8 = vsel %vm8634_vm7, %v7668_v53, %v651_v62  ;;  %v2034_v24 = vshll.u32 %v1993_v16, 16  ;;  %v2308_v27 = vld [vmem:[#allocation2 + $0x20] sm:$0xe]  ;;  %v2027_v31 = vrot.slane %v2025_v21, 4  ;;  %v2309_v38 = vld [vmem:[#allocation2 + $0x24] sm:$0x1] }
  0x25   :  { %v7680_v12 = vcombine.low %v636_v58, %v640_v6  ;;  %v656_v13 = vsel %vm8634_vm7, %v7669_v1, %v655_v2  ;;  %723 = vrot.lane.b32.xlu1 %v7681_v5, %s8423_s21  ;;  %v2375_v28 = vsel %vm8634_vm7, %v7745_v15, %v2374_v19  ;;  %v2030_v35 = vrot.slane %v2028_v22, 5  ;;  %v2310_v46 = vld [vmem:[#allocation2 + $0x28] sm:$0xe]  ;;  %v2311_v50 = vld [vmem:[#allocation2 + $0x2c] sm:$0x1]  ;;  %s8425_s23 = smov 64  }
  0x26   :  { %v7682_v18 = vcombine.low %v652_v8, %v656_v13  ;;  %v2048_v37 = vshll.u32 %v1995_v20, 16  ;;  %v7760_v40 = vcombine.low %v2371_v23, %v2375_v28  ;;  %v2041_v41 = vrot.slane %v2039_v25, 4  ;;  %v756_v58 = vld [vmem:[#allocation2 + $0x8] sm:$0xe]  ;;  %v757_v61 = vld [vmem:[#allocation2 + $0xc] sm:$0x3] }
  0x27   :  { %721 = vrot.lane.b32.xlu0 %v7680_v12, %s8423_s21  ;;  %v2044_v45 = vrot.slane %v2042_v26, 5  ;;  %v802_v47 = vshll.u32 %v8620_v36, 16  ;;  %v2031_v48 = vor.u32 %v2030_v35, %v2027_v31  ;;  %v2036_v49 = vrot.slane %v2034_v24, 5  ;;  %v1615_v9 = vld [vmem:[#allocation2 + $0x8] sm:$0xe] }
  0x28   :  { %v7746_v51 = vrot.slane %v2308_v27, 9  ;;  %v2378_v52 = vrot.slane %v2309_v38, 5  ;;  %v2050_v55 = vrot.slane %v2048_v37, 5  ;;  %v7747_v56 = vrot.slane %v2310_v46, 9  ;;  %v1616_v10 = vld [vmem:[#allocation2 + $0xc] sm:$0x3] }
  0x29   :  { %725 = vrot.lane.b32.xlu1 %v7682_v18, %s8423_s21  ;;  %v2045_v54 = vor.u32 %v2044_v45, %v2041_v41  ;;  %v2382_v57 = vrot.slane %v2311_v50, 5  ;;  %v2032_v59 = vrot.slane %v2031_v48, 4  ;;  %v792_v62 = vrot.slane %v790_v39, 5  ;;  %v1617_v15 = vld [vmem:[#allocation2 + $0x10] sm:$0xe] }
  0x2a   :  { %v2379_v60 = vsel %vm8634_vm7, %v7746_v51, %v2378_v52  ;;  %v795_v63 = vrot.slane %v793_v42, 6  ;;  %v801_v2 = vrot.slane %v799_v43, 5  ;;  %v804_v3 = vrot.slane %v802_v47, 6  ;;  %v1618_v22 = vld [vmem:[#allocation2 + $0x14] sm:$0x3] }
  0x2b   :  { %2456 = vrot.lane.b32.xlu0 %v7760_v40, %s8424_s22  ;;  %v2046_v0 = vrot.slane %v2045_v54, 4  ;;  %v2383_v1 = vsel %vm8634_vm7, %v7747_v56, %v2382_v57  ;;  %v2037_v4 = vsel %vm8661_vm12, %v2032_v59, %v2036_v49  ;;  %v808_v8 = vshrl.u32 %v756_v58, 16  ;;  %v1134_v31 = vld [vmem:[#allocation2 + $0x8] sm:$0xf]  ;;  %v1135_v48 = vld [vmem:[#allocation2 + $0xc] sm:$0x1] }
  0x2c   :  { %v7761_v5 = vcombine.low %v2379_v60, %v2383_v1  ;;  %v796_v6 = vor.u32 %v795_v63, %v792_v62  ;;  %v805_v42 = vor.u32 %v804_v3, %v801_v2  ;;  %v811_v36 = vshll.u32 %v756_v58, 16  ;;  %v1136_v52 = vld [vmem:[#allocation2 + $0x10] sm:$0xf]  ;;  %v1137_v58 = vld [vmem:[#allocation2 + $0x14] sm:$0x1] }
  0x2d   :  { %v2051_v39 = vsel %vm8661_vm12, %v2046_v0, %v2050_v55  ;;  %v817_v43 = vshrl.u32 %v757_v61, 16  ;;  %v810_v13 = vrot.slane %v808_v8, 5  ;;  %v820_v14 = vshll.u32 %v757_v61, 16  ;;  %v1619_v0 = vld [vmem:[#allocation2 + $0x18] sm:$0xe] }
  0x2e   :  { %v7736_v11 = vcombine.low %v2037_v4, %v2051_v39  ;;  %v797_v12 = vrot.slane %v796_v6, 4  ;;  %v813_v16 = vrot.slane %v811_v36, 6  ;;  %v1648_v18 = vshrl.u32 %v1615_v9, 16  ;;  %v1620_v39 = vld [vmem:[#allocation2 + $0x1c] sm:$0x3] }
  0x2f   :  { %2458 = vrot.lane.b32.xlu0 %v7761_v5, %s8424_s22  ;;  %v819_v17 = vrot.slane %v817_v43, 5  ;;  %v1651_v19 = vshll.u32 %v1615_v9, 16  ;;  %v822_v21 = vrot.slane %v820_v14, 6  ;;  %v1657_v23 = vshrl.u32 %v1616_v10, 16 }
  0x30   :  { %2272 = vrot.lane.b32.xlu1 %v7736_v11, %s8425_s23  ;;  %v806_v20 = vsel %vm8681_vm13, %v797_v12, %v805_v42  ;;  %v1660_v24 = vshll.u32 %v1616_v10, 16  ;;  %v814_v25 = vor.u32 %v813_v16, %v810_v13  ;;  %v1650_v26 = vrot.slane %v1648_v18, 5  ;;  %v1621_v10 = vld [vmem:[#allocation2 + $0x20] sm:$0xe] }
  0x31   :  { %v1653_v27 = vrot.slane %v1651_v19, 6  ;;  %v1666_v28 = vshrl.u32 %v1617_v15, 16  ;;  %v823_v35 = vor.u32 %v822_v21, %v819_v17  ;;  %v1659_v37 = vrot.slane %v1657_v23, 5 }
  0x32   :  { %v1662_v38 = vrot.slane %v1660_v24, 6  ;;  %v1669_v40 = vshll.u32 %v1617_v15, 16  ;;  %v815_v41 = vrot.slane %v814_v25, 4  ;;  %v1675_v47 = vshrl.u32 %v1618_v22, 16  ;;  %v1622_v15 = vld [vmem:[#allocation2 + $0x24] sm:$0x3] }
  0x33   :  { %v1654_v45 = vor.u32 %v1653_v27, %v1650_v26  ;;  %v1668_v46 = vrot.slane %v1666_v28, 5  ;;  %v1678_v51 = vshll.u32 %v1618_v22, 16  ;;  %v1167_v54 = vshrl.u32 %v1134_v31, 16  ;;  %v758_v25 = vld [vmem:[#allocation2 + $0x10] sm:$0xe] }
  0x34   :  { %v1663_v49 = vor.u32 %v1662_v38, %v1659_v37  ;;  %v1671_v50 = vrot.slane %v1669_v40, 6  ;;  %v824_v55 = vsel %vm8681_vm13, %v815_v41, %v823_v35  ;;  %v1677_v57 = vrot.slane %v1675_v47, 5  ;;  %v759_v47 = vld [vmem:[#allocation2 + $0x14] sm:$0x3] }
  0x35   :  { %v1655_v56 = vrot.slane %v1654_v45, 4  ;;  %v1170_v59 = vshll.u32 %v1134_v31, 16  ;;  %v7688_v60 = vcombine.low %v806_v20, %v824_v55  ;;  %v1680_v62 = vrot.slane %v1678_v51, 6 }
  0x36   :  { %v1672_v61 = vor.u32 %v1671_v50, %v1668_v46  ;;  %v1169_v63 = vrot.slane %v1167_v54, 4  ;;  %v1176_v3 = vshll.u32 %v1135_v48, 16  ;;  %v1181_v4 = vshrl.u32 %v1136_v52, 16 }
  0x37   :  { %v1664_v1 = vsel %vm8681_vm13, %v1655_v56, %v1663_v49  ;;  %v1172_v2 = vrot.slane %v1170_v59, 5  ;;  %1101 = vrot.lane.b32.xlu1 %v7688_v60, %s8425_s23  ;;  %v1681_v6 = vor.u32 %v1680_v62, %v1677_v57  ;;  %v1184_v8 = vshll.u32 %v1136_v52, 16  ;;  %v760_v52 = vld [vmem:[#allocation2 + $0x18] sm:$0xe] }
  0x38   :  { %v1673_v5 = vrot.slane %v1672_v61, 4  ;;  %v1190_v9 = vshll.u32 %v1137_v58, 16  ;;  %v1178_v36 = vrot.slane %v1176_v3, 5  ;;  %v1183_v43 = vrot.slane %v1181_v4, 4  ;;  %v761_v58 = vld [vmem:[#allocation2 + $0x1c] sm:$0x3] }
  0x39   :  { %v1173_v42 = vor.u32 %v1172_v2, %v1169_v63  ;;  %v1684_v11 = vshrl.u32 %v1619_v0, 16  ;;  %v1186_v13 = vrot.slane %v1184_v8, 5  ;;  %v1687_v16 = vshll.u32 %v1619_v0, 16  ;;  %v1996_v4 = vld [vmem:[#allocation2 + $0x20] sm:$0xf] }
  0x3a   :  { %v1682_v12 = vsel %vm8681_vm13, %v1673_v5, %v1681_v6  ;;  %v1192_v14 = vrot.slane %v1190_v9, 5  ;;  %v1693_v20 = vshrl.u32 %v1620_v39, 16  ;;  %v1696_v23 = vshll.u32 %v1620_v39, 16  ;;  %v1997_v39 = vld [vmem:[#allocation2 + $0x24] sm:$0x1] }
  0x3b   :  { %v7728_v17 = vcombine.low %v1664_v1, %v1682_v12  ;;  %v1174_v18 = vrot.slane %v1173_v42, 4  ;;  %v1686_v19 = vrot.slane %v1684_v11, 5  ;;  %v1187_v21 = vor.u32 %v1186_v13, %v1183_v43  ;;  %v1998_v11 = vld [vmem:[#allocation2 + $0x28] sm:$0xf] }
  0x3c   :  { %v1689_v22 = vrot.slane %v1687_v16, 6  ;;  %v1702_v24 = vshrl.u32 %v1621_v10, 16  ;;  %v1695_v27 = vrot.slane %v1693_v20, 5  ;;  %v1705_v28 = vshll.u32 %v1621_v10, 16 }
  0x3d   :  { %1959 = vrot.lane.b32.xlu0 %v7728_v17, %s8423_s21  ;;  %v1179_v26 = vsel %vm8661_vm12, %v1174_v18, %v1178_v36  ;;  %v1711_v31 = vshrl.u32 %v1622_v15, 16  ;;  %v1188_v35 = vrot.slane %v1187_v21, 4  ;;  %v1698_v38 = vrot.slane %v1696_v23, 6  ;;  %v1999_v18 = vld [vmem:[#allocation2 + $0x2c] sm:$0x1] }
  0x3e   :  { %v1690_v37 = vor.u32 %v1689_v22, %v1686_v19  ;;  %v1704_v40 = vrot.slane %v1702_v24, 5  ;;  %v1707_v41 = vrot.slane %v1705_v28, 6  ;;  %v1714_v46 = vshll.u32 %v1622_v15, 16 }
  0x3f   :  { %v1713_v45 = vrot.slane %v1711_v31, 5  ;;  %v826_v48 = vshrl.u32 %v758_v25, 16  ;;  %v1193_v49 = vsel %vm8661_vm12, %v1188_v35, %v1192_v14  ;;  %v1699_v51 = vor.u32 %v1698_v38, %v1695_v27  ;;  %v1139_v35 = vld [vmem:[#allocation2 + $0x1c] sm:$0x1] }
  0x40   :  { %v1691_v50 = vrot.slane %v1690_v37, 4  ;;  %v829_v54 = vshll.u32 %v758_v25, 16  ;;  %v7696_v55 = vcombine.low %v1179_v26, %v1193_v49  ;;  %v1708_v56 = vor.u32 %v1707_v41, %v1704_v40  ;;  %v1138_v25 = vld [vmem:[#allocation2 + $0x18] sm:$0xf] }
  0x41   :  { %v1716_v57 = vrot.slane %v1714_v46, 6  ;;  %v828_v59 = vrot.slane %v826_v48, 5  ;;  %v835_v62 = vshrl.u32 %v759_v47, 16  ;;  %v838_v63 = vshll.u32 %v759_v47, 16  ;;  %v1141_v48 = vld [vmem:[#allocation2 + $0x24] sm:$0x1] }
  0x42   :  { %v1700_v60 = vsel %vm8681_vm13, %v1691_v50, %v1699_v51  ;;  %v831_v61 = vrot.slane %v829_v54, 6  ;;  %1414 = vrot.lane.b32.xlu1 %v7696_v55, %s8424_s22  ;;  %v1709_v0 = vrot.slane %v1708_v56, 4  ;;  %v844_v2 = vshrl.u32 %v760_v52, 16 }
  0x43   :  { %v1717_v1 = vor.u32 %v1716_v57, %v1713_v45  ;;  %v847_v3 = vshll.u32 %v760_v52, 16  ;;  %v837_v6 = vrot.slane %v835_v62, 5  ;;  %v840_v8 = vrot.slane %v838_v63, 6  ;;  %v1140_v45 = vld [vmem:[#allocation2 + $0x20] sm:$0xf] }
  0x44   :  { %v832_v5 = vor.u32 %v831_v61, %v828_v59  ;;  %v853_v9 = vshrl.u32 %v761_v58, 16  ;;  %v846_v36 = vrot.slane %v844_v2, 5  ;;  %v856_v10 = vshll.u32 %v761_v58, 16 }
  0x45   :  { %v1718_v42 = vsel %vm8681_vm13, %v1709_v0, %v1717_v1  ;;  %v849_v43 = vrot.slane %v847_v3, 6  ;;  %v841_v14 = vor.u32 %v840_v8, %v837_v6  ;;  %v2053_v19 = vshrl.u32 %v1996_v4, 16  ;;  %v1624_v1 = vld [vmem:[#allocation2 + $0x2c] sm:$0x3]  ;;  %v1625_v6 = vld [vmem:[#allocation2 + $0x30] sm:$0xe] }
  0x46   :  { %v7729_v12 = vcombine.low %v1700_v60, %v1718_v42  ;;  %v833_v13 = vrot.slane %v832_v5, 4  ;;  %v855_v15 = vrot.slane %v853_v9, 5  ;;  %v858_v17 = vrot.slane %v856_v10, 6  ;;  %v1623_v60 = vld [vmem:[#allocation2 + $0x28] sm:$0xe] }
  0x47   :  { %v850_v16 = vor.u32 %v849_v43, %v846_v36  ;;  %v2056_v20 = vshll.u32 %v1996_v4, 16  ;;  %v2062_v22 = vshll.u32 %v1997_v39, 16  ;;  %v2067_v23 = vshrl.u32 %v1998_v11, 16 }
  0x48   :  { %1961 = vrot.lane.b32.xlu0 %v7729_v12, %s8423_s21  ;;  %v842_v21 = vsel %vm8681_vm13, %v833_v13, %v841_v14  ;;  %v2070_v24 = vshll.u32 %v1998_v11, 16  ;;  %v859_v27 = vor.u32 %v858_v17, %v855_v15  ;;  %v2055_v28 = vrot.slane %v2053_v19, 4 }
  0x49   :  { %v851_v26 = vrot.slane %v850_v16, 4  ;;  %v2058_v31 = vrot.slane %v2056_v20, 5  ;;  %v2064_v37 = vrot.slane %v2062_v22, 5  ;;  %v2069_v38 = vrot.slane %v2067_v23, 4  ;;  %v2000_v16 = vld [vmem:[#allocation2 + $0x30] sm:$0xf] }
  0x4a   :  { %v2072_v40 = vrot.slane %v2070_v24, 5  ;;  %v2076_v41 = vshll.u32 %v1999_v18, 16  ;;  %v1195_v49 = vshrl.u32 %v1138_v25, 16  ;;  %v1198_v50 = vshll.u32 %v1138_v25, 16  ;;  %v2002_v20 = vld [vmem:[#allocation2 + $0x38] sm:$0xf] }
  0x4b   :  { %v860_v46 = vsel %vm8681_vm13, %v851_v26, %v859_v27  ;;  %v2059_v47 = vor.u32 %v2058_v31, %v2055_v28  ;;  %v1204_v55 = vshll.u32 %v1139_v35, 16  ;;  %v1209_v59 = vshrl.u32 %v1140_v45, 16 }
  0x4c   :  { %v7689_v51 = vcombine.low %v842_v21, %v860_v46  ;;  %v2073_v52 = vor.u32 %v2072_v40, %v2069_v38  ;;  %v2078_v54 = vrot.slane %v2076_v41, 5  ;;  %v1197_v57 = vrot.slane %v1195_v49, 4 }
  0x4d   :  { %v2060_v56 = vrot.slane %v2059_v47, 4  ;;  %v1200_v58 = vrot.slane %v1198_v50, 5  ;;  %v1206_v62 = vrot.slane %v1204_v55, 5  ;;  %v1212_v63 = vshll.u32 %v1140_v45, 16  ;;  %v762_v47 = vld [vmem:[#allocation2 + $0x20] sm:$0xe] }
  0x4e   :  { %1103 = vrot.lane.b32.xlu1 %v7689_v51, %s8425_s23  ;;  %v2074_v61 = vrot.slane %v2073_v52, 4  ;;  %v1218_v0 = vshll.u32 %v1141_v48, 16  ;;  %v1211_v4 = vrot.slane %v1209_v59, 4  ;;  %v134_v5 = vrot.slane %v8609_v29, 4  ;;  %v763_v48 = vld [vmem:[#allocation2 + $0x24] sm:$0x3] }
  0x4f   :  { %v2065_v2 = vsel %vm8661_vm12, %v2060_v56, %v2064_v37  ;;  %v1201_v3 = vor.u32 %v1200_v58, %v1197_v57  ;;  %v1214_v9 = vrot.slane %v1212_v63, 5  ;;  %v1720_v42 = vshrl.u32 %v1623_v60, 16  ;;  %v764_v63 = vld [vmem:[#allocation2 + $0x28] sm:$0xe] }
  0x50   :  { %v2079_v8 = vsel %vm8661_vm12, %v2074_v61, %v2078_v54  ;;  %v1220_v39 = vrot.slane %v1218_v0, 5  ;;  %201 = vst.msk [vmem:[#allocation2 + $0x34] sm:$0x1] %vm190_vm0, %v134_v5  ;;  %v1723_v10 = vshll.u32 %v1623_v60, 16  ;;  %v1729_v11 = vshrl.u32 %v1624_v1, 16 }
  0x51   :  { %v7737_v36 = vcombine.low %v2065_v2, %v2079_v8  ;;  %v1202_v43 = vrot.slane %v1201_v3, 4  ;;  %v1215_v12 = vor.u32 %v1214_v9, %v1211_v4  ;;  %v1722_v13 = vrot.slane %v1720_v42, 5  ;;  %v765_v5 = vld [vmem:[#allocation2 + $0x2c] sm:$0x3] }
  0x52   :  { %v1732_v14 = vshll.u32 %v1624_v1, 16  ;;  %v1738_v15 = vshrl.u32 %v1625_v6, 16  ;;  %v1725_v17 = vrot.slane %v1723_v10, 6  ;;  %v1731_v18 = vrot.slane %v1729_v11, 5 }
  0x53   :  { %2274 = vrot.lane.b32.xlu0 %v7737_v36, %s8425_s23  ;;  %v1207_v29 = vsel %vm8661_vm12, %v1202_v43, %v1206_v62  ;;  %v1741_v19 = vshll.u32 %v1625_v6, 16  ;;  %v1216_v21 = vrot.slane %v1215_v12, 4  ;;  %v136_v24 = vrot.slane %v8611_v30, 4 }
  0x54   :  { %v1734_v22 = vrot.slane %v1732_v14, 6  ;;  %v1740_v23 = vrot.slane %v1738_v15, 5  ;;  %v1726_v25 = vor.u32 %v1725_v17, %v1722_v13  ;;  %v2081_v27 = vshrl.u32 %v2000_v16, 16  ;;  %v2312_v13 = vld [vmem:[#allocation2 + $0x30] sm:$0xe] }
  0x55   :  { %v1743_v26 = vrot.slane %v1741_v19, 6  ;;  %v2084_v28 = vshll.u32 %v2000_v16, 16  ;;  %v1221_v31 = vsel %vm8661_vm12, %v1216_v21, %v1220_v39  ;;  %203 = vst.msk [vmem:[#allocation2 + $0x3c] sm:$0x1] %vm190_vm0, %v136_v24  ;;  %v2095_v37 = vshrl.u32 %v2002_v20, 16 }
  0x56   :  { %v1735_v35 = vor.u32 %v1734_v22, %v1731_v18  ;;  %v2098_v38 = vshll.u32 %v2002_v20, 16  ;;  %v7697_v40 = vcombine.low %v1207_v29, %v1221_v31  ;;  %v1727_v41 = vrot.slane %v1726_v25, 4  ;;  %v2314_v18 = vld [vmem:[#allocation2 + $0x38] sm:$0xe] }
  0x57   :  { %v1744_v45 = vor.u32 %v1743_v26, %v1740_v23  ;;  %v2083_v46 = vrot.slane %v2081_v27, 4  ;;  %v1626_v49 = vld [vmem:[#allocation2 + $0x34] sm:$0x3]  ;;  %v2086_v50 = vrot.slane %v2084_v28, 5  ;;  %v2097_v51 = vrot.slane %v2095_v37, 4 }
  0x58   :  { %v2001_v30 = vld [vmem:[#allocation2 + $0x34] sm:$0x1]  ;;  %1416 = vrot.lane.b32.xlu1 %v7697_v40, %s8424_s22  ;;  %v1736_v52 = vsel %vm8681_vm13, %v1727_v41, %v1735_v35  ;;  %v1747_v55 = vshrl.u32 %v1626_v49, 16  ;;  %v1750_v56 = vshll.u32 %v1626_v49, 16  ;;  %v2100_v59 = vrot.slane %v2098_v38, 5 }
  0x59   :  { %v1745_v54 = vrot.slane %v1744_v45, 4  ;;  %v2087_v57 = vor.u32 %v2086_v50, %v2083_v46  ;;  %v2090_v58 = vshll.u32 %v2001_v30, 16  ;;  %v862_v60 = vshrl.u32 %v762_v47, 16  ;;  %v2313_v17 = vld [vmem:[#allocation2 + $0x34] sm:$0x1] }
  0x5a   :  { %v1749_v61 = vrot.slane %v1747_v55, 5  ;;  %v1752_v62 = vrot.slane %v1750_v56, 6  ;;  %v865_v0 = vshll.u32 %v762_v47, 16  ;;  %v871_v1 = vshrl.u32 %v763_v48, 16  ;;  %v1142_v23 = vld [vmem:[#allocation2 + $0x28] sm:$0xf] }
  0x5b   :  { %v2088_v2 = vrot.slane %v2087_v57, 4  ;;  %v2092_v3 = vrot.slane %v2090_v58, 5  ;;  %v2101_v4 = vor.u32 %v2100_v59, %v2097_v51  ;;  %v864_v6 = vrot.slane %v862_v60, 5  ;;  %v1143_v40 = vld [vmem:[#allocation2 + $0x2c] sm:$0x1] }
  0x5c   :  { %v1753_v8 = vor.u32 %v1752_v62, %v1749_v61  ;;  %v2003_v9 = vld [vmem:[#allocation2 + $0x3c] sm:$0x1]  ;;  %v867_v39 = vrot.slane %v865_v0, 6  ;;  %v873_v42 = vrot.slane %v871_v1, 5  ;;  %v874_v36 = vshll.u32 %v763_v48, 16 }
  0x5d   :  { %v2093_v43 = vsel %vm8661_vm12, %v2088_v2, %v2092_v3  ;;  %v2102_v10 = vrot.slane %v2101_v4, 4  ;;  %v2104_v11 = vshll.u32 %v2003_v9, 16  ;;  %v880_v12 = vshrl.u32 %v764_v63, 16  ;;  %v2315_v28 = vld [vmem:[#allocation2 + $0x3c] sm:$0x1] }
  0x5e   :  { %v1754_v14 = vsel %vm8681_vm13, %v1745_v54, %v1753_v8  ;;  %v868_v15 = vor.u32 %v867_v39, %v864_v6  ;;  %v876_v16 = vrot.slane %v874_v36, 6  ;;  %v883_v29 = vshll.u32 %v764_v63, 16  ;;  %v1144_v48 = vld [vmem:[#allocation2 + $0x30] sm:$0xf]  ;;  %v1145_v49 = vld [vmem:[#allocation2 + $0x34] sm:$0x1] }
  0x5f   :  { %v7730_v19 = vcombine.low %v1736_v52, %v1754_v14  ;;  %v2106_v20 = vrot.slane %v2104_v11, 5  ;;  %v882_v21 = vrot.slane %v880_v12, 5  ;;  %v889_v22 = vshrl.u32 %v765_v5, 16  ;;  %v1627_v54 = vld [vmem:[#allocation2 + $0x38] sm:$0xe] }
  0x60   :  { %v869_v24 = vrot.slane %v868_v15, 4  ;;  %v877_v25 = vor.u32 %v876_v16, %v873_v42  ;;  %v885_v26 = vrot.slane %v883_v29, 6  ;;  %v892_v27 = vshll.u32 %v765_v5, 16  ;;  %v1628_v63 = vld [vmem:[#allocation2 + $0x3c] sm:$0x3] }
  0x61   :  { %1963 = vrot.lane.b32.xlu0 %v7730_v19, %s8423_s21  ;;  %v2107_v31 = vsel %vm8661_vm12, %v2102_v10, %v2106_v20  ;;  %v891_v35 = vrot.slane %v889_v22, 5  ;;  %v7748_v37 = vrot.slane %v2312_v13, 9  ;;  %v2386_v38 = vrot.slane %v2313_v17, 5  ;;  %v1629_v0 = vld [vmem:[#allocation2 + $0x40] sm:$0xe] }
  0x62   :  { %v7738_v41 = vcombine.low %v2093_v43, %v2107_v31  ;;  %v878_v45 = vsel %vm8681_vm13, %v869_v24, %v877_v25  ;;  %v886_v46 = vor.u32 %v885_v26, %v882_v21  ;;  %v894_v47 = vrot.slane %v892_v27, 6  ;;  %v578_v39 = vld [vmem:[#allocation2 + $0x30] sm:$0xe]  ;;  %v579_v11 = vld [vmem:[#allocation2 + $0x34] sm:$0x1] }
  0x63   :  { %v2387_v30 = vsel %vm8634_vm7, %v7748_v37, %v2386_v38  ;;  %v7749_v50 = vrot.slane %v2314_v18, 9  ;;  %v2390_v51 = vrot.slane %v2315_v28, 5  ;;  %v1223_v52 = vshrl.u32 %v1142_v23, 16  ;;  %v580_v16 = vld [vmem:[#allocation2 + $0x38] sm:$0xe] }
  0x64   :  { %v887_v55 = vrot.slane %v886_v46, 4  ;;  %v895_v56 = vor.u32 %v894_v47, %v891_v35  ;;  %v1226_v57 = vshll.u32 %v1142_v23, 16  ;;  %v1232_v58 = vshll.u32 %v1143_v40, 16  ;;  %v581_v29 = vld [vmem:[#allocation2 + $0x3c] sm:$0x1] }
  0x65   :  { %2276 = vrot.lane.b32.xlu0 %v7738_v41, %s8425_s23  ;;  %v2391_v59 = vsel %vm8634_vm7, %v7749_v50, %v2390_v51  ;;  %v1225_v60 = vrot.slane %v1223_v52, 4  ;;  %v1237_v61 = vshrl.u32 %v1144_v48, 16  ;;  %v1240_v62 = vshll.u32 %v1144_v48, 16  ;;  %v2006_v40 = vld [vmem:[#allocation2 + $0x48] sm:$0xf] }
  0x66   :  { %v896_v1 = vsel %vm8681_vm13, %v887_v55, %v895_v56  ;;  %v7762_v2 = vcombine.low %v2387_v30, %v2391_v59  ;;  %v1228_v3 = vrot.slane %v1226_v57, 5  ;;  %v1234_v4 = vrot.slane %v1232_v58, 5  ;;  %v8755_v41 = vld [vmem:[%s10932_s0 + $0x48] sm:$0xff]  ;;  %v766_v30 = vld [vmem:[#allocation2 + $0x30] sm:$0xe] }
  0x67   :  { %v7690_v5 = vcombine.low %v878_v45, %v896_v1  ;;  %v1239_v6 = vrot.slane %v1237_v61, 4  ;;  %v1242_v8 = vrot.slane %v1240_v62, 5  ;;  %v1246_v9 = vshll.u32 %v1145_v49, 16  ;;  %v2007_v49 = vld [vmem:[#allocation2 + $0x4c] sm:$0x1] }
  0x68   :  { %v1229_v42 = vor.u32 %v1228_v3, %v1225_v60  ;;  %v138_v36 = vrot.slane %v8616_v33, 4  ;;  %v1756_v43 = vshrl.u32 %v1627_v54, 16  ;;  %v1759_v10 = vshll.u32 %v1627_v54, 16  ;;  %v2004_v33 = vld [vmem:[#allocation2 + $0x40] sm:$0xf] }
  0x69   :  { %1105 = vrot.lane.b32.xlu1 %v7690_v5, %s8425_s23  ;;  %2460 = vrot.lane.b32.xlu0 %v7762_v2, %s8424_s22  ;;  %v1243_v12 = vor.u32 %v1242_v8, %v1239_v6  ;;  %v1248_v13 = vrot.slane %v1246_v9, 5  ;;  %v1765_v14 = vshrl.u32 %v1628_v63, 16  ;;  %v1768_v15 = vshll.u32 %v1628_v63, 16  ;;  %v768_v5 = vld [vmem:[#allocation2 + $0x38] sm:$0xe] }
  0x6a   :  { %v1230_v17 = vrot.slane %v1229_v42, 4  ;;  %205 = vst.msk [vmem:[#allocation2 + $0x44] sm:$0x1] %vm190_vm0, %v138_v36  ;;  %v1758_v18 = vrot.slane %v1756_v43, 5  ;;  %v1761_v19 = vrot.slane %v1759_v10, 6  ;;  %v1774_v20 = vshrl.u32 %v1629_v0, 16 }
  0x6b   :  { %v1244_v21 = vrot.slane %v1243_v12, 4  ;;  %v1767_v22 = vrot.slane %v1765_v14, 5  ;;  %v1770_v23 = vrot.slane %v1768_v15, 6  ;;  %v1777_v24 = vshll.u32 %v1629_v0, 16  ;;  %v769_v14 = vld [vmem:[#allocation2 + $0x3c] sm:$0x3] }
  0x6c   :  { %v1235_v25 = vsel %vm8661_vm12, %v1230_v17, %v1234_v4  ;;  %v1762_v26 = vor.u32 %v1761_v19, %v1758_v18  ;;  %v1776_v27 = vrot.slane %v1774_v20, 5  ;;  %v7670_v28 = vrot.slane %v578_v39, 9  ;;  %v767_v39 = vld [vmem:[#allocation2 + $0x34] sm:$0x3]  ;;  %v2316_v20 = vld [vmem:[#allocation2 + $0x40] sm:$0xe] }
  0x6d   :  { %v1249_v31 = vsel %vm8661_vm12, %v1244_v21, %v1248_v13  ;;  %v1771_v35 = vor.u32 %v1770_v23, %v1767_v22  ;;  %v1779_v37 = vrot.slane %v1777_v24, 6  ;;  %v659_v38 = vrot.slane %v579_v11, 5  ;;  %v2318_v24 = vld [vmem:[#allocation2 + $0x48] sm:$0xe] }
  0x6e   :  { %v7698_v45 = vcombine.low %v1235_v25, %v1249_v31  ;;  %v1763_v46 = vrot.slane %v1762_v26, 4  ;;  %v7671_v47 = vrot.slane %v580_v16, 9  ;;  %v663_v48 = vrot.slane %v581_v29, 5  ;;  %v2319_v25 = vld [vmem:[#allocation2 + $0x4c] sm:$0x1]  ;;  %v8336_v26 = vld [vmem:[%s10933_s1 + $0x40] sm:$0xff]  }
  0x6f   :  { %v1780_v50 = vor.u32 %v1779_v37, %v1776_v27  ;;  %v660_v51 = vsel %vm8634_vm7, %v7670_v28, %v659_v38  ;;  %v2109_v52 = vshrl.u32 %v2004_v33, 16  ;;  %v2112_v54 = vshll.u32 %v2004_v33, 16  ;;  %v8337_v27 = vld [vmem:[%s10933_s1] sm:$0xff]   ;;  %8021 = vmatprep.subr.bf16.mxu0 %v8336_v26 }
  0x70   :  { %1418 = vrot.lane.b32.xlu1 %v7698_v45, %s8424_s22  ;;  %v664_v55 = vsel %vm8634_vm7, %v7671_v47, %v663_v48  ;;  %v2123_v56 = vshrl.u32 %v2006_v40, 16  ;;  %v2126_v57 = vshll.u32 %v2006_v40, 16  ;;  %v7998_v58 = vpack.c.bf16 %v8755_v41, %v8755_v41  ;;  %v8338_v40 = vld [vmem:[%s10933_s1 + $0x48] sm:$0xff]   ;;  %8022 = vmatpush3.bf16.msra.mxu0 %v8337_v27  ;;  %v8804_v27 = vld [vmem:[#allocation2 + $0x58] sm:$0xe]  ;;  %v8340_v41 = vld [vmem:[%s10933_s1 + $0x50] sm:$0xff]  }
  0x71   :  { %v1630_v59 = vld [vmem:[#allocation2 + $0x44] sm:$0x3]  ;;  %v1772_v60 = vsel %vm8681_vm13, %v1763_v46, %v1771_v35  ;;  %v1781_v61 = vrot.slane %v1780_v50, 4  ;;  %v7683_v62 = vcombine.low %v660_v51, %v664_v55  ;;  %v2111_v0 = vrot.slane %v2109_v52, 4  ;;  %v8339_v55 = vld [vmem:[%s10933_s1 + $0x8] sm:$0xff]   ;;  %8023 = vmatprep.subr.bf16.mxu0 %v8338_v40 }
  0x72   :  { %v2005_v63 = vld [vmem:[#allocation2 + $0x44] sm:$0x1]  ;;  %v1783_v1 = vshrl.u32 %v1630_v59, 16  ;;  %v1786_v2 = vshll.u32 %v1630_v59, 16  ;;  %v2114_v3 = vrot.slane %v2112_v54, 5  ;;  %v2125_v6 = vrot.slane %v2123_v56, 4 }
  0x73   :  { %v2118_v4 = vshll.u32 %v2005_v63, 16  ;;  %v2128_v8 = vrot.slane %v2126_v57, 5  ;;  %v2132_v9 = vshll.u32 %v2007_v49, 16  ;;  %v898_v42 = vshrl.u32 %v766_v30, 16  ;;  %v2317_v38 = vld [vmem:[#allocation2 + $0x44] sm:$0x1] }
  0x74   :  { %v1785_v36 = vrot.slane %v1783_v1, 5  ;;  %v1788_v43 = vrot.slane %v1786_v2, 6  ;;  %727 = vrot.lane.b32.xlu1 %v7683_v62, %s8423_s21  ;;  %v2115_v10 = vor.u32 %v2114_v3, %v2111_v0  ;;  %v901_v16 = vshll.u32 %v766_v30, 16  ;;  %v1146_v49 = vld [vmem:[#allocation2 + $0x38] sm:$0xf]  ;;  %8024 = vmatpush3.bf16.msra.mxu0 %v8339_v55 }
  0x75   :  { %v2120_v11 = vrot.slane %v2118_v4, 5  ;;  %v2129_v12 = vor.u32 %v2128_v8, %v2125_v6  ;;  %v2134_v13 = vrot.slane %v2132_v9, 5  ;;  %v900_v15 = vrot.slane %v898_v42, 5  ;;  %v1147_v30 = vld [vmem:[#allocation2 + $0x3c] sm:$0x1]  ;;  %v53_v8 = vld [vmem:[%s10932_s0 + $0x50] sm:$0xff]  ;;  %8025 = vmatprep.subr.bf16.mxu0 %v8340_v41 }
  0x76   :  { %v1789_v29 = vor.u32 %v1788_v43, %v1785_v36  ;;  %v2116_v17 = vrot.slane %v2115_v10, 4  ;;  %v907_v18 = vshrl.u32 %v767_v39, 16  ;;  %v910_v19 = vshll.u32 %v767_v39, 16  ;;  %v1148_v1 = vld [vmem:[#allocation2 + $0x40] sm:$0xf] }
  0x77   :  { %v2130_v33 = vrot.slane %v2129_v12, 4  ;;  %v903_v21 = vrot.slane %v901_v16, 6  ;;  %v916_v22 = vshrl.u32 %v768_v5, 16  ;;  %v919_v23 = vshll.u32 %v768_v5, 16  ;;  %v1149_v5 = vld [vmem:[#allocation2 + $0x44] sm:$0x1] }
  0x78   :  { %v1790_v28 = vsel %vm8681_vm13, %v1781_v61, %v1789_v29  ;;  %v2121_v31 = vsel %vm8661_vm12, %v2116_v17, %v2120_v11  ;;  %v909_v35 = vrot.slane %v907_v18, 5  ;;  %v912_v37 = vrot.slane %v910_v19, 6  ;;  %v1631_v43 = vld [vmem:[#allocation2 + $0x58] sm:$0xe]  ;;  %v770_v18 = vld [vmem:[#allocation2 + $0x50] sm:$0xe] }
  0x79   :  { %v7731_v45 = vcombine.low %v1772_v60, %v1790_v28  ;;  %v2135_v46 = vsel %vm8661_vm12, %v2130_v33, %v2134_v13  ;;  %v904_v47 = vor.u32 %v903_v21, %v900_v15  ;;  %v918_v48 = vrot.slane %v916_v22, 5  ;;  %v583_v22 = vld [vmem:[#allocation2 + $0x54] sm:$0x1] }
  0x7a   :  { %v7739_v50 = vcombine.low %v2121_v31, %v2135_v46  ;;  %v913_v51 = vor.u32 %v912_v37, %v909_v35  ;;  %v921_v52 = vrot.slane %v919_v23, 6  ;;  %v925_v54 = vshrl.u32 %v769_v14, 16 }
  0x7b   :  { %1965 = vrot.lane.b32.xlu0 %v7731_v45, %s8423_s21  ;;  %v905_v56 = vrot.slane %v904_v47, 4  ;;  %v928_v57 = vshll.u32 %v769_v14, 16  ;;  %v7750_v59 = vrot.slane %v2316_v20, 9  ;;  %v2394_v60 = vrot.slane %v2317_v38, 5  ;;  %v8796_v14 = vld [vmem:[#allocation2 + $0x50] sm:$0xe] }
  0x7c   :  { %v922_v61 = vor.u32 %v921_v52, %v918_v48  ;;  %v927_v62 = vrot.slane %v925_v54, 5  ;;  %v7751_v63 = vrot.slane %v2318_v24, 9  ;;  %v2398_v0 = vrot.slane %v2319_v25, 5  ;;  %v8817_v45 = vld [vmem:[#allocation2 + $0x54] sm:$0x3] }
  0x7d   :  { %v914_v2 = vsel %vm8681_vm13, %v905_v56, %v913_v51  ;;  %v930_v3 = vrot.slane %v928_v57, 6  ;;  %v2395_v4 = vsel %vm8634_vm7, %v7750_v59, %v2394_v60  ;;  %v1251_v6 = vshrl.u32 %v1146_v49, 16  ;;  %v8827_v54 = vld [vmem:[#allocation2 + $0x58] sm:$0xe]  ;;  %v8832_v56 = vld [vmem:[%s10932_s0 + $0x60] sm:$0xff] }
  0x7e   :  { %v923_v9 = vrot.slane %v922_v61, 4  ;;  %v2399_v39 = vsel %vm8634_vm7, %v7751_v63, %v2398_v0  ;;  %v1254_v42 = vshll.u32 %v1146_v49, 16  ;;  %v1260_v36 = vshll.u32 %v1147_v30, 16  ;;  %v8823_v30 = vld [vmem:[%s10932_s0 + $0x58] sm:$0xff]  ;;  %v8344_v0 = vld [vmem:[%s10933_s1 + $0x60] sm:$0xff]  }
  0x7f   :  { %2278 = vrot.lane.b32.xlu0 %v7739_v50, %s8425_s23  ;;  %v931_v10 = vor.u32 %v930_v3, %v927_v62  ;;  %v7763_v11 = vcombine.low %v2395_v4, %v2399_v39  ;;  %v1253_v12 = vrot.slane %v1251_v6, 4  ;;  %v1265_v13 = vshrl.u32 %v1148_v1, 16  ;;  %v8342_v62 = vld [vmem:[%s10933_s1 + $0x58] sm:$0xff]   ;;  %v8345_v39 = vld [vmem:[%s10933_s1 + $0x20] sm:$0xff]  }
  0x80   :  { %v1256_v15 = vrot.slane %v1254_v42, 5  ;;  %v1268_v16 = vshll.u32 %v1148_v1, 16  ;;  %v1274_v29 = vshll.u32 %v1149_v5, 16  ;;  %v7999_v17 = vpack.c.bf16 %v53_v8, %v53_v8  ;;  %v8343_v63 = vld [vmem:[%s10933_s1 + $0x18] sm:$0xff]   ;;  %v8346_v42 = vld [vmem:[%s10933_s1 + $0x68] sm:$0xff]  }
  0x81   :  { %v932_v19 = vsel %vm8681_vm13, %v923_v9, %v931_v10  ;;  %v1267_v20 = vrot.slane %v1265_v13, 4  ;;  %v140_v33 = vrot.slane %v8618_v34, 4  ;;  %v141_v21 = vrot.slane %v7998_v58, 7  ;;  %v8341_v58 = vld [vmem:[%s10933_s1 + $0x10] sm:$0xff]  }
  0x82   :  { %v7691_v23 = vcombine.low %v914_v2, %v932_v19  ;;  %v1257_v24 = vor.u32 %v1256_v15, %v1253_v12  ;;  %v1262_v25 = vrot.slane %v1260_v36, 5  ;;  %v1270_v26 = vrot.slane %v1268_v16, 5  ;;  %8026 = vmatpush3.bf16.msra.mxu0 %v8341_v58  ;;  %v8347_v58 = vld [vmem:[%s10933_s1 + $0x28] sm:$0xff]  }
  0x83   :  { %2462 = vrot.lane.b32.xlu0 %v7763_v11, %s8424_s22  ;;  %v142_v28 = vrot.slane %v141_v21, 4  ;;  %207 = vst.msk [vmem:[#allocation2 + $0x5c] sm:$0x1] %vm190_vm0, %v140_v33  ;;  %v1792_v31 = vshrl.u32 %v1631_v43, 16  ;;  %v1795_v34 = vshll.u32 %v1631_v43, 16  ;;  %v1276_v38 = vrot.slane %v1274_v29, 5  ;;  %8027 = vmatprep.subr.bf16.mxu0 %v8342_v62 }
  0x84   :  { %208 = vst.msk [vmem:[#allocation2 + $0x60] sm:$0xe] %vm188_vm2, %v141_v21  ;;  %1107 = vrot.lane.b32.xlu1 %v7691_v23, %s8425_s23  ;;  %v1258_v35 = vrot.slane %v1257_v24, 4  ;;  %v1271_v37 = vor.u32 %v1270_v26, %v1267_v20  ;;  %v7672_v40 = vrot.slane %v8796_v14, 9  ;;  %v143_v48 = vrot.slane %v7999_v17, 7 }
  0x85   :  { %209 = vst.msk [vmem:[#allocation2 + $0x64] sm:$0x1] %vm190_vm0, %v142_v28  ;;  %v1794_v46 = vrot.slane %v1792_v31, 5  ;;  %v1797_v47 = vrot.slane %v1795_v34, 6  ;;  %v934_v49 = vshrl.u32 %v770_v18, 16  ;;  %v667_v52 = vrot.slane %v583_v22, 5 }
  0x86   :  { %v1263_v50 = vsel %vm8661_vm12, %v1258_v35, %v1262_v25  ;;  %v1272_v51 = vrot.slane %v1271_v37, 4  ;;  %v937_v55 = vshll.u32 %v770_v18, 16  ;;  %v7673_v59 = vrot.slane %v8804_v27, 9  ;;  %210 = vst.msk [vmem:[#allocation2 + $0x68] sm:$0xe] %vm188_vm2, %v143_v48  ;;  %8028 = vmatpush3.bf16.msra.mxu0 %v8343_v63 }
  0x87   :  { %v1798_v57 = vor.u32 %v1797_v47, %v1794_v46  ;;  %v144_v60 = vrot.slane %v143_v48, 4  ;;  %v943_v61 = vshrl.u32 %v8817_v45, 16  ;;  %v8848_v2 = vrot.slane %v934_v49, 5  ;;  %8029 = vmatprep.subr.bf16.mxu0 %v8344_v0  ;;  %v8348_v46 = vld [vmem:[%s10933_s1 + $0x70] sm:$0xff]  }
  0x88   :  { %v1277_v1 = vsel %vm8661_vm12, %v1272_v51, %v1276_v38  ;;  %v8850_v3 = vrot.slane %v937_v55, 6  ;;  %v946_v4 = vshll.u32 %v8817_v45, 16  ;;  %v952_v9 = vshrl.u32 %v8827_v54, 16 }
  0x89   :  { %v7699_v5 = vcombine.low %v1263_v50, %v1277_v1  ;;  %v1799_v6 = vrot.slane %v1798_v57, 4  ;;  %211 = vst.msk [vmem:[#allocation2 + $0x6c] sm:$0x1] %vm190_vm0, %v144_v60  ;;  %v8854_v8 = vrot.slane %v943_v61, 5  ;;  %v668_v11 = vsel %vm8634_vm7, %v7672_v40, %v667_v52  ;;  %v8349_v1 = vld [vmem:[%s10933_s1 + $0x30] sm:$0xff]  }
  0x8a   :  { %v1632_v36 = vld [vmem:[#allocation2 + $0x5c] sm:$0x3]  ;;  %v8000_v12 = vpack.c.bf16 %v8823_v30, %v8823_v30  ;;  %v8001_v13 = vpack.c.bf16 %v8832_v56, %v8832_v56  ;;  %v940_v33 = vor.u32 %v8850_v3, %v8848_v2  ;;  %v955_v21 = vshll.u32 %v8827_v54, 16  ;;  %8030 = vmatpush3.bf16.msra.mxu0 %v8345_v39  ;;  %v8350_v2 = vld [vmem:[%s10933_s1 + $0x80] sm:$0xff]  }
  0x8b   :  { %v1633_v43 = vld [vmem:[#allocation2 + $0x60] sm:$0xe]  ;;  %v585_v10 = vld [vmem:[#allocation2 + $0x5c] sm:$0x1]  ;;  %1420 = vrot.lane.b32.xlu1 %v7699_v5, %s8424_s22  ;;  %v1801_v14 = vshrl.u32 %v1632_v36, 16  ;;  %v1804_v15 = vshll.u32 %v1632_v36, 16  ;;  %8031 = vmatprep.subr.bf16.mxu0 %v8346_v42 }
  0x8c   :  { %v1810_v16 = vshrl.u32 %v1633_v43, 16  ;;  %v1813_v29 = vshll.u32 %v1633_v43, 16  ;;  %v2008_v17 = vld [vmem:[#allocation2 + $0x60] sm:$0xf]  ;;  %v1634_v18 = vld [vmem:[#allocation2 + $0x64] sm:$0x3]  ;;  %8246 = vmatprep.subr.bf16.mxu1 %v8350_v2 }
  0x8d   :  { %v671_v19 = vrot.slane %v585_v10, 5  ;;  %v2137_v20 = vshrl.u32 %v2008_v17, 16  ;;  %v1803_v22 = vrot.slane %v1801_v14, 5  ;;  %v1806_v23 = vrot.slane %v1804_v15, 6  ;;  %v2009_v26 = vld [vmem:[#allocation2 + $0x64] sm:$0x1]  ;;  %8247 = vmatpush3.bf16.msra.mxu1 %v8350_v2 }
  0x8e   :  { %v1812_v24 = vrot.slane %v1810_v16, 5  ;;  %v1815_v25 = vrot.slane %v1813_v29, 6  ;;  %v1819_v27 = vshrl.u32 %v1634_v18, 16  ;;  %v1822_v28 = vshll.u32 %v1634_v18, 16  ;;  %v2010_v34 = vld [vmem:[#allocation2 + $0x68] sm:$0xf]  ;;  %8032 = vmatpush3.bf16.msra.mxu0 %v8347_v58 }
  0x8f   :  { %v672_v31 = vsel %vm8634_vm7, %v7673_v59, %v671_v19  ;;  %v2139_v41 = vrot.slane %v2137_v20, 4  ;;  %v1807_v35 = vor.u32 %v1806_v23, %v1803_v22  ;;  %v2140_v40 = vshll.u32 %v2008_v17, 16  ;;  %v773_v60 = vld [vmem:[#allocation2 + $0x5c] sm:$0x3]  ;;  %v2320_v42 = vld [vmem:[#allocation2 + $0x60] sm:$0xe]  ;;  %8033 = vmatprep.subr.bf16.mxu0 %v8348_v46 }
  0x90   :  { %v1816_v37 = vor.u32 %v1815_v25, %v1812_v24  ;;  %v7684_v38 = vcombine.low %v668_v11, %v672_v31  ;;  %v1821_v47 = vrot.slane %v1819_v27, 5  ;;  %v1824_v48 = vrot.slane %v1822_v28, 6  ;;  %v2011_v49 = vld [vmem:[#allocation2 + $0x6c] sm:$0x1]  ;;  %v8351_v36 = vld [vmem:[%s10933_s1 + $0x78] sm:$0xff]  }
  0x91   :  { %v2146_v50 = vshll.u32 %v2009_v26, 16  ;;  %v2151_v51 = vshrl.u32 %v2010_v34, 16  ;;  %v1808_v52 = vsel %vm8681_vm13, %v1799_v6, %v1807_v35  ;;  %v2142_v57 = vrot.slane %v2140_v40, 5  ;;  %v2321_v15 = vld [vmem:[#allocation2 + $0x64] sm:$0x1]  ;;  %v8353_v19 = vld [vmem:[%s10933_s1 + $0x88] sm:$0xff]  }
  0x92   :  { %v1817_v55 = vrot.slane %v1816_v37, 4  ;;  %729 = vrot.lane.b32.xlu1 %v7684_v38, %s8423_s21  ;;  %v2154_v59 = vshll.u32 %v2010_v34, 16  ;;  %v1825_v61 = vor.u32 %v1824_v48, %v1821_v47  ;;  %v2160_v0 = vshll.u32 %v2011_v49, 16  ;;  %v2322_v17 = vld [vmem:[#allocation2 + $0x68] sm:$0xe]  ;;  %8034 = vmatpush3.bf16.msra.mxu0 %v8349_v1 }
  0x93   :  { %v2148_v62 = vrot.slane %v2146_v50, 5  ;;  %v2153_v63 = vrot.slane %v2151_v51, 4  ;;  %v2143_v3 = vor.u32 %v2142_v57, %v2139_v41  ;;  %v941_v6 = vrot.slane %v940_v33, 4  ;;  %v1150_v18 = vld [vmem:[#allocation2 + $0x58] sm:$0xf]  ;;  %8035 = vmatprep.subr.bf16.mxu0 %v8351_v36  ;;  %8248 = vmatprep.subr.bf16.mxu1 %v8353_v19 }
  0x94   :  { %v2156_v5 = vrot.slane %v2154_v59, 5  ;;  %v948_v39 = vrot.slane %v946_v4, 6  ;;  %v1826_v43 = vsel %vm8681_vm13, %v1817_v55, %v1825_v61  ;;  %v2162_v10 = vrot.slane %v2160_v0, 5  ;;  %v2323_v54 = vld [vmem:[#allocation2 + $0x6c] sm:$0x1]  ;;  %8249 = vmatpush3.bf16.msra.mxu1 %v8353_v19 }
  0x95   :  { %v954_v11 = vrot.slane %v952_v9, 5  ;;  %v957_v14 = vrot.slane %v955_v21, 6  ;;  %v7732_v16 = vcombine.low %v1808_v52, %v1826_v43  ;;  %v2144_v29 = vrot.slane %v2143_v3, 4  ;;  %v8352_v21 = vld [vmem:[%s10933_s1 + $0x38] sm:$0xff]   ;;  %v1152_v41 = vld [vmem:[#allocation2 + $0x60] sm:$0xf] }
  0x96   :  { %v2157_v45 = vor.u32 %v2156_v5, %v2153_v63  ;;  %v949_v4 = vor.u32 %v948_v39, %v8854_v8  ;;  %v961_v33 = vshrl.u32 %v773_v60, 16  ;;  %v964_v22 = vshll.u32 %v773_v60, 16  ;;  %v1151_v26 = vld [vmem:[#allocation2 + $0x5c] sm:$0x1]  ;;  %v1153_v47 = vld [vmem:[#allocation2 + $0x64] sm:$0x1]  ;;  %8036 = vmatpush3.bf16.msra.mxu0 %v8352_v21 }
  0x97   :  { %v958_v20 = vor.u32 %v957_v14, %v954_v11  ;;  %v7752_v9 = vrot.slane %v2320_v42, 9  ;;  %1967 = vrot.lane.b32.xlu0 %v7732_v16, %s8423_s21  ;;  %v2149_v8 = vsel %vm8661_vm12, %v2144_v29, %v2148_v62  ;;  %v2402_v25 = vrot.slane %v2321_v15, 5  ;;  %v1635_v57 = vld [vmem:[#allocation2 + $0x68] sm:$0xe]  ;;  %v1636_v63 = vld [vmem:[#allocation2 + $0x6c] sm:$0x3] }
  0x98   :  { %v2158_v23 = vrot.slane %v2157_v45, 4  ;;  %v950_v24 = vsel %vm8681_vm13, %v941_v6, %v949_v4  ;;  %v963_v28 = vrot.slane %v961_v33, 5  ;;  %v966_v31 = vrot.slane %v964_v22, 6  ;;  %v586_v5 = vld [vmem:[#allocation2 + $0x60] sm:$0xe] }
  0x99   :  { %v959_v27 = vrot.slane %v958_v20, 4  ;;  %v7753_v34 = vrot.slane %v2322_v17, 9  ;;  %v2403_v35 = vsel %vm8634_vm7, %v7752_v9, %v2402_v25  ;;  %v2406_v37 = vrot.slane %v2323_v54, 5  ;;  %v587_v43 = vld [vmem:[#allocation2 + $0x64] sm:$0x1] }
  0x9a   :  { %v2163_v58 = vsel %vm8661_vm12, %v2158_v23, %v2162_v10  ;;  %v1279_v38 = vshrl.u32 %v1150_v18, 16  ;;  %v967_v46 = vor.u32 %v966_v31, %v963_v28  ;;  %v1282_v48 = vshll.u32 %v1150_v18, 16  ;;  %v588_v16 = vld [vmem:[#allocation2 + $0x68] sm:$0xe]  ;;  %v589_v30 = vld [vmem:[#allocation2 + $0x6c] sm:$0x1] }
  0x9b   :  { %v7740_v40 = vcombine.low %v2149_v8, %v2163_v58  ;;  %v1288_v49 = vshll.u32 %v1151_v26, 16  ;;  %v2407_v50 = vsel %vm8634_vm7, %v7753_v34, %v2406_v37  ;;  %v1293_v52 = vshrl.u32 %v1152_v41, 16  ;;  %v774_v33 = vld [vmem:[#allocation2 + $0x60] sm:$0xe]  ;;  %v775_v8 = vld [vmem:[#allocation2 + $0x64] sm:$0x3] }
  0x9c   :  { %v1281_v51 = vrot.slane %v1279_v38, 4  ;;  %v1296_v55 = vshll.u32 %v1152_v41, 16  ;;  %v968_v59 = vsel %vm8681_vm13, %v959_v27, %v967_v46  ;;  %v7764_v60 = vcombine.low %v2403_v35, %v2407_v50  ;;  %v8932_v23 = vld [vmem:[%s10932_s0 + $0x68] sm:$0xff] }
  0x9d   :  { %2280 = vrot.lane.b32.xlu0 %v7740_v40, %s8425_s23  ;;  %v1284_v61 = vrot.slane %v1282_v48, 5  ;;  %v1290_v62 = vrot.slane %v1288_v49, 5  ;;  %v7692_v0 = vcombine.low %v950_v24, %v968_v59  ;;  %v1295_v1 = vrot.slane %v1293_v52, 4  ;;  %v8937_v24 = vld [vmem:[%s10932_s0 + $0x70] sm:$0xff] }
  0x9e   :  { %v1298_v2 = vrot.slane %v1296_v55, 5  ;;  %v1302_v3 = vshll.u32 %v1153_v47, 16  ;;  %v145_v39 = vrot.slane %v8000_v12, 7  ;;  %v1828_v42 = vshrl.u32 %v1635_v57, 16  ;;  %v776_v47 = vld [vmem:[#allocation2 + $0x68] sm:$0xe] }
  0x9f   :  { %v1285_v6 = vor.u32 %v1284_v61, %v1281_v51  ;;  %v1831_v36 = vshll.u32 %v1635_v57, 16  ;;  %1109 = vrot.lane.b32.xlu1 %v7692_v0, %s8425_s23  ;;  %v1837_v14 = vshrl.u32 %v1636_v63, 16  ;;  %v1840_v15 = vshll.u32 %v1636_v63, 16 }
  0xa0   :  { %v1299_v10 = vor.u32 %v1298_v2, %v1295_v1  ;;  %v1304_v11 = vrot.slane %v1302_v3, 5  ;;  %v146_v45 = vrot.slane %v145_v39, 4  ;;  %212 = vst.msk [vmem:[#allocation2 + $0x70] sm:$0xe] %vm188_vm2, %v145_v39  ;;  %v1830_v4 = vrot.slane %v1828_v42, 5 }
  0xa1   :  { %2464 = vrot.lane.b32.xlu0 %v7764_v60, %s8424_s22  ;;  %v1286_v29 = vrot.slane %v1285_v6, 4  ;;  %v1833_v17 = vrot.slane %v1831_v36, 6  ;;  %v1839_v18 = vrot.slane %v1837_v14, 5  ;;  %v1842_v19 = vrot.slane %v1840_v15, 6 }
  0xa2   :  { %v1300_v12 = vrot.slane %v1299_v10, 4  ;;  %v7674_v20 = vrot.slane %v586_v5, 9  ;;  %213 = vst.msk [vmem:[#allocation2 + $0x74] sm:$0x1] %vm190_vm0, %v146_v45  ;;  %v675_v9 = vrot.slane %v587_v43, 5  ;;  %v7675_v21 = vrot.slane %v588_v16, 9 }
  0xa3   :  { %v1291_v22 = vsel %vm8661_vm12, %v1286_v29, %v1290_v62  ;;  %v1834_v54 = vor.u32 %v1833_v17, %v1830_v4  ;;  %v1843_v26 = vor.u32 %v1842_v19, %v1839_v18  ;;  %v679_v27 = vrot.slane %v589_v30, 5  ;;  %v777_v45 = vld [vmem:[#allocation2 + $0x6c] sm:$0x3] }
  0xa4   :  { %v1305_v25 = vsel %vm8661_vm12, %v1300_v12, %v1304_v11  ;;  %v147_v28 = vrot.slane %v8001_v13, 7  ;;  %v676_v41 = vsel %vm8634_vm7, %v7674_v20, %v675_v9  ;;  %v970_v58 = vshrl.u32 %v774_v33, 16 }
  0xa5   :  { %v7700_v31 = vcombine.low %v1291_v22, %v1305_v25  ;;  %v1835_v34 = vrot.slane %v1834_v54, 4  ;;  %v680_v35 = vsel %vm8634_vm7, %v7675_v21, %v679_v27  ;;  %v973_v38 = vshll.u32 %v774_v33, 16 }
  0xa6   :  { %v148_v37 = vrot.slane %v147_v28, 4  ;;  %214 = vst.msk [vmem:[#allocation2 + $0x78] sm:$0xe] %vm188_vm2, %v147_v28  ;;  %v979_v40 = vshrl.u32 %v775_v8, 16  ;;  %v7685_v46 = vcombine.low %v676_v41, %v680_v35  ;;  %v972_v56 = vrot.slane %v970_v58, 5 }
  0xa7   :  { %1422 = vrot.lane.b32.xlu1 %v7700_v31, %s8424_s22  ;;  %v982_v13 = vshll.u32 %v775_v8, 16  ;;  %v1637_v48 = vld [vmem:[#allocation2 + $0x70] sm:$0xe]  ;;  %v975_v50 = vrot.slane %v973_v38, 6  ;;  %v8002_v52 = vpack.c.bf16 %v8932_v23, %v8932_v23  ;;  %v8003_v55 = vpack.c.bf16 %v8937_v24, %v8937_v24 }
  0xa8   :  { %215 = vst.msk [vmem:[#allocation2 + $0x7c] sm:$0x1] %vm190_vm0, %v148_v37  ;;  %v2012_v49 = vld [vmem:[#allocation2 + $0x70] sm:$0xf]  ;;  %v981_v51 = vrot.slane %v979_v40, 5  ;;  %v1846_v57 = vshrl.u32 %v1637_v48, 16  ;;  %v1844_v63 = vsel %vm8681_vm13, %v1835_v34, %v1843_v26 }
  0xa9   :  { %v1849_v59 = vshll.u32 %v1637_v48, 16  ;;  %v2165_v60 = vshrl.u32 %v2012_v49, 16  ;;  %v2168_v61 = vshll.u32 %v2012_v49, 16  ;;  %v1638_v62 = vld [vmem:[#allocation2 + $0x74] sm:$0x3]  ;;  %v976_v1 = vor.u32 %v975_v50, %v972_v56 }
  0xaa   :  { %v2013_v0 = vld [vmem:[#allocation2 + $0x74] sm:$0x1]  ;;  %v984_v2 = vrot.slane %v982_v13, 6  ;;  %v988_v3 = vshrl.u32 %v776_v47, 16  ;;  %v1848_v5 = vrot.slane %v1846_v57, 5  ;;  %v1855_v39 = vshrl.u32 %v1638_v62, 16 }
  0xab   :  { %v1851_v6 = vrot.slane %v1849_v59, 6  ;;  %v1858_v42 = vshll.u32 %v1638_v62, 16  ;;  %731 = vrot.lane.b32.xlu1 %v7685_v46, %s8423_s21  ;;  %v2167_v36 = vrot.slane %v2165_v60, 4  ;;  %v2170_v43 = vrot.slane %v2168_v61, 5  ;;  %v2324_v19 = vld [vmem:[#allocation2 + $0x70] sm:$0xe] }
  0xac   :  { %v2174_v10 = vshll.u32 %v2013_v0, 16  ;;  %v977_v11 = vrot.slane %v976_v1, 4  ;;  %v1857_v15 = vrot.slane %v1855_v39, 5  ;;  %v985_v4 = vor.u32 %v984_v2, %v981_v51  ;;  %v2325_v21 = vld [vmem:[#allocation2 + $0x74] sm:$0x1] }
  0xad   :  { %v1852_v14 = vor.u32 %v1851_v6, %v1848_v5  ;;  %v1860_v16 = vrot.slane %v1858_v42, 6  ;;  %v2014_v29 = vld [vmem:[#allocation2 + $0x78] sm:$0xf]  ;;  %v2171_v17 = vor.u32 %v2170_v43, %v2167_v36  ;;  %v990_v9 = vrot.slane %v988_v3, 5  ;;  %v1154_v56 = vld [vmem:[#allocation2 + $0x68] sm:$0xf] }
  0xae   :  { %v2176_v30 = vrot.slane %v2174_v10, 5  ;;  %v2179_v12 = vshrl.u32 %v2014_v29, 16  ;;  %v2182_v18 = vshll.u32 %v2014_v29, 16  ;;  %v8960_v54 = vsel %vm8681_vm13, %v977_v11, %v985_v4  ;;  %v2326_v28 = vld [vmem:[#allocation2 + $0x78] sm:$0xe] }
  0xaf   :  { %v1853_v20 = vrot.slane %v1852_v14, 4  ;;  %v1861_v33 = vor.u32 %v1860_v16, %v1857_v15  ;;  %v2015_v22 = vld [vmem:[#allocation2 + $0x7c] sm:$0x1]  ;;  %v2172_v8 = vrot.slane %v2171_v17, 4  ;;  %v991_v34 = vshll.u32 %v776_v47, 16 }
  0xb0   :  { %v2181_v25 = vrot.slane %v2179_v12, 4  ;;  %v2184_v26 = vrot.slane %v2182_v18, 5  ;;  %v2188_v27 = vshll.u32 %v2015_v22, 16  ;;  %v997_v41 = vshrl.u32 %v777_v45, 16  ;;  %v2327_v35 = vld [vmem:[#allocation2 + $0x7c] sm:$0x1] }
  0xb1   :  { %v1862_v31 = vsel %vm8681_vm13, %v1853_v20, %v1861_v33  ;;  %v1000_v58 = vshll.u32 %v777_v45, 16  ;;  %v2177_v38 = vsel %vm8661_vm12, %v2172_v8, %v2176_v30  ;;  %v993_v13 = vrot.slane %v991_v34, 6  ;;  %v1155_v51 = vld [vmem:[#allocation2 + $0x6c] sm:$0x1]  ;;  %v1157_v6 = vld [vmem:[#allocation2 + $0x74] sm:$0x1] }
  0xb2   :  { %v7733_v37 = vcombine.low %v1844_v63, %v1862_v31  ;;  %v2185_v40 = vor.u32 %v2184_v26, %v2181_v25  ;;  %v2190_v46 = vrot.slane %v2188_v27, 5  ;;  %v999_v48 = vrot.slane %v997_v41, 5  ;;  %v1156_v63 = vld [vmem:[#allocation2 + $0x70] sm:$0xf]  ;;  %v1639_v42 = vld [vmem:[#allocation2 + $0x78] sm:$0xe] }
  0xb3   :  { %v1002_v49 = vrot.slane %v1000_v58, 6  ;;  %v7754_v50 = vrot.slane %v2324_v19, 9  ;;  %v2410_v59 = vrot.slane %v2325_v21, 5  ;;  %v7755_v47 = vrot.slane %v2326_v28, 9  ;;  %v1640_v45 = vld [vmem:[#allocation2 + $0x7c] sm:$0x3] }
  0xb4   :  { %1969 = vrot.lane.b32.xlu0 %v7733_v37, %s8423_s21  ;;  %v2186_v57 = vrot.slane %v2185_v40, 4  ;;  %v2414_v60 = vrot.slane %v2327_v35, 5  ;;  %v994_v61 = vor.u32 %v993_v13, %v990_v9  ;;  %v1307_v0 = vshrl.u32 %v1154_v56, 16  ;;  %v590_v18 = vld [vmem:[#allocation2 + $0x70] sm:$0xe] }
  0xb5   :  { %v1003_v62 = vor.u32 %v1002_v49, %v999_v48  ;;  %v1310_v1 = vshll.u32 %v1154_v56, 16  ;;  %v2411_v3 = vsel %vm8634_vm7, %v7754_v50, %v2410_v59  ;;  %v1316_v39 = vshll.u32 %v1155_v51, 16  ;;  %v591_v9 = vld [vmem:[#allocation2 + $0x74] sm:$0x1]  ;;  %v592_v21 = vld [vmem:[#allocation2 + $0x78] sm:$0xe] }
  0xb6   :  { %v2191_v2 = vsel %vm8661_vm12, %v2186_v57, %v2190_v46  ;;  %v2415_v5 = vsel %vm8634_vm7, %v7755_v47, %v2414_v60  ;;  %v995_v43 = vrot.slane %v994_v61, 4  ;;  %v1309_v11 = vrot.slane %v1307_v0, 4  ;;  %v593_v34 = vld [vmem:[#allocation2 + $0x7c] sm:$0x1]  ;;  %v778_v37 = vld [vmem:[#allocation2 + $0x70] sm:$0xe] }
  0xb7   :  { %v7741_v36 = vcombine.low %v2177_v38, %v2191_v2  ;;  %v7765_v10 = vcombine.low %v2411_v3, %v2415_v5  ;;  %v1312_v14 = vrot.slane %v1310_v1, 5  ;;  %v1318_v15 = vrot.slane %v1316_v39, 5  ;;  %v8994_v51 = vld [vmem:[%s10932_s0 + $0x78] sm:$0xff]  ;;  %v779_v24 = vld [vmem:[#allocation2 + $0x74] sm:$0x3] }
  0xb8   :  { %v1321_v16 = vshrl.u32 %v1156_v63, 16  ;;  %v1324_v29 = vshll.u32 %v1156_v63, 16  ;;  %v1004_v4 = vsel %vm8681_vm13, %v995_v43, %v1003_v62  ;;  %v1330_v17 = vshll.u32 %v1157_v6, 16 }
  0xb9   :  { %2282 = vrot.lane.b32.xlu0 %v7741_v36, %s8425_s23  ;;  %v149_v30 = vrot.slane %v8002_v52, 7  ;;  %v1864_v12 = vshrl.u32 %v1639_v42, 16  ;;  %v7693_v19 = vcombine.low %v8960_v54, %v1004_v4  ;;  %v1313_v20 = vor.u32 %v1312_v14, %v1309_v11 }
  0xba   :  { %v1323_v33 = vrot.slane %v1321_v16, 4  ;;  %v1326_v22 = vrot.slane %v1324_v29, 5  ;;  %v1332_v8 = vrot.slane %v1330_v17, 5  ;;  %v1867_v27 = vshll.u32 %v1639_v42, 16 }
  0xbb   :  { %v150_v25 = vrot.slane %v149_v30, 4  ;;  %216 = vst.msk [vmem:[#allocation2 + $0x80] sm:$0xe] %vm188_vm2, %v149_v30  ;;  %v1866_v26 = vrot.slane %v1864_v12, 5  ;;  %1111 = vrot.lane.b32.xlu1 %v7693_v19, %s8425_s23  ;;  %v1314_v28 = vrot.slane %v1313_v20, 4  ;;  %v1873_v52 = vshrl.u32 %v1640_v45, 16 }
  0xbc   :  { %v1327_v23 = vor.u32 %v1326_v22, %v1323_v33  ;;  %v1876_v31 = vshll.u32 %v1640_v45, 16  ;;  %v1869_v54 = vrot.slane %v1867_v27, 6  ;;  %v7676_v41 = vrot.slane %v590_v18, 9  ;;  %v780_v30 = vld [vmem:[#allocation2 + $0x78] sm:$0xe] }
  0xbd   :  { %2466 = vrot.lane.b32.xlu0 %v7765_v10, %s8424_s22  ;;  %217 = vst.msk [vmem:[#allocation2 + $0x84] sm:$0x1] %vm190_vm0, %v150_v25  ;;  %v683_v58 = vrot.slane %v591_v9, 5  ;;  %v7677_v35 = vrot.slane %v592_v21, 9  ;;  %v1319_v38 = vsel %vm8661_vm12, %v1314_v28, %v1318_v15  ;;  %v1875_v46 = vrot.slane %v1873_v52, 5 }
  0xbe   :  { %v1328_v40 = vrot.slane %v1327_v23, 4  ;;  %v1878_v56 = vrot.slane %v1876_v31, 6  ;;  %v1870_v13 = vor.u32 %v1869_v54, %v1866_v26  ;;  %v687_v49 = vrot.slane %v593_v34, 5  ;;  %v781_v27 = vld [vmem:[#allocation2 + $0x7c] sm:$0x3] }
  0xbf   :  { %v684_v48 = vsel %vm8634_vm7, %v7676_v41, %v683_v58  ;;  %v151_v50 = vrot.slane %v8003_v55, 7  ;;  %v1006_v47 = vshrl.u32 %v778_v37, 16  ;;  %v1009_v60 = vshll.u32 %v778_v37, 16 }
  0xc0   :  { %v1333_v57 = vsel %vm8661_vm12, %v1328_v40, %v1332_v8  ;;  %v1879_v59 = vor.u32 %v1878_v56, %v1875_v46  ;;  %v1871_v62 = vrot.slane %v1870_v13, 4  ;;  %v688_v63 = vsel %vm8634_vm7, %v7677_v35, %v687_v49 }
  0xc1   :  { %v7701_v61 = vcombine.low %v1319_v38, %v1333_v57  ;;  %v152_v0 = vrot.slane %v151_v50, 4  ;;  %218 = vst.msk [vmem:[#allocation2 + $0x88] sm:$0xe] %vm188_vm2, %v151_v50  ;;  %v1008_v2 = vrot.slane %v1006_v47, 5  ;;  %v1011_v3 = vrot.slane %v1009_v60, 6 }
  0xc2   :  { %v1641_v55 = vld [vmem:[#allocation2 + $0x80] sm:$0xe]  ;;  %v8004_v5 = vpack.c.bf16 %v8994_v51, %v8994_v51  ;;  %v7686_v42 = vcombine.low %v684_v48, %v688_v63  ;;  %v1880_v10 = vsel %vm8681_vm13, %v1871_v62, %v1879_v59  ;;  %v1015_v16 = vshrl.u32 %v779_v24, 16  ;;  %v9012_v62 = vpop.permute.xlu0 %721 }
  0xc3   :  { %v2016_v1 = vld [vmem:[#allocation2 + $0x80] sm:$0xf]  ;;  %1424 = vrot.lane.b32.xlu1 %v7701_v61, %s8424_s22  ;;  %v1882_v6 = vshrl.u32 %v1641_v55, 16  ;;  %v1885_v39 = vshll.u32 %v1641_v55, 16  ;;  %219 = vst.msk [vmem:[#allocation2 + $0x8c] sm:$0x1] %vm190_vm0, %v152_v0  ;;  %v1012_v15 = vor.u32 %v1011_v3, %v1008_v2 }
  0xc4   :  { %v2193_v36 = vshrl.u32 %v2016_v1, 16  ;;  %v1642_v43 = vld [vmem:[#allocation2 + $0x84] sm:$0x3]  ;;  %v2196_v14 = vshll.u32 %v2016_v1, 16  ;;  %v1017_v21 = vrot.slane %v1015_v16, 5  ;;  %v1018_v28 = vshll.u32 %v779_v24, 16 }
  0xc5   :  { %v2017_v11 = vld [vmem:[#allocation2 + $0x84] sm:$0x1]  ;;  %v1884_v29 = vrot.slane %v1882_v6, 5  ;;  %v1887_v45 = vrot.slane %v1885_v39, 6  ;;  %v1891_v4 = vshrl.u32 %v1642_v43, 16  ;;  %v1894_v17 = vshll.u32 %v1642_v43, 16 }
  0xc6   :  { %v2195_v12 = vrot.slane %v2193_v36, 4  ;;  %v2198_v18 = vrot.slane %v2196_v14, 5  ;;  %v2202_v19 = vshll.u32 %v2017_v11, 16  ;;  %v1013_v20 = vrot.slane %v1012_v15, 4  ;;  %v2328_v41 = vld [vmem:[#allocation2 + $0x80] sm:$0xe] }
  0xc7   :  { %v1888_v33 = vor.u32 %v1887_v45, %v1884_v29  ;;  %v1893_v22 = vrot.slane %v1891_v4, 5  ;;  %v1896_v9 = vrot.slane %v1894_v17, 6  ;;  %733 = vrot.lane.b32.xlu1 %v7686_v42, %s8423_s21  ;;  %v1024_v23 = vshrl.u32 %v780_v30, 16  ;;  %v2329_v49 = vld [vmem:[#allocation2 + $0x84] sm:$0x1] }
  0xc8   :  { %v2018_v8 = vld [vmem:[#allocation2 + $0x88] sm:$0xf]  ;;  %v2199_v25 = vor.u32 %v2198_v18, %v2195_v12  ;;  %v2204_v26 = vrot.slane %v2202_v19, 5  ;;  %v1020_v37 = vrot.slane %v1018_v28, 6  ;;  %v1027_v40 = vshll.u32 %v780_v30, 16 }
  0xc9   :  { %v1889_v52 = vrot.slane %v1888_v33, 4  ;;  %v1897_v31 = vor.u32 %v1896_v9, %v1893_v22  ;;  %v2207_v34 = vshrl.u32 %v2018_v8, 16  ;;  %v2210_v54 = vshll.u32 %v2018_v8, 16  ;;  %v2330_v60 = vld [vmem:[#allocation2 + $0x88] sm:$0xe] }
  0xca   :  { %v2019_v58 = vld [vmem:[#allocation2 + $0x8c] sm:$0x1]  ;;  %v2200_v35 = vrot.slane %v2199_v25, 4  ;;  %v1026_v38 = vrot.slane %v1024_v23, 5  ;;  %v1021_v59 = vor.u32 %v1020_v37, %v1017_v21  ;;  %v1029_v47 = vrot.slane %v1027_v40, 6  ;;  %v9023_v21 = vpop.permute.xlu0 %2456 }
  0xcb   :  { %v1898_v46 = vsel %vm8681_vm13, %v1889_v52, %v1897_v31  ;;  %v2209_v56 = vrot.slane %v2207_v34, 4  ;;  %v2212_v13 = vrot.slane %v2210_v54, 5  ;;  %v2216_v48 = vshll.u32 %v2019_v58, 16  ;;  %v1158_v61 = vld [vmem:[#allocation2 + $0x78] sm:$0xf] }
  0xcc   :  { %v7734_v50 = vcombine.low %v1880_v10, %v1898_v46  ;;  %v2205_v57 = vsel %vm8661_vm12, %v2200_v35, %v2204_v26  ;;  %v1033_v24 = vshrl.u32 %v781_v27, 16  ;;  %v1036_v55 = vshll.u32 %v781_v27, 16  ;;  %v2331_v1 = vld [vmem:[#allocation2 + $0x8c] sm:$0x1]  ;;  %v1159_v42 = vld [vmem:[#allocation2 + $0x7c] sm:$0x1] }
  0xcd   :  { %v2213_v63 = vor.u32 %v2212_v13, %v2209_v56  ;;  %v2218_v0 = vrot.slane %v2216_v48, 5  ;;  %v1022_v2 = vsel %vm8681_vm13, %v1013_v20, %v1021_v59  ;;  %v1030_v3 = vor.u32 %v1029_v47, %v1026_v38  ;;  %v1160_v14 = vld [vmem:[#allocation2 + $0x80] sm:$0xf]  ;;  %v1161_v30 = vld [vmem:[#allocation2 + $0x84] sm:$0x1] }
  0xce   :  { %1971 = vrot.lane.b32.xlu0 %v7734_v50, %s8423_s21  ;;  %v7756_v6 = vrot.slane %v2328_v41, 9  ;;  %v2418_v39 = vrot.slane %v2329_v49, 5  ;;  %v1035_v43 = vrot.slane %v1033_v24, 5  ;;  %v1038_v10 = vrot.slane %v1036_v55, 6  ;;  %v1643_v9 = vld [vmem:[#allocation2 + $0x88] sm:$0xe]  ;;  %v9028_v41 = vpop.permute.xlu1 %723  ;;  %v9036_v55 = vpop.permute.xlu0 %2458 }
  0xcf   :  { %v2214_v36 = vrot.slane %v2213_v63, 4  ;;  %v7757_v11 = vrot.slane %v2330_v60, 9  ;;  %v1031_v15 = vrot.slane %v1030_v3, 4  ;;  %v2422_v29 = vrot.slane %v2331_v1, 5  ;;  %v1644_v28 = vld [vmem:[#allocation2 + $0x8c] sm:$0x3] }
  0xd0   :  { %v2419_v16 = vsel %vm8634_vm7, %v7756_v6, %v2418_v39  ;;  %v1335_v45 = vshrl.u32 %v1158_v61, 16  ;;  %v1039_v17 = vor.u32 %v1038_v10, %v1035_v43  ;;  %v1338_v12 = vshll.u32 %v1158_v61, 16  ;;  %v594_v54 = vld [vmem:[#allocation2 + $0x80] sm:$0xe]  ;;  %v595_v40 = vld [vmem:[#allocation2 + $0x84] sm:$0x1] }
  0xd1   :  { %v2219_v4 = vsel %vm8661_vm12, %v2214_v36, %v2218_v0  ;;  %v1344_v18 = vshll.u32 %v1159_v42, 16  ;;  %v2423_v20 = vsel %vm8634_vm7, %v7757_v11, %v2422_v29  ;;  %v1349_v22 = vshrl.u32 %v1160_v14, 16  ;;  %v2022_v46 = vld [vmem:[#allocation2 + $0x98] sm:$0xf]  ;;  %v596_v50 = vld [vmem:[#allocation2 + $0x88] sm:$0xe] }
  0xd2   :  { %v7742_v19 = vcombine.low %v2205_v57, %v2219_v4  ;;  %v1337_v33 = vrot.slane %v1335_v45, 4  ;;  %v1040_v8 = vsel %vm8681_vm13, %v1031_v15, %v1039_v17  ;;  %v7766_v25 = vcombine.low %v2419_v16, %v2423_v20  ;;  %v597_v61 = vld [vmem:[#allocation2 + $0x8c] sm:$0x1]  ;;  %v2023_v24 = vld [vmem:[#allocation2 + $0x9c] sm:$0x1]  ;;  %v9041_v11 = vpop.permute.xlu1 %725 }
  0xd3   :  { %v1340_v26 = vrot.slane %v1338_v12, 5  ;;  %v1346_v27 = vrot.slane %v1344_v18, 5  ;;  %v7694_v23 = vcombine.low %v1022_v2, %v1040_v8  ;;  %v1351_v52 = vrot.slane %v1349_v22, 4  ;;  %v782_v39 = vld [vmem:[#allocation2 + $0x80] sm:$0xe] }
  0xd4   :  { %2284 = vrot.lane.b32.xlu0 %v7742_v19, %s8425_s23  ;;  %v1352_v31 = vshll.u32 %v1160_v14, 16  ;;  %v1358_v34 = vshll.u32 %v1161_v30, 16  ;;  %v153_v35 = vrot.slane %v8004_v5, 7  ;;  %v1900_v37 = vshrl.u32 %v1643_v9, 16  ;;  %v783_v19 = vld [vmem:[#allocation2 + $0x84] sm:$0x3] }
  0xd5   :  { %v1341_v58 = vor.u32 %v1340_v26, %v1337_v33  ;;  %v1903_v38 = vshll.u32 %v1643_v9, 16  ;;  %1113 = vrot.lane.b32.xlu1 %v7694_v23, %s8425_s23  ;;  %v1909_v48 = vshrl.u32 %v1644_v28, 16  ;;  %v1912_v49 = vshll.u32 %v1644_v28, 16 }
  0xd6   :  { %v1354_v56 = vrot.slane %v1352_v31, 5  ;;  %v1360_v13 = vrot.slane %v1358_v34, 5  ;;  %v154_v59 = vrot.slane %v153_v35, 4  ;;  %220 = vst.msk [vmem:[#allocation2 + $0x90] sm:$0xe] %vm188_vm2, %v153_v35  ;;  %v1902_v47 = vrot.slane %v1900_v37, 5  ;;  %v9054_v37 = vpop.permute.xlu1 %2272 }
  0xd7   :  { %v1342_v57 = vrot.slane %v1341_v58, 4  ;;  %v1905_v60 = vrot.slane %v1903_v38, 6  ;;  %v1911_v5 = vrot.slane %v1909_v48, 5  ;;  %v1914_v63 = vrot.slane %v1912_v49, 6 }
  0xd8   :  { %2468 = vrot.lane.b32.xlu0 %v7766_v25, %s8424_s22  ;;  %v1355_v51 = vor.u32 %v1354_v56, %v1351_v52  ;;  %v7678_v0 = vrot.slane %v594_v54, 9  ;;  %221 = vst.msk [vmem:[#allocation2 + $0x94] sm:$0x1] %vm190_vm0, %v154_v59  ;;  %v691_v3 = vrot.slane %v595_v40, 5  ;;  %v7679_v6 = vrot.slane %v596_v50, 9  ;;  %v9049_v25 = vpop.permute.xlu0 %1959 }
  0xd9   :  { %v1347_v1 = vsel %vm8661_vm12, %v1342_v57, %v1346_v27  ;;  %v1906_v2 = vor.u32 %v1905_v60, %v1902_v47  ;;  %v1915_v36 = vor.u32 %v1914_v63, %v1911_v5  ;;  %v695_v43 = vrot.slane %v597_v61, 5  ;;  %v784_v57 = vld [vmem:[#allocation2 + $0x88] sm:$0xe]  ;;  %v785_v61 = vld [vmem:[#allocation2 + $0x8c] sm:$0x3] }
  0xda   :  { %v1356_v42 = vrot.slane %v1355_v51, 4  ;;  %v2235_v10 = vshrl.u32 %v2022_v46, 16  ;;  %v692_v15 = vsel %vm8634_vm7, %v7678_v0, %v691_v3  ;;  %v2238_v16 = vshll.u32 %v2022_v46, 16 }
  0xdb   :  { %v1907_v14 = vrot.slane %v1906_v2, 4  ;;  %v2244_v29 = vshll.u32 %v2023_v24, 16  ;;  %v696_v4 = vsel %vm8634_vm7, %v7679_v6, %v695_v43  ;;  %v1042_v30 = vshrl.u32 %v782_v39, 16 }
  0xdc   :  { %v1361_v45 = vsel %vm8661_vm12, %v1356_v42, %v1360_v13  ;;  %v2237_v17 = vrot.slane %v2235_v10, 4  ;;  %v2240_v18 = vrot.slane %v2238_v16, 5  ;;  %v7687_v33 = vcombine.low %v692_v15, %v696_v4  ;;  %v2334_v42 = vld [vmem:[#allocation2 + $0x98] sm:$0xe]  ;;  %v9061_v16 = vpop.permute.xlu1 %1101 }
  0xdd   :  { %v7702_v12 = vcombine.low %v1347_v1, %v1361_v45  ;;  %v1645_v20 = vld [vmem:[#allocation2 + $0x90] sm:$0xe]  ;;  %v2246_v9 = vrot.slane %v2244_v29, 5  ;;  %v1044_v8 = vrot.slane %v1042_v30, 5  ;;  %v1916_v31 = vsel %vm8681_vm13, %v1907_v14, %v1915_v36  ;;  %v9059_v1 = vpop.permute.xlu0 %1961 }
  0xde   :  { %v2020_v22 = vld [vmem:[#allocation2 + $0x90] sm:$0xf]  ;;  %v1918_v26 = vshrl.u32 %v1645_v20, 16  ;;  %v1921_v27 = vshll.u32 %v1645_v20, 16  ;;  %v2241_v54 = vor.u32 %v2240_v18, %v2237_v17  ;;  %v1045_v58 = vshll.u32 %v782_v39, 16 }
  0xdf   :  { %1426 = vrot.lane.b32.xlu1 %v7702_v12, %s8424_s22  ;;  %v2221_v28 = vshrl.u32 %v2020_v22, 16  ;;  %v2224_v23 = vshll.u32 %v2020_v22, 16  ;;  %v1646_v52 = vld [vmem:[#allocation2 + $0x94] sm:$0x3]  ;;  %v1051_v35 = vshrl.u32 %v783_v19, 16  ;;  %v1054_v39 = vshll.u32 %v783_v19, 16 }
  0xe0   :  { %v2021_v34 = vld [vmem:[#allocation2 + $0x94] sm:$0x1]  ;;  %v1920_v38 = vrot.slane %v1918_v26, 5  ;;  %v1923_v40 = vrot.slane %v1921_v27, 6  ;;  %v1927_v46 = vshrl.u32 %v1646_v52, 16  ;;  %v1930_v56 = vshll.u32 %v1646_v52, 16 }
  0xe1   :  { %v2223_v13 = vrot.slane %v2221_v28, 4  ;;  %v2226_v48 = vrot.slane %v2224_v23, 5  ;;  %v2230_v49 = vshll.u32 %v2021_v34, 16  ;;  %v2242_v50 = vrot.slane %v2241_v54, 4  ;;  %v2332_v15 = vld [vmem:[#allocation2 + $0x90] sm:$0xe] }
  0xe2   :  { %v1924_v59 = vor.u32 %v1923_v40, %v1920_v38  ;;  %v1929_v47 = vrot.slane %v1927_v46, 5  ;;  %v1932_v60 = vrot.slane %v1930_v56, 6  ;;  %v1047_v51 = vrot.slane %v1045_v58, 6  ;;  %v2333_v30 = vld [vmem:[#allocation2 + $0x94] sm:$0x1] }
  0xe3   :  { %735 = vrot.lane.b32.xlu1 %v7687_v33, %s8423_s21  ;;  %v2227_v5 = vor.u32 %v2226_v48, %v2223_v13  ;;  %v2232_v63 = vrot.slane %v2230_v49, 5  ;;  %v2247_v0 = vsel %vm8661_vm12, %v2242_v50, %v2246_v9  ;;  %v1053_v24 = vrot.slane %v1051_v35, 5  ;;  %v2335_v33 = vld [vmem:[#allocation2 + $0x9c] sm:$0x1]  ;;  %v1162_v22 = vld [vmem:[#allocation2 + $0x88] sm:$0xf] }
  0xe4   :  { %v1925_v2 = vrot.slane %v1924_v59, 4  ;;  %v1933_v3 = vor.u32 %v1932_v60, %v1929_v47  ;;  %v1048_v6 = vor.u32 %v1047_v51, %v1044_v8  ;;  %v1060_v43 = vshrl.u32 %v784_v57, 16  ;;  %v1163_v28 = vld [vmem:[#allocation2 + $0x8c] sm:$0x1]  ;;  %v1164_v58 = vld [vmem:[#allocation2 + $0x90] sm:$0xf]  ;;  %v9074_v59 = vpop.permute.xlu1 %1414 }
  0xe5   :  { %v2228_v36 = vrot.slane %v2227_v5, 4  ;;  %v1063_v10 = vshll.u32 %v784_v57, 16  ;;  %v1069_v14 = vshrl.u32 %v785_v61, 16  ;;  %v1056_v4 = vrot.slane %v1054_v39, 6  ;;  %v270_v56 = vld [vmem:[#allocation2 + $0x10] sm:$0xf] }
  0xe6   :  { %v1934_v29 = vsel %vm8681_vm13, %v1925_v2, %v1933_v3  ;;  %v1049_v45 = vrot.slane %v1048_v6, 4  ;;  %v1072_v17 = vshll.u32 %v785_v61, 16  ;;  %v1062_v19 = vrot.slane %v1060_v43, 5  ;;  %v1165_v49 = vld [vmem:[#allocation2 + $0x94] sm:$0x1] }
  0xe7   :  { %v7735_v12 = vcombine.low %v1916_v31, %v1934_v29  ;;  %v2233_v18 = vsel %vm8661_vm12, %v2228_v36, %v2232_v63  ;;  %v1065_v20 = vrot.slane %v1063_v10, 6  ;;  %v1057_v8 = vor.u32 %v1056_v4, %v1053_v24  ;;  %v9068_v31 = vpop.permute.xlu0 %2274  ;;  %v272_v5 = vld [vmem:[#allocation2 + $0x18] sm:$0xf]  ;;  %v273_v3 = vld [vmem:[#allocation2 + $0x1c] sm:$0x1] }
  0xe8   :  { %v7743_v9 = vcombine.low %v2233_v18, %v2247_v0  ;;  %v1071_v26 = vrot.slane %v1069_v14, 5  ;;  %v1074_v27 = vrot.slane %v1072_v17, 6  ;;  %v7758_v52 = vrot.slane %v2332_v15, 9 }
  0xe9   :  { %1973 = vrot.lane.b32.xlu0 %v7735_v12, %s8423_s21  ;;  %v1066_v23 = vor.u32 %v1065_v20, %v1062_v19  ;;  %v2426_v34 = vrot.slane %v2333_v30, 5  ;;  %v7759_v54 = vrot.slane %v2334_v42, 9  ;;  %v1058_v35 = vsel %vm8681_vm13, %v1049_v45, %v1057_v8  ;;  %v271_v12 = vld [vmem:[#allocation2 + $0x14] sm:$0x1] }
  0xea   :  { %v1075_v38 = vor.u32 %v1074_v27, %v1071_v26  ;;  %v2430_v40 = vrot.slane %v2335_v33, 5  ;;  %v1363_v46 = vshrl.u32 %v1162_v22, 16  ;;  %v1366_v50 = vshll.u32 %v1162_v22, 16  ;;  %v266_v22 = vld [vmem:[#allocation2] sm:$0xf] }
  0xeb   :  { %v1067_v13 = vrot.slane %v1066_v23, 4  ;;  %v2427_v48 = vsel %vm8634_vm7, %v7758_v52, %v2426_v34  ;;  %v1372_v57 = vshll.u32 %v1163_v28, 16  ;;  %v1377_v61 = vshrl.u32 %v1164_v58, 16  ;;  %v9081_v29 = vpop.permute.xlu0 %1963  ;;  %v267_v28 = vld [vmem:[#allocation2 + $0x4] sm:$0x1] }
  0xec   :  { %v2431_v47 = vsel %vm8634_vm7, %v7759_v54, %v2430_v40  ;;  %v1365_v60 = vrot.slane %v1363_v46, 4  ;;  %v1380_v51 = vshll.u32 %v1164_v58, 16  ;;  %v1368_v24 = vrot.slane %v1366_v50, 5  ;;  %v268_v54 = vld [vmem:[#allocation2 + $0x8] sm:$0xf] }
  0xed   :  { %2286 = vrot.lane.b32.xlu0 %v7743_v9, %s8425_s23  ;;  %v1076_v63 = vsel %vm8681_vm13, %v1067_v13, %v1075_v38  ;;  %v7767_v0 = vcombine.low %v2427_v48, %v2431_v47  ;;  %v1374_v2 = vrot.slane %v1372_v57, 5  ;;  %v1379_v39 = vrot.slane %v1377_v61, 4  ;;  %v9085_v9 = vpop.permute.xlu1 %1103  ;;  %v269_v46 = vld [vmem:[#allocation2 + $0xc] sm:$0x1]  ;;  %v274_v50 = vld [vmem:[#allocation2 + $0x20] sm:$0xf] }
  0xee   :  { %v7695_v6 = vcombine.low %v1058_v35, %v1076_v63  ;;  %v1382_v42 = vrot.slane %v1380_v51, 5  ;;  %v1386_v36 = vshll.u32 %v1165_v49, 16  ;;  %v1369_v43 = vor.u32 %v1368_v24, %v1365_v60 }
  0xef   :  { %v330_v10 = vshrl.u32 %v270_v56, 16  ;;  %v333_v14 = vshll.u32 %v270_v56, 16  ;;  %v344_v15 = vshrl.u32 %v272_v5, 16  ;;  %v347_v17 = vshll.u32 %v272_v5, 16  ;;  %v9091_v57 = vpop.permute.xlu0 %2276  ;;  %v275_v5 = vld [vmem:[#allocation2 + $0x24] sm:$0x1] }
  0xf0   :  { %1115 = vrot.lane.b32.xlu1 %v7695_v6, %s8425_s23  ;;  %v1383_v45 = vor.u32 %v1382_v42, %v1379_v39  ;;  %v1388_v4 = vrot.slane %v1386_v36, 5  ;;  %v353_v30 = vshll.u32 %v273_v3, 16  ;;  %v1370_v18 = vrot.slane %v1369_v43, 4  ;;  %v276_v3 = vld [vmem:[#allocation2 + $0x28] sm:$0xf] }
  0xf1   :  { %2470 = vrot.lane.b32.xlu0 %v7767_v0, %s8424_s22  ;;  %v332_v19 = vrot.slane %v330_v10, 4  ;;  %v335_v20 = vrot.slane %v333_v14, 5  ;;  %v346_v33 = vrot.slane %v344_v15, 4  ;;  %v349_v26 = vrot.slane %v347_v17, 5  ;;  %v1417_v6 = vpop.permute.xlu1 %1416  ;;  %v277_v43 = vld [vmem:[#allocation2 + $0x2c] sm:$0x1] }
  0xf2   :  { %v1384_v8 = vrot.slane %v1383_v45, 4  ;;  %v355_v27 = vrot.slane %v353_v30, 5  ;;  %vm557_vm14 = vcmask 261120   ;;  %v1375_v23 = vsel %vm8661_vm12, %v1370_v18, %v1374_v2  ;;  %v1447_v17 = vld [vmem:[#allocation2 + $0x8] sm:$0xe] }
  0xf3   :  { %v336_v52 = vor.u32 %v335_v20, %v332_v19  ;;  %vm745_vm15 = vcmask 523520   ;;  %v339_v34 = vshll.u32 %v271_v12, 16  ;;  %v350_v35 = vor.u32 %v349_v26, %v346_v33  ;;  %v1448_v30 = vld [vmem:[#allocation2 + $0xc] sm:$0x1]  ;;  %v1449_v12 = vld [vmem:[#allocation2 + $0x10] sm:$0xe] }
  0xf4   :  { %v1389_v58 = vsel %vm8661_vm12, %v1384_v8, %v1388_v4  ;;  %v302_v38 = vshrl.u32 %v266_v22, 16  ;;  %v305_v40 = vshll.u32 %v266_v22, 16  ;;  %v311_v49 = vshll.u32 %v267_v28, 16  ;;  %v1450_v22 = vld [vmem:[#allocation2 + $0x14] sm:$0x1] }
  0xf5   :  { %v7703_v56 = vcombine.low %v1375_v23, %v1389_v58  ;;  %v337_v13 = vrot.slane %v336_v52, 4  ;;  %v341_v48 = vrot.slane %v339_v34, 5  ;;  %v351_v47 = vrot.slane %v350_v35, 4  ;;  %v1451_v23 = vld [vmem:[#allocation2 + $0x18] sm:$0xe]  ;;  %v9099_v52 = vpop.permute.xlu0 %2460 }
  0xf6   :  { %v304_v60 = vrot.slane %v302_v38, 4  ;;  %v307_v61 = vrot.slane %v305_v40, 5  ;;  %v316_v51 = vshrl.u32 %v268_v54, 16  ;;  %v313_v0 = vrot.slane %v311_v49, 5  ;;  %v1452_v35 = vld [vmem:[#allocation2 + $0x1c] sm:$0x1] }
  0xf7   :  { %1428 = vrot.lane.b32.xlu1 %v7703_v56, %s8424_s22  ;;  %v342_v63 = vsel %vm8661_vm12, %v337_v13, %v341_v48  ;;  %v319_v24 = vshll.u32 %v268_v54, 16  ;;  %v325_v2 = vshll.u32 %v269_v46, 16  ;;  %v356_v39 = vsel %vm8661_vm12, %v351_v47, %v355_v27  ;;  %v1453_v13 = vld [vmem:[#allocation2 + $0x20] sm:$0xe]  ;;  %v9107_v48 = vpop.permute.xlu1 %1105  ;;  %v1454_v47 = vld [vmem:[#allocation2 + $0x24] sm:$0x1] }
  0xf8   :  { %v308_v42 = vor.u32 %v307_v61, %v304_v60  ;;  %v318_v36 = vrot.slane %v316_v51, 4  ;;  %v358_v10 = vshrl.u32 %v274_v50, 16  ;;  %v7657_v14 = vcombine.low %v342_v63, %v356_v39  ;;  %v1455_v63 = vld [vmem:[#allocation2 + $0x28] sm:$0xe]  ;;  %v1457_v39 = vld [vmem:[#allocation2 + $0x30] sm:$0xe] }
  0xf9   :  { %v321_v15 = vrot.slane %v319_v24, 5  ;;  %v327_v45 = vrot.slane %v325_v2, 5  ;;  %v361_v4 = vshll.u32 %v274_v50, 16  ;;  %v367_v20 = vshll.u32 %v275_v5, 16 }
  0xfa   :  { %v309_v18 = vrot.slane %v308_v42, 4  ;;  %v360_v19 = vrot.slane %v358_v10, 4  ;;  %v372_v33 = vshrl.u32 %v276_v3, 16  ;;  %559 = vst.msk [vmem:[#allocation4 + $0x18] sm:$0xff] %vm557_vm14, %v7657_v14  ;;  %v375_v27 = vshll.u32 %v276_v3, 16 }
  0xfb   :  { %v322_v8 = vor.u32 %v321_v15, %v318_v36  ;;  %v363_v26 = vrot.slane %v361_v4, 5  ;;  %v381_v28 = vshll.u32 %v277_v43, 16  ;;  %747 = vst.msk [vmem:[#allocation4 + $0x18] sm:$0xff] %vm745_vm15, %v9028_v41  ;;  %v369_v54 = vrot.slane %v367_v20, 5  ;;  %v1458_v42 = vld [vmem:[#allocation2 + $0x34] sm:$0x1] }
  0xfc   :  { %v314_v34 = vsel %vm8661_vm12, %v309_v18, %v313_v0  ;;  %v374_v58 = vrot.slane %v372_v33, 4  ;;  %vm1125_vm0 = vcmask 785920   ;;  %v377_v46 = vrot.slane %v375_v27, 5  ;;  %v1456_v0 = vld [vmem:[#allocation2 + $0x2c] sm:$0x1]  ;;  %v1419_v27 = vpop.permute.xlu1 %1418 }
  0xfd   :  { %v323_v38 = vrot.slane %v322_v8, 4  ;;  %v364_v40 = vor.u32 %v363_v26, %v360_v19  ;;  %v383_v56 = vrot.slane %v381_v28, 5  ;;  %1127 = vst.msk [vmem:[#allocation4 + $0x18] sm:$0xff] %vm1125_vm0, %v9085_v9  ;;  %vm1438_vm1 = vcmask 1048320   ;;  %v2488_v15 = vld [vmem:[#allocation2 + $0x10] sm:$0xe] }
  0xfe   :  { %v7704_v49 = vrot.slane %v1447_v17, 9  ;;  %v1513_v41 = vrot.slane %v1448_v30, 5  ;;  %v7705_v50 = vrot.slane %v1449_v12, 9  ;;  %v378_v51 = vor.u32 %v377_v46, %v374_v58  ;;  %1440 = vst.msk [vmem:[#allocation4 + $0x18] sm:$0xff] %vm1438_vm1, %v1417_v6  ;;  %v2489_v6 = vld [vmem:[#allocation2 + $0x14] sm:$0x3] }
  0xff   :  { %v328_v60 = vsel %vm8661_vm12, %v323_v38, %v327_v45  ;;  %v365_v61 = vrot.slane %v364_v40, 4  ;;  %v1517_v5 = vrot.slane %v1450_v22, 5  ;;  %v7706_v2 = vrot.slane %v1451_v23, 9  ;;  %v9118_v45 = vpop.permute.xlu0 %1965  ;;  %v2490_v18 = vld [vmem:[#allocation2 + $0x18] sm:$0xe] }
 0x100   :  { %v7656_v24 = vcombine.low %v314_v34, %v328_v60  ;;  %v1514_v9 = vsel %vm8634_vm7, %v7704_v49, %v1513_v41  ;;  %v1521_v3 = vrot.slane %v1452_v35, 5  ;;  %v379_v43 = vrot.slane %v378_v51, 4  ;;  %v2491_v19 = vld [vmem:[#allocation2 + $0x1c] sm:$0x3]  ;;  %v2492_v26 = vld [vmem:[#allocation2 + $0x20] sm:$0xe] }
 0x101   :  { %v370_v36 = vsel %vm8661_vm12, %v365_v61, %v369_v54  ;;  %v1518_v10 = vsel %vm8634_vm7, %v7705_v50, %v1517_v5  ;;  %v7707_v14 = vrot.slane %v1453_v13, 9  ;;  %v1525_v30 = vrot.slane %v1454_v47, 5  ;;  %v2494_v50 = vld [vmem:[#allocation2 + $0x28] sm:$0xe] }
 0x102   :  { %558 = vst.msk [vmem:[#allocation4] sm:$0xff] %vm557_vm14, %v7656_v24  ;;  %v7720_v4 = vcombine.low %v1514_v9, %v1518_v10  ;;  %v1522_v17 = vsel %vm8634_vm7, %v7706_v2, %v1521_v3  ;;  %v7708_v12 = vrot.slane %v1455_v63, 9  ;;  %v384_v20 = vsel %vm8661_vm12, %v379_v43, %v383_v56  ;;  %v2493_v56 = vld [vmem:[#allocation2 + $0x24] sm:$0x3]  ;;  %v2495_v63 = vld [vmem:[#allocation2 + $0x2c] sm:$0x3] }
 0x103   :  { %746 = vst.msk [vmem:[#allocation4] sm:$0xff] %vm745_vm15, %v9012_v62  ;;  %v1529_v33 = vrot.slane %v1456_v0, 5  ;;  %v7709_v22 = vrot.slane %v1457_v39, 9  ;;  %v1533_v8 = vrot.slane %v1458_v42, 5  ;;  %v7658_v28 = vcombine.low %v370_v36, %v384_v20  ;;  %v9148_v47 = vpop.permute.xlu0 %2278  ;;  %v9160_v0 = vpop.permute.xlu1 %727 }
 0x104   :  { %1126 = vst.msk [vmem:[#allocation4] sm:$0xff] %vm1125_vm0, %v9061_v16  ;;  %v1526_v23 = vsel %vm8634_vm7, %v7707_v14, %v1525_v30  ;;  %v2521_v34 = vshrl.u32 %v2488_v15, 16  ;;  %v2524_v54 = vshll.u32 %v2488_v15, 16  ;;  %v2530_v35 = vshrl.u32 %v2489_v6, 16  ;;  %v1460_v14 = vld [vmem:[#allocation2 + $0x3c] sm:$0x1] }
 0x105   :  { %1607 = vst.msk [vmem:[#allocation4 + $0x8] sm:$0xff] %vm557_vm14, %v7720_v4  ;;  %v7721_v62 = vcombine.low %v1522_v17, %v1526_v23  ;;  %v1530_v58 = vsel %vm8634_vm7, %v7708_v12, %v1529_v33  ;;  %v1534_v16 = vsel %vm8634_vm7, %v7709_v22, %v1533_v8  ;;  %560 = vst.msk [vmem:[#allocation4 + $0x30] sm:$0xff] %vm557_vm14, %v7658_v28  ;;  %v2539_v13 = vshrl.u32 %v2490_v18, 16  ;;  %v1461_v15 = vld [vmem:[#allocation2 + $0x40] sm:$0xe] }
 0x106   :  { %1983 = vst.msk [vmem:[#allocation4 + $0x8] sm:$0xff] %vm745_vm15, %v9049_v25  ;;  %v7722_v38 = vcombine.low %v1530_v58, %v1534_v16  ;;  %v2523_v40 = vrot.slane %v2521_v34, 5  ;;  %v2526_v46 = vrot.slane %v2524_v54, 6  ;;  %v2533_v25 = vshll.u32 %v2489_v6, 16  ;;  %748 = vst.msk [vmem:[#allocation4 + $0x30] sm:$0xff] %vm745_vm15, %v9041_v11 }
 0x107   :  { %1439 = vst.msk [vmem:[#allocation4] sm:$0xff] %vm1438_vm1, %v9074_v59  ;;  %v2532_v59 = vrot.slane %v2530_v35, 5  ;;  %v2542_v49 = vshll.u32 %v2490_v18, 16  ;;  %v2548_v41 = vshrl.u32 %v2491_v19, 16  ;;  %v2551_v11 = vshll.u32 %v2491_v19, 16  ;;  %v9170_v19 = vpop.permute.xlu0 %2462  ;;  %v9174_v54 = vpop.permute.xlu1 %1107 }
 0x108   :  { %2296 = vst.msk [vmem:[#allocation4 + $0x8] sm:$0xff] %vm1125_vm0, %v9054_v37  ;;  %v2527_v37 = vor.u32 %v2526_v46, %v2523_v40  ;;  %v2535_v60 = vrot.slane %v2533_v25, 6  ;;  %v2557_v61 = vshrl.u32 %v2492_v26, 16  ;;  %1128 = vst.msk [vmem:[#allocation4 + $0x30] sm:$0xff] %vm1125_vm0, %v9107_v48  ;;  %v2566_v39 = vshrl.u32 %v2493_v56, 16 }
 0x109   :  { %2480 = vst.msk [vmem:[#allocation4 + $0x8] sm:$0xff] %vm1438_vm1, %v9023_v21  ;;  %v2541_v21 = vrot.slane %v2539_v13, 5  ;;  %v2544_v51 = vrot.slane %v2542_v49, 6  ;;  %v2550_v5 = vrot.slane %v2548_v41, 5  ;;  %1441 = vst.msk [vmem:[#allocation4 + $0x30] sm:$0xff] %vm1438_vm1, %v1419_v27  ;;  %v2553_v9 = vrot.slane %v2551_v11, 6 }
 0x10a   :  { %1608 = vst.msk [vmem:[#allocation4 + $0x20] sm:$0xff] %vm557_vm14, %v7721_v62  ;;  %1609 = vst.msk [vmem:[#allocation4 + $0x38] sm:$0xff] %vm557_vm14, %v7722_v38  ;;  %v2528_v24 = vrot.slane %v2527_v37, 4  ;;  %v2536_v48 = vor.u32 %v2535_v60, %v2532_v59  ;;  %v2559_v2 = vrot.slane %v2557_v61, 5  ;;  %v2569_v42 = vshll.u32 %v2493_v56, 16 }
 0x10b   :  { %1984 = vst.msk [vmem:[#allocation4 + $0x20] sm:$0xff] %vm745_vm15, %v9059_v1  ;;  %1985 = vst.msk [vmem:[#allocation4 + $0x38] sm:$0xff] %vm745_vm15, %v9081_v29  ;;  %v2560_v1 = vshll.u32 %v2492_v26, 16  ;;  %v2545_v29 = vor.u32 %v2544_v51, %v2541_v21  ;;  %v2554_v43 = vor.u32 %v2553_v9, %v2550_v5  ;;  %v2578_v10 = vshll.u32 %v2494_v50, 16  ;;  %v1462_v6 = vld [vmem:[#allocation2 + $0x44] sm:$0x1] }
 0x10c   :  { %2297 = vst.msk [vmem:[#allocation4 + $0x20] sm:$0xff] %vm1125_vm0, %v9068_v31  ;;  %2298 = vst.msk [vmem:[#allocation4 + $0x38] sm:$0xff] %vm1125_vm0, %v9091_v57  ;;  %v1459_v31 = vld [vmem:[#allocation2 + $0x38] sm:$0xe]  ;;  %v2537_v36 = vsel %vm8681_vm13, %v2528_v24, %v2536_v48  ;;  %v2568_v30 = vrot.slane %v2566_v39, 5  ;;  %v2571_v12 = vrot.slane %v2569_v42, 6 }
 0x10d   :  { %2481 = vst.msk [vmem:[#allocation4 + $0x20] sm:$0xff] %vm1438_vm1, %v9036_v55  ;;  %v2562_v3 = vrot.slane %v2560_v1, 6  ;;  %2482 = vst.msk [vmem:[#allocation4 + $0x38] sm:$0xff] %vm1438_vm1, %v9099_v52  ;;  %v2575_v55 = vshrl.u32 %v2494_v50, 16  ;;  %v2546_v17 = vrot.slane %v2545_v29, 4  ;;  %v2580_v52 = vrot.slane %v2578_v10, 6  ;;  %v9183_v1 = vpop.permute.xlu0 %1967 }
 0x10e   :  { %v2848_v4 = vld [vmem:[#allocation4] sm:$0xff]  ;;  %v278_v18 = vld [vmem:[#allocation2 + $0x30] sm:$0xf]  ;;  %v2584_v22 = vshrl.u32 %v2495_v63, 16  ;;  %v2587_v8 = vshll.u32 %v2495_v63, 16  ;;  %v2572_v23 = vor.u32 %v2571_v12, %v2568_v30  ;;  %v7710_v34 = vrot.slane %v1459_v31, 9 }
 0x10f   :  { %v2563_v57 = vor.u32 %v2562_v3, %v2559_v2  ;;  %v2577_v33 = vrot.slane %v2575_v55, 5  ;;  %v279_v26 = vld [vmem:[#allocation2 + $0x34] sm:$0x1]  ;;  %v2555_v27 = vsel %vm8681_vm13, %v2546_v17, %v2554_v43  ;;  %v280_v38 = vld [vmem:[#allocation2 + $0x38] sm:$0xf]  ;;  %v1537_v25 = vrot.slane %v1460_v14, 5  ;;  %v9187_v43 = vpop.permute.xlu1 %1420 }
 0x110   :  { %v2849_v20 = vld [vmem:[#allocation4 + $0x8] sm:$0xff]  ;;  %v7768_v62 = vcombine.low %v2537_v36, %v2555_v27  ;;  %v2586_v16 = vrot.slane %v2584_v22, 5  ;;  %v2589_v35 = vrot.slane %v2587_v8, 6  ;;  %v7711_v56 = vrot.slane %v1461_v15, 9  ;;  %v281_v13 = vld [vmem:[#allocation2 + $0x3c] sm:$0x1] }
 0x111   :  { %3072 = vmatprep.mubr.bf16.mxu0 %v2849_v20  ;;  %v2564_v28 = vrot.slane %v2563_v57, 4  ;;  %v2581_v58 = vor.u32 %v2580_v52, %v2577_v33  ;;  %v1541_v59 = vrot.slane %v1462_v6, 5  ;;  %v2496_v49 = vld [vmem:[#allocation2 + $0x30] sm:$0xe]  ;;  %v386_v37 = vshrl.u32 %v278_v18, 16  ;;  %v2851_v29 = vld [vmem:[#allocation4 + $0x18] sm:$0xff] }
 0x112   :  { %3073 = vmatmul.mubr.bf16.vlgmr.msra.gmra.mrb[0].mxu0 %v2848_v4  ;;  %2840 = vst.msk [vmem:[#allocation4 + $0x10] sm:$0xff] %vm557_vm14, %v7768_v62  ;;  %v2590_v50 = vor.u32 %v2589_v35, %v2586_v16  ;;  %v389_v60 = vshll.u32 %v278_v18, 16  ;;  %v2497_v11 = vld [vmem:[#allocation2 + $0x34] sm:$0x3]  ;;  %v2498_v61 = vld [vmem:[#allocation2 + $0x38] sm:$0xe]  ;;  %v1538_v21 = vsel %vm8634_vm7, %v7710_v34, %v1537_v25 }
 0x113   :  { %v2573_v40 = vsel %vm8681_vm13, %v2564_v28, %v2572_v23  ;;  %v2582_v41 = vrot.slane %v2581_v58, 4  ;;  %v1542_v51 = vsel %vm8634_vm7, %v7711_v56, %v1541_v59  ;;  %v395_v5 = vshll.u32 %v279_v26, 16  ;;  %v2499_v36 = vld [vmem:[#allocation2 + $0x3c] sm:$0x3]  ;;  %v2500_v4 = vld [vmem:[#allocation2 + $0x40] sm:$0xe]  ;;  %v9202_v56 = vpop.permute.xlu1 %729 }
 0x114   :  { %v2852_v46 = vld [vmem:[#allocation4 + $0x20] sm:$0xff]  ;;  %v400_v63 = vshrl.u32 %v280_v38, 16  ;;  %v7723_v48 = vcombine.low %v1538_v21, %v1542_v51  ;;  %v388_v9 = vrot.slane %v386_v37, 4  ;;  %v391_v2 = vrot.slane %v389_v60, 5  ;;  %v2855_v14 = vld [vmem:[#allocation4 + $0x38] sm:$0xff]  ;;  %v2854_v37 = vld [vmem:[#allocation4 + $0x30] sm:$0xff] }
 0x115   :  { %3080 = vmatprep.mubr.bf16.mxu0 %v2852_v46  ;;  %v2591_v24 = vsel %vm8681_vm13, %v2582_v41, %v2590_v50  ;;  %v397_v3 = vrot.slane %v395_v5, 5  ;;  %v403_v42 = vshll.u32 %v280_v38, 16  ;;  %v409_v10 = vshll.u32 %v281_v13, 16  ;;  %v2501_v22 = vld [vmem:[#allocation2 + $0x44] sm:$0x3] }
 0x116   :  { %v7769_v31 = vcombine.low %v2573_v40, %v2591_v24  ;;  %v402_v39 = vrot.slane %v400_v63, 4  ;;  %1610 = vst.msk [vmem:[#allocation4 + $0x50] sm:$0xff] %vm557_vm14, %v7723_v48  ;;  %v392_v55 = vor.u32 %v391_v2, %v388_v9  ;;  %v2593_v15 = vshrl.u32 %v2496_v49, 16  ;;  %v2502_v16 = vld [vmem:[#allocation2 + $0x48] sm:$0xe] }
 0x117   :  { %v2596_v6 = vshll.u32 %v2496_v49, 16  ;;  %1986 = vst.msk [vmem:[#allocation4 + $0x50] sm:$0xff] %vm745_vm15, %v9118_v45  ;;  %v405_v17 = vrot.slane %v403_v42, 5  ;;  %v2602_v57 = vshrl.u32 %v2497_v11, 16  ;;  %v2605_v30 = vshll.u32 %v2497_v11, 16  ;;  %v9197_v45 = vpop.permute.xlu0 %2280 }
 0x118   :  { %2841 = vst.msk [vmem:[#allocation4 + $0x28] sm:$0xff] %vm557_vm14, %v7769_v31  ;;  %v2611_v12 = vshrl.u32 %v2498_v61, 16  ;;  %v393_v18 = vrot.slane %v392_v55, 4  ;;  %v411_v20 = vrot.slane %v409_v10, 5  ;;  %v2595_v33 = vrot.slane %v2593_v15, 5 }
 0x119   :  { %2299 = vst.msk [vmem:[#allocation4 + $0x50] sm:$0xff] %vm1125_vm0, %v9148_v47  ;;  %v2598_v52 = vrot.slane %v2596_v6, 6  ;;  %v2850_v8 = vld [vmem:[#allocation4 + $0x10] sm:$0xff]  ;;  %v406_v26 = vor.u32 %v405_v17, %v402_v39  ;;  %v2604_v27 = vrot.slane %v2602_v57, 5  ;;  %v2607_v28 = vrot.slane %v2605_v30, 6 }
 0x11a   :  { %3081 = vmatmul.mubr.bf16.gmra.mrb[4].mxu0 %v2851_v29  ;;  %v2613_v23 = vrot.slane %v2611_v12, 5  ;;  %2483 = vst.msk [vmem:[#allocation4 + $0x50] sm:$0xff] %vm1438_vm1, %v9170_v19  ;;  %8250 = vmatprep.mubr.msk.bf16.mxu1 %vm557_vm14, %v2850_v8  ;;  %v398_v34 = vsel %vm8661_vm12, %v393_v18, %v397_v3  ;;  %v2614_v62 = vshll.u32 %v2498_v61, 16  ;;  %v2620_v58 = vshrl.u32 %v2499_v36, 16  ;;  %v2503_v46 = vld [vmem:[#allocation2 + $0x4c] sm:$0x3]  ;;  %v9214_v18 = vpop.permute.xlu1 %1109 }
 0x11b   :  { %3088 = vmatprep.mubr.bf16.mxu0 %v2855_v14  ;;  %v2599_v47 = vor.u32 %v2598_v52, %v2595_v33  ;;  %v407_v35 = vrot.slane %v406_v26, 4  ;;  %v2608_v38 = vor.u32 %v2607_v28, %v2604_v27  ;;  %v2623_v40 = vshll.u32 %v2499_v36, 16  ;;  %v1463_v41 = vld [vmem:[#allocation2 + $0x58] sm:$0xe]  ;;  %v1464_v48 = vld [vmem:[#allocation2 + $0x5c] sm:$0x1]  ;;  %v9209_v36 = vpop.permute.xlu0 %2464 }
 0x11c   :  { %v2629_v25 = vshrl.u32 %v2500_v4, 16  ;;  %v2616_v19 = vrot.slane %v2614_v62, 6  ;;  %v2622_v13 = vrot.slane %v2620_v58, 5  ;;  %v2632_v49 = vshll.u32 %v2500_v4, 16  ;;  %v1465_v3 = vld [vmem:[#allocation2 + $0x60] sm:$0xe] }
 0x11d   :  { %v2600_v59 = vrot.slane %v2599_v47, 4  ;;  %v412_v50 = vsel %vm8661_vm12, %v407_v35, %v411_v20  ;;  %v2625_v60 = vrot.slane %v2623_v40, 6  ;;  %v2638_v61 = vshrl.u32 %v2501_v22, 16  ;;  %v1466_v39 = vld [vmem:[#allocation2 + $0x64] sm:$0x1] }
 0x11e   :  { %v2631_v11 = vrot.slane %v2629_v25, 5  ;;  %v7659_v51 = vcombine.low %v398_v34, %v412_v50  ;;  %v2617_v63 = vor.u32 %v2616_v19, %v2613_v23  ;;  %v2634_v24 = vrot.slane %v2632_v49, 6  ;;  %v282_v42 = vld [vmem:[#allocation2 + $0x50] sm:$0xf]  ;;  %v283_v12 = vld [vmem:[#allocation2 + $0x54] sm:$0x1] }
 0x11f   :  { %v2853_v21 = vld [vmem:[#allocation4 + $0x28] sm:$0xff]  ;;  %v2609_v5 = vsel %vm8681_vm13, %v2600_v59, %v2608_v38  ;;  %v2626_v9 = vor.u32 %v2625_v60, %v2622_v13  ;;  %v2640_v2 = vrot.slane %v2638_v61, 5  ;;  %v2641_v31 = vshll.u32 %v2501_v22, 16  ;;  %v284_v8 = vld [vmem:[#allocation2 + $0x58] sm:$0xf] }
 0x120   :  { %8251 = vmatmul.mubr.msk.bf16.vlgmr.msra.gmra.mrb[0].mxu1 %vm557_vm14, %v2853_v21  ;;  %v2647_v29 = vshrl.u32 %v2502_v16, 16  ;;  %561 = vst.msk [vmem:[#allocation4 + $0x48] sm:$0xff] %vm557_vm14, %v7659_v51  ;;  %v2618_v55 = vrot.slane %v2617_v63, 4  ;;  %v2635_v10 = vor.u32 %v2634_v24, %v2631_v11  ;;  %v2650_v14 = vshll.u32 %v2502_v16, 16  ;;  %v285_v23 = vld [vmem:[#allocation2 + $0x5c] sm:$0x1]  ;;  %v9231_v21 = vpop.permute.xlu1 %1422 }
 0x121   :  { %v2656_v15 = vshrl.u32 %v2503_v46, 16  ;;  %v2858_v6 = vld [vmem:[#allocation4 + $0x50] sm:$0xff]  ;;  %749 = vst.msk [vmem:[#allocation4 + $0x48] sm:$0xff] %vm745_vm15, %v9160_v0  ;;  %v2643_v4 = vrot.slane %v2641_v31, 6  ;;  %v2659_v57 = vshll.u32 %v2503_v46, 16  ;;  %v7712_v30 = vrot.slane %v1463_v41, 9 }
 0x122   :  { %3089 = vmatmul.mubr.bf16.gmra.mrb[8].mxu0 %v2854_v37  ;;  %v2649_v17 = vrot.slane %v2647_v29, 5  ;;  %1129 = vst.msk [vmem:[#allocation4 + $0x48] sm:$0xff] %vm1125_vm0, %v9174_v54  ;;  %v2627_v20 = vsel %vm8681_vm13, %v2618_v55, %v2626_v9  ;;  %v2636_v33 = vrot.slane %v2635_v10, 4  ;;  %v2652_v52 = vrot.slane %v2650_v14, 6  ;;  %v1467_v34 = vld [vmem:[#allocation2 + $0x68] sm:$0xe] }
 0x123   :  { %3096 = vmatprep.mubr.bf16.mxu0 %v2858_v6  ;;  %v2658_v22 = vrot.slane %v2656_v15, 5  ;;  %v7770_v26 = vcombine.low %v2609_v5, %v2627_v20  ;;  %v2644_v0 = vor.u32 %v2643_v4, %v2640_v2  ;;  %v2661_v27 = vrot.slane %v2659_v57, 6  ;;  %1442 = vst.msk [vmem:[#allocation4 + $0x48] sm:$0xff] %vm1438_vm1, %v9187_v43  ;;  %v1468_v46 = vld [vmem:[#allocation2 + $0x6c] sm:$0x1] }
 0x124   :  { %v1545_v28 = vrot.slane %v1464_v48, 5  ;;  %v2653_v47 = vor.u32 %v2652_v52, %v2649_v17  ;;  %v7713_v62 = vrot.slane %v1465_v3, 9  ;;  %v1549_v58 = vrot.slane %v1466_v39, 5  ;;  %v1469_v25 = vld [vmem:[#allocation2 + $0x70] sm:$0xe] }
 0x125   :  { %v414_v54 = vshrl.u32 %v282_v42, 16  ;;  %2842 = vst.msk [vmem:[#allocation4 + $0x40] sm:$0xff] %vm557_vm14, %v7770_v26  ;;  %v2645_v16 = vsel %vm8681_vm13, %v2636_v33, %v2644_v0  ;;  %v2662_v35 = vor.u32 %v2661_v27, %v2658_v22  ;;  %v417_v40 = vshll.u32 %v282_v42, 16  ;;  %v1470_v43 = vld [vmem:[#allocation2 + $0x74] sm:$0x1] }
 0x126   :  { %v1546_v38 = vsel %vm8634_vm7, %v7712_v30, %v1545_v28  ;;  %v9227_v59 = vpop.permute.xlu0 %1969  ;;  %v2654_v19 = vrot.slane %v2653_v47, 4  ;;  %v1550_v13 = vsel %vm8634_vm7, %v7713_v62, %v1549_v58  ;;  %v423_v41 = vshll.u32 %v283_v12, 16  ;;  %v286_v50 = vld [vmem:[#allocation2 + $0x60] sm:$0xf]  ;;  %v287_v51 = vld [vmem:[#allocation2 + $0x64] sm:$0x1]  ;;  %v9250_v28 = vpop.permute.xlu1 %731 }
 0x127   :  { %v416_v49 = vrot.slane %v414_v54, 4  ;;  %v7724_v37 = vcombine.low %v1546_v38, %v1550_v13  ;;  %v419_v60 = vrot.slane %v417_v40, 5  ;;  %v428_v11 = vshrl.u32 %v284_v8, 16  ;;  %v288_v5 = vld [vmem:[#allocation2 + $0x68] sm:$0xf] }
 0x128   :  { %v431_v61 = vshll.u32 %v284_v8, 16  ;;  %v2663_v63 = vsel %vm8681_vm13, %v2654_v19, %v2662_v35  ;;  %v425_v24 = vrot.slane %v423_v41, 5  ;;  %v437_v48 = vshll.u32 %v285_v23, 16  ;;  %v289_v15 = vld [vmem:[#allocation2 + $0x6c] sm:$0x1] }
 0x129   :  { %v7714_v9 = vrot.slane %v1467_v34, 9  ;;  %v7771_v2 = vcombine.low %v2645_v16, %v2663_v63  ;;  %1611 = vst.msk [vmem:[#allocation4 + $0x68] sm:$0xff] %vm557_vm14, %v7724_v37  ;;  %v420_v31 = vor.u32 %v419_v60, %v416_v49  ;;  %v430_v29 = vrot.slane %v428_v11, 4  ;;  %v2504_v4 = vld [vmem:[#allocation2 + $0x60] sm:$0xe] }
 0x12a   :  { %v433_v3 = vrot.slane %v431_v61, 5  ;;  %1987 = vst.msk [vmem:[#allocation4 + $0x68] sm:$0xff] %vm745_vm15, %v9183_v1  ;;  %v439_v39 = vrot.slane %v437_v48, 5  ;;  %v2857_v42 = vld [vmem:[#allocation4 + $0x48] sm:$0xff]  ;;  %v1553_v55 = vrot.slane %v1468_v46, 5  ;;  %v7715_v10 = vrot.slane %v1469_v25, 9 }
 0x12b   :  { %v1557_v14 = vrot.slane %v1470_v43, 5  ;;  %v2283_v6 = vpop.permute.xlu0 %2282  ;;  %2843 = vst.msk [vmem:[#allocation4 + $0x58] sm:$0xff] %vm557_vm14, %v7771_v2  ;;  %v421_v17 = vrot.slane %v420_v31, 4  ;;  %3097 = vmatmul.mubr.bf16.gmra.mrb[12].mxu0 %v2857_v42  ;;  %v442_v30 = vshrl.u32 %v286_v50, 16  ;;  %v445_v12 = vshll.u32 %v286_v50, 16 }
 0x12c   :  { %v434_v57 = vor.u32 %v433_v3, %v430_v29  ;;  %2300 = vst.msk [vmem:[#allocation4 + $0x68] sm:$0xff] %vm1125_vm0, %v9197_v45  ;;  %v2505_v20 = vld [vmem:[#allocation2 + $0x64] sm:$0x3]  ;;  %v1554_v33 = vsel %vm8634_vm7, %v7714_v9, %v1553_v55  ;;  %v451_v22 = vshll.u32 %v287_v51, 16  ;;  %v456_v8 = vshrl.u32 %v288_v5, 16 }
 0x12d   :  { %v2856_v1 = vld [vmem:[#allocation4 + $0x40] sm:$0xff]  ;;  %2484 = vst.msk [vmem:[#allocation4 + $0x68] sm:$0xff] %vm1438_vm1, %v9209_v36  ;;  %v1558_v52 = vsel %vm8634_vm7, %v7715_v10, %v1557_v14  ;;  %v426_v45 = vsel %vm8661_vm12, %v421_v17, %v425_v24  ;;  %v444_v27 = vrot.slane %v442_v30, 4  ;;  %v2506_v23 = vld [vmem:[#allocation2 + $0x68] sm:$0xe]  ;;  %v447_v36 = vrot.slane %v445_v12, 5 }
 0x12e   :  { %8254 = vmatprep.mubr.msk.bf16.mxu1 %vm557_vm14, %v2856_v1  ;;  %v435_v26 = vrot.slane %v434_v57, 4  ;;  %v7725_v0 = vcombine.low %v1554_v33, %v1558_v52  ;;  %v453_v34 = vrot.slane %v451_v22, 5  ;;  %v458_v47 = vrot.slane %v456_v8, 4  ;;  %v2507_v58 = vld [vmem:[#allocation2 + $0x6c] sm:$0x3] }
 0x12f   :  { %v459_v62 = vshll.u32 %v288_v5, 16  ;;  %v465_v16 = vshll.u32 %v289_v15, 16  ;;  %v2665_v35 = vshrl.u32 %v2504_v4, 16  ;;  %v2668_v38 = vshll.u32 %v2504_v4, 16  ;;  %v2467_v40 = vpop.permute.xlu0 %2466  ;;  %v2508_v37 = vld [vmem:[#allocation2 + $0x70] sm:$0xe] }
 0x130   :  { %v440_v54 = vsel %vm8661_vm12, %v435_v26, %v439_v39  ;;  %1612 = vst.msk [vmem:[#allocation4 + $0x80] sm:$0xff] %vm557_vm14, %v7725_v0  ;;  %v448_v25 = vor.u32 %v447_v36, %v444_v27  ;;  %v2674_v19 = vshrl.u32 %v2505_v20, 16  ;;  %v2677_v50 = vshll.u32 %v2505_v20, 16  ;;  %v2509_v63 = vld [vmem:[#allocation2 + $0x74] sm:$0x3] }
 0x131   :  { %v7660_v46 = vcombine.low %v426_v45, %v440_v54  ;;  %1988 = vst.msk [vmem:[#allocation4 + $0x80] sm:$0xff] %vm745_vm15, %v9227_v59  ;;  %v461_v43 = vrot.slane %v459_v62, 5  ;;  %v467_v13 = vrot.slane %v465_v16, 5  ;;  %v2667_v49 = vrot.slane %v2665_v35, 5  ;;  %v1112_v59 = vpop.permute.xlu1 %1111  ;;  %v2510_v55 = vld [vmem:[#allocation2 + $0x78] sm:$0xe] }
 0x132   :  { %2301 = vst.msk [vmem:[#allocation4 + $0x80] sm:$0xff] %vm1125_vm0, %v2283_v6  ;;  %v2670_v41 = vrot.slane %v2668_v38, 6  ;;  %v2859_v60 = vld [vmem:[#allocation4 + $0x58] sm:$0xff]  ;;  %v449_v11 = vrot.slane %v448_v25, 4  ;;  %v2676_v51 = vrot.slane %v2674_v19, 5  ;;  %v2683_v5 = vshrl.u32 %v2506_v23, 16 }
 0x133   :  { %562 = vst.msk [vmem:[#allocation4 + $0x60] sm:$0xff] %vm557_vm14, %v7660_v46  ;;  %v462_v61 = vor.u32 %v461_v43, %v458_v47  ;;  %8255 = vmatmul.mubr.msk.bf16.gmra.mrb[4].mxu1 %vm557_vm14, %v2859_v60  ;;  %v2679_v9 = vrot.slane %v2677_v50, 6  ;;  %v2686_v2 = vshll.u32 %v2506_v23, 16  ;;  %v2692_v31 = vshrl.u32 %v2507_v58, 16  ;;  %v2511_v6 = vld [vmem:[#allocation2 + $0x7c] sm:$0x3] }
 0x134   :  { %2485 = vst.msk [vmem:[#allocation4 + $0x80] sm:$0xff] %vm1438_vm1, %v2467_v40  ;;  %v2861_v24 = vld [vmem:[#allocation4 + $0x68] sm:$0xff]  ;;  %v2671_v48 = vor.u32 %v2670_v41, %v2667_v49  ;;  %v454_v29 = vsel %vm8661_vm12, %v449_v11, %v453_v34  ;;  %v2685_v39 = vrot.slane %v2683_v5, 5  ;;  %v2695_v42 = vshll.u32 %v2507_v58, 16  ;;  %v1471_v30 = vld [vmem:[#allocation2 + $0x78] sm:$0xe] }
 0x135   :  { %750 = vst.msk [vmem:[#allocation4 + $0x60] sm:$0xff] %vm745_vm15, %v9202_v56  ;;  %v463_v3 = vrot.slane %v462_v61, 4  ;;  %3104 = vmatprep.mubr.bf16.mxu0 %v2861_v24  ;;  %v2680_v10 = vor.u32 %v2679_v9, %v2676_v51  ;;  %v2688_v14 = vrot.slane %v2686_v2, 6  ;;  %v2694_v15 = vrot.slane %v2692_v31, 5  ;;  %v1472_v45 = vld [vmem:[#allocation2 + $0x7c] sm:$0x1]  ;;  %v1425_v34 = vpop.permute.xlu1 %1424 }
 0x136   :  { %1130 = vst.msk [vmem:[#allocation4 + $0x60] sm:$0xff] %vm1125_vm0, %v9214_v18  ;;  %v2672_v56 = vrot.slane %v2671_v48, 4  ;;  %v2697_v18 = vrot.slane %v2695_v42, 6  ;;  %v2701_v17 = vshrl.u32 %v2508_v37, 16  ;;  %v2704_v57 = vshll.u32 %v2508_v37, 16 }
 0x137   :  { %1443 = vst.msk [vmem:[#allocation4 + $0x60] sm:$0xff] %vm1438_vm1, %v9231_v21  ;;  %v468_v4 = vsel %vm8661_vm12, %v463_v3, %v467_v13  ;;  %v2689_v1 = vor.u32 %v2688_v14, %v2685_v39  ;;  %v2710_v33 = vshrl.u32 %v2509_v63, 16  ;;  %v2713_v8 = vshll.u32 %v2509_v63, 16  ;;  %v1473_v26 = vld [vmem:[#allocation2 + $0x80] sm:$0xe] }
 0x138   :  { %v7661_v12 = vcombine.low %v454_v29, %v468_v4  ;;  %v2681_v20 = vsel %vm8681_vm13, %v2672_v56, %v2680_v10  ;;  %v2698_v52 = vor.u32 %v2697_v18, %v2694_v15  ;;  %v2703_v21 = vrot.slane %v2701_v17, 5  ;;  %v1474_v47 = vld [vmem:[#allocation2 + $0x84] sm:$0x1]  ;;  %v290_v62 = vld [vmem:[#allocation2 + $0x70] sm:$0xf] }
 0x139   :  { %v2706_v22 = vrot.slane %v2704_v57, 6  ;;  %v2690_v0 = vrot.slane %v2689_v1, 4  ;;  %v2712_v27 = vrot.slane %v2710_v33, 5  ;;  %v2719_v23 = vshrl.u32 %v2510_v55, 16  ;;  %v291_v38 = vld [vmem:[#allocation2 + $0x74] sm:$0x1] }
 0x13a   :  { %563 = vst.msk [vmem:[#allocation4 + $0x78] sm:$0xff] %vm557_vm14, %v7661_v12  ;;  %v2722_v36 = vshll.u32 %v2510_v55, 16  ;;  %v2715_v54 = vrot.slane %v2713_v8, 6  ;;  %v2728_v16 = vshrl.u32 %v2511_v6, 16  ;;  %v2731_v35 = vshll.u32 %v2511_v6, 16 }
 0x13b   :  { %751 = vst.msk [vmem:[#allocation4 + $0x78] sm:$0xff] %vm745_vm15, %v9250_v28  ;;  %v2707_v58 = vor.u32 %v2706_v22, %v2703_v21  ;;  %v2699_v40 = vsel %vm8681_vm13, %v2690_v0, %v2698_v52  ;;  %v2721_v46 = vrot.slane %v2719_v23, 5  ;;  %v7716_v43 = vrot.slane %v1471_v30, 9  ;;  %v292_v19 = vld [vmem:[#allocation2 + $0x78] sm:$0xf]  ;;  %v2864_v13 = vld [vmem:[#allocation4 + $0x80] sm:$0xff] }
 0x13c   :  { %1131 = vst.msk [vmem:[#allocation4 + $0x78] sm:$0xff] %vm1125_vm0, %v1112_v59  ;;  %v2724_v25 = vrot.slane %v2722_v36, 6  ;;  %v7772_v41 = vcombine.low %v2681_v20, %v2699_v40  ;;  %v2716_v37 = vor.u32 %v2715_v54, %v2712_v27  ;;  %v2730_v28 = vrot.slane %v2728_v16, 5  ;;  %v293_v5 = vld [vmem:[#allocation2 + $0x7c] sm:$0x1] }
 0x13d   :  { %v2708_v50 = vrot.slane %v2707_v58, 4  ;;  %1444 = vst.msk [vmem:[#allocation4 + $0x78] sm:$0xff] %vm1438_vm1, %v1425_v34  ;;  %v2733_v11 = vrot.slane %v2731_v35, 6  ;;  %v1561_v61 = vrot.slane %v1472_v45, 5  ;;  %v7717_v51 = vrot.slane %v1473_v26, 9 }
 0x13e   :  { %v2860_v49 = vld [vmem:[#allocation4 + $0x60] sm:$0xff]  ;;  %v2725_v60 = vor.u32 %v2724_v25, %v2721_v46  ;;  %2844 = vst.msk [vmem:[#allocation4 + $0x70] sm:$0xff] %vm557_vm14, %v7772_v41  ;;  %v1565_v59 = vrot.slane %v1474_v47, 5  ;;  %v470_v24 = vshrl.u32 %v290_v62, 16  ;;  %v473_v48 = vshll.u32 %v290_v62, 16 }
 0x13f   :  { %3105 = vmatmul.mubr.bf16.gmra.mrb[16].mxu0 %v2860_v49  ;;  %v2717_v63 = vsel %vm8681_vm13, %v2708_v50, %v2716_v37  ;;  %v1475_v9 = vld [vmem:[#allocation2 + $0x88] sm:$0xe]  ;;  %v1476_v2 = vld [vmem:[#allocation2 + $0x8c] sm:$0x1]  ;;  %v1477_v31 = vld [vmem:[#allocation2 + $0x90] sm:$0xe]  ;;  %v2734_v3 = vor.u32 %v2733_v11, %v2730_v28  ;;  %v1562_v39 = vsel %vm8634_vm7, %v7716_v43, %v1561_v61 }
 0x140   :  { %3112 = vmatprep.mubr.bf16.mxu0 %v2864_v13  ;;  %v2726_v29 = vrot.slane %v2725_v60, 4  ;;  %v1972_v42 = vpop.permute.xlu0 %1971  ;;  %v479_v55 = vshll.u32 %v291_v38, 16  ;;  %v1566_v56 = vsel %vm8634_vm7, %v7717_v51, %v1565_v59  ;;  %v472_v10 = vrot.slane %v470_v24, 4 }
 0x141   :  { %v475_v14 = vrot.slane %v473_v48, 5  ;;  %v484_v15 = vshrl.u32 %v292_v19, 16 }
 0x142   :  { %17 = vsyncpa [#allocation7], 0  ;;  %v2735_v6 = vsel %vm8681_vm13, %v2726_v29, %v2734_v3  ;;  %v7726_v4 = vcombine.low %v1562_v39, %v1566_v56  ;;  %v481_v18 = vrot.slane %v479_v55, 5  ;;  %v487_v17 = vshll.u32 %v292_v19, 16  ;;  %v1478_v57 = vld [vmem:[#allocation2 + $0x94] sm:$0x1]  ;;  %v734_v36 = vpop.permute.xlu1 %733 }
 0x143   :  { %v294_v30 = vld [vmem:[#allocation2 + $0x80] sm:$0xf]  ;;  %v7773_v12 = vcombine.low %v2717_v63, %v2735_v6  ;;  %v476_v20 = vor.u32 %v475_v14, %v472_v10  ;;  %v486_v1 = vrot.slane %v484_v15, 4  ;;  %v493_v33 = vshll.u32 %v293_v5, 16  ;;  %v295_v52 = vld [vmem:[#allocation2 + $0x84] sm:$0x1] }
 0x144   :  { %v296_v21 = vld [vmem:[#allocation2 + $0x88] sm:$0xf]  ;;  %1613 = vst.msk [vmem:[#allocation4 + $0x98] sm:$0xff] %vm557_vm14, %v7726_v4  ;;  %v489_v22 = vrot.slane %v487_v17, 5  ;;  %v2863_v8 = vld [vmem:[#allocation4 + $0x78] sm:$0xff]  ;;  %v7718_v45 = vrot.slane %v1475_v9, 9 }
 0x145   :  { %v1569_v26 = vrot.slane %v1476_v2, 5  ;;  %v7719_v0 = vrot.slane %v1477_v31, 9  ;;  %2845 = vst.msk [vmem:[#allocation4 + $0x88] sm:$0xff] %vm557_vm14, %v7773_v12  ;;  %v477_v27 = vrot.slane %v476_v20, 4  ;;  %v495_v23 = vrot.slane %v493_v33, 5  ;;  %v2862_v58 = vld [vmem:[#allocation4 + $0x70] sm:$0xff] }
 0x146   :  { %1989 = vst.msk [vmem:[#allocation4 + $0x98] sm:$0xff] %vm745_vm15, %v1972_v42  ;;  %v1573_v34 = vrot.slane %v1478_v57, 5  ;;  %v297_v47 = vld [vmem:[#allocation2 + $0x8c] sm:$0x1]  ;;  %v498_v62 = vshrl.u32 %v294_v30, 16  ;;  %v490_v54 = vor.u32 %v489_v22, %v486_v1  ;;  %v2285_v16 = vpop.permute.xlu0 %2284  ;;  %v501_v38 = vshll.u32 %v294_v30, 16  ;;  %8258 = vmatprep.mubr.msk.bf16.mxu1 %vm557_vm14, %v2862_v58 }
 0x147   :  { %3113 = vmatmul.mubr.bf16.gmra.mrb[20].mxu0 %v2863_v8  ;;  %v1570_v35 = vsel %vm8634_vm7, %v7718_v45, %v1569_v26  ;;  %v507_v40 = vshll.u32 %v295_v52, 16  ;;  %v2512_v46 = vld [vmem:[#allocation2 + $0x80] sm:$0xe]  ;;  %v482_v25 = vsel %vm8661_vm12, %v477_v27, %v481_v18  ;;  %2302 = vst.msk [vmem:[#allocation4 + $0x98] sm:$0xff] %vm1125_vm0, %v2285_v16  ;;  %v512_v13 = vshrl.u32 %v296_v21, 16  ;;  %v1114_v29 = vpop.permute.xlu1 %1113 }
 0x148   :  { %v1574_v43 = vsel %vm8634_vm7, %v7719_v0, %v1573_v34  ;;  %v500_v19 = vrot.slane %v498_v62, 4  ;;  %v2513_v49 = vld [vmem:[#allocation2 + $0x84] sm:$0x3]  ;;  %v491_v41 = vrot.slane %v490_v54, 4  ;;  %v503_v37 = vrot.slane %v501_v38, 5 }
 0x149   :  { %v7727_v50 = vcombine.low %v1570_v35, %v1574_v43  ;;  %v509_v28 = vrot.slane %v507_v40, 5  ;;  %v514_v60 = vrot.slane %v512_v13, 4  ;;  %v515_v11 = vshll.u32 %v296_v21, 16  ;;  %v2514_v24 = vld [vmem:[#allocation2 + $0x88] sm:$0xe] }
 0x14a   :  { %v521_v61 = vshll.u32 %v297_v47, 16  ;;  %v2737_v51 = vshrl.u32 %v2512_v46, 16  ;;  %v496_v5 = vsel %vm8661_vm12, %v491_v41, %v495_v23  ;;  %v2469_v63 = vpop.permute.xlu0 %2468  ;;  %v504_v59 = vor.u32 %v503_v37, %v500_v19  ;;  %v2515_v48 = vld [vmem:[#allocation2 + $0x8c] sm:$0x3]  ;;  %v2516_v57 = vld [vmem:[#allocation2 + $0x90] sm:$0xe] }
 0x14b   :  { %1614 = vst.msk [vmem:[#allocation4 + $0xb0] sm:$0xff] %vm557_vm14, %v7727_v50  ;;  %v2740_v9 = vshll.u32 %v2512_v46, 16  ;;  %v2746_v2 = vshrl.u32 %v2513_v49, 16  ;;  %v7662_v31 = vcombine.low %v482_v25, %v496_v5  ;;  %v517_v3 = vrot.slane %v515_v11, 5  ;;  %v2517_v33 = vld [vmem:[#allocation2 + $0x94] sm:$0x3] }
 0x14c   :  { %2486 = vst.msk [vmem:[#allocation4 + $0x98] sm:$0xff] %vm1438_vm1, %v2469_v63  ;;  %v523_v39 = vrot.slane %v521_v61, 5  ;;  %v2739_v42 = vrot.slane %v2737_v51, 5  ;;  %v2865_v55 = vld [vmem:[#allocation4 + $0x88] sm:$0xff]  ;;  %v505_v56 = vrot.slane %v504_v59, 4  ;;  %v2749_v15 = vshll.u32 %v2513_v49, 16 }
 0x14d   :  { %v2742_v10 = vrot.slane %v2740_v9, 6  ;;  %v2748_v14 = vrot.slane %v2746_v2, 5  ;;  %8259 = vmatmul.mubr.msk.bf16.gmra.mrb[8].mxu1 %vm557_vm14, %v2865_v55  ;;  %564 = vst.msk [vmem:[#allocation4 + $0x90] sm:$0xff] %vm557_vm14, %v7662_v31  ;;  %v518_v6 = vor.u32 %v517_v3, %v514_v60  ;;  %v2755_v4 = vshrl.u32 %v2514_v24, 16  ;;  %v2518_v47 = vld [vmem:[#allocation2 + $0x98] sm:$0xe] }
 0x14e   :  { %v2758_v18 = vshll.u32 %v2514_v24, 16  ;;  %v2764_v17 = vshrl.u32 %v2515_v48, 16  ;;  %752 = vst.msk [vmem:[#allocation4 + $0x90] sm:$0xff] %vm745_vm15, %v734_v36  ;;  %v510_v30 = vsel %vm8661_vm12, %v505_v56, %v509_v28  ;;  %v2751_v20 = vrot.slane %v2749_v15, 6  ;;  %v2519_v62 = vld [vmem:[#allocation2 + $0x9c] sm:$0x3] }
 0x14f   :  { %v2743_v12 = vor.u32 %v2742_v10, %v2739_v42  ;;  %v2767_v1 = vshll.u32 %v2515_v48, 16  ;;  %1132 = vst.msk [vmem:[#allocation4 + $0x90] sm:$0xff] %vm1125_vm0, %v1114_v29  ;;  %v519_v52 = vrot.slane %v518_v6, 4  ;;  %v2757_v21 = vrot.slane %v2755_v4, 5 }
 0x150   :  { %v2760_v22 = vrot.slane %v2758_v18, 6  ;;  %v2766_v8 = vrot.slane %v2764_v17, 5  ;;  %v2752_v26 = vor.u32 %v2751_v20, %v2748_v14  ;;  %v2773_v27 = vshrl.u32 %v2516_v57, 16 }
 0x151   :  { %v2744_v45 = vrot.slane %v2743_v12, 4  ;;  %v2769_v0 = vrot.slane %v2767_v1, 6  ;;  %v1427_v23 = vpop.permute.xlu1 %1426  ;;  %v524_v36 = vsel %vm8661_vm12, %v519_v52, %v523_v39  ;;  %v2776_v58 = vshll.u32 %v2516_v57, 16 }
 0x152   :  { %v2761_v34 = vor.u32 %v2760_v22, %v2757_v21  ;;  %v2782_v54 = vshrl.u32 %v2517_v33, 16  ;;  %1445 = vst.msk [vmem:[#allocation4 + $0x90] sm:$0xff] %vm1438_vm1, %v1427_v23  ;;  %v7663_v16 = vcombine.low %v510_v30, %v524_v36  ;;  %v2775_v46 = vrot.slane %v2773_v27, 5 }
 0x153   :  { %v2867_v35 = vld [vmem:[#allocation4 + $0x98] sm:$0xff]  ;;  %v2753_v38 = vsel %vm8681_vm13, %v2744_v45, %v2752_v26  ;;  %v2770_v40 = vor.u32 %v2769_v0, %v2766_v8  ;;  %v2778_v43 = vrot.slane %v2776_v58, 6  ;;  %v2785_v13 = vshll.u32 %v2517_v33, 16 }
 0x154   :  { %3120 = vmatprep.mubr.bf16.mxu0 %v2867_v35  ;;  %v2762_v25 = vrot.slane %v2761_v34, 4  ;;  %v2784_v19 = vrot.slane %v2782_v54, 5  ;;  %565 = vst.msk [vmem:[#allocation4 + $0xa8] sm:$0xff] %vm557_vm14, %v7663_v16  ;;  %v2791_v49 = vshrl.u32 %v2518_v47, 16  ;;  %v2794_v41 = vshll.u32 %v2518_v47, 16 }
 0x155   :  { %v2800_v50 = vshrl.u32 %v2519_v62, 16  ;;  %v2803_v37 = vshll.u32 %v2519_v62, 16  ;;  %v736_v28 = vpop.permute.xlu1 %735  ;;  %v2779_v11 = vor.u32 %v2778_v43, %v2775_v46  ;;  %v2787_v61 = vrot.slane %v2785_v13, 6 }
 0x156   :  { %v2771_v60 = vsel %vm8681_vm13, %v2762_v25, %v2770_v40  ;;  %753 = vst.msk [vmem:[#allocation4 + $0xa8] sm:$0xff] %vm745_vm15, %v736_v28  ;;  %v2793_v5 = vrot.slane %v2791_v49, 5  ;;  %v2796_v63 = vrot.slane %v2794_v41, 6  ;;  %vm3553_vm2 = vcmask 516096  }
 0x157   :  { %v7774_v51 = vcombine.low %v2753_v38, %v2771_v60  ;;  %v2802_v59 = vrot.slane %v2800_v50, 5  ;;  %v2780_v24 = vrot.slane %v2779_v11, 4  ;;  %v2788_v48 = vor.u32 %v2787_v61, %v2784_v19  ;;  %3596 = vst.msk [vmem:[#allocation3 + $0x8] sm:$0x1] %vm3553_vm2, %v8422_v7  ;;  %3597 = vst.msk [vmem:[#allocation3 + $0x10] sm:$0x1] %vm3553_vm2, %v8422_v7 }
 0x158   :  { %v2805_v9 = vrot.slane %v2803_v37, 6  ;;  %v2797_v2 = vor.u32 %v2796_v63, %v2793_v5  ;;  %vm3585_vm3 = vcmask 519168   ;;  %3598 = vst.msk [vmem:[#allocation3 + $0x18] sm:$0x1] %vm3553_vm2, %v8422_v7  ;;  %3599 = vst.msk [vmem:[#allocation3 + $0x20] sm:$0x1] %vm3553_vm2, %v8422_v7 }
 0x159   :  { %2846 = vst.msk [vmem:[#allocation4 + $0xa0] sm:$0xff] %vm557_vm14, %v7774_v51  ;;  %v2866_v31 = vld [vmem:[#allocation4 + $0x90] sm:$0xff]  ;;  %v2789_v3 = vsel %vm8681_vm13, %v2780_v24, %v2788_v48  ;;  %vm3587_vm4 = vcmask 517120   ;;  %vm3259_vm5 = vcmask 523264   ;;  %vm3612_vm6 = vcmask 517121  }
 0x15a   :  { %v2806_v29 = vor.u32 %v2805_v9, %v2802_v59  ;;  %3121 = vmatmul.mubr.bf16.gmra.mrb[24].mxu0 %v2866_v31  ;;  %v2798_v39 = vrot.slane %v2797_v2, 4  ;;  %3600 = vst.msk [vmem:[#allocation3 + $0x28] sm:$0x1] %vm3553_vm2, %v8422_v7  ;;  %3601 = vst.msk [vmem:[#allocation3 + $0x30] sm:$0x1] %vm3553_vm2, %v8422_v7  ;;  %vm3551_vm8 = vcmask 519169  }
 0x15b   :  { %v1974_v42 = vpop.permute.xlu0 %1973  ;;  %3602 = vst.msk [vmem:[#allocation3 + $0x38] sm:$0x1] %vm3553_vm2, %v8422_v7  ;;  %3603 = vst.msk [vmem:[#allocation3 + $0x40] sm:$0x1] %vm3553_vm2, %v8422_v7  ;;  %vm4101_vm9 = vcmask 1048064   ;;  %vm7018_vm10 = vcmask 1041409  }
 0x15c   :  { %v2807_v55 = vsel %vm8681_vm13, %v2798_v39, %v2806_v29  ;;  %1990 = vst.msk [vmem:[#allocation4 + $0xb0] sm:$0xff] %vm745_vm15, %v1974_v42  ;;  %vm7105_vm11 = vcmask 1043456   ;;  %vm7355_vm15 = vcmask 1044484  }
 0x15d   :  { %v7775_v56 = vcombine.low %v2789_v3, %v2807_v55  ;;  %3604 = vst.msk [vmem:[#allocation3 + $0x58] sm:$0x1] %vm3553_vm2, %v8422_v7  ;;  %3605 = vst.msk [vmem:[#allocation3 + $0x60] sm:$0x1] %vm3553_vm2, %v8422_v7 }
 0x15e   :  { %3606 = vst.msk [vmem:[#allocation3 + $0x68] sm:$0x1] %vm3553_vm2, %v8422_v7  ;;  %3607 = vst.msk [vmem:[#allocation3 + $0x70] sm:$0x1] %vm3553_vm2, %v8422_v7 }
 0x15f   :  { %2847 = vst.msk [vmem:[#allocation4 + $0xb8] sm:$0xff] %vm557_vm14, %v7775_v56  ;;  %v2287_v14 = vpop.permute.xlu0 %2286 }
 0x160   :  { %v2868_v10 = vld [vmem:[#allocation4 + $0xa0] sm:$0xff]  ;;  %2303 = vst.msk [vmem:[#allocation4 + $0xb0] sm:$0xff] %vm1125_vm0, %v2287_v14 }
 0x161   :  { %8262 = vmatprep.mubr.msk.bf16.mxu1 %vm557_vm14, %v2868_v10  ;;  %3608 = vst.msk [vmem:[#allocation3 + $0x78] sm:$0x1] %vm3553_vm2, %v8422_v7  ;;  %3609 = vst.msk [vmem:[#allocation3 + $0x80] sm:$0x1] %vm3553_vm2, %v8422_v7 }
 0x162   :  { %v1116_v15 = vpop.permute.xlu1 %1115  ;;  %3610 = vst.msk [vmem:[#allocation3 + $0x88] sm:$0x1] %vm3553_vm2, %v8422_v7  ;;  %3611 = vst.msk [vmem:[#allocation3 + $0x90] sm:$0x1] %vm3553_vm2, %v8422_v7 }
 0x163   :  { %1133 = vst.msk [vmem:[#allocation4 + $0xa8] sm:$0xff] %vm1125_vm0, %v1116_v15  ;;  %v2471_v6 = vpop.permute.xlu0 %2470  ;;  %vm7358_vm0 = vcmask 1045509  }
 0x164   :  { %2487 = vst.msk [vmem:[#allocation4 + $0xb0] sm:$0xff] %vm1438_vm1, %v2471_v6 }
 0x165   :  { %3586 = vst.msk [vmem:[#allocation3] sm:$0xf] %vm3585_vm3, %v8422_v7  ;;  %3589 = vst.msk [vmem:[#allocation3 + $0x50] sm:$0xf] %vm3585_vm3, %v8422_v7 }
 0x166   :  { %v2871_v4 = vld [vmem:[#allocation4 + $0xb8] sm:$0xff]  ;;  %3592 = vst.msk [vmem:[#allocation3 + $0x48] sm:$0xf] %vm3585_vm3, %v8422_v7  ;;  %3594 = vst.msk [vmem:[#allocation3 + $0x98] sm:$0xf] %vm3585_vm3, %v8422_v7 }
 0x167   :  { %8263 = vmatmul.mubr.msk.bf16.gmra.mrb[12].mxu1 %vm557_vm14, %v2871_v4  ;;  %3588 = vst.msk [vmem:[#allocation3 + $0x4] sm:$0x3] %vm3587_vm4, %v8422_v7  ;;  %3590 = vst.msk [vmem:[#allocation3 + $0x54] sm:$0x3] %vm3587_vm4, %v8422_v7  ;;  %vm7352_vm14 = vcmask 1043459  }
 0x168   :  { %3593 = vst.msk [vmem:[#allocation3 + $0x4c] sm:$0x3] %vm3587_vm4, %v8422_v7  ;;  %3595 = vst.msk [vmem:[#allocation3 + $0x9c] sm:$0x3] %vm3587_vm4, %v8422_v7 }
 0x169   :  { %v1429_v18 = vpop.permute.xlu1 %1428  ;;  %3613 = vst.msk [vmem:[#allocation3 + $0xc] sm:$0x2] %vm3612_vm6, %v8422_v7  ;;  %3614 = vst.msk [vmem:[#allocation3 + $0x14] sm:$0x2] %vm3612_vm6, %v8422_v7 }
 0x16a   :  { %1446 = vst.msk [vmem:[#allocation4 + $0xa8] sm:$0xff] %vm1438_vm1, %v1429_v18  ;;  %vm7361_vm1 = vcmask 1046534  }
 0x16b   :  { %v2870_v17 = vld [vmem:[#allocation4 + $0xb0] sm:$0xff]  ;;  %3615 = vst.msk [vmem:[#allocation3 + $0x1c] sm:$0x2] %vm3612_vm6, %v8422_v7  ;;  %3616 = vst.msk [vmem:[#allocation3 + $0x24] sm:$0x2] %vm3612_vm6, %v8422_v7 }
 0x16c   :  { %3128 = vmatprep.mubr.bf16.mxu0 %v2870_v17  ;;  %3617 = vst.msk [vmem:[#allocation3 + $0x2c] sm:$0x2] %vm3612_vm6, %v8422_v7  ;;  %3618 = vst.msk [vmem:[#allocation3 + $0x34] sm:$0x2] %vm3612_vm6, %v8422_v7 }
 0x16d   :  { %3619 = vst.msk [vmem:[#allocation3 + $0x3c] sm:$0x2] %vm3612_vm6, %v8422_v7  ;;  %3620 = vst.msk [vmem:[#allocation3 + $0x44] sm:$0x2] %vm3612_vm6, %v8422_v7 }
 0x16e   :  { %3621 = vst.msk [vmem:[#allocation3 + $0x5c] sm:$0x2] %vm3612_vm6, %v8422_v7  ;;  %3622 = vst.msk [vmem:[#allocation3 + $0x64] sm:$0x2] %vm3612_vm6, %v8422_v7 }
 0x16f   :  { %3623 = vst.msk [vmem:[#allocation3 + $0x6c] sm:$0x2] %vm3612_vm6, %v8422_v7  ;;  %3624 = vst.msk [vmem:[#allocation3 + $0x74] sm:$0x2] %vm3612_vm6, %v8422_v7 }
 0x170   :  { %3625 = vst.msk [vmem:[#allocation3 + $0x7c] sm:$0x2] %vm3612_vm6, %v8422_v7  ;;  %3626 = vst.msk [vmem:[#allocation3 + $0x84] sm:$0x2] %vm3612_vm6, %v8422_v7 }
 0x171   :  { %v2869_v57 = vld [vmem:[#allocation4 + $0xa8] sm:$0xff]  ;;  %3627 = vst.msk [vmem:[#allocation3 + $0x8c] sm:$0x2] %vm3612_vm6, %v8422_v7  ;;  %3628 = vst.msk [vmem:[#allocation3 + $0x94] sm:$0x2] %vm3612_vm6, %v8422_v7 }
 0x172   :  { %3129 = vmatmul.mubr.bf16.gmra.mrb[28].mxu0 %v2869_v57 }
 0x1e5   :  { %v8037_v30 = vpop.f32.mrb[0].mxu0 }
 0x1e6   :  { %v8038_v12 = vpop.f32.mrb[1].mxu0 }
 0x1e7   :  { %v8039_v20 = vadd.f32 %v8038_v12, %v8037_v30  ;;  %v8040_v1 = vpop.f32.mrb[2].mxu0 }
 0x1e8   :  { %v8041_v33 = vpop.f32.mrb[3].mxu0 }
 0x1e9   :  { %v8042_v52 = vadd.f32 %v8041_v33, %v8040_v1 }
 0x1ed   :  { %v8043_v21 = vpop.f32.mrb[4].mxu0 }
 0x1ee   :  { %v8044_v22 = vpop.f32.mrb[5].mxu0 }
 0x1ef   :  { %v8045_v8 = vadd.f32 %v8044_v22, %v8043_v21  ;;  %v8046_v45 = vpop.f32.mrb[6].mxu0 }
 0x1f0   :  { %v8047_v26 = vpop.f32.mrb[7].mxu0 }
 0x1f1   :  { %v8048_v0 = vadd.f32 %v8047_v26, %v8046_v45 }
 0x1f3   :  { %v8252_v27 = vpop.f32.mrb[0].mxu1 }
 0x1f4   :  { %v3171_v23 = vpop.f32.mrb[1].mxu1  ;;  %v9332_v36 = vadd.f32 %v8252_v27, %v8045_v8 }
 0x1f5   :  { %v8049_v34 = vpop.f32.mrb[8].mxu0  ;;  %v9334_v47 = vadd.f32 %v8039_v20, %v3171_v23  ;;  %v8253_v62 = vpop.f32.mrb[2].mxu1 }
 0x1f6   :  { %v8050_v58 = vpop.f32.mrb[9].mxu0  ;;  %v3174_v54 = vpop.f32.mrb[3].mxu1  ;;  %v9336_v16 = vadd.f32 %v8253_v62, %v8048_v0  ;;  %v3299_v20 = vmul.f32 %v9332_v36, %v9332_v36  ;;  %v3263_v21 = vsel %vm3259_vm5, %v9332_v36, 0.0 }
 0x1f7   :  { %v8051_v35 = vadd.f32 %v8050_v58, %v8049_v34  ;;  %v8052_v38 = vpop.f32.mrb[10].mxu0  ;;  %v9338_v40 = vadd.f32 %v8042_v52, %v3174_v54  ;;  %v3297_v30 = vmul.f32 %v9334_v47, %v9334_v47  ;;  %v3260_v33 = vsel %vm3259_vm5, %v9334_v47, 0.0 }
 0x1f8   :  { %v8053_v46 = vpop.f32.mrb[11].mxu0  ;;  %v3316_v45 = vsel %vm3259_vm5, %v3299_v20, 0.0  ;;  %v3300_v26 = vmul.f32 %v9336_v16, %v9336_v16  ;;  %v3265_v23 = vsel %vm3259_vm5, %v9336_v16, 0.0 }
 0x1f9   :  { %v8054_v25 = vadd.f32 %v8053_v46, %v8052_v38  ;;  %v3298_v6 = vmul.f32 %v9338_v40, %v9338_v40  ;;  %v3261_v12 = vsel %vm3259_vm5, %v9338_v40, 0.0  ;;  %v3313_v8 = vsel %vm3259_vm5, %v3297_v30, 0.0 }
 0x1fa   :  { %v3262_v22 = vadd.f32 %v3261_v12, %v3260_v33  ;;  %v3318_v58 = vsel %vm3259_vm5, %v3300_v26, 0.0 }
 0x1fb   :  { %v3314_v52 = vsel %vm3259_vm5, %v3298_v6, 0.0 }
 0x1fc   :  { %v3315_v0 = vadd.f32 %v3314_v52, %v3313_v8  ;;  %v3264_v27 = vadd.f32 %v3263_v21, %v3262_v22 }
 0x1fe   :  { %v8055_v43 = vpop.f32.mrb[12].mxu0  ;;  %v3317_v62 = vadd.f32 %v3316_v45, %v3315_v0 }
 0x1ff   :  { %v8056_v19 = vpop.f32.mrb[13].mxu0 }
 0x200   :  { %v8057_v13 = vadd.f32 %v8056_v19, %v8055_v43  ;;  %v8058_v49 = vpop.f32.mrb[14].mxu0  ;;  %v3319_v19 = vadd.f32 %v3318_v58, %v3317_v62 }
 0x201   :  { %v8059_v41 = vpop.f32.mrb[15].mxu0 }
 0x202   :  { %v8060_v50 = vadd.f32 %v8059_v41, %v8058_v49 }
 0x206   :  { %v8256_v37 = vpop.f32.mrb[4].mxu1 }
 0x207   :  { %v3187_v28 = vpop.f32.mrb[5].mxu1  ;;  %v9384_v60 = vadd.f32 %v8256_v37, %v8057_v13 }
 0x208   :  { %v9386_v11 = vadd.f32 %v8051_v35, %v3187_v28  ;;  %v8257_v61 = vpop.f32.mrb[6].mxu1  ;;  %v3266_v35 = vadd.f32 %v3265_v23, %v3264_v27 }
 0x209   :  { %v3190_v51 = vpop.f32.mrb[7].mxu1  ;;  %v9388_v5 = vadd.f32 %v8257_v61, %v8060_v50  ;;  %v3303_v50 = vmul.f32 %v9384_v60, %v9384_v60 }
 0x20a   :  { %v9390_v63 = vadd.f32 %v8054_v25, %v3190_v51  ;;  %v3301_v34 = vmul.f32 %v9386_v11, %v9386_v11  ;;  %v3267_v54 = vsel %vm3259_vm5, %v9386_v11, 0.0 }
 0x20b   :  { %v3268_v43 = vadd.f32 %v3267_v54, %v3266_v35 }
 0x20c   :  { %v3320_v46 = vsel %vm3259_vm5, %v3301_v34, 0.0  ;;  %v3302_v7 = vmul.f32 %v9390_v63, %v9390_v63  ;;  %v3269_v41 = vsel %vm3259_vm5, %v9390_v63, 0.0 }
 0x20d   :  { %v3321_v28 = vadd.f32 %v3320_v46, %v3319_v19 }
 0x20e   :  { %v3322_v51 = vsel %vm3259_vm5, %v3302_v7, 0.0 }
 0x212   :  { %v8061_v59 = vpop.f32.mrb[16].mxu0 }
 0x213   :  { %v8062_v24 = vpop.f32.mrb[17].mxu0 }
 0x214   :  { %v8063_v48 = vadd.f32 %v8062_v24, %v8061_v59  ;;  %v8064_v9 = vpop.f32.mrb[18].mxu0  ;;  %v3271_v59 = vsel %vm3259_vm5, %v9384_v60, 0.0  ;;  %v3270_v24 = vadd.f32 %v3269_v41, %v3268_v43 }
 0x215   :  { %v8065_v2 = vpop.f32.mrb[19].mxu0 }
 0x216   :  { %v8066_v31 = vadd.f32 %v8065_v2, %v8064_v9  ;;  %v3304_v9 = vmul.f32 %v9388_v5, %v9388_v5  ;;  %v3323_v2 = vadd.f32 %v3322_v51, %v3321_v28 }
 0x21a   :  { %v8067_v29 = vpop.f32.mrb[20].mxu0 }
 0x21b   :  { %v8068_v3 = vpop.f32.mrb[21].mxu0 }
 0x21c   :  { %v8069_v39 = vadd.f32 %v8068_v3, %v8067_v29  ;;  %v8070_v42 = vpop.f32.mrb[22].mxu0  ;;  %v3273_v29 = vsel %vm3259_vm5, %v9388_v5, 0.0 }
 0x21d   :  { %v8071_v55 = vpop.f32.mrb[23].mxu0 }
 0x21e   :  { %v8072_v56 = vadd.f32 %v8071_v55, %v8070_v42  ;;  %v3326_v42 = vsel %vm3259_vm5, %v3304_v9, 0.0 }
 0x220   :  { %v8260_v10 = vpop.f32.mrb[8].mxu1 }
 0x221   :  { %v3203_v14 = vpop.f32.mrb[9].mxu1  ;;  %v9392_v15 = vadd.f32 %v8260_v10, %v8069_v39 }
 0x222   :  { %v9396_v4 = vadd.f32 %v8063_v48, %v3203_v14  ;;  %v8261_v18 = vpop.f32.mrb[10].mxu1  ;;  %v3324_v48 = vsel %vm3259_vm5, %v3303_v50, 0.0 }
 0x223   :  { %v3206_v17 = vpop.f32.mrb[11].mxu1  ;;  %v9398_v57 = vadd.f32 %v8261_v18, %v8072_v56  ;;  %v3325_v39 = vadd.f32 %v3324_v48, %v3323_v2  ;;  %v3307_v20 = vmul.f32 %v9392_v15, %v9392_v15  ;;  %v3279_v45 = vsel %vm3259_vm5, %v9392_v15, 0.0 }
 0x224   :  { %v9406_v1 = vadd.f32 %v8066_v31, %v3206_v17  ;;  %v3272_v31 = vadd.f32 %v3271_v59, %v3270_v24  ;;  %v3305_v3 = vmul.f32 %v9396_v4, %v9396_v4  ;;  %v3275_v55 = vsel %vm3259_vm5, %v9396_v4, 0.0 }
 0x225   :  { %v3327_v17 = vadd.f32 %v3326_v42, %v3325_v39  ;;  %v3332_v27 = vsel %vm3259_vm5, %v3307_v20, 0.0  ;;  %v3308_v23 = vmul.f32 %v9398_v57, %v9398_v57  ;;  %v3281_v58 = vsel %vm3259_vm5, %v9398_v57, 0.0 }
 0x226   :  { %v3274_v56 = vadd.f32 %v3273_v29, %v3272_v31  ;;  %v3328_v10 = vsel %vm3259_vm5, %v3305_v3, 0.0  ;;  %v3306_v14 = vmul.f32 %v9406_v1, %v9406_v1  ;;  %v3277_v12 = vsel %vm3259_vm5, %v9406_v1, 0.0 }
 0x227   :  { %v3329_v21 = vadd.f32 %v3328_v10, %v3327_v17 }
 0x228   :  { %v3276_v18 = vadd.f32 %v3275_v55, %v3274_v56  ;;  %v3330_v8 = vsel %vm3259_vm5, %v3306_v14, 0.0 }
 0x229   :  { %v3331_v34 = vadd.f32 %v3330_v8, %v3329_v21 }
 0x22a   :  { %v3278_v0 = vadd.f32 %v3277_v12, %v3276_v18 }
 0x22b   :  { %v3333_v35 = vadd.f32 %v3332_v27, %v3331_v34 }
 0x22c   :  { %v3280_v62 = vadd.f32 %v3279_v45, %v3278_v0 }
 0x22d   :  { %v8073_v38 = vpop.f32.mrb[24].mxu0 }
 0x22e   :  { %v8074_v25 = vpop.f32.mrb[25].mxu0  ;;  %v3282_v7 = vadd.f32 %v3281_v58, %v3280_v62 }
 0x22f   :  { %v8075_v13 = vadd.f32 %v8074_v25, %v8073_v38  ;;  %v8076_v49 = vpop.f32.mrb[26].mxu0  ;;  %v3334_v38 = vsel %vm3259_vm5, %v3308_v23, 0.0 }
 0x230   :  { %v8077_v37 = vpop.f32.mrb[27].mxu0 }
 0x231   :  { %v8078_v61 = vadd.f32 %v8077_v37, %v8076_v49  ;;  %v3335_v49 = vadd.f32 %v3334_v38, %v3333_v35 }
 0x23a   :  { %v8264_v6 = vpop.f32.mrb[12].mxu1 }
 0x23b   :  { %v3219_v30 = vpop.f32.mrb[13].mxu1 }
 0x23c   :  { %v9483_v33 = vadd.f32 %v8075_v13, %v3219_v30  ;;  %v8265_v52 = vpop.f32.mrb[14].mxu1 }
 0x23d   :  { %v3222_v22 = vpop.f32.mrb[15].mxu1 }
 0x23e   :  { %v9488_v26 = vadd.f32 %v8078_v61, %v3222_v22  ;;  %v3309_v54 = vmul.f32 %v9483_v33, %v9483_v33  ;;  %v3283_v46 = vsel %vm3259_vm5, %v9483_v33, 0.0 }
 0x23f   :  { %v3284_v13 = vadd.f32 %v3283_v46, %v3282_v7  ;;  %v3363_v46 = vlaneseq }
 0x240   :  { %v3336_v25 = vsel %vm3259_vm5, %v3309_v54, 0.0  ;;  %v3310_v43 = vmul.f32 %v9488_v26, %v9488_v26  ;;  %v3285_v50 = vsel %vm3259_vm5, %v9488_v26, 0.0 }
 0x241   :  { %v3337_v61 = vadd.f32 %v3336_v25, %v3335_v49  ;;  %v3286_v9 = vadd.f32 %v3285_v50, %v3284_v13  ;;  %v9520_v7 = vshrl.u32 %v3363_v46, 7  ;;  %v3355_v25 = vld [vmem:[%s10934_s2] sm:$0x1]  ;;  %v9528_v49 = vld [vmem:[#allocation3] sm:$0xe] }
 0x242   :  { %v3338_v59 = vsel %vm3259_vm5, %v3310_v43, 0.0  ;;  %v3359_v50 = vld [vmem:[%s10935_s3] sm:$0x1] }
 0x243   :  { %v3339_v3 = vadd.f32 %v3338_v59, %v3337_v61  ;;  %v9526_v43 = vsub.s32 0, %v9520_v7  ;;  %v7827_v61 = vrot.slane %v9528_v49, 9 }
 0x245   :  { %v8079_v19 = vpop.f32.mrb[28].mxu0 }
 0x246   :  { %v8080_v41 = vpop.f32.mrb[29].mxu0 }
 0x247   :  { %v8081_v37 = vadd.f32 %v8080_v41, %v8079_v19  ;;  %v8082_v28 = vpop.f32.mrb[30].mxu0  ;;  %v9530_v41 = vld [vmem:[#allocation3 + $0x4] sm:$0x1] }
 0x248   :  { %v8083_v51 = vpop.f32.mrb[31].mxu0 }
 0x249   :  { %v9506_v24 = vadd.f32 %v8264_v6, %v8081_v37  ;;  %v8084_v48 = vadd.f32 %v8083_v51, %v8082_v28  ;;  %v3991_v51 = vrot.slane %v9530_v41, 5 }
 0x24b   :  { %v3287_v2 = vsel %vm3259_vm5, %v9506_v24, 0.0  ;;  %v3311_v31 = vmul.f32 %v9506_v24, %v9506_v24  ;;  %v9512_v29 = vadd.f32 %v8265_v52, %v8084_v48 }
 0x24c   :  { %v3288_v39 = vadd.f32 %v3287_v2, %v3286_v9 }
 0x24d   :  { %v3340_v42 = vsel %vm3259_vm5, %v3311_v31, 0.0  ;;  %v3289_v55 = vsel %vm3259_vm5, %v9512_v29, 0.0  ;;  %v3312_v56 = vmul.f32 %v9512_v29, %v9512_v29 }
 0x24e   :  { %v3341_v10 = vadd.f32 %v3340_v42, %v3339_v3  ;;  %v3290_v14 = vadd.f32 %v3289_v55, %v3288_v39 }
 0x24f   :  { %v3342_v6 = vsel %vm3259_vm5, %v3312_v56, 0.0 }
 0x250   :  { %v3291_v18 = vrot.slane %v3290_v14, 4  ;;  %v3343_v17 = vadd.f32 %v3342_v6, %v3341_v10 }
 0x252   :  { %v3292_v30 = vadd.f32 %v3291_v18, %v3290_v14  ;;  %v3344_v12 = vrot.slane %v3343_v17, 4 }
 0x254   :  { %v3293_v20 = vrot.slane %v3292_v30, 2  ;;  %v3345_v52 = vadd.f32 %v3344_v12, %v3343_v17 }
 0x256   :  { %v3294_v21 = vadd.f32 %v3293_v20, %v3292_v30  ;;  %v3346_v22 = vrot.slane %v3345_v52, 2 }
 0x258   :  { %v3295_v8 = vrot.slane %v3294_v21, 1  ;;  %v3347_v45 = vadd.f32 %v3346_v22, %v3345_v52 }
 0x25a   :  { %v3296_v0 = vadd.f32 %v3295_v8, %v3294_v21  ;;  %v3348_v27 = vrot.slane %v3347_v45, 1 }
 0x25c   :  { %v3349_v23 = vadd.f32 %v3348_v27, %v3347_v45  ;;  %v3350_v34 = vmul.f32 0.0078125, %v3296_v0 }
 0x25e   :  { %v3351_v62 = vmul.f32 0.0078125, %v3349_v23  ;;  %v3352_v58 = vmul.f32 %v3350_v34, %v3350_v34 }
 0x260   :  { %v3353_v54 = vsub.f32 %v3351_v62, %v3352_v58 }
 0x262   :  { %v3354_v35 = vmax.f32 %v3353_v54, 0.0 }
 0x264   :  { %v3356_v38 = vadd.f32 1e-05, %v3354_v35 }
 0x266   :  { %8390 = vrsqrt.f32 %v3356_v38 }
 0x270   :  { %v8391_v19 = vpop.eup %8390 }
 0x271   :  { %v3358_v13 = vmul.f32 %v8391_v19, %v3355_v25 }
 0x273   :  { %v3360_v37 = vmul.f32 %v3358_v13, %v3350_v34  ;;  %v9536_v28 = vrot.slane %v3358_v13, %v9526_v43 }
 0x275   :  { %v3361_v59 = vsub.f32 %v3359_v50, %v3360_v37  ;;  %v3383_v48 = vmul.f32 %v9536_v28, %v9512_v29  ;;  %v3368_v9 = vmul.f32 %v9536_v28, %v9334_v47  ;;  %v3369_v2 = vmul.f32 %v9536_v28, %v9338_v40 }
 0x276   :  { %v3370_v31 = vmul.f32 %v9536_v28, %v9332_v36  ;;  %v3371_v3 = vmul.f32 %v9536_v28, %v9336_v16  ;;  %v3372_v39 = vmul.f32 %v9536_v28, %v9386_v11  ;;  %v3373_v42 = vmul.f32 %v9536_v28, %v9390_v63 }
 0x277   :  { %v9555_v55 = vrot.slane %v3361_v59, %v9526_v43  ;;  %v3374_v56 = vmul.f32 %v9536_v28, %v9384_v60  ;;  %v3375_v10 = vmul.f32 %v9536_v28, %v9388_v5  ;;  %v3376_v14 = vmul.f32 %v9536_v28, %v9396_v4 }
 0x278   :  { %v3377_v6 = vmul.f32 %v9536_v28, %v9406_v1  ;;  %v3378_v18 = vmul.f32 %v9536_v28, %v9392_v15  ;;  %v9569_v17 = vmul.f32 %v9536_v28, %v9398_v57  ;;  %v9573_v30 = vmul.f32 %v9536_v28, %v9483_v33 }
 0x279   :  { %v3405_v12 = vadd.f32 %v9555_v55, %v3383_v48  ;;  %v3390_v20 = vadd.f32 %v9555_v55, %v3368_v9  ;;  %v3391_v52 = vadd.f32 %v9555_v55, %v3369_v2  ;;  %v3392_v21 = vadd.f32 %v9555_v55, %v3370_v31 }
 0x27a   :  { %v3393_v22 = vadd.f32 %v9555_v55, %v3371_v3  ;;  %v3394_v8 = vadd.f32 %v9555_v55, %v3372_v39  ;;  %v3395_v45 = vadd.f32 %v9555_v55, %v3373_v42  ;;  %v3396_v0 = vadd.f32 %v9555_v55, %v3374_v56 }
 0x27b   :  { %v3421_v27 = vmax.f32 %v3405_v12, 0.0  ;;  %v3406_v23 = vmax.f32 %v3390_v20, 0.0  ;;  %v3407_v34 = vmax.f32 %v3391_v52, 0.0  ;;  %v3408_v62 = vmax.f32 %v3392_v21, 0.0  ;;  %v9583_v20 = vld [vmem:[#allocation3 + $0x50] sm:$0xe] }
 0x27c   :  { %v3409_v58 = vmax.f32 %v3393_v22, 0.0  ;;  %v3410_v54 = vmax.f32 %v3394_v8, 0.0  ;;  %v3411_v35 = vmax.f32 %v3395_v45, 0.0  ;;  %v3412_v38 = vmax.f32 %v3396_v0, 0.0  ;;  %v9585_v52 = vld [vmem:[#allocation3 + $0x54] sm:$0x1] }
 0x27d   :  { %v8020_v46 = vpack.c.bf16 %v3421_v27, %v3421_v27  ;;  %v8005_v25 = vpack.c.bf16 %v3406_v23, %v3406_v23  ;;  %v8006_v19 = vpack.c.bf16 %v3407_v34, %v3407_v34  ;;  %v8007_v13 = vpack.c.bf16 %v3408_v62, %v3408_v62  ;;  %v9591_v0 = vld [vmem:[#allocation3 + $0x48] sm:$0xe] }
 0x27e   :  { %v8008_v50 = vpack.c.bf16 %v3409_v58, %v3409_v58  ;;  %v8009_v37 = vpack.c.bf16 %v3410_v54, %v3410_v54  ;;  %v8010_v59 = vpack.c.bf16 %v3411_v35, %v3411_v35  ;;  %v8011_v48 = vpack.c.bf16 %v3412_v38, %v3412_v38  ;;  %v9597_v58 = vld [vmem:[#allocation3 + $0x4c] sm:$0x1] }
 0x27f   :  { %v3516_v9 = vrot.slane %v8020_v46, 7  ;;  %v3486_v2 = vrot.slane %v8005_v25, 7  ;;  %v3488_v31 = vrot.slane %v8006_v19, 7  ;;  %v3490_v3 = vrot.slane %v8007_v13, 7 }
 0x280   :  { %v3492_v39 = vrot.slane %v8008_v50, 7  ;;  %v3494_v42 = vrot.slane %v8009_v37, 7  ;;  %v3496_v56 = vrot.slane %v8010_v59, 7  ;;  %v3498_v12 = vrot.slane %v8011_v48, 7 }
 0x281   :  { %v3517_v21 = vrot.slane %v3516_v9, 4  ;;  %3583 = vst.msk [vmem:[#allocation3 + $0x90] sm:$0xe] %vm3551_vm8, %v3516_v9  ;;  %v3487_v22 = vrot.slane %v3486_v2, 4  ;;  %3552 = vst.msk [vmem:[#allocation3 + $0x8] sm:$0xe] %vm3551_vm8, %v3486_v2  ;;  %v3397_v54 = vadd.f32 %v9555_v55, %v3375_v10  ;;  %v3398_v35 = vadd.f32 %v9555_v55, %v3376_v14 }
 0x282   :  { %v3489_v8 = vrot.slane %v3488_v31, 4  ;;  %3555 = vst.msk [vmem:[#allocation3 + $0x10] sm:$0xe] %vm3551_vm8, %v3488_v31  ;;  %v3491_v45 = vrot.slane %v3490_v3, 4  ;;  %3557 = vst.msk [vmem:[#allocation3 + $0x18] sm:$0xe] %vm3551_vm8, %v3490_v3  ;;  %v9606_v38 = vadd.f32 %v9555_v55, %v3377_v6  ;;  %v9609_v46 = vadd.f32 %v9555_v55, %v3378_v18 }
 0x283   :  { %v3493_v27 = vrot.slane %v3492_v39, 4  ;;  %3559 = vst.msk [vmem:[#allocation3 + $0x20] sm:$0xe] %vm3551_vm8, %v3492_v39  ;;  %v3495_v23 = vrot.slane %v3494_v42, 4  ;;  %3561 = vst.msk [vmem:[#allocation3 + $0x28] sm:$0xe] %vm3551_vm8, %v3494_v42  ;;  %v9617_v25 = vadd.f32 %v9555_v55, %v9569_v17  ;;  %v3381_v10 = vmul.f32 %v9536_v28, %v9488_v26 }
 0x284   :  { %v3497_v34 = vrot.slane %v3496_v56, 4  ;;  %3563 = vst.msk [vmem:[#allocation3 + $0x30] sm:$0xe] %vm3551_vm8, %v3496_v56  ;;  %v3499_v62 = vrot.slane %v3498_v12, 4  ;;  %3565 = vst.msk [vmem:[#allocation3 + $0x38] sm:$0xe] %vm3551_vm8, %v3498_v12  ;;  %v9623_v14 = vadd.f32 %v9555_v55, %v9573_v30  ;;  %v3382_v6 = vmul.f32 %v9536_v28, %v9506_v24 }
 0x285   :  { %3584 = vst.msk [vmem:[#allocation3 + $0x94] sm:$0x1] %vm3553_vm2, %v3517_v21  ;;  %3554 = vst.msk [vmem:[#allocation3 + $0xc] sm:$0x1] %vm3553_vm2, %v3487_v22  ;;  %v7835_v18 = vrot.slane %v9583_v20, 9  ;;  %v4023_v19 = vrot.slane %v9585_v52, 5  ;;  %v9632_v59 = vadd.f32 %v9555_v55, %v3381_v10 }
 0x286   :  { %3556 = vst.msk [vmem:[#allocation3 + $0x14] sm:$0x1] %vm3553_vm2, %v3489_v8  ;;  %3558 = vst.msk [vmem:[#allocation3 + $0x1c] sm:$0x1] %vm3553_vm2, %v3491_v45  ;;  %v5717_v50 = vrot.slane %v9597_v58, 5  ;;  %v3413_v17 = vmax.f32 %v3397_v54, 0.0  ;;  %v9635_v48 = vadd.f32 %v9555_v55, %v3382_v6  ;;  %v3992_v55 = vsel %vm8634_vm7, %v7827_v61, %v3991_v51 }
 0x287   :  { %3560 = vst.msk [vmem:[#allocation3 + $0x24] sm:$0x1] %vm3553_vm2, %v3493_v27  ;;  %3562 = vst.msk [vmem:[#allocation3 + $0x2c] sm:$0x1] %vm3553_vm2, %v3495_v23  ;;  %v3414_v37 = vmax.f32 %v3398_v35, 0.0  ;;  %v3415_v30 = vmax.f32 %v9606_v38, 0.0  ;;  %v9653_v23 = vsel %vm8634_vm7, %v7835_v18, %v4023_v19 }
 0x288   :  { %3564 = vst.msk [vmem:[#allocation3 + $0x34] sm:$0x1] %vm3553_vm2, %v3497_v34  ;;  %3566 = vst.msk [vmem:[#allocation3 + $0x3c] sm:$0x1] %vm3553_vm2, %v3499_v62  ;;  %v3927_v31 = vld [vmem:[#allocation3 + $0x8] sm:$0xe]  ;;  %v9647_v45 = vpack.c.bf16 %v3413_v17, %v3413_v17 }
 0x289   :  { %v4470_v3 = vld [vmem:[#allocation3 + $0x8] sm:$0xf]  ;;  %v4472_v39 = vld [vmem:[#allocation3 + $0x10] sm:$0xf]  ;;  %v7828_v42 = vrot.slane %v3927_v31, 9  ;;  %v9649_v27 = vpack.c.bf16 %v3414_v37, %v3414_v37 }
 0x28a   :  { %v4503_v56 = vshrl.u32 %v4470_v3, 16  ;;  %v4506_v12 = vshll.u32 %v4470_v3, 16  ;;  %v4517_v20 = vshrl.u32 %v4472_v39, 16  ;;  %v3929_v52 = vld [vmem:[#allocation3 + $0x10] sm:$0xe]  ;;  %v4520_v49 = vshll.u32 %v4472_v39, 16 }
 0x28b   :  { %v3931_v6 = vld [vmem:[#allocation3 + $0x18] sm:$0xe]  ;;  %v7829_v61 = vrot.slane %v3929_v52, 9  ;;  %v8354_v39 = vld [vmem:[%s10936_s4 + $0x40] sm:$0xff]   ;;  %v4478_v9 = vld [vmem:[#allocation3 + $0x28] sm:$0xf] }
 0x28c   :  { %v3928_v21 = vld [vmem:[#allocation3 + $0xc] sm:$0x1]  ;;  %v4505_v62 = vrot.slane %v4503_v56, 4  ;;  %v4508_v54 = vrot.slane %v4506_v12, 5  ;;  %v4519_v38 = vrot.slane %v4517_v20, 4  ;;  %v4522_v19 = vrot.slane %v4520_v49, 5  ;;  %8095 = vmatprep.subr.bf16.mxu1 %v8354_v39 }
 0x28d   :  { %v4471_v22 = vld [vmem:[#allocation3 + $0xc] sm:$0x1]  ;;  %v4473_v8 = vld [vmem:[#allocation3 + $0x14] sm:$0x1]  ;;  %v3995_v34 = vrot.slane %v3928_v21, 5  ;;  %v7830_v56 = vrot.slane %v3931_v6, 9 }
 0x28e   :  { %v4512_v35 = vshll.u32 %v4471_v22, 16  ;;  %v3930_v41 = vld [vmem:[#allocation3 + $0x14] sm:$0x1]  ;;  %v4526_v10 = vshll.u32 %v4473_v8, 16  ;;  %v4509_v17 = vor.u32 %v4508_v54, %v4505_v62  ;;  %v3932_v31 = vld [vmem:[#allocation3 + $0x1c] sm:$0x1] }
 0x28f   :  { %v3996_v51 = vsel %vm8634_vm7, %v7828_v42, %v3995_v34  ;;  %v3999_v3 = vrot.slane %v3930_v41, 5  ;;  %v4474_v2 = vld [vmem:[#allocation3 + $0x18] sm:$0xf]  ;;  %v4475_v12 = vld [vmem:[#allocation3 + $0x1c] sm:$0x1]  ;;  %v4003_v22 = vrot.slane %v3932_v31, 5  ;;  %v9662_v34 = vpack.c.bf16 %v3415_v30, %v3415_v30 }
 0x290   :  { %v4514_v37 = vrot.slane %v4512_v35, 5  ;;  %v7843_v18 = vcombine.low %v3992_v55, %v3996_v51  ;;  %v4528_v21 = vrot.slane %v4526_v10, 5  ;;  %v4510_v20 = vrot.slane %v4509_v17, 4  ;;  %v4476_v42 = vld [vmem:[#allocation3 + $0x20] sm:$0xf] }
 0x291   :  { %v4000_v52 = vsel %vm8634_vm7, %v7829_v61, %v3999_v3  ;;  %v4477_v8 = vld [vmem:[#allocation3 + $0x24] sm:$0x1]  ;;  %v4523_v55 = vor.u32 %v4522_v19, %v4519_v38  ;;  %v4531_v62 = vshrl.u32 %v4474_v2, 16  ;;  %v4534_v54 = vshll.u32 %v4474_v2, 16  ;;  %v3933_v41 = vld [vmem:[#allocation3 + $0x20] sm:$0xe] }
 0x292   :  { %4077 = vrot.lane.b32.xlu1 %v7843_v18, %s8425_s23  ;;  %v4540_v35 = vshll.u32 %v4475_v12, 16  ;;  %v8355_v49 = vld [vmem:[%s10936_s4 + $0xc0] sm:$0xff]   ;;  %v4515_v10 = vsel %vm8661_vm12, %v4510_v20, %v4514_v37  ;;  %v4004_v6 = vsel %vm8634_vm7, %v7830_v56, %v4003_v22  ;;  %v4545_v30 = vshrl.u32 %v4476_v42, 16  ;;  %v3935_v17 = vld [vmem:[#allocation3 + $0x28] sm:$0xe] }
 0x293   :  { %v4548_v61 = vshll.u32 %v4476_v42, 16  ;;  %v3934_v51 = vld [vmem:[#allocation3 + $0x24] sm:$0x1]  ;;  %v4524_v38 = vrot.slane %v4523_v55, 4  ;;  %v7844_v31 = vcombine.low %v4000_v52, %v4004_v6  ;;  %v4533_v2 = vrot.slane %v4531_v62, 4  ;;  %8159 = vmatprep.subr.bf16.mxu0 %v8355_v49 }
 0x294   :  { %v4536_v3 = vrot.slane %v4534_v54, 5  ;;  %v3936_v18 = vld [vmem:[#allocation3 + $0x2c] sm:$0x1]  ;;  %v8356_v19 = vld [vmem:[%s10936_s4] sm:$0xff]   ;;  %v4542_v12 = vrot.slane %v4540_v35, 5  ;;  %v4547_v39 = vrot.slane %v4545_v30, 4 }
 0x295   :  { %v4550_v37 = vrot.slane %v4548_v61, 5  ;;  %v4554_v20 = vshll.u32 %v4477_v8, 16  ;;  %v4529_v56 = vsel %vm8661_vm12, %v4524_v38, %v4528_v21  ;;  %v7831_v52 = vrot.slane %v3933_v41, 9  ;;  %v4479_v55 = vld [vmem:[#allocation3 + $0x2c] sm:$0x1]  ;;  %8096 = vmatpush3.bf16.msra.mxu1 %v8356_v19  ;;  %v8357_v21 = vld [vmem:[%s10936_s4 + $0x80] sm:$0xff]  }
 0x296   :  { %4079 = vrot.lane.b32.xlu1 %v7844_v31, %s8425_s23  ;;  %v4537_v22 = vor.u32 %v4536_v3, %v4533_v2  ;;  %v4007_v42 = vrot.slane %v3934_v51, 5  ;;  %v4480_v62 = vld [vmem:[#allocation3 + $0x30] sm:$0xf]  ;;  %v7859_v54 = vcombine.low %v4515_v10, %v4529_v56  ;;  %v7832_v28 = vrot.slane %v3935_v17, 9  ;;  %v4481_v61 = vld [vmem:[#allocation3 + $0x34] sm:$0x1]  ;;  %8160 = vmatpush3.bf16.msra.mxu0 %v8357_v21 }
 0x297   :  { %v4551_v49 = vor.u32 %v4550_v37, %v4547_v39  ;;  %v4556_v6 = vrot.slane %v4554_v20, 5  ;;  %v4011_v30 = vrot.slane %v3936_v18, 5  ;;  %v4559_v13 = vshrl.u32 %v4478_v9, 16  ;;  %v3937_v31 = vld [vmem:[#allocation3 + $0x30] sm:$0xe] }
 0x298   :  { %v4538_v35 = vrot.slane %v4537_v22, 4  ;;  %v4008_v8 = vsel %vm8634_vm7, %v7831_v52, %v4007_v42  ;;  %4750 = vrot.lane.b32.xlu0 %v7859_v54, %s8425_s23  ;;  %v4562_v51 = vshll.u32 %v4478_v9, 16  ;;  %v4568_v38 = vshll.u32 %v4479_v55, 16  ;;  %v3938_v19 = vld [vmem:[#allocation3 + $0x34] sm:$0x1] }
 0x299   :  { %v4552_v41 = vrot.slane %v4551_v49, 4  ;;  %v4573_v10 = vshrl.u32 %v4480_v62, 16  ;;  %v4012_v2 = vsel %vm8634_vm7, %v7832_v28, %v4011_v30  ;;  %v4561_v3 = vrot.slane %v4559_v13, 4  ;;  %v3939_v39 = vld [vmem:[#allocation3 + $0x38] sm:$0xe]  ;;  %v8358_v13 = vld [vmem:[%s10936_s4 + $0x48] sm:$0xff]  }
 0x29a   :  { %v4543_v17 = vsel %vm8661_vm12, %v4538_v35, %v4542_v12  ;;  %v4576_v18 = vshll.u32 %v4480_v62, 16  ;;  %v7845_v20 = vcombine.low %v4008_v8, %v4012_v2  ;;  %v4564_v56 = vrot.slane %v4562_v51, 5  ;;  %v3940_v22 = vld [vmem:[#allocation3 + $0x3c] sm:$0x1]  ;;  %v4482_v52 = vld [vmem:[#allocation3 + $0x38] sm:$0xf]  ;;  %8097 = vmatprep.subr.bf16.mxu1 %v8358_v13 }
 0x29b   :  { %v4557_v37 = vsel %vm8661_vm12, %v4552_v41, %v4556_v6  ;;  %v4570_v9 = vrot.slane %v4568_v38, 5  ;;  %v4575_v55 = vrot.slane %v4573_v10, 4  ;;  %v4582_v12 = vshll.u32 %v4481_v61, 16  ;;  %v4483_v49 = vld [vmem:[#allocation3 + $0x3c] sm:$0x1]  ;;  %v8359_v30 = vld [vmem:[%s10936_s4 + $0x8] sm:$0xff]  }
 0x29c   :  { %v7860_v42 = vcombine.low %v4543_v17, %v4557_v37  ;;  %v4578_v54 = vrot.slane %v4576_v18, 5  ;;  %4081 = vrot.lane.b32.xlu1 %v7845_v20, %s8425_s23  ;;  %v4565_v28 = vor.u32 %v4564_v56, %v4561_v3  ;;  %v7833_v62 = vrot.slane %v3937_v31, 9  ;;  %v5623_v8 = vld [vmem:[#allocation3 + $0x10] sm:$0xe]  ;;  %v5624_v38 = vld [vmem:[#allocation3 + $0x14] sm:$0x1]  ;;  %8098 = vmatpush3.bf16.msra.mxu1 %v8359_v30 }
 0x29d   :  { %v4015_v35 = vrot.slane %v3938_v19, 5  ;;  %v7834_v6 = vrot.slane %v3939_v39, 9  ;;  %v4584_v61 = vrot.slane %v4582_v12, 5  ;;  %v4019_v41 = vrot.slane %v3940_v22, 5  ;;  %v8360_v10 = vld [vmem:[%s10936_s4 + $0x50] sm:$0xff]   ;;  %v8361_v19 = vld [vmem:[%s10936_s4 + $0xc8] sm:$0xff]  }
 0x29e   :  { %4752 = vrot.lane.b32.xlu0 %v7860_v42, %s8425_s23  ;;  %v4579_v21 = vor.u32 %v4578_v54, %v4575_v55  ;;  %v3500_v51 = vrot.slane %v9647_v45, 7  ;;  %v4566_v31 = vrot.slane %v4565_v28, 4  ;;  %v4587_v2 = vshrl.u32 %v4482_v52, 16  ;;  %v5625_v18 = vld [vmem:[#allocation3 + $0x18] sm:$0xe]  ;;  %8099 = vmatprep.subr.bf16.mxu1 %v8360_v10  ;;  %v8362_v22 = vld [vmem:[%s10936_s4 + $0x10] sm:$0xff]  }
 0x29f   :  { %v4016_v17 = vsel %vm8634_vm7, %v7833_v62, %v4015_v35  ;;  %v4590_v3 = vshll.u32 %v4482_v52, 16  ;;  %v4020_v45 = vsel %vm8634_vm7, %v7834_v6, %v4019_v41  ;;  %v4596_v20 = vshll.u32 %v4483_v49, 16  ;;  %v5626_v56 = vld [vmem:[#allocation3 + $0x1c] sm:$0x1]  ;;  %v4950_v12 = vld [vmem:[#allocation3 + $0x8] sm:$0xe]  ;;  %8161 = vmatprep.subr.bf16.mxu0 %v8361_v19 }
 0x2a0   :  { %v4580_v39 = vrot.slane %v4579_v21, 4  ;;  %v3501_v37 = vrot.slane %v3500_v51, 4  ;;  %3567 = vst.msk [vmem:[#allocation3 + $0x40] sm:$0xe] %vm3551_vm8, %v3500_v51  ;;  %v4571_v52 = vsel %vm8661_vm12, %v4566_v31, %v4570_v9  ;;  %v7846_v42 = vcombine.low %v4016_v17, %v4020_v45  ;;  %v4951_v35 = vld [vmem:[#allocation3 + $0xc] sm:$0x3]  ;;  %8100 = vmatpush3.bf16.msra.mxu1 %v8362_v22 }
 0x2a1   :  { %v4589_v55 = vrot.slane %v4587_v2, 4  ;;  %v4592_v54 = vrot.slane %v4590_v3, 5  ;;  %v9718_v49 = vrot.slane %v4596_v20, 5  ;;  %v7907_v28 = vrot.slane %v5623_v8, 9  ;;  %v8363_v6 = vld [vmem:[%s10936_s4 + $0x88] sm:$0xff]   ;;  %v8364_v10 = vld [vmem:[%s10936_s4 + $0x58] sm:$0xff]  }
 0x2a2   :  { %v4585_v13 = vsel %vm8661_vm12, %v4580_v39, %v4584_v61  ;;  %3568 = vst.msk [vmem:[#allocation3 + $0x44] sm:$0x1] %vm3553_vm2, %v3501_v37  ;;  %v5689_v62 = vrot.slane %v5624_v38, 5  ;;  %4083 = vrot.lane.b32.xlu1 %v7846_v42, %s8425_s23  ;;  %v7908_v21 = vrot.slane %v5625_v18, 9  ;;  %v5693_v41 = vrot.slane %v5626_v56, 5  ;;  %8162 = vmatpush3.bf16.msra.mxu0 %v8363_v6  ;;  %v8366_v20 = vld [vmem:[%s10936_s4 + $0x60] sm:$0xff]  }
 0x2a3   :  { %v7861_v9 = vcombine.low %v4571_v52, %v4585_v13  ;;  %v4593_v30 = vor.u32 %v4592_v54, %v4589_v55  ;;  %v3502_v51 = vrot.slane %v9649_v27, 7  ;;  %v3504_v8 = vrot.slane %v9662_v34, 7  ;;  %v4952_v2 = vld [vmem:[#allocation3 + $0x10] sm:$0xe]  ;;  %v8365_v27 = vld [vmem:[%s10936_s4 + $0x18] sm:$0xff]   ;;  %8101 = vmatprep.subr.bf16.mxu1 %v8364_v10 }
 0x2a4   :  { %v5690_v61 = vsel %vm8634_vm7, %v7907_v28, %v5689_v62  ;;  %v4983_v38 = vshrl.u32 %v4950_v12, 16  ;;  %v5694_v17 = vsel %vm8634_vm7, %v7908_v21, %v5693_v41  ;;  %v4986_v3 = vshll.u32 %v4950_v12, 16  ;;  %v4953_v45 = vld [vmem:[#allocation3 + $0x14] sm:$0x3]  ;;  %8102 = vmatpush3.bf16.msra.mxu1 %v8365_v27 }
 0x2a5   :  { %4754 = vrot.lane.b32.xlu0 %v7861_v9, %s8425_s23  ;;  %v9732_v31 = vrot.slane %v4593_v30, 4  ;;  %v4992_v18 = vshrl.u32 %v4951_v35, 16  ;;  %v7923_v34 = vcombine.low %v5690_v61, %v5694_v17  ;;  %v3503_v19 = vrot.slane %v3502_v51, 4  ;;  %3569 = vst.msk [vmem:[#allocation3 + $0x58] sm:$0xe] %vm3551_vm8, %v3502_v51  ;;  %v8367_v12 = vld [vmem:[%s10936_s4 + $0xd0] sm:$0xff]   ;;  %8103 = vmatprep.subr.bf16.mxu1 %v8366_v20 }
 0x2a6   :  { %v3505_v39 = vrot.slane %v3504_v8, 4  ;;  %3571 = vst.msk [vmem:[#allocation3 + $0x60] sm:$0xe] %vm3551_vm8, %v3504_v8  ;;  %v4985_v37 = vrot.slane %v4983_v38, 5  ;;  %v4988_v22 = vrot.slane %v4986_v3, 6  ;;  %v4995_v42 = vshll.u32 %v4951_v35, 16  ;;  %8163 = vmatprep.subr.bf16.mxu0 %v8367_v12 }
 0x2a7   :  { %v4484_v56 = vld [vmem:[#allocation3 + $0x40] sm:$0xf]  ;;  %v4994_v52 = vrot.slane %v4992_v18, 5  ;;  %v10951_v55 = vrot.slane %v9591_v0, 9  ;;  %5775 = vrot.lane.b32.xlu1 %v7923_v34, %s8425_s23  ;;  %3570 = vst.msk [vmem:[#allocation3 + $0x5c] sm:$0x1] %vm3553_vm2, %v3503_v19  ;;  %v4599_v20 = vsel %vm8661_vm12, %v9732_v31, %v9718_v49 }
 0x2a8   :  { %v4601_v13 = vshrl.u32 %v4484_v56, 16  ;;  %v4604_v28 = vshll.u32 %v4484_v56, 16  ;;  %3572 = vst.msk [vmem:[#allocation3 + $0x64] sm:$0x1] %vm3553_vm2, %v3505_v39  ;;  %v5001_v58 = vshrl.u32 %v4952_v2, 16  ;;  %v5004_v62 = vshll.u32 %v4952_v2, 16 }
 0x2a9   :  { %v9750_v54 = vsel %vm8634_vm7, %v10951_v55, %v5717_v50  ;;  %v4485_v0 = vld [vmem:[#allocation3 + $0x44] sm:$0x1]  ;;  %v4989_v35 = vor.u32 %v4988_v22, %v4985_v37  ;;  %v4997_v50 = vrot.slane %v4995_v42, 6  ;;  %v5010_v6 = vshrl.u32 %v4953_v45, 16  ;;  %v9761_v8 = vld [vmem:[#allocation3 + $0x20] sm:$0xe] }
 0x2aa   :  { %v5013_v9 = vshll.u32 %v4953_v45, 16  ;;  %v8368_v30 = vld [vmem:[%s10936_s4 + $0x20] sm:$0xff]   ;;  %v4603_v21 = vrot.slane %v4601_v13, 4  ;;  %v4606_v41 = vrot.slane %v4604_v28, 5  ;;  %v4610_v61 = vshll.u32 %v4485_v0, 16  ;;  %v8369_v3 = vld [vmem:[%s10936_s4 + $0x90] sm:$0xff]  }
 0x2ab   :  { %v5003_v51 = vrot.slane %v5001_v58, 5  ;;  %v4990_v38 = vrot.slane %v4989_v35, 4  ;;  %v4998_v10 = vor.u32 %v4997_v50, %v4994_v52  ;;  %v5006_v17 = vrot.slane %v5004_v62, 6  ;;  %8104 = vmatpush3.bf16.msra.mxu1 %v8368_v30  ;;  %v8370_v37 = vld [vmem:[%s10936_s4 + $0x68] sm:$0xff]   ;;  %8164 = vmatpush3.bf16.msra.mxu0 %v8369_v3  ;;  %v5628_v50 = vld [vmem:[#allocation3 + $0x24] sm:$0x1] }
 0x2ac   :  { %v5012_v2 = vrot.slane %v5010_v6, 5  ;;  %v4607_v18 = vor.u32 %v4606_v41, %v4603_v21  ;;  %v5015_v27 = vrot.slane %v5013_v9, 6  ;;  %v10952_v34 = vmax.f32 %v9609_v46, 0.0  ;;  %v4486_v22 = vld [vmem:[#allocation3 + $0x58] sm:$0xf]  ;;  %8105 = vmatprep.subr.bf16.mxu1 %v8370_v37 }
 0x2ad   :  { %v10953_v39 = vmax.f32 %v9617_v25, 0.0  ;;  %v4612_v56 = vrot.slane %v4610_v61, 5  ;;  %v4488_v46 = vld [vmem:[#allocation3 + $0x60] sm:$0xf]  ;;  %v5007_v52 = vor.u32 %v5006_v17, %v5003_v51  ;;  %v7909_v42 = vrot.slane %v9761_v8, 9  ;;  %v8371_v51 = vld [vmem:[%s10936_s4 + $0x28] sm:$0xff]  }
 0x2ae   :  { %v9769_v19 = vpack.c.bf16 %v10952_v34, %v10952_v34  ;;  %v4608_v25 = vrot.slane %v4607_v18, 4  ;;  %v4615_v55 = vshrl.u32 %v4486_v22, 16  ;;  %v4618_v12 = vshll.u32 %v4486_v22, 16  ;;  %v3943_v28 = vld [vmem:[#allocation3 + $0x58] sm:$0xe] }
 0x2af   :  { %v9774_v45 = vpack.c.bf16 %v10953_v39, %v10953_v39  ;;  %v4629_v13 = vshrl.u32 %v4488_v46, 16  ;;  %v4487_v58 = vld [vmem:[#allocation3 + $0x5c] sm:$0x1]  ;;  %v4489_v62 = vld [vmem:[#allocation3 + $0x64] sm:$0x1]  ;;  %v4632_v0 = vshll.u32 %v4488_v46, 16  ;;  %v4999_v35 = vsel %vm8681_vm13, %v4990_v38, %v4998_v10  ;;  %8106 = vmatpush3.bf16.msra.mxu1 %v8371_v51 }
 0x2b0   :  { %v5008_v49 = vrot.slane %v5007_v52, 4  ;;  %v5016_v31 = vor.u32 %v5015_v27, %v5012_v2  ;;  %v5629_v6 = vld [vmem:[#allocation3 + $0x28] sm:$0xe]  ;;  %v4613_v9 = vsel %vm8661_vm12, %v4608_v25, %v4612_v56  ;;  %v4617_v30 = vrot.slane %v4615_v55, 4  ;;  %v3944_v61 = vld [vmem:[#allocation3 + $0x5c] sm:$0x1] }
 0x2b1   :  { %v4620_v21 = vrot.slane %v4618_v12, 5  ;;  %v4624_v41 = vshll.u32 %v4487_v58, 16  ;;  %v7862_v8 = vcombine.low %v4599_v20, %v4613_v9  ;;  %v4631_v17 = vrot.slane %v4629_v13, 4  ;;  %v5630_v38 = vld [vmem:[#allocation3 + $0x2c] sm:$0x1]  ;;  %v8372_v10 = vld [vmem:[%s10936_s4 + $0x70] sm:$0xff]  }
 0x2b2   :  { %v4634_v3 = vrot.slane %v4632_v0, 5  ;;  %v4638_v18 = vshll.u32 %v4489_v62, 16  ;;  %v5017_v34 = vsel %vm8681_vm13, %v5008_v49, %v5016_v31  ;;  %v7836_v39 = vrot.slane %v3943_v28, 9  ;;  %8107 = vmatprep.subr.bf16.mxu1 %v8372_v10  ;;  %v4954_v12 = vld [vmem:[#allocation3 + $0x18] sm:$0xe] }
 0x2b3   :  { %v4621_v2 = vor.u32 %v4620_v21, %v4617_v30  ;;  %v4626_v27 = vrot.slane %v4624_v41, 5  ;;  %4756 = vrot.lane.b32.xlu0 %v7862_v8, %s8425_s23  ;;  %v7891_v20 = vcombine.low %v4999_v35, %v5017_v34  ;;  %v4027_v22 = vrot.slane %v3944_v61, 5  ;;  %v4955_v0 = vld [vmem:[#allocation3 + $0x1c] sm:$0x3]  ;;  %v4956_v9 = vld [vmem:[#allocation3 + $0x20] sm:$0xe] }
 0x2b4   :  { %v4635_v37 = vor.u32 %v4634_v3, %v4631_v17  ;;  %v4640_v56 = vrot.slane %v4638_v18, 5  ;;  %v5697_v52 = vrot.slane %v5628_v50, 5  ;;  %v7910_v25 = vrot.slane %v5629_v6, 9  ;;  %v8373_v35 = vld [vmem:[%s10936_s4 + $0xd8] sm:$0xff]   ;;  %v3945_v8 = vld [vmem:[#allocation3 + $0x60] sm:$0xe] }
 0x2b5   :  { %v4622_v46 = vrot.slane %v4621_v2, 4  ;;  %v5701_v55 = vrot.slane %v5630_v38, 5  ;;  %5294 = vrot.lane.b32.xlu1 %v7891_v20, %s8425_s23  ;;  %v4028_v58 = vsel %vm8634_vm7, %v7836_v39, %v4027_v22  ;;  %v3506_v28 = vrot.slane %v9769_v19, 7  ;;  %v4957_v19 = vld [vmem:[#allocation3 + $0x24] sm:$0x3]  ;;  %8165 = vmatprep.subr.bf16.mxu0 %v8373_v35  ;;  %v8374_v3 = vld [vmem:[%s10936_s4 + $0x30] sm:$0xff]  }
 0x2b6   :  { %v4636_v13 = vrot.slane %v4635_v37, 4  ;;  %v3508_v62 = vrot.slane %v9774_v45, 7  ;;  %v7847_v31 = vcombine.low %v9653_v23, %v4028_v58  ;;  %v5698_v50 = vsel %vm8634_vm7, %v7909_v42, %v5697_v52  ;;  %v9816_v17 = vld [vmem:[#allocation3 + $0x30] sm:$0xe]  ;;  %v5632_v20 = vld [vmem:[#allocation3 + $0x34] sm:$0x1]  ;;  %8108 = vmatpush3.bf16.msra.mxu1 %v8374_v3 }
 0x2b7   :  { %v4627_v49 = vsel %vm8661_vm12, %v4622_v46, %v4626_v27  ;;  %v5702_v6 = vsel %vm8634_vm7, %v7910_v25, %v5701_v55  ;;  %v3507_v21 = vrot.slane %v3506_v28, 4  ;;  %3573 = vst.msk [vmem:[#allocation3 + $0x68] sm:$0xe] %vm3551_vm8, %v3506_v28  ;;  %v5019_v61 = vshrl.u32 %v4954_v12, 16  ;;  %v3946_v27 = vld [vmem:[#allocation3 + $0x64] sm:$0x1] }
 0x2b8   :  { %v4641_v45 = vsel %vm8661_vm12, %v4636_v13, %v4640_v56  ;;  %v7924_v30 = vcombine.low %v5698_v50, %v5702_v6  ;;  %v3509_v41 = vrot.slane %v3508_v62, 4  ;;  %3575 = vst.msk [vmem:[#allocation3 + $0x70] sm:$0xe] %vm3551_vm8, %v3508_v62  ;;  %v5022_v51 = vshll.u32 %v4954_v12, 16  ;;  %v5633_v55 = vld [vmem:[#allocation3 + $0x38] sm:$0xe] }
 0x2b9   :  { %v7863_v23 = vcombine.low %v4627_v49, %v4641_v45  ;;  %v5028_v42 = vshrl.u32 %v4955_v0, 16  ;;  %3574 = vst.msk [vmem:[#allocation3 + $0x6c] sm:$0x1] %vm3553_vm2, %v3507_v21  ;;  %v5031_v18 = vshll.u32 %v4955_v0, 16  ;;  %v5037_v38 = vshrl.u32 %v4956_v9, 16  ;;  %v8375_v62 = vld [vmem:[%s10936_s4 + $0x98] sm:$0xff]  }
 0x2ba   :  { %5777 = vrot.lane.b32.xlu1 %v7924_v30, %s8425_s23  ;;  %3576 = vst.msk [vmem:[#allocation3 + $0x74] sm:$0x1] %vm3553_vm2, %v3509_v41  ;;  %v5040_v10 = vshll.u32 %v4956_v9, 16  ;;  %v5046_v2 = vshrl.u32 %v4957_v19, 16  ;;  %v5021_v34 = vrot.slane %v5019_v61, 5  ;;  %v5024_v39 = vrot.slane %v5022_v51, 6  ;;  %8166 = vmatpush3.bf16.msra.mxu0 %v8375_v62 }
 0x2bb   :  { %4758 = vrot.lane.b32.xlu0 %v7863_v23, %s8425_s23  ;;  %v5030_v37 = vrot.slane %v5028_v42, 5  ;;  %v5049_v56 = vshll.u32 %v4957_v19, 16  ;;  %v5033_v22 = vrot.slane %v5031_v18, 6  ;;  %v5039_v46 = vrot.slane %v5037_v38, 5  ;;  %v5634_v30 = vld [vmem:[#allocation3 + $0x3c] sm:$0x1] }
 0x2bc   :  { %v5042_v52 = vrot.slane %v5040_v10, 6  ;;  %v5048_v25 = vrot.slane %v5046_v2, 5  ;;  %v5025_v12 = vor.u32 %v5024_v39, %v5021_v34  ;;  %v7837_v58 = vrot.slane %v3945_v8, 9 }
 0x2bd   :  { %v5051_v13 = vrot.slane %v5049_v56, 6  ;;  %v4031_v28 = vrot.slane %v3946_v27, 5  ;;  %v5034_v0 = vor.u32 %v5033_v22, %v5030_v37  ;;  %v7911_v49 = vrot.slane %v9816_v17, 9 }
 0x2be   :  { %v5043_v35 = vor.u32 %v5042_v52, %v5039_v46  ;;  %v5705_v50 = vrot.slane %v5632_v20, 5  ;;  %v4490_v6 = vld [vmem:[#allocation3 + $0x68] sm:$0xf]  ;;  %v5026_v19 = vrot.slane %v5025_v12, 4  ;;  %v7912_v21 = vrot.slane %v5633_v55, 9  ;;  %v8376_v52 = vld [vmem:[%s10936_s4 + $0x78] sm:$0xff]  }
 0x2bf   :  { %4085 = vrot.lane.b32.xlu0 %v7847_v31, %s8425_s23  ;;  %v4492_v9 = vld [vmem:[#allocation3 + $0x70] sm:$0xf]  ;;  %v5052_v45 = vor.u32 %v5051_v13, %v5048_v25  ;;  %v10954_v41 = vmax.f32 %v9623_v14, 0.0  ;;  %v4643_v61 = vshrl.u32 %v4490_v6, 16  ;;  %v4646_v51 = vshll.u32 %v4490_v6, 16  ;;  %8109 = vmatprep.subr.bf16.mxu1 %v8376_v52 }
 0x2c0   :  { %v4657_v42 = vshrl.u32 %v4492_v9, 16  ;;  %v4660_v8 = vshll.u32 %v4492_v9, 16  ;;  %v3947_v3 = vld [vmem:[#allocation3 + $0x68] sm:$0xe]  ;;  %v4491_v17 = vld [vmem:[#allocation3 + $0x6c] sm:$0x1]  ;;  %v5035_v31 = vsel %vm8681_vm13, %v5026_v19, %v5034_v0  ;;  %v9837_v10 = vsel %vm8634_vm7, %v7837_v58, %v4031_v28 }
 0x2c1   :  { %v8017_v23 = vpack.c.bf16 %v10954_v41, %v10954_v41  ;;  %v4493_v18 = vld [vmem:[#allocation3 + $0x74] sm:$0x1]  ;;  %v5044_v38 = vrot.slane %v5043_v35, 4  ;;  %v7838_v2 = vrot.slane %v3947_v3, 9  ;;  %v4645_v14 = vrot.slane %v4643_v61, 4 }
 0x2c2   :  { %v4648_v27 = vrot.slane %v4646_v51, 5  ;;  %v4652_v34 = vshll.u32 %v4491_v17, 16  ;;  %v4659_v39 = vrot.slane %v4657_v42, 4  ;;  %v3948_v37 = vld [vmem:[#allocation3 + $0x6c] sm:$0x1]  ;;  %v4662_v56 = vrot.slane %v4660_v8, 5 }
 0x2c3   :  { %v4666_v20 = vshll.u32 %v4493_v18, 16  ;;  %v5053_v22 = vsel %vm8681_vm13, %v5044_v38, %v5052_v45  ;;  %v4035_v46 = vrot.slane %v3948_v37, 5  ;;  %v5706_v12 = vsel %vm8634_vm7, %v7911_v49, %v5705_v50  ;;  %v4958_v58 = vld [vmem:[#allocation3 + $0x28] sm:$0xe]  ;;  %v4959_v6 = vld [vmem:[#allocation3 + $0x2c] sm:$0x3] }
 0x2c4   :  { %v4649_v25 = vor.u32 %v4648_v27, %v4645_v14  ;;  %v7892_v55 = vcombine.low %v5035_v31, %v5053_v22  ;;  %v5709_v13 = vrot.slane %v5634_v30, 5  ;;  %v4654_v28 = vrot.slane %v4652_v34, 5  ;;  %v4960_v61 = vld [vmem:[#allocation3 + $0x30] sm:$0xe]  ;;  %v4961_v8 = vld [vmem:[#allocation3 + $0x34] sm:$0x3] }
 0x2c5   :  { %v4663_v62 = vor.u32 %v4662_v56, %v4659_v39  ;;  %v4668_v0 = vrot.slane %v4666_v20, 5  ;;  %v3419_v35 = vmax.f32 %v9632_v59, 0.0  ;;  %v9850_v19 = vsel %vm8634_vm7, %v7838_v2, %v4035_v46  ;;  %v8377_v18 = vld [vmem:[%s10936_s4 + $0x38] sm:$0xff]   ;;  %v3949_v2 = vld [vmem:[#allocation3 + $0x70] sm:$0xe]  ;;  %v8378_v14 = vld [vmem:[%s10936_s4 + $0xe0] sm:$0xff]  }
 0x2c6   :  { %v4650_v9 = vrot.slane %v4649_v25, 4  ;;  %5296 = vrot.lane.b32.xlu1 %v7892_v55, %s8425_s23  ;;  %v5710_v45 = vsel %vm8634_vm7, %v7912_v21, %v5709_v13  ;;  %v3510_v49 = vrot.slane %v8017_v23, 7  ;;  %v5055_v51 = vshrl.u32 %v4958_v58, 16  ;;  %v3950_v56 = vld [vmem:[#allocation3 + $0x74] sm:$0x1]  ;;  %8110 = vmatpush3.bf16.msra.mxu1 %v8377_v18  ;;  %v9870_v20 = vld [vmem:[%s10936_s4 + $0x100] sm:$0xff]  }
 0x2c7   :  { %v4664_v50 = vrot.slane %v4663_v62, 4  ;;  %v7925_v30 = vcombine.low %v5706_v12, %v5710_v45  ;;  %v8018_v41 = vpack.c.bf16 %v3419_v35, %v3419_v35  ;;  %v5058_v3 = vshll.u32 %v4958_v58, 16  ;;  %v5636_v55 = vld [vmem:[#allocation3 + $0x44] sm:$0x1]  ;;  %8167 = vmatprep.subr.bf16.mxu0 %v8378_v14  ;;  %v5635_v62 = vld [vmem:[#allocation3 + $0x40] sm:$0xe]  ;;  %8266 = vmatprep.subr.bf16.mxu1 %v9870_v20 }
 0x2c8   :  { %v4655_v59 = vsel %vm8661_vm12, %v4650_v9, %v4654_v28  ;;  %v3511_v42 = vrot.slane %v3510_v49, 4  ;;  %3577 = vst.msk [vmem:[#allocation3 + $0x78] sm:$0xe] %vm3551_vm8, %v3510_v49  ;;  %v5064_v17 = vshrl.u32 %v4959_v6, 16  ;;  %v5057_v31 = vrot.slane %v5055_v51, 5 }
 0x2c9   :  { %v4669_v21 = vsel %vm8661_vm12, %v4664_v50, %v4668_v0  ;;  %v3512_v23 = vrot.slane %v8018_v41, 7  ;;  %v5067_v38 = vshll.u32 %v4959_v6, 16  ;;  %v5060_v34 = vrot.slane %v5058_v3, 6  ;;  %v8380_v0 = vld [vmem:[%s10936_s4 + $0xa0] sm:$0xff]   ;;  %v9879_v49 = vld [vmem:[#allocation3 + $0x90] sm:$0xf] }
 0x2ca   :  { %v7864_v27 = vcombine.low %v4655_v59, %v4669_v21  ;;  %5779 = vrot.lane.b32.xlu1 %v7925_v30, %s8425_s23  ;;  %3578 = vst.msk [vmem:[#allocation3 + $0x7c] sm:$0x1] %vm3553_vm2, %v3511_v42  ;;  %v5066_v39 = vrot.slane %v5064_v17, 5  ;;  %v5073_v37 = vshrl.u32 %v4960_v61, 16  ;;  %v5076_v52 = vshll.u32 %v4960_v61, 16  ;;  %v8381_v50 = vld [vmem:[%s10936_s4 + $0xe8] sm:$0xff]   ;;  %8168 = vmatpush3.bf16.msra.mxu0 %v8380_v0 }
 0x2cb   :  { %v3513_v22 = vrot.slane %v3512_v23, 4  ;;  %3579 = vst.msk [vmem:[#allocation3 + $0x80] sm:$0xe] %vm3551_vm8, %v3512_v23  ;;  %v5069_v46 = vrot.slane %v5067_v38, 6  ;;  %v5082_v25 = vshrl.u32 %v4961_v8, 16  ;;  %v5061_v12 = vor.u32 %v5060_v34, %v5057_v31  ;;  %8169 = vmatprep.subr.bf16.mxu0 %v8381_v50 }
 0x2cc   :  { %4760 = vrot.lane.b32.xlu0 %v7864_v27, %s8425_s23  ;;  %v5075_v13 = vrot.slane %v5073_v37, 5  ;;  %v5085_v58 = vshll.u32 %v4961_v8, 16  ;;  %v7839_v28 = vrot.slane %v3949_v2, 9  ;;  %v5078_v6 = vrot.slane %v5076_v52, 6 }
 0x2cd   :  { %3580 = vst.msk [vmem:[#allocation3 + $0x84] sm:$0x1] %vm3553_vm2, %v3513_v22  ;;  %v5070_v35 = vor.u32 %v5069_v46, %v5066_v39  ;;  %v5084_v9 = vrot.slane %v5082_v25, 5  ;;  %v4039_v45 = vrot.slane %v3950_v56, 5  ;;  %v7848_v30 = vcombine.low %v9837_v10, %v9850_v19 }
 0x2ce   :  { %v5062_v41 = vrot.slane %v5061_v12, 4  ;;  %v5087_v61 = vrot.slane %v5085_v58, 6  ;;  %v5713_v51 = vrot.slane %v5636_v55, 5  ;;  %v5079_v42 = vor.u32 %v5078_v6, %v5075_v13  ;;  %v4501_v12 = vld [vmem:[#allocation3 + $0x94] sm:$0x1]  ;;  %v8382_v6 = vld [vmem:[%s10936_s4 + $0xa8] sm:$0xff]  }
 0x2cf   :  { %v4494_v59 = vld [vmem:[#allocation3 + $0x78] sm:$0xf]  ;;  %v9888_v8 = vsel %vm8634_vm7, %v7839_v28, %v4039_v45  ;;  %v7913_v3 = vrot.slane %v5635_v62, 9  ;;  %v3420_v17 = vmax.f32 %v9635_v48, 0.0  ;;  %v4713_v19 = vshrl.u32 %v9879_v49, 16  ;;  %8170 = vmatpush3.bf16.msra.mxu0 %v8382_v6 }
 0x2d0   :  { %4087 = vrot.lane.b32.xlu0 %v7848_v30, %s8425_s23  ;;  %v4671_v18 = vshrl.u32 %v4494_v59, 16  ;;  %v4674_v21 = vshll.u32 %v4494_v59, 16  ;;  %v5088_v23 = vor.u32 %v5087_v61, %v5084_v9  ;;  %v3951_v10 = vld [vmem:[#allocation3 + $0x78] sm:$0xe]  ;;  %v5071_v38 = vsel %vm8681_vm13, %v5062_v41, %v5070_v35  ;;  %v8383_v41 = vld [vmem:[%s10936_s4 + $0xf0] sm:$0xff]  }
 0x2d1   :  { %v4495_v31 = vld [vmem:[#allocation3 + $0x7c] sm:$0x1]  ;;  %v5080_v2 = vrot.slane %v5079_v42, 4  ;;  %v5714_v27 = vsel %vm8634_vm7, %v7913_v3, %v5713_v51  ;;  %v8019_v34 = vpack.c.bf16 %v3420_v17, %v3420_v17  ;;  %v7840_v55 = vrot.slane %v3951_v10, 9  ;;  %v4962_v35 = vld [vmem:[#allocation3 + $0x38] sm:$0xe]  ;;  %8171 = vmatprep.subr.bf16.mxu0 %v8383_v41 }
 0x2d2   :  { %v3952_v14 = vld [vmem:[#allocation3 + $0x7c] sm:$0x1]  ;;  %v4496_v48 = vld [vmem:[#allocation3 + $0x80] sm:$0xf]  ;;  %v4673_v39 = vrot.slane %v4671_v18, 4  ;;  %v4676_v37 = vrot.slane %v4674_v21, 5  ;;  %v7926_v0 = vcombine.low %v5714_v27, %v9750_v54 }
 0x2d3   :  { %v4680_v56 = vshll.u32 %v4495_v31, 16  ;;  %v4043_v22 = vrot.slane %v3952_v14, 5  ;;  %v4685_v46 = vshrl.u32 %v4496_v48, 16  ;;  %v4688_v52 = vshll.u32 %v4496_v48, 16  ;;  %v4963_v42 = vld [vmem:[#allocation3 + $0x3c] sm:$0x3] }
 0x2d4   :  { %v5089_v25 = vsel %vm8681_vm13, %v5080_v2, %v5088_v23  ;;  %v4497_v13 = vld [vmem:[#allocation3 + $0x84] sm:$0x1]  ;;  %v4677_v58 = vor.u32 %v4676_v37, %v4673_v39  ;;  %v3514_v54 = vrot.slane %v8019_v34, 7  ;;  %v4715_v51 = vrot.slane %v4713_v19, 4  ;;  %v4964_v21 = vld [vmem:[#allocation3 + $0x40] sm:$0xe] }
 0x2d5   :  { %v4682_v28 = vrot.slane %v4680_v56, 5  ;;  %v7893_v62 = vcombine.low %v5071_v38, %v5089_v25  ;;  %v4687_v9 = vrot.slane %v4685_v46, 4  ;;  %v4690_v45 = vrot.slane %v4688_v52, 5  ;;  %v8384_v10 = vld [vmem:[%s10936_s4 + $0xb0] sm:$0xff]   ;;  %v8385_v14 = vld [vmem:[%s10936_s4 + $0xf8] sm:$0xff]  }
 0x2d6   :  { %v4694_v50 = vshll.u32 %v4497_v13, 16  ;;  %v9905_v30 = vsel %vm8634_vm7, %v7840_v55, %v4043_v22  ;;  %v4678_v61 = vrot.slane %v4677_v58, 4  ;;  %v4716_v59 = vshll.u32 %v9879_v49, 16  ;;  %3581 = vst.msk [vmem:[#allocation3 + $0x88] sm:$0xe] %vm3551_vm8, %v3514_v54  ;;  %8172 = vmatpush3.bf16.msra.mxu0 %v8384_v10  ;;  %v8386_v52 = vld [vmem:[%s10936_s4 + $0xb8] sm:$0xff]  }
 0x2d7   :  { %5298 = vrot.lane.b32.xlu1 %v7893_v62, %s8425_s23  ;;  %v4691_v3 = vor.u32 %v4690_v45, %v4687_v9  ;;  %v4722_v18 = vshll.u32 %v4501_v12, 16  ;;  %v5091_v23 = vshrl.u32 %v4962_v35, 16  ;;  %v3515_v38 = vrot.slane %v3514_v54, 4  ;;  %v4965_v49 = vld [vmem:[#allocation3 + $0x44] sm:$0x3]  ;;  %8173 = vmatprep.subr.bf16.mxu0 %v8385_v14 }
 0x2d8   :  { %v4696_v17 = vrot.slane %v4694_v50, 5  ;;  %v4683_v31 = vsel %vm8661_vm12, %v4678_v61, %v4682_v28  ;;  %v4718_v19 = vrot.slane %v4716_v59, 5  ;;  %v5094_v2 = vshll.u32 %v4962_v35, 16  ;;  %v3953_v58 = vld [vmem:[#allocation3 + $0x80] sm:$0xe] }
 0x2d9   :  { %v4692_v27 = vrot.slane %v4691_v3, 4  ;;  %v9921_v34 = vrot.slane %v4722_v18, 5  ;;  %v5093_v48 = vrot.slane %v5091_v23, 5  ;;  %v5100_v39 = vshrl.u32 %v4963_v42, 16  ;;  %3582 = vst.msk [vmem:[#allocation3 + $0x8c] sm:$0x1] %vm3553_vm2, %v3515_v38 }
 0x2da   :  { %v4719_v37 = vor.u32 %v4718_v19, %v4715_v51  ;;  %v5096_v56 = vrot.slane %v5094_v2, 6  ;;  %v5103_v22 = vshll.u32 %v4963_v42, 16  ;;  %v5109_v46 = vshrl.u32 %v4964_v21, 16  ;;  %v3954_v6 = vld [vmem:[#allocation3 + $0x84] sm:$0x1]  ;;  %8174 = vmatpush3.bf16.msra.mxu0 %v8386_v52 }
 0x2db   :  { %5781 = vrot.lane.b32.xlu1 %v7926_v0, %s8425_s23  ;;  %v4697_v25 = vsel %vm8661_vm12, %v4692_v27, %v4696_v17  ;;  %v5102_v55 = vrot.slane %v5100_v39, 5  ;;  %v5112_v12 = vshll.u32 %v4964_v21, 16  ;;  %v5118_v13 = vshrl.u32 %v4965_v49, 16  ;;  %v4966_v42 = vld [vmem:[#allocation3 + $0x58] sm:$0xe] }
 0x2dc   :  { %v7865_v28 = vcombine.low %v4683_v31, %v4697_v25  ;;  %v9930_v62 = vrot.slane %v4719_v37, 4  ;;  %v5097_v0 = vor.u32 %v5096_v56, %v5093_v48  ;;  %v5105_v35 = vrot.slane %v5103_v22, 6  ;;  %v4967_v19 = vld [vmem:[#allocation3 + $0x5c] sm:$0x3]  ;;  %v4969_v25 = vld [vmem:[#allocation3 + $0x64] sm:$0x3] }
 0x2dd   :  { %v5111_v9 = vrot.slane %v5109_v46, 5  ;;  %v5114_v45 = vrot.slane %v5112_v12, 6  ;;  %v5120_v50 = vrot.slane %v5118_v13, 5  ;;  %v5121_v41 = vshll.u32 %v4965_v49, 16  ;;  %v4498_v3 = vld [vmem:[#allocation3 + $0x88] sm:$0xf] }
 0x2de   :  { %4762 = vrot.lane.b32.xlu0 %v7865_v28, %s8425_s23  ;;  %v7849_v61 = vcombine.low %v9888_v8, %v9905_v30  ;;  %v5098_v54 = vrot.slane %v5097_v0, 4  ;;  %v5106_v51 = vor.u32 %v5105_v35, %v5102_v55  ;;  %v7841_v59 = vrot.slane %v3953_v58, 9  ;;  %v3955_v23 = vld [vmem:[#allocation3 + $0x88] sm:$0xe]  ;;  %v4968_v46 = vld [vmem:[#allocation3 + $0x60] sm:$0xe] }
 0x2df   :  { %v4725_v17 = vsel %vm8661_vm12, %v9930_v62, %v9921_v34  ;;  %v5115_v18 = vor.u32 %v5114_v45, %v5111_v9  ;;  %v5123_v21 = vrot.slane %v5121_v41, 6  ;;  %v4047_v10 = vrot.slane %v3954_v6, 5  ;;  %v5639_v35 = vld [vmem:[#allocation3 + $0x60] sm:$0xe]  ;;  %v5640_v41 = vld [vmem:[#allocation3 + $0x64] sm:$0x1] }
 0x2e0   :  { %v4699_v31 = vshrl.u32 %v4498_v3, 16  ;;  %v4702_v38 = vshll.u32 %v4498_v3, 16  ;;  %v5107_v8 = vsel %vm8681_vm13, %v5098_v54, %v5106_v51  ;;  %v7842_v30 = vrot.slane %v3955_v23, 9  ;;  %v4499_v49 = vld [vmem:[#allocation3 + $0x8c] sm:$0x1] }
 0x2e1   :  { %v5116_v2 = vrot.slane %v5115_v18, 4  ;;  %v5124_v14 = vor.u32 %v5123_v21, %v5120_v50  ;;  %v3956_v27 = vld [vmem:[#allocation3 + $0x8c] sm:$0x1]  ;;  %v9943_v48 = vsel %vm8634_vm7, %v7841_v59, %v4047_v10  ;;  %v5127_v34 = vshrl.u32 %v4966_v42, 16 }
 0x2e2   :  { %4089 = vrot.lane.b32.xlu0 %v7849_v61, %s8425_s23  ;;  %v4701_v39 = vrot.slane %v4699_v31, 4  ;;  %v4704_v37 = vrot.slane %v4702_v38, 5  ;;  %v4708_v56 = vshll.u32 %v4499_v49, 16  ;;  %v4051_v22 = vrot.slane %v3956_v27, 5  ;;  %v5642_v23 = vld [vmem:[#allocation3 + $0x6c] sm:$0x1] }
 0x2e3   :  { %v5125_v52 = vsel %vm8681_vm13, %v5116_v2, %v5124_v14  ;;  %v5129_v55 = vrot.slane %v5127_v34, 5  ;;  %v5130_v12 = vshll.u32 %v4966_v42, 16  ;;  %v5136_v13 = vshrl.u32 %v4967_v19, 16  ;;  %v5641_v42 = vld [vmem:[#allocation3 + $0x68] sm:$0xe] }
 0x2e4   :  { %v4705_v58 = vor.u32 %v4704_v37, %v4701_v39  ;;  %v4710_v28 = vrot.slane %v4708_v56, 5  ;;  %v7894_v62 = vcombine.low %v5107_v8, %v5125_v52  ;;  %v4052_v0 = vsel %vm8634_vm7, %v7842_v30, %v4051_v22  ;;  %v4972_v52 = vld [vmem:[#allocation3 + $0x70] sm:$0xe] }
 0x2e5   :  { %v7850_v6 = vcombine.low %v9943_v48, %v4052_v0  ;;  %v5132_v9 = vrot.slane %v5130_v12, 6  ;;  %v5138_v45 = vrot.slane %v5136_v13, 5  ;;  %v5139_v50 = vshll.u32 %v4967_v19, 16  ;;  %v4970_v19 = vld [vmem:[#allocation3 + $0x68] sm:$0xe] }
 0x2e6   :  { %v4706_v61 = vrot.slane %v4705_v58, 4  ;;  %5300 = vrot.lane.b32.xlu1 %v7894_v62, %s8425_s23  ;;  %v5145_v54 = vshrl.u32 %v4968_v46, 16  ;;  %v5148_v51 = vshll.u32 %v4968_v46, 16  ;;  %v5154_v59 = vshrl.u32 %v4969_v25, 16  ;;  %v4971_v48 = vld [vmem:[#allocation3 + $0x6c] sm:$0x3] }
 0x2e7   :  { %v5133_v3 = vor.u32 %v5132_v9, %v5129_v55  ;;  %v5141_v18 = vrot.slane %v5139_v50, 6  ;;  %v5157_v21 = vshll.u32 %v4969_v25, 16  ;;  %v7915_v10 = vrot.slane %v5639_v35, 9  ;;  %v4973_v58 = vld [vmem:[#allocation3 + $0x74] sm:$0x3] }
 0x2e8   :  { %v4711_v31 = vsel %vm8661_vm12, %v4706_v61, %v4710_v28  ;;  %v5147_v38 = vrot.slane %v5145_v54, 5  ;;  %v5150_v8 = vrot.slane %v5148_v51, 6  ;;  %v5156_v30 = vrot.slane %v5154_v59, 5  ;;  %v5644_v51 = vld [vmem:[#allocation3 + $0x74] sm:$0x1] }
 0x2e9   :  { %v7866_v49 = vcombine.low %v4711_v31, %v4725_v17  ;;  %v5134_v2 = vrot.slane %v5133_v3, 4  ;;  %v5142_v14 = vor.u32 %v5141_v18, %v5138_v45  ;;  %v5159_v27 = vrot.slane %v5157_v21, 6  ;;  %v5643_v45 = vld [vmem:[#allocation3 + $0x70] sm:$0xe]  ;;  %v5645_v21 = vld [vmem:[#allocation3 + $0x78] sm:$0xe] }
 0x2ea   :  { %v5151_v34 = vor.u32 %v5150_v8, %v5147_v38  ;;  %v5721_v39 = vrot.slane %v5640_v41, 5  ;;  %v7916_v37 = vrot.slane %v5641_v42, 9  ;;  %v5725_v56 = vrot.slane %v5642_v23, 5  ;;  %v5646_v23 = vld [vmem:[#allocation3 + $0x7c] sm:$0x1] }
 0x2eb   :  { %4764 = vrot.lane.b32.xlu0 %v7866_v49, %s8425_s23  ;;  %v5143_v22 = vsel %vm8681_vm13, %v5134_v2, %v5142_v14  ;;  %v5160_v46 = vor.u32 %v5159_v27, %v5156_v30  ;;  %v5163_v25 = vshrl.u32 %v4970_v19, 16  ;;  %v5166_v55 = vshll.u32 %v4970_v19, 16  ;;  %v4974_v30 = vld [vmem:[#allocation3 + $0x78] sm:$0xe]  ;;  %v4975_v27 = vld [vmem:[#allocation3 + $0x7c] sm:$0x3] }
 0x2ec   :  { %v5152_v12 = vrot.slane %v5151_v34, 4  ;;  %v5722_v17 = vsel %vm8634_vm7, %v7915_v10, %v5721_v39  ;;  %v5726_v13 = vsel %vm8634_vm7, %v7916_v37, %v5725_v56  ;;  %v5172_v28 = vshrl.u32 %v4971_v48, 16 }
 0x2ed   :  { %v7927_v62 = vcombine.low %v5722_v17, %v5726_v13  ;;  %v5165_v0 = vrot.slane %v5163_v25, 5  ;;  %v5168_v35 = vrot.slane %v5166_v55, 6  ;;  %v5175_v9 = vshll.u32 %v4971_v48, 16  ;;  %v4977_v17 = vld [vmem:[#allocation3 + $0x84] sm:$0x3] }
 0x2ee   :  { %v5161_v50 = vsel %vm8681_vm13, %v5152_v12, %v5160_v46  ;;  %v5174_v41 = vrot.slane %v5172_v28, 5  ;;  %v5181_v61 = vshrl.u32 %v4972_v52, 16  ;;  %v5184_v54 = vshll.u32 %v4972_v52, 16 }
 0x2ef   :  { %4091 = vrot.lane.b32.xlu0 %v7850_v6, %s8425_s23  ;;  %v7895_v59 = vcombine.low %v5143_v22, %v5161_v50  ;;  %v5169_v42 = vor.u32 %v5168_v35, %v5165_v0  ;;  %v5177_v3 = vrot.slane %v5175_v9, 6  ;;  %v5190_v18 = vshrl.u32 %v4973_v58, 16  ;;  %v4976_v22 = vld [vmem:[#allocation3 + $0x80] sm:$0xe] }
 0x2f0   :  { %v5183_v10 = vrot.slane %v5181_v61, 5  ;;  %v5186_v31 = vrot.slane %v5184_v54, 6  ;;  %v5193_v38 = vshll.u32 %v4973_v58, 16  ;;  %v7917_v8 = vrot.slane %v5643_v45, 9  ;;  %v5647_v35 = vld [vmem:[#allocation3 + $0x80] sm:$0xe] }
 0x2f1   :  { %5302 = vrot.lane.b32.xlu1 %v7895_v59, %s8425_s23  ;;  %v5170_v19 = vrot.slane %v5169_v42, 4  ;;  %v5178_v49 = vor.u32 %v5177_v3, %v5174_v41  ;;  %v5192_v2 = vrot.slane %v5190_v18, 5  ;;  %v5729_v14 = vrot.slane %v5644_v51, 5  ;;  %v5648_v61 = vld [vmem:[#allocation3 + $0x84] sm:$0x1] }
 0x2f2   :  { %v5187_v48 = vor.u32 %v5186_v31, %v5183_v10  ;;  %v5195_v6 = vrot.slane %v5193_v38, 6  ;;  %v7918_v34 = vrot.slane %v5645_v21, 9  ;;  %v5733_v39 = vrot.slane %v5646_v23, 5  ;;  %v5649_v3 = vld [vmem:[#allocation3 + $0x88] sm:$0xe] }
 0x2f3   :  { %5783 = vrot.lane.b32.xlu0 %v7927_v62, %s8425_s23  ;;  %v5179_v37 = vsel %vm8681_vm13, %v5170_v19, %v5178_v49  ;;  %v5730_v56 = vsel %vm8634_vm7, %v7917_v8, %v5729_v14  ;;  %v5199_v46 = vshrl.u32 %v4974_v30, 16  ;;  %v5202_v52 = vshll.u32 %v4974_v30, 16  ;;  %v5650_v18 = vld [vmem:[#allocation3 + $0x8c] sm:$0x1]  ;;  %v4978_v38 = vld [vmem:[#allocation3 + $0x88] sm:$0xe] }
 0x2f4   :  { %v5188_v25 = vrot.slane %v5187_v48, 4  ;;  %v5196_v55 = vor.u32 %v5195_v6, %v5192_v2  ;;  %v5734_v12 = vsel %vm8634_vm7, %v7918_v34, %v5733_v39  ;;  %v5208_v13 = vshrl.u32 %v4975_v27, 16  ;;  %v4979_v2 = vld [vmem:[#allocation3 + $0x8c] sm:$0x3] }
 0x2f5   :  { %v7928_v58 = vcombine.low %v5730_v56, %v5734_v12  ;;  %v5201_v28 = vrot.slane %v5199_v46, 5  ;;  %v5204_v0 = vrot.slane %v5202_v52, 6  ;;  %v5211_v62 = vshll.u32 %v4975_v27, 16 }
 0x2f6   :  { %v5197_v9 = vsel %vm8681_vm13, %v5188_v25, %v5196_v55  ;;  %v5210_v45 = vrot.slane %v5208_v13, 5  ;;  %v5217_v50 = vshrl.u32 %v4976_v22, 16  ;;  %v5220_v41 = vshll.u32 %v4976_v22, 16  ;;  %v4981_v55 = vld [vmem:[#allocation3 + $0x94] sm:$0x3] }
 0x2f7   :  { %v7896_v54 = vcombine.low %v5179_v37, %v5197_v9  ;;  %5785 = vrot.lane.b32.xlu0 %v7928_v58, %s8425_s23  ;;  %v5205_v51 = vor.u32 %v5204_v0, %v5201_v28  ;;  %v5213_v59 = vrot.slane %v5211_v62, 6  ;;  %v5226_v42 = vshrl.u32 %v4977_v17, 16  ;;  %v4980_v37 = vld [vmem:[#allocation3 + $0x90] sm:$0xe] }
 0x2f8   :  { %v5219_v21 = vrot.slane %v5217_v50, 5  ;;  %v5222_v23 = vrot.slane %v5220_v41, 6  ;;  %v5229_v10 = vshll.u32 %v4977_v17, 16  ;;  %v7919_v31 = vrot.slane %v5647_v35, 9  ;;  %v5651_v0 = vld [vmem:[#allocation3 + $0x90] sm:$0xe] }
 0x2f9   :  { %5304 = vrot.lane.b32.xlu1 %v7896_v54, %s8425_s23  ;;  %v5206_v8 = vrot.slane %v5205_v51, 4  ;;  %v5214_v30 = vor.u32 %v5213_v59, %v5210_v45  ;;  %v5228_v19 = vrot.slane %v5226_v42, 5  ;;  %v5737_v49 = vrot.slane %v5648_v61, 5  ;;  %v5652_v50 = vld [vmem:[#allocation3 + $0x94] sm:$0x1] }
 0x2fa   :  { %v5223_v14 = vor.u32 %v5222_v23, %v5219_v21  ;;  %v5231_v27 = vrot.slane %v5229_v10, 6  ;;  %v7920_v48 = vrot.slane %v5649_v3, 9  ;;  %v5741_v6 = vrot.slane %v5650_v18, 5  ;;  %v5653_v59 = vld [vmem:[#allocation3 + $0x98] sm:$0xe] }
 0x2fb   :  { %v5215_v34 = vsel %vm8681_vm13, %v5206_v8, %v5214_v30  ;;  %v5738_v39 = vsel %vm8634_vm7, %v7919_v31, %v5737_v49  ;;  %v5235_v56 = vshrl.u32 %v4978_v38, 16  ;;  %v5238_v22 = vshll.u32 %v4978_v38, 16  ;;  %v5654_v42 = vld [vmem:[#allocation3 + $0x9c] sm:$0x1]  ;;  %v3629_v10 = vld [vmem:[#allocation3] sm:$0xf] }
 0x2fc   :  { %v5224_v46 = vrot.slane %v5223_v14, 4  ;;  %v5232_v52 = vor.u32 %v5231_v27, %v5228_v19  ;;  %v5742_v25 = vsel %vm8634_vm7, %v7920_v48, %v5741_v6  ;;  %v5244_v12 = vshrl.u32 %v4979_v2, 16  ;;  %v3630_v19 = vld [vmem:[#allocation3 + $0x4] sm:$0x1]  ;;  %v3631_v48 = vld [vmem:[#allocation3 + $0x8] sm:$0xf] }
 0x2fd   :  { %v7929_v17 = vcombine.low %v5738_v39, %v5742_v25  ;;  %v5237_v13 = vrot.slane %v5235_v56, 5  ;;  %v5240_v58 = vrot.slane %v5238_v22, 6  ;;  %v5247_v28 = vshll.u32 %v4979_v2, 16  ;;  %v3632_v25 = vld [vmem:[#allocation3 + $0xc] sm:$0x1] }
 0x2fe   :  { %v5233_v62 = vsel %vm8681_vm13, %v5224_v46, %v5232_v52  ;;  %v5246_v35 = vrot.slane %v5244_v12, 5  ;;  %v5253_v9 = vshrl.u32 %v4980_v37, 16  ;;  %v5256_v45 = vshll.u32 %v4980_v37, 16 }
 0x2ff   :  { %v7897_v41 = vcombine.low %v5215_v34, %v5233_v62  ;;  %5787 = vrot.lane.b32.xlu0 %v7929_v17, %s8425_s23  ;;  %v5241_v61 = vor.u32 %v5240_v58, %v5237_v13  ;;  %v5249_v54 = vrot.slane %v5247_v28, 6  ;;  %v5262_v51 = vshrl.u32 %v4981_v55, 16  ;;  %v4111_v28 = vld [vmem:[#allocation3 + $0x4] sm:$0x3] }
 0x300   :  { %v5255_v3 = vrot.slane %v5253_v9, 5  ;;  %v5258_v18 = vrot.slane %v5256_v45, 6  ;;  %v5265_v21 = vshll.u32 %v4981_v55, 16  ;;  %v7921_v23 = vrot.slane %v5651_v0, 9  ;;  %v4110_v55 = vld [vmem:[#allocation3] sm:$0xe] }
 0x301   :  { %5306 = vrot.lane.b32.xlu1 %v7897_v41, %s8425_s23  ;;  %v5242_v31 = vrot.slane %v5241_v61, 4  ;;  %v5250_v38 = vor.u32 %v5249_v54, %v5246_v35  ;;  %v5264_v8 = vrot.slane %v5262_v51, 5  ;;  %v5745_v30 = vrot.slane %v5652_v50, 5  ;;  %v4112_v9 = vld [vmem:[#allocation3 + $0x8] sm:$0xe] }
 0x302   :  { %v5259_v49 = vor.u32 %v5258_v18, %v5255_v3  ;;  %v5267_v2 = vrot.slane %v5265_v21, 6  ;;  %v7922_v14 = vrot.slane %v5653_v59, 9  ;;  %v5749_v27 = vrot.slane %v5654_v42, 5  ;;  %v7802_v54 = vld [vmem:[%s10939_s7] ss:$0 sm:$0xff] }
 0x303   :  { %v5251_v6 = vsel %vm8681_vm13, %v5242_v31, %v5250_v38  ;;  %v5746_v34 = vsel %vm8634_vm7, %v7921_v23, %v5745_v30  ;;  %v3662_v39 = vshrl.u32 %v3629_v10, 16  ;;  %v3665_v37 = vshll.u32 %v3629_v10, 16  ;;  %v4113_v31 = vld [vmem:[#allocation3 + $0xc] sm:$0x3] }
 0x304   :  { %v5260_v56 = vrot.slane %v5259_v49, 4  ;;  %v5268_v22 = vor.u32 %v5267_v2, %v5264_v8  ;;  %v5750_v46 = vsel %vm8634_vm7, %v7922_v14, %v5749_v27  ;;  %v3671_v52 = vshll.u32 %v3630_v19, 16  ;;  %v3633_v49 = vld [vmem:[#allocation3 + $0x10] sm:$0xf] }
 0x305   :  { %v7930_v12 = vcombine.low %v5746_v34, %v5750_v46  ;;  %v3664_v17 = vrot.slane %v3662_v39, 4  ;;  %v3667_v13 = vrot.slane %v3665_v37, 5  ;;  %v3676_v58 = vshrl.u32 %v3631_v48, 16 }
 0x306   :  { %v5269_v0 = vsel %vm8681_vm13, %v5260_v56, %v5268_v22  ;;  %v3673_v62 = vrot.slane %v3671_v52, 5  ;;  %v3679_v35 = vshll.u32 %v3631_v48, 16  ;;  %v3685_v61 = vshll.u32 %v3632_v25, 16  ;;  %v3634_v56 = vld [vmem:[#allocation3 + $0x14] sm:$0x1] }
 0x307   :  { %v7898_v45 = vcombine.low %v5251_v6, %v5269_v0  ;;  %5789 = vrot.lane.b32.xlu0 %v7930_v12, %s8425_s23  ;;  %v3668_v50 = vor.u32 %v3667_v13, %v3664_v17  ;;  %v3678_v41 = vrot.slane %v3676_v58, 4  ;;  %v4143_v59 = vshrl.u32 %v4110_v55, 16  ;;  %v3635_v52 = vld [vmem:[#allocation3 + $0x18] sm:$0xf]  ;;  %v4078_v0 = vpop.permute.xlu1 %4077 }
 0x308   :  { %v3681_v51 = vrot.slane %v3679_v35, 5  ;;  %v4146_v42 = vshll.u32 %v4110_v55, 16  ;;  %v4152_v3 = vshrl.u32 %v4111_v28, 16  ;;  %v3687_v21 = vrot.slane %v3685_v61, 5 }
 0x309   :  { %5308 = vrot.lane.b32.xlu1 %v7898_v45, %s8425_s23  ;;  %v3669_v18 = vrot.slane %v3668_v50, 4  ;;  %v4155_v23 = vshll.u32 %v4111_v28, 16  ;;  %v4161_v10 = vshrl.u32 %v4112_v9, 16  ;;  %v4145_v8 = vrot.slane %v4143_v59, 5  ;;  %v3636_v28 = vld [vmem:[#allocation3 + $0x1c] sm:$0x1] }
 0x30a   :  { %v3682_v38 = vor.u32 %v3681_v51, %v3678_v41  ;;  %v4148_v30 = vrot.slane %v4146_v42, 6  ;;  %v4154_v19 = vrot.slane %v4152_v3, 5  ;;  %v4164_v48 = vshll.u32 %v4112_v9, 16  ;;  %v4114_v50 = vld [vmem:[#allocation3 + $0x10] sm:$0xe] }
 0x30b   :  { %3240 = vrot.lane.b32.xlu0 %v7802_v54, %s8425_s23  ;;  %v3674_v2 = vsel %vm8661_vm12, %v3669_v18, %v3673_v62  ;;  %v4157_v14 = vrot.slane %v4155_v23, 6  ;;  %v4163_v27 = vrot.slane %v4161_v10, 5  ;;  %v4170_v39 = vshrl.u32 %v4113_v31, 16 }
 0x30c   :  { %v3683_v6 = vrot.slane %v3682_v38, 4  ;;  %v4149_v34 = vor.u32 %v4148_v30, %v4145_v8  ;;  %v4173_v37 = vshll.u32 %v4113_v31, 16  ;;  %v4166_v46 = vrot.slane %v4164_v48, 6  ;;  %v4116_v31 = vld [vmem:[#allocation3 + $0x18] sm:$0xe] }
 0x30d   :  { %v4158_v22 = vor.u32 %v4157_v14, %v4154_v19  ;;  %v3690_v25 = vshrl.u32 %v3633_v49, 16  ;;  %v3693_v55 = vshll.u32 %v3633_v49, 16  ;;  %v4172_v13 = vrot.slane %v4170_v39, 5  ;;  %v4117_v14 = vld [vmem:[#allocation3 + $0x1c] sm:$0x3] }
 0x30e   :  { %v3688_v12 = vsel %vm8661_vm12, %v3683_v6, %v3687_v21  ;;  %v4150_v17 = vrot.slane %v4149_v34, 4  ;;  %v4175_v58 = vrot.slane %v4173_v37, 6  ;;  %v4167_v35 = vor.u32 %v4166_v46, %v4163_v27  ;;  %v4115_v21 = vld [vmem:[#allocation3 + $0x14] sm:$0x3]  ;;  %v4751_v27 = vpop.permute.xlu0 %4750 }
 0x30f   :  { %v7819_v62 = vcombine.low %v3674_v2, %v3688_v12  ;;  %v3692_v9 = vrot.slane %v3690_v25, 4  ;;  %v3695_v45 = vrot.slane %v3693_v55, 5  ;;  %v3699_v54 = vshll.u32 %v3634_v56, 16 }
 0x310   :  { %v4159_v41 = vsel %vm8681_vm13, %v4150_v17, %v4158_v22  ;;  %v4176_v61 = vor.u32 %v4175_v58, %v4172_v13  ;;  %v3704_v51 = vshrl.u32 %v3635_v52, 16  ;;  %v4168_v59 = vrot.slane %v4167_v35, 4 }
 0x311   :  { %3917 = vst.msk [vmem:[#allocation5] sm:$0xff] %vm3259_vm5, %v7819_v62  ;;  %v3696_v42 = vor.u32 %v3695_v45, %v3692_v9  ;;  %v3707_v3 = vshll.u32 %v3635_v52, 16  ;;  %v3713_v18 = vshll.u32 %v3636_v28, 16  ;;  %v3701_v23 = vrot.slane %v3699_v54, 5  ;;  %v3637_v52 = vld [vmem:[#allocation3 + $0x20] sm:$0xf] }
 0x312   :  { %4102 = vst.msk [vmem:[#allocation5] sm:$0xff] %vm4101_vm9, %v4078_v0  ;;  %v3706_v10 = vrot.slane %v3704_v51, 4  ;;  %v4179_v38 = vshrl.u32 %v4114_v50, 16  ;;  %v4182_v8 = vshll.u32 %v4114_v50, 16  ;;  %v4177_v30 = vsel %vm8681_vm13, %v4168_v59, %v4176_v61  ;;  %v3638_v62 = vld [vmem:[#allocation3 + $0x24] sm:$0x1] }
 0x313   :  { %v3697_v19 = vrot.slane %v3696_v42, 4  ;;  %v3709_v49 = vrot.slane %v3707_v3, 5  ;;  %v3715_v2 = vrot.slane %v3713_v18, 5  ;;  %v7851_v48 = vcombine.low %v4159_v41, %v4177_v30  ;;  %v3639_v50 = vld [vmem:[#allocation3 + $0x28] sm:$0xf]  ;;  %v4080_v18 = vpop.permute.xlu1 %4079 }
 0x314   :  { %v4181_v6 = vrot.slane %v4179_v38, 5  ;;  %v4184_v34 = vrot.slane %v4182_v8, 6  ;;  %v4188_v39 = vshrl.u32 %v4115_v21, 16  ;;  %v4191_v22 = vshll.u32 %v4115_v21, 16  ;;  %v3640_v59 = vld [vmem:[#allocation3 + $0x2c] sm:$0x1] }
 0x315   :  { %v3702_v37 = vsel %vm8661_vm12, %v3697_v19, %v3701_v23  ;;  %v3710_v56 = vor.u32 %v3709_v49, %v3706_v10  ;;  %v4197_v46 = vshrl.u32 %v4116_v31, 16  ;;  %4462 = vst.msk [vmem:[#allocation5 + $0x8] sm:$0xff] %vm3259_vm5, %v7851_v48  ;;  %v4200_v12 = vshll.u32 %v4116_v31, 16  ;;  %v4118_v31 = vld [vmem:[#allocation3 + $0x20] sm:$0xe] }
 0x316   :  { %v4185_v25 = vor.u32 %v4184_v34, %v4181_v6  ;;  %v4190_v55 = vrot.slane %v4188_v39, 5  ;;  %v4206_v17 = vshrl.u32 %v4117_v14, 16  ;;  %4774 = vst.msk [vmem:[#allocation5 + $0x8] sm:$0xff] %vm4101_vm9, %v4751_v27  ;;  %v4193_v58 = vrot.slane %v4191_v22, 6  ;;  %v4119_v49 = vld [vmem:[#allocation3 + $0x24] sm:$0x3] }
 0x317   :  { %v3711_v13 = vrot.slane %v3710_v56, 4  ;;  %v4199_v28 = vrot.slane %v4197_v46, 5  ;;  %v4209_v0 = vshll.u32 %v4117_v14, 16  ;;  %v4202_v9 = vrot.slane %v4200_v12, 6  ;;  %v4120_v39 = vld [vmem:[#allocation3 + $0x28] sm:$0xe] }
 0x318   :  { %v4186_v35 = vrot.slane %v4185_v25, 4  ;;  %v4208_v45 = vrot.slane %v4206_v17, 5  ;;  %v3718_v41 = vshrl.u32 %v3637_v52, 16  ;;  %v4194_v54 = vor.u32 %v4193_v58, %v4190_v55  ;;  %v8387_v22 = vld [vmem:[%s10936_s4 + $0x108] sm:$0xff]   ;;  %v4753_v58 = vpop.permute.xlu0 %4752 }
 0x319   :  { %v3716_v61 = vsel %vm8661_vm12, %v3711_v13, %v3715_v2  ;;  %v4211_v51 = vrot.slane %v4209_v0, 6  ;;  %v3721_v42 = vshll.u32 %v3637_v52, 16  ;;  %v4203_v21 = vor.u32 %v4202_v9, %v4199_v28  ;;  %v4121_v55 = vld [vmem:[#allocation3 + $0x2c] sm:$0x3] }
 0x31a   :  { %v7820_v3 = vcombine.low %v3702_v37, %v3716_v61  ;;  %v3720_v23 = vrot.slane %v3718_v41, 4  ;;  %v3727_v10 = vshll.u32 %v3638_v62, 16  ;;  %v4195_v38 = vsel %vm8681_vm13, %v4186_v35, %v4194_v54  ;;  %v6167_v35 = vld [vmem:[#allocation5] sm:$0xff]  ;;  %v3641_v61 = vld [vmem:[#allocation3 + $0x30] sm:$0xf] }
 0x31b   :  { %v4212_v8 = vor.u32 %v4211_v51, %v4208_v45  ;;  %v3723_v30 = vrot.slane %v3721_v42, 5  ;;  %v3732_v19 = vshrl.u32 %v3639_v50, 16  ;;  %v4204_v2 = vrot.slane %v4203_v21, 4 }
 0x31c   :  { %3918 = vst.msk [vmem:[#allocation5 + $0x28] sm:$0xff] %vm3259_vm5, %v7820_v3  ;;  %v3729_v14 = vrot.slane %v3727_v10, 5  ;;  %v3735_v27 = vshll.u32 %v3639_v50, 16  ;;  %v3741_v48 = vshll.u32 %v3640_v59, 16  ;;  %v4215_v37 = vshrl.u32 %v4118_v31, 16 }
 0x31d   :  { %4103 = vst.msk [vmem:[#allocation5 + $0x28] sm:$0xff] %vm4101_vm9, %v4080_v18  ;;  %v3724_v6 = vor.u32 %v3723_v30, %v3720_v23  ;;  %v3734_v34 = vrot.slane %v3732_v19, 4  ;;  %v4218_v56 = vshll.u32 %v4118_v31, 16  ;;  %v4213_v46 = vsel %vm8681_vm13, %v4204_v2, %v4212_v8  ;;  %v6168_v17 = vld [vmem:[#allocation5 + $0x8] sm:$0xff]  ;;  %v3642_v3 = vld [vmem:[#allocation3 + $0x34] sm:$0x1] }
 0x31e   :  { %v3737_v52 = vrot.slane %v3735_v27, 5  ;;  %v3743_v25 = vrot.slane %v3741_v48, 5  ;;  %v4224_v12 = vshrl.u32 %v4119_v49, 16  ;;  %v7852_v13 = vcombine.low %v4195_v38, %v4213_v46  ;;  %6551 = vmatprep.mubr.bf16.mxu1 %v6168_v17  ;;  %v8388_v31 = vld [vmem:[%s10936_s4 + $0x110] sm:$0xff]   ;;  %v3643_v19 = vld [vmem:[#allocation3 + $0x38] sm:$0xf] }
 0x31f   :  { %v3725_v28 = vrot.slane %v3724_v6, 4  ;;  %v4217_v0 = vrot.slane %v4215_v37, 5  ;;  %v4220_v62 = vrot.slane %v4218_v56, 6  ;;  %v4227_v50 = vshll.u32 %v4119_v49, 16  ;;  %6552 = vmatmul.mubr.bf16.vlgmr.msra.gmra.mrb[16].mxu1 %v6167_v35  ;;  %v3644_v27 = vld [vmem:[#allocation3 + $0x3c] sm:$0x1] }
 0x320   :  { %v3738_v9 = vor.u32 %v3737_v52, %v3734_v34  ;;  %v4226_v45 = vrot.slane %v4224_v12, 5  ;;  %v4233_v41 = vshrl.u32 %v4120_v39, 16  ;;  %4463 = vst.msk [vmem:[#allocation5 + $0x30] sm:$0xff] %vm3259_vm5, %v7852_v13  ;;  %v4236_v59 = vshll.u32 %v4120_v39, 16  ;;  %8267 = vmatpush3.bf16.msra.mxu1 %v9870_v20  ;;  %v4082_v34 = vpop.permute.xlu1 %4081  ;;  %v4122_v46 = vld [vmem:[#allocation3 + $0x30] sm:$0xe] }
 0x321   :  { %v3730_v54 = vsel %vm8661_vm12, %v3725_v28, %v3729_v14  ;;  %v4221_v51 = vor.u32 %v4220_v62, %v4217_v0  ;;  %v4242_v42 = vshrl.u32 %v4121_v55, 16  ;;  %4775 = vst.msk [vmem:[#allocation5 + $0x30] sm:$0xff] %vm4101_vm9, %v4753_v58  ;;  %v4229_v21 = vrot.slane %v4227_v50, 6  ;;  %8268 = vmatprep.subr.bf16.mxu1 %v8387_v22  ;;  %v4123_v13 = vld [vmem:[#allocation3 + $0x34] sm:$0x3] }
 0x322   :  { %v3739_v18 = vrot.slane %v3738_v9, 4  ;;  %v4235_v23 = vrot.slane %v4233_v41, 5  ;;  %v4245_v10 = vshll.u32 %v4121_v55, 16  ;;  %v4238_v8 = vrot.slane %v4236_v59, 6  ;;  %v4124_v9 = vld [vmem:[#allocation3 + $0x38] sm:$0xe] }
 0x323   :  { %v4222_v38 = vrot.slane %v4221_v51, 4  ;;  %v4244_v30 = vrot.slane %v4242_v42, 5  ;;  %v3746_v49 = vshrl.u32 %v3641_v61, 16  ;;  %v4230_v20 = vor.u32 %v4229_v21, %v4226_v45  ;;  %v4125_v51 = vld [vmem:[#allocation3 + $0x3c] sm:$0x3] }
 0x324   :  { %v3744_v2 = vsel %vm8661_vm12, %v3739_v18, %v3743_v25  ;;  %v4247_v14 = vrot.slane %v4245_v10, 6  ;;  %v3749_v48 = vshll.u32 %v3641_v61, 16  ;;  %v4239_v39 = vor.u32 %v4238_v8, %v4235_v23  ;;  %8269 = vmatpush3.bf16.msra.mxu1 %v8387_v22  ;;  %v8389_v25 = vld [vmem:[%s10936_s4 + $0x118] sm:$0xff]   ;;  %v4755_v18 = vpop.permute.xlu0 %4754 }
 0x325   :  { %v7821_v6 = vcombine.low %v3730_v54, %v3744_v2  ;;  %v3748_v37 = vrot.slane %v3746_v49, 4  ;;  %v3755_v56 = vshll.u32 %v3642_v3, 16  ;;  %v4231_v52 = vsel %vm8681_vm13, %v4222_v38, %v4230_v20  ;;  %8270 = vmatprep.subr.bf16.mxu1 %v8388_v31  ;;  %v6172_v38 = vld [vmem:[#allocation5 + $0x28] sm:$0xff]  ;;  %v5327_v2 = vld [vmem:[#allocation3 + $0x10] sm:$0xf] }
 0x326   :  { %v4248_v55 = vor.u32 %v4247_v14, %v4244_v30  ;;  %v3751_v12 = vrot.slane %v3749_v48, 5  ;;  %v3760_v17 = vshrl.u32 %v3643_v19, 16  ;;  %v4240_v58 = vrot.slane %v4239_v39, 4 }
 0x327   :  { %3919 = vst.msk [vmem:[#allocation5 + $0x50] sm:$0xff] %vm3259_vm5, %v7821_v6  ;;  %v3757_v28 = vrot.slane %v3755_v56, 5  ;;  %v3763_v0 = vshll.u32 %v3643_v19, 16  ;;  %v3769_v62 = vshll.u32 %v3644_v27, 16  ;;  %v4251_v45 = vshrl.u32 %v4122_v46, 16 }
 0x328   :  { %4104 = vst.msk [vmem:[#allocation5 + $0x50] sm:$0xff] %vm4101_vm9, %v4082_v34  ;;  %v3752_v22 = vor.u32 %v3751_v12, %v3748_v37  ;;  %v3762_v35 = vrot.slane %v3760_v17, 4  ;;  %v4254_v50 = vshll.u32 %v4122_v46, 16  ;;  %v4249_v41 = vsel %vm8681_vm13, %v4240_v58, %v4248_v55  ;;  %v6173_v42 = vld [vmem:[#allocation5 + $0x30] sm:$0xff]  ;;  %8271 = vmatpush3.bf16.msra.mxu1 %v8388_v31  ;;  %v5329_v55 = vld [vmem:[#allocation3 + $0x18] sm:$0xf] }
 0x329   :  { %v3765_v61 = vrot.slane %v3763_v0, 5  ;;  %v3771_v54 = vrot.slane %v3769_v62, 5  ;;  %v4260_v59 = vshrl.u32 %v4123_v13, 16  ;;  %v7853_v3 = vcombine.low %v4231_v52, %v4249_v41  ;;  %6559 = vmatprep.mubr.bf16.mxu1 %v6173_v42  ;;  %8272 = vmatprep.subr.bf16.mxu1 %v8389_v25  ;;  %v5328_v37 = vld [vmem:[#allocation3 + $0x14] sm:$0x1] }
 0x32a   :  { %v3753_v21 = vrot.slane %v3752_v22, 4  ;;  %v4253_v23 = vrot.slane %v4251_v45, 5  ;;  %v4256_v10 = vrot.slane %v4254_v50, 6  ;;  %v4263_v19 = vshll.u32 %v4123_v13, 16  ;;  %6560 = vmatmul.mubr.bf16.gmra.mrb[20].mxu1 %v6172_v38  ;;  %v4084_v22 = vpop.permute.xlu1 %4083  ;;  %v4126_v50 = vld [vmem:[#allocation3 + $0x50] sm:$0xe] }
 0x32b   :  { %v3766_v8 = vor.u32 %v3765_v61, %v3762_v35  ;;  %v4262_v30 = vrot.slane %v4260_v59, 5  ;;  %v4269_v49 = vshrl.u32 %v4124_v9, 16  ;;  %4464 = vst.msk [vmem:[#allocation5 + $0x58] sm:$0xff] %vm3259_vm5, %v7853_v3  ;;  %v4272_v14 = vshll.u32 %v4124_v9, 16  ;;  %v4127_v59 = vld [vmem:[#allocation3 + $0x54] sm:$0x3] }
 0x32c   :  { %v3758_v20 = vsel %vm8661_vm12, %v3753_v21, %v3757_v28  ;;  %v4257_v31 = vor.u32 %v4256_v10, %v4253_v23  ;;  %v4278_v27 = vshrl.u32 %v4125_v51, 16  ;;  %4776 = vst.msk [vmem:[#allocation5 + $0x58] sm:$0xff] %vm4101_vm9, %v4755_v18  ;;  %v4265_v6 = vrot.slane %v4263_v19, 6  ;;  %8273 = vmatpush3.bf16.msra.mxu1 %v8389_v25  ;;  %v5330_v28 = vld [vmem:[#allocation3 + $0x1c] sm:$0x1] }
 0x32d   :  { %v3767_v48 = vrot.slane %v3766_v8, 4  ;;  %v4271_v34 = vrot.slane %v4269_v49, 5  ;;  %v4281_v39 = vshll.u32 %v4125_v51, 16  ;;  %v4274_v46 = vrot.slane %v4272_v14, 6  ;;  %v4128_v10 = vld [vmem:[#allocation3 + $0x58] sm:$0xe] }
 0x32e   :  { %v4258_v56 = vrot.slane %v4257_v31, 4  ;;  %v4280_v52 = vrot.slane %v4278_v27, 5  ;;  %v5360_v12 = vshrl.u32 %v5327_v2, 16  ;;  %v4266_v13 = vor.u32 %v4265_v6, %v4262_v30  ;;  %v4757_v27 = vpop.permute.xlu0 %4756 }
 0x32f   :  { %v3772_v17 = vsel %vm8661_vm12, %v3767_v48, %v3771_v54  ;;  %v4283_v58 = vrot.slane %v4281_v39, 6  ;;  %v5363_v0 = vshll.u32 %v5327_v2, 16  ;;  %v4275_v35 = vor.u32 %v4274_v46, %v4271_v34  ;;  %v4129_v2 = vld [vmem:[#allocation3 + $0x5c] sm:$0x3]  ;;  %v6177_v39 = vld [vmem:[#allocation5 + $0x50] sm:$0xff] }
 0x330   :  { %v7822_v62 = vcombine.low %v3758_v20, %v3772_v17  ;;  %v5362_v9 = vrot.slane %v5360_v12, 4  ;;  %v5369_v45 = vshll.u32 %v5328_v37, 16  ;;  %v4267_v25 = vsel %vm8681_vm13, %v4258_v56, %v4266_v13 }
 0x331   :  { %v4284_v41 = vor.u32 %v4283_v58, %v4280_v52  ;;  %v5365_v61 = vrot.slane %v5363_v0, 5  ;;  %v5374_v51 = vshrl.u32 %v5329_v55, 16  ;;  %v4276_v54 = vrot.slane %v4275_v35, 4  ;;  %v4784_v0 = vld [vmem:[#allocation3 + $0x10] sm:$0xe] }
 0x332   :  { %3920 = vst.msk [vmem:[#allocation5 + $0x78] sm:$0xff] %vm3259_vm5, %v7822_v62  ;;  %v5371_v42 = vrot.slane %v5369_v45, 5  ;;  %v5377_v3 = vshll.u32 %v5329_v55, 16  ;;  %v5383_v18 = vshll.u32 %v5330_v28, 16  ;;  %v4287_v38 = vshrl.u32 %v4126_v50, 16 }
 0x333   :  { %4105 = vst.msk [vmem:[#allocation5 + $0x78] sm:$0xff] %vm4101_vm9, %v4084_v22  ;;  %v5366_v21 = vor.u32 %v5365_v61, %v5362_v9  ;;  %v5376_v23 = vrot.slane %v5374_v51, 4  ;;  %v4290_v8 = vshll.u32 %v4126_v50, 16  ;;  %v4285_v30 = vsel %vm8681_vm13, %v4276_v54, %v4284_v41  ;;  %v6178_v31 = vld [vmem:[#allocation5 + $0x58] sm:$0xff]  ;;  %v4782_v55 = vld [vmem:[#allocation3 + $0x8] sm:$0xe]  ;;  %v5776_v22 = vpop.permute.xlu1 %5775 }
 0x334   :  { %v5379_v19 = vrot.slane %v5377_v3, 5  ;;  %v5385_v49 = vrot.slane %v5383_v18, 5  ;;  %v4296_v20 = vshrl.u32 %v4127_v59, 16  ;;  %v7854_v14 = vcombine.low %v4267_v25, %v4285_v30  ;;  %6567 = vmatprep.mubr.bf16.mxu1 %v6178_v31  ;;  %v4783_v28 = vld [vmem:[#allocation3 + $0xc] sm:$0x1] }
 0x335   :  { %v5367_v48 = vrot.slane %v5366_v21, 4  ;;  %v4289_v6 = vrot.slane %v4287_v38, 5  ;;  %v4292_v34 = vrot.slane %v4290_v8, 6  ;;  %v4299_v46 = vshll.u32 %v4127_v59, 16  ;;  %6568 = vmatmul.mubr.bf16.gmra.mrb[24].mxu1 %v6177_v39  ;;  %v4785_v50 = vld [vmem:[#allocation3 + $0x14] sm:$0x1] }
 0x336   :  { %v5380_v37 = vor.u32 %v5379_v19, %v5376_v23  ;;  %v4298_v56 = vrot.slane %v4296_v20, 5  ;;  %v4305_v52 = vshrl.u32 %v4128_v10, 16  ;;  %4465 = vst.msk [vmem:[#allocation5 + $0x80] sm:$0xff] %vm3259_vm5, %v7854_v14  ;;  %v4308_v13 = vshll.u32 %v4128_v10, 16  ;;  %v3645_v59 = vld [vmem:[#allocation3 + $0x50] sm:$0xf] }
 0x337   :  { %v5372_v12 = vsel %vm8661_vm12, %v5367_v48, %v5371_v42  ;;  %v4293_v17 = vor.u32 %v4292_v34, %v4289_v6  ;;  %v4314_v58 = vshrl.u32 %v4129_v2, 16  ;;  %4777 = vst.msk [vmem:[#allocation5 + $0x80] sm:$0xff] %vm4101_vm9, %v4757_v27  ;;  %v4301_v35 = vrot.slane %v4299_v46, 6  ;;  %v3646_v21 = vld [vmem:[#allocation3 + $0x54] sm:$0x1] }
 0x338   :  { %v5381_v62 = vrot.slane %v5380_v37, 4  ;;  %v4307_v9 = vrot.slane %v4305_v52, 5  ;;  %v4317_v45 = vshll.u32 %v4129_v2, 16  ;;  %v4310_v41 = vrot.slane %v4308_v13, 6  ;;  %v3647_v30 = vld [vmem:[#allocation3 + $0x58] sm:$0xf]  ;;  %v5295_v37 = vpop.permute.xlu1 %5294 }
 0x339   :  { %v4294_v25 = vrot.slane %v4293_v17, 4  ;;  %v4316_v61 = vrot.slane %v4314_v58, 5  ;;  %v7867_v51 = vrot.slane %v4782_v55, 9  ;;  %v4302_v42 = vor.u32 %v4301_v35, %v4298_v56  ;;  %v3648_v31 = vld [vmem:[#allocation3 + $0x5c] sm:$0x1]  ;;  %v4759_v35 = vpop.permute.xlu0 %4758 }
 0x33a   :  { %v5386_v54 = vsel %vm8661_vm12, %v5381_v62, %v5385_v49  ;;  %v4319_v3 = vrot.slane %v4317_v45, 6  ;;  %v4848_v18 = vrot.slane %v4783_v28, 5  ;;  %v4311_v10 = vor.u32 %v4310_v41, %v4307_v9  ;;  %v5331_v34 = vld [vmem:[#allocation3 + $0x20] sm:$0xf]  ;;  %v5332_v55 = vld [vmem:[#allocation3 + $0x24] sm:$0x1] }
 0x33b   :  { %v7899_v23 = vcombine.low %v5372_v12, %v5386_v54  ;;  %v7868_v38 = vrot.slane %v4784_v0, 9  ;;  %v4852_v8 = vrot.slane %v4785_v50, 5  ;;  %v4303_v19 = vsel %vm8681_vm13, %v4294_v25, %v4302_v42  ;;  %v5333_v28 = vld [vmem:[#allocation3 + $0x28] sm:$0xf]  ;;  %v5334_v45 = vld [vmem:[#allocation3 + $0x2c] sm:$0x1] }
 0x33c   :  { %v4320_v2 = vor.u32 %v4319_v3, %v4316_v61  ;;  %v4849_v20 = vsel %vm8634_vm7, %v7867_v51, %v4848_v18  ;;  %v3774_v14 = vshrl.u32 %v3645_v59, 16  ;;  %v4312_v49 = vrot.slane %v4311_v10, 4  ;;  %v6182_v25 = vld [vmem:[#allocation5 + $0x78] sm:$0xff]  ;;  %v4130_v54 = vld [vmem:[#allocation3 + $0x60] sm:$0xe] }
 0x33d   :  { %5615 = vst.msk [vmem:[#allocation5 + $0x18] sm:$0xff] %vm3259_vm5, %v7899_v23  ;;  %v4853_v27 = vsel %vm8634_vm7, %v7868_v38, %v4852_v8  ;;  %v3777_v48 = vshll.u32 %v3645_v59, 16  ;;  %v3783_v6 = vshll.u32 %v3646_v21, 16  ;;  %v3788_v46 = vshrl.u32 %v3647_v30, 16 }
 0x33e   :  { %5799 = vst.msk [vmem:[#allocation5 + $0x18] sm:$0xff] %vm4101_vm9, %v5776_v22  ;;  %v7883_v39 = vcombine.low %v4849_v20, %v4853_v27  ;;  %v3776_v56 = vrot.slane %v3774_v14, 4  ;;  %v3791_v52 = vshll.u32 %v3647_v30, 16  ;;  %v4321_v12 = vsel %vm8681_vm13, %v4312_v49, %v4320_v2  ;;  %v6183_v0 = vld [vmem:[#allocation5 + $0x80] sm:$0xff] }
 0x33f   :  { %v3779_v17 = vrot.slane %v3777_v48, 5  ;;  %v3785_v13 = vrot.slane %v3783_v6, 5  ;;  %v3797_v58 = vshll.u32 %v3648_v31, 16  ;;  %v7855_v62 = vcombine.low %v4303_v19, %v4321_v12  ;;  %6575 = vmatprep.mubr.bf16.mxu1 %v6183_v0  ;;  %v4131_v30 = vld [vmem:[#allocation3 + $0x64] sm:$0x3]  ;;  %v4086_v12 = vpop.permute.xlu0 %4085 }
 0x340   :  { %4942 = vst.msk [vmem:[#allocation5 + $0x10] sm:$0xff] %vm3259_vm5, %v7883_v39  ;;  %v3790_v9 = vrot.slane %v3788_v46, 4  ;;  %v3793_v22 = vrot.slane %v3791_v52, 5  ;;  %v5388_v50 = vshrl.u32 %v5331_v34, 16  ;;  %v5391_v51 = vshll.u32 %v5331_v34, 16  ;;  %6576 = vmatmul.mubr.bf16.gmra.mrb[28].mxu1 %v6182_v25 }
 0x341   :  { %5318 = vst.msk [vmem:[#allocation5 + $0x10] sm:$0xff] %vm4101_vm9, %v5295_v37  ;;  %v3780_v41 = vor.u32 %v3779_v17, %v3776_v56  ;;  %v3799_v61 = vrot.slane %v3797_v58, 5  ;;  %v5397_v59 = vshll.u32 %v5332_v55, 16  ;;  %v5402_v18 = vshrl.u32 %v5333_v28, 16  ;;  %v4132_v6 = vld [vmem:[#allocation3 + $0x68] sm:$0xe] }
 0x342   :  { %4466 = vst.msk [vmem:[#allocation5 + $0xa8] sm:$0xff] %vm3259_vm5, %v7855_v62  ;;  %v3794_v42 = vor.u32 %v3793_v22, %v3790_v9  ;;  %v5390_v3 = vrot.slane %v5388_v50, 4  ;;  %v5405_v21 = vshll.u32 %v5333_v28, 16  ;;  %v5393_v10 = vrot.slane %v5391_v51, 5  ;;  %v4133_v56 = vld [vmem:[#allocation3 + $0x6c] sm:$0x3] }
 0x343   :  { %4778 = vst.msk [vmem:[#allocation5 + $0xa8] sm:$0xff] %vm4101_vm9, %v4759_v35  ;;  %v3781_v23 = vrot.slane %v3780_v41, 4  ;;  %v5399_v38 = vrot.slane %v5397_v59, 5  ;;  %v5411_v8 = vshll.u32 %v5334_v45, 16  ;;  %v5404_v2 = vrot.slane %v5402_v18, 4 }
 0x344   :  { %v3795_v19 = vrot.slane %v3794_v42, 4  ;;  %v5407_v20 = vrot.slane %v5405_v21, 5  ;;  %v4323_v31 = vshrl.u32 %v4130_v54, 16  ;;  %v5394_v49 = vor.u32 %v5393_v10, %v5390_v3  ;;  %v4786_v0 = vld [vmem:[#allocation3 + $0x18] sm:$0xe]  ;;  %v5778_v42 = vpop.permute.xlu1 %5777 }
 0x345   :  { %v3786_v14 = vsel %vm8661_vm12, %v3781_v23, %v3785_v13  ;;  %v5413_v27 = vrot.slane %v5411_v8, 5  ;;  %v6170_v48 = vld [vmem:[#allocation5 + $0x18] sm:$0xff]  ;;  %v4326_v34 = vshll.u32 %v4130_v54, 16  ;;  %v4332_v52 = vshrl.u32 %v4131_v30, 16  ;;  %v4788_v51 = vld [vmem:[#allocation3 + $0x20] sm:$0xe] }
 0x346   :  { %v3800_v39 = vsel %vm8661_vm12, %v3795_v19, %v3799_v61  ;;  %v5408_v37 = vor.u32 %v5407_v20, %v5404_v2  ;;  %6648 = vmatprep.mubr.bf16.mxu0 %v6170_v48  ;;  %v4325_v46 = vrot.slane %v4323_v31, 5  ;;  %v5395_v17 = vrot.slane %v5394_v49, 4  ;;  %v4787_v13 = vld [vmem:[#allocation3 + $0x1c] sm:$0x1]  ;;  %v4789_v59 = vld [vmem:[#allocation3 + $0x24] sm:$0x1] }
 0x347   :  { %v7823_v55 = vcombine.low %v3786_v14, %v3800_v39  ;;  %v4328_v58 = vrot.slane %v4326_v34, 6  ;;  %v4335_v28 = vshll.u32 %v4131_v30, 16  ;;  %v4334_v35 = vrot.slane %v4332_v52, 5  ;;  %v3649_v23 = vld [vmem:[#allocation3 + $0x60] sm:$0xf] }
 0x348   :  { %v5409_v62 = vrot.slane %v5408_v37, 4  ;;  %v4341_v9 = vshrl.u32 %v4132_v6, 16  ;;  %v4344_v22 = vshll.u32 %v4132_v6, 16  ;;  %v6169_v45 = vld [vmem:[#allocation5 + $0x10] sm:$0xff]  ;;  %v5400_v50 = vsel %vm8661_vm12, %v5395_v17, %v5399_v38  ;;  %v3650_v2 = vld [vmem:[#allocation3 + $0x64] sm:$0x1] }
 0x349   :  { %3921 = vst.msk [vmem:[#allocation5 + $0xa0] sm:$0xff] %vm3259_vm5, %v7823_v55  ;;  %v4329_v25 = vor.u32 %v4328_v58, %v4325_v46  ;;  %v4337_v41 = vrot.slane %v4335_v28, 6  ;;  %v4350_v61 = vshrl.u32 %v4133_v56, 16  ;;  %6649 = vmatmul.mubr.bf16.vlgmr.msra.gmra.mrb[32].mxu0 %v6169_v45  ;;  %v4353_v21 = vshll.u32 %v4133_v56, 16  ;;  %v3651_v48 = vld [vmem:[#allocation3 + $0x68] sm:$0xf] }
 0x34a   :  { %4106 = vst.msk [vmem:[#allocation5 + $0xa0] sm:$0xff] %vm4101_vm9, %v4086_v12  ;;  %v5414_v54 = vsel %vm8661_vm12, %v5409_v62, %v5413_v27  ;;  %v4343_v3 = vrot.slane %v4341_v9, 5  ;;  %v4346_v18 = vrot.slane %v4344_v22, 6  ;;  %v6188_v10 = vld [vmem:[#allocation5 + $0xa8] sm:$0xff]  ;;  %v7869_v14 = vrot.slane %v4786_v0, 9  ;;  %v4761_v12 = vpop.permute.xlu0 %4760  ;;  %v5297_v9 = vpop.permute.xlu1 %5296 }
 0x34b   :  { %v7900_v8 = vcombine.low %v5400_v50, %v5414_v54  ;;  %v4330_v30 = vrot.slane %v4329_v25, 4  ;;  %v4338_v38 = vor.u32 %v4337_v41, %v4334_v35  ;;  %v4352_v19 = vrot.slane %v4350_v61, 5  ;;  %6583 = vmatprep.mubr.bf16.mxu1 %v6188_v10  ;;  %v3652_v52 = vld [vmem:[#allocation3 + $0x6c] sm:$0x1]  ;;  %v5336_v50 = vld [vmem:[#allocation3 + $0x34] sm:$0x1] }
 0x34c   :  { %v4347_v20 = vor.u32 %v4346_v18, %v4343_v3  ;;  %v4355_v31 = vrot.slane %v4353_v21, 6  ;;  %v4856_v49 = vrot.slane %v4787_v13, 5  ;;  %v7870_v6 = vrot.slane %v4788_v51, 9  ;;  %v5335_v13 = vld [vmem:[#allocation3 + $0x30] sm:$0xf] }
 0x34d   :  { %5616 = vst.msk [vmem:[#allocation5 + $0x40] sm:$0xff] %vm3259_vm5, %v7900_v8  ;;  %v4339_v27 = vsel %vm8681_vm13, %v4330_v30, %v4338_v38  ;;  %v4860_v34 = vrot.slane %v4789_v59, 5  ;;  %v3802_v39 = vshrl.u32 %v3649_v23, 16  ;;  %v3805_v55 = vshll.u32 %v3649_v23, 16  ;;  %v5337_v25 = vld [vmem:[#allocation3 + $0x38] sm:$0xf] }
 0x34e   :  { %5800 = vst.msk [vmem:[#allocation5 + $0x40] sm:$0xff] %vm4101_vm9, %v5778_v42  ;;  %v4348_v37 = vrot.slane %v4347_v20, 4  ;;  %v4356_v56 = vor.u32 %v4355_v31, %v4352_v19  ;;  %v4857_v46 = vsel %vm8634_vm7, %v7869_v14, %v4856_v49  ;;  %v3811_v28 = vshll.u32 %v3650_v2, 16  ;;  %v5338_v18 = vld [vmem:[#allocation3 + $0x3c] sm:$0x1] }
 0x34f   :  { %v4861_v17 = vsel %vm8634_vm7, %v7870_v6, %v4860_v34  ;;  %v3804_v58 = vrot.slane %v3802_v39, 4  ;;  %v3816_v0 = vshrl.u32 %v3651_v48, 16  ;;  %v3807_v22 = vrot.slane %v3805_v55, 5  ;;  %v4134_v19 = vld [vmem:[#allocation3 + $0x70] sm:$0xe] }
 0x350   :  { %v4357_v62 = vsel %vm8681_vm13, %v4348_v37, %v4356_v56  ;;  %v7884_v35 = vcombine.low %v4857_v46, %v4861_v17  ;;  %v3819_v45 = vshll.u32 %v3651_v48, 16  ;;  %v3813_v61 = vrot.slane %v3811_v28, 5  ;;  %v4135_v49 = vld [vmem:[#allocation3 + $0x74] sm:$0x3]  ;;  %v4088_v48 = vpop.permute.xlu0 %4087  ;;  %v4136_v55 = vld [vmem:[#allocation3 + $0x78] sm:$0xe] }
 0x351   :  { %v7856_v41 = vcombine.low %v4339_v27, %v4357_v62  ;;  %v3818_v51 = vrot.slane %v3816_v0, 4  ;;  %v3825_v59 = vshll.u32 %v3652_v52, 16  ;;  %v6187_v54 = vld [vmem:[#allocation5 + $0xa0] sm:$0xff]  ;;  %v3808_v42 = vor.u32 %v3807_v22, %v3804_v58  ;;  %v4137_v28 = vld [vmem:[#allocation3 + $0x7c] sm:$0x3] }
 0x352   :  { %4943 = vst.msk [vmem:[#allocation5 + $0x38] sm:$0xff] %vm3259_vm5, %v7884_v35  ;;  %v3821_v3 = vrot.slane %v3819_v45, 5  ;;  %v5416_v21 = vshrl.u32 %v5335_v13, 16  ;;  %v5419_v23 = vshll.u32 %v5335_v13, 16  ;;  %6584 = vmatmul.mubr.bf16.gmra.mrb[32].mxu1 %v6187_v54  ;;  %v5425_v8 = vshll.u32 %v5336_v50, 16 }
 0x353   :  { %4467 = vst.msk [vmem:[#allocation5 + $0xd0] sm:$0xff] %vm3259_vm5, %v7856_v41  ;;  %v3827_v10 = vrot.slane %v3825_v59, 5  ;;  %v5430_v30 = vshrl.u32 %v5337_v25, 16  ;;  %v5433_v38 = vshll.u32 %v5337_v25, 16  ;;  %v3809_v2 = vrot.slane %v3808_v42, 4 }
 0x354   :  { %5319 = vst.msk [vmem:[#allocation5 + $0x38] sm:$0xff] %vm4101_vm9, %v5297_v9  ;;  %4779 = vst.msk [vmem:[#allocation5 + $0xd0] sm:$0xff] %vm4101_vm9, %v4761_v12  ;;  %v3822_v20 = vor.u32 %v3821_v3, %v3818_v51  ;;  %v5418_v31 = vrot.slane %v5416_v21, 4  ;;  %v5421_v14 = vrot.slane %v5419_v23, 5  ;;  %v5427_v27 = vrot.slane %v5425_v8, 5 }
 0x355   :  { %v5432_v6 = vrot.slane %v5430_v30, 4  ;;  %v5435_v34 = vrot.slane %v5433_v38, 5  ;;  %v5439_v39 = vshll.u32 %v5338_v18, 16  ;;  %v6175_v37 = vld [vmem:[#allocation5 + $0x40] sm:$0xff]  ;;  %v3814_v56 = vsel %vm8661_vm12, %v3809_v2, %v3813_v61  ;;  %v4790_v45 = vld [vmem:[#allocation3 + $0x28] sm:$0xe] }
 0x356   :  { %v3823_v46 = vrot.slane %v3822_v20, 4  ;;  %v5422_v52 = vor.u32 %v5421_v14, %v5418_v31  ;;  %6656 = vmatprep.mubr.bf16.mxu0 %v6175_v37  ;;  %v4359_v17 = vshrl.u32 %v4134_v19, 16  ;;  %v4362_v0 = vshll.u32 %v4134_v19, 16  ;;  %v4791_v51 = vld [vmem:[#allocation3 + $0x2c] sm:$0x1]  ;;  %v10109_v19 = vpop.permute.xlu0 %4762 }
 0x357   :  { %v5436_v12 = vor.u32 %v5435_v34, %v5432_v6  ;;  %v5441_v58 = vrot.slane %v5439_v39, 5  ;;  %v4368_v13 = vshrl.u32 %v4135_v49, 16  ;;  %v4371_v22 = vshll.u32 %v4135_v49, 16  ;;  %v4792_v18 = vld [vmem:[#allocation3 + $0x30] sm:$0xe] }
 0x358   :  { %v3828_v62 = vsel %vm8661_vm12, %v3823_v46, %v3827_v10  ;;  %v5423_v35 = vrot.slane %v5422_v52, 4  ;;  %v4361_v9 = vrot.slane %v4359_v17, 5  ;;  %v4364_v41 = vrot.slane %v4362_v0, 6  ;;  %v5780_v10 = vpop.permute.xlu1 %5779  ;;  %v4793_v2 = vld [vmem:[#allocation3 + $0x34] sm:$0x1] }
 0x359   :  { %v7824_v50 = vcombine.low %v3814_v56, %v3828_v62  ;;  %v5437_v25 = vrot.slane %v5436_v12, 4  ;;  %v4370_v61 = vrot.slane %v4368_v13, 5  ;;  %v4373_v54 = vrot.slane %v4371_v22, 6  ;;  %v3653_v6 = vld [vmem:[#allocation3 + $0x70] sm:$0xf] }
 0x35a   :  { %v5428_v59 = vsel %vm8661_vm12, %v5423_v35, %v5427_v27  ;;  %v4377_v42 = vshrl.u32 %v4136_v55, 16  ;;  %v4380_v3 = vshll.u32 %v4136_v55, 16  ;;  %v4365_v8 = vor.u32 %v4364_v41, %v4361_v9  ;;  %v3654_v46 = vld [vmem:[#allocation3 + $0x74] sm:$0x1]  ;;  %v3656_v0 = vld [vmem:[#allocation3 + $0x7c] sm:$0x1] }
 0x35b   :  { %v6174_v21 = vld [vmem:[#allocation5 + $0x38] sm:$0xff]  ;;  %3922 = vst.msk [vmem:[#allocation5 + $0xc8] sm:$0xff] %vm3259_vm5, %v7824_v50  ;;  %v5442_v23 = vsel %vm8661_vm12, %v5437_v25, %v5441_v58  ;;  %v4386_v30 = vshrl.u32 %v4137_v28, 16  ;;  %v4389_v38 = vshll.u32 %v4137_v28, 16  ;;  %v6193_v20 = vld [vmem:[#allocation5 + $0xd0] sm:$0xff]  ;;  %v4374_v14 = vor.u32 %v4373_v54, %v4370_v61  ;;  %v10120_v54 = vpop.permute.xlu0 %4089 }
 0x35c   :  { %6657 = vmatmul.mubr.bf16.gmra.mrb[36].mxu0 %v6174_v21  ;;  %4107 = vst.msk [vmem:[#allocation5 + $0xc8] sm:$0xff] %vm4101_vm9, %v4088_v48  ;;  %v7901_v31 = vcombine.low %v5428_v59, %v5442_v23  ;;  %v4379_v49 = vrot.slane %v4377_v42, 5  ;;  %v4382_v27 = vrot.slane %v4380_v3, 6  ;;  %6591 = vmatprep.mubr.bf16.mxu1 %v6193_v20  ;;  %v4366_v34 = vrot.slane %v4365_v8, 4  ;;  %v3655_v58 = vld [vmem:[#allocation3 + $0x78] sm:$0xf]  ;;  %v5299_v41 = vpop.permute.xlu1 %5298 }
 0x35d   :  { %v4388_v39 = vrot.slane %v4386_v30, 5  ;;  %v4391_v37 = vrot.slane %v4389_v38, 6  ;;  %v7871_v56 = vrot.slane %v4790_v45, 9  ;;  %v4864_v55 = vrot.slane %v4791_v51, 5  ;;  %v5339_v50 = vld [vmem:[#allocation3 + $0x40] sm:$0xf] }
 0x35e   :  { %5617 = vst.msk [vmem:[#allocation5 + $0x68] sm:$0xff] %vm3259_vm5, %v7901_v31  ;;  %v4383_v52 = vor.u32 %v4382_v27, %v4379_v49  ;;  %v7872_v17 = vrot.slane %v4792_v18, 9  ;;  %v4868_v12 = vrot.slane %v4793_v2, 5  ;;  %v4375_v48 = vsel %vm8681_vm13, %v4366_v34, %v4374_v14  ;;  %v5340_v42 = vld [vmem:[#allocation3 + $0x44] sm:$0x1] }
 0x35f   :  { %5801 = vst.msk [vmem:[#allocation5 + $0x68] sm:$0xff] %vm4101_vm9, %v5780_v10  ;;  %v4392_v28 = vor.u32 %v4391_v37, %v4388_v39  ;;  %v3830_v13 = vshrl.u32 %v3653_v6, 16  ;;  %v3833_v62 = vshll.u32 %v3653_v6, 16  ;;  %v4865_v9 = vsel %vm8634_vm7, %v7871_v56, %v4864_v55  ;;  %v5341_v10 = vld [vmem:[#allocation3 + $0x48] sm:$0xf] }
 0x360   :  { %v4384_v35 = vrot.slane %v4383_v52, 4  ;;  %v4869_v22 = vsel %vm8634_vm7, %v7872_v17, %v4868_v12  ;;  %v3839_v45 = vshll.u32 %v3654_v46, 16  ;;  %v3844_v59 = vshrl.u32 %v3655_v58, 16  ;;  %v5342_v2 = vld [vmem:[#allocation3 + $0x4c] sm:$0x1] }
 0x361   :  { %v7885_v25 = vcombine.low %v4865_v9, %v4869_v22  ;;  %v3832_v61 = vrot.slane %v3830_v13, 4  ;;  %v3835_v51 = vrot.slane %v3833_v62, 5  ;;  %v3847_v21 = vshll.u32 %v3655_v58, 16  ;;  %v4138_v34 = vld [vmem:[#allocation3 + $0x80] sm:$0xe]  ;;  %v10131_v9 = vpop.permute.xlu0 %4764 }
 0x362   :  { %v4393_v3 = vsel %vm8681_vm13, %v4384_v35, %v4392_v28  ;;  %v3841_v18 = vrot.slane %v3839_v45, 5  ;;  %v3853_v23 = vshll.u32 %v3656_v0, 16  ;;  %v3846_v38 = vrot.slane %v3844_v59, 4  ;;  %v4140_v62 = vld [vmem:[#allocation3 + $0x88] sm:$0xe] }
 0x363   :  { %v7857_v8 = vcombine.low %v4375_v48, %v4393_v3  ;;  %4944 = vst.msk [vmem:[#allocation5 + $0x60] sm:$0xff] %vm3259_vm5, %v7885_v25  ;;  %v3836_v30 = vor.u32 %v3835_v51, %v3832_v61  ;;  %v5444_v20 = vshrl.u32 %v5339_v50, 16  ;;  %v6192_v31 = vld [vmem:[#allocation5 + $0xc8] sm:$0xff]  ;;  %v3849_v14 = vrot.slane %v3847_v21, 5  ;;  %v4139_v48 = vld [vmem:[#allocation3 + $0x84] sm:$0x3] }
 0x364   :  { %5320 = vst.msk [vmem:[#allocation5 + $0x60] sm:$0xff] %vm4101_vm9, %v5299_v41  ;;  %v3855_v49 = vrot.slane %v3853_v23, 5  ;;  %v5447_v27 = vshll.u32 %v5339_v50, 16  ;;  %v5453_v6 = vshll.u32 %v5340_v42, 16  ;;  %6592 = vmatmul.mubr.bf16.gmra.mrb[36].mxu1 %v6192_v31  ;;  %v5458_v56 = vshrl.u32 %v5341_v10, 16 }
 0x365   :  { %4468 = vst.msk [vmem:[#allocation5 + $0xf8] sm:$0xff] %vm3259_vm5, %v7857_v8  ;;  %v3837_v39 = vrot.slane %v3836_v30, 4  ;;  %v5446_v37 = vrot.slane %v5444_v20, 4  ;;  %v5461_v46 = vshll.u32 %v5341_v10, 16  ;;  %v3850_v52 = vor.u32 %v3849_v14, %v3846_v38  ;;  %v4141_v41 = vld [vmem:[#allocation3 + $0x8c] sm:$0x3] }
 0x366   :  { %4780 = vst.msk [vmem:[#allocation5 + $0xf8] sm:$0xff] %vm4101_vm9, %v10109_v19  ;;  %v5449_v55 = vrot.slane %v5447_v27, 5  ;;  %v5455_v17 = vrot.slane %v5453_v6, 5  ;;  %v5467_v12 = vshll.u32 %v5342_v2, 16  ;;  %v6180_v58 = vld [vmem:[#allocation5 + $0x68] sm:$0xff]  ;;  %v5460_v0 = vrot.slane %v5458_v56, 4 }
 0x367   :  { %v3842_v28 = vsel %vm8661_vm12, %v3837_v39, %v3841_v18  ;;  %v5463_v13 = vrot.slane %v5461_v46, 5  ;;  %6664 = vmatprep.mubr.bf16.mxu0 %v6180_v58  ;;  %v4395_v35 = vshrl.u32 %v4138_v34, 16  ;;  %v3851_v22 = vrot.slane %v3850_v52, 4  ;;  %v4794_v23 = vld [vmem:[#allocation3 + $0x38] sm:$0xe] }
 0x368   :  { %v5450_v45 = vor.u32 %v5449_v55, %v5446_v37  ;;  %v5469_v50 = vrot.slane %v5467_v12, 5  ;;  %v4398_v19 = vshll.u32 %v4138_v34, 16  ;;  %v4404_v51 = vshrl.u32 %v4139_v48, 16  ;;  %v4795_v2 = vld [vmem:[#allocation3 + $0x3c] sm:$0x1]  ;;  %v5782_v37 = vpop.permute.xlu1 %5781  ;;  %v10140_v12 = vpop.permute.xlu0 %4091 }
 0x369   :  { %v5464_v25 = vor.u32 %v5463_v13, %v5460_v0  ;;  %v4397_v61 = vrot.slane %v4395_v35, 5  ;;  %v4407_v59 = vshll.u32 %v4139_v48, 16  ;;  %v3856_v42 = vsel %vm8661_vm12, %v3851_v22, %v3855_v49  ;;  %v4796_v34 = vld [vmem:[#allocation3 + $0x40] sm:$0xe]  ;;  %v4797_v39 = vld [vmem:[#allocation3 + $0x44] sm:$0x1] }
 0x36a   :  { %v5451_v3 = vrot.slane %v5450_v45, 4  ;;  %v4400_v18 = vrot.slane %v4398_v19, 6  ;;  %v4413_v21 = vshrl.u32 %v4140_v62, 16  ;;  %v7825_v10 = vcombine.low %v3842_v28, %v3856_v42  ;;  %v3657_v55 = vld [vmem:[#allocation3 + $0x80] sm:$0xf] }
 0x36b   :  { %v5465_v8 = vrot.slane %v5464_v25, 4  ;;  %v4406_v30 = vrot.slane %v4404_v51, 5  ;;  %v4409_v38 = vrot.slane %v4407_v59, 6  ;;  %v6179_v20 = vld [vmem:[#allocation5 + $0x60] sm:$0xff]  ;;  %v4416_v6 = vshll.u32 %v4140_v62, 16 }
 0x36c   :  { %v5456_v31 = vsel %vm8661_vm12, %v5451_v3, %v5455_v17  ;;  %v4401_v14 = vor.u32 %v4400_v18, %v4397_v61  ;;  %v4415_v27 = vrot.slane %v4413_v21, 5  ;;  %6665 = vmatmul.mubr.bf16.gmra.mrb[40].mxu0 %v6179_v20  ;;  %3923 = vst.msk [vmem:[#allocation5 + $0xf0] sm:$0xff] %vm3259_vm5, %v7825_v10  ;;  %v4422_v46 = vshrl.u32 %v4141_v41, 16  ;;  %v3658_v13 = vld [vmem:[#allocation3 + $0x84] sm:$0x1] }
 0x36d   :  { %v5470_v49 = vsel %vm8661_vm12, %v5465_v8, %v5469_v50  ;;  %v4410_v56 = vor.u32 %v4409_v38, %v4406_v30  ;;  %v4425_v52 = vshll.u32 %v4141_v41, 16  ;;  %v6198_v58 = vld [vmem:[#allocation5 + $0xf8] sm:$0xff]  ;;  %4108 = vst.msk [vmem:[#allocation5 + $0xf0] sm:$0xff] %vm4101_vm9, %v10120_v54  ;;  %v4418_v28 = vrot.slane %v4416_v6, 6  ;;  %v3659_v50 = vld [vmem:[#allocation3 + $0x88] sm:$0xf] }
 0x36e   :  { %v7902_v17 = vcombine.low %v5456_v31, %v5470_v49  ;;  %v4402_v48 = vrot.slane %v4401_v14, 4  ;;  %v7873_v0 = vrot.slane %v4794_v23, 9  ;;  %6599 = vmatprep.mubr.bf16.mxu1 %v6198_v58  ;;  %v4424_v62 = vrot.slane %v4422_v46, 5  ;;  %v3660_v61 = vld [vmem:[#allocation3 + $0x8c] sm:$0x1]  ;;  %v5301_v31 = vpop.permute.xlu1 %5300 }
 0x36f   :  { %v4427_v35 = vrot.slane %v4425_v52, 6  ;;  %v4872_v22 = vrot.slane %v4795_v2, 5  ;;  %v7874_v45 = vrot.slane %v4796_v34, 9  ;;  %v4419_v25 = vor.u32 %v4418_v28, %v4415_v27  ;;  %v4798_v51 = vld [vmem:[#allocation3 + $0x58] sm:$0xe] }
 0x370   :  { %5618 = vst.msk [vmem:[#allocation5 + $0x90] sm:$0xff] %vm3259_vm5, %v7902_v17  ;;  %v4411_v19 = vsel %vm8681_vm13, %v4402_v48, %v4410_v56  ;;  %v4876_v41 = vrot.slane %v4797_v39, 5  ;;  %v3858_v54 = vshrl.u32 %v3657_v55, 16  ;;  %v3861_v3 = vshll.u32 %v3657_v55, 16  ;;  %v4799_v21 = vld [vmem:[#allocation3 + $0x5c] sm:$0x1]  ;;  %v10152_v39 = vpop.permute.xlu0 %5783 }
 0x371   :  { %5802 = vst.msk [vmem:[#allocation5 + $0x90] sm:$0xff] %vm4101_vm9, %v5782_v37  ;;  %v4428_v59 = vor.u32 %v4427_v35, %v4424_v62  ;;  %v4873_v42 = vsel %vm8634_vm7, %v7873_v0, %v4872_v22  ;;  %v3867_v18 = vshll.u32 %v3658_v13, 16  ;;  %v4800_v23 = vld [vmem:[#allocation3 + $0x60] sm:$0xe]  ;;  %v4420_v10 = vrot.slane %v4419_v25, 4 }
 0x372   :  { %v4877_v8 = vsel %vm8634_vm7, %v7874_v45, %v4876_v41  ;;  %v3860_v30 = vrot.slane %v3858_v54, 4  ;;  %v3872_v38 = vshrl.u32 %v3659_v50, 16  ;;  %v4801_v2 = vld [vmem:[#allocation3 + $0x64] sm:$0x1]  ;;  %v3863_v14 = vrot.slane %v3861_v3, 5 }
 0x373   :  { %v7886_v20 = vcombine.low %v4873_v42, %v4877_v8  ;;  %v3869_v27 = vrot.slane %v3867_v18, 5  ;;  %v3875_v6 = vshll.u32 %v3659_v50, 16  ;;  %v5343_v34 = vld [vmem:[#allocation3 + $0x60] sm:$0xf]  ;;  %v4429_v49 = vsel %vm8681_vm13, %v4420_v10, %v4428_v59  ;;  %v5344_v52 = vld [vmem:[#allocation3 + $0x64] sm:$0x1]  ;;  %v5303_v8 = vpop.permute.xlu1 %5302 }
 0x374   :  { %v3874_v37 = vrot.slane %v3872_v38, 4  ;;  %v3881_v56 = vshll.u32 %v3660_v61, 16  ;;  %v7875_v46 = vrot.slane %v4798_v51, 9  ;;  %v7858_v55 = vcombine.low %v4411_v19, %v4429_v49  ;;  %v5345_v28 = vld [vmem:[#allocation3 + $0x68] sm:$0xf]  ;;  %v6197_v0 = vld [vmem:[#allocation5 + $0xf0] sm:$0xff] }
 0x375   :  { %4945 = vst.msk [vmem:[#allocation5 + $0x88] sm:$0xff] %vm3259_vm5, %v7886_v20  ;;  %v3864_v58 = vor.u32 %v3863_v14, %v3860_v30  ;;  %v3877_v17 = vrot.slane %v3875_v6, 5  ;;  %v4880_v48 = vrot.slane %v4799_v21, 5  ;;  %v7876_v62 = vrot.slane %v4800_v23, 9  ;;  %6600 = vmatmul.mubr.bf16.gmra.mrb[40].mxu1 %v6197_v0  ;;  %v5346_v25 = vld [vmem:[#allocation3 + $0x6c] sm:$0x1]  ;;  %v10167_v20 = vpop.permute.xlu0 %5785 }
 0x376   :  { %5321 = vst.msk [vmem:[#allocation5 + $0x88] sm:$0xff] %vm4101_vm9, %v5301_v31  ;;  %v3883_v13 = vrot.slane %v3881_v56, 5  ;;  %v4884_v35 = vrot.slane %v4801_v2, 5  ;;  %v5472_v22 = vshrl.u32 %v5343_v34, 16  ;;  %v5475_v41 = vshll.u32 %v5343_v34, 16 }
 0x377   :  { %4469 = vst.msk [vmem:[#allocation5 + $0x120] sm:$0xff] %vm3259_vm5, %v7858_v55  ;;  %v3865_v45 = vrot.slane %v3864_v58, 4  ;;  %v3878_v50 = vor.u32 %v3877_v17, %v3874_v37  ;;  %v4881_v19 = vsel %vm8634_vm7, %v7875_v46, %v4880_v48  ;;  %v4802_v61 = vld [vmem:[#allocation3 + $0x68] sm:$0xe]  ;;  %v5481_v42 = vshll.u32 %v5344_v52, 16 }
 0x378   :  { %4781 = vst.msk [vmem:[#allocation5 + $0x120] sm:$0xff] %vm4101_vm9, %v10131_v9  ;;  %v4885_v54 = vsel %vm8634_vm7, %v7876_v62, %v4884_v35  ;;  %v6185_v51 = vld [vmem:[#allocation5 + $0x90] sm:$0xff]  ;;  %v5474_v59 = vrot.slane %v5472_v22, 4  ;;  %v5486_v3 = vshrl.u32 %v5345_v28, 16  ;;  %v4803_v18 = vld [vmem:[#allocation3 + $0x6c] sm:$0x1] }
 0x379   :  { %v3870_v21 = vsel %vm8661_vm12, %v3865_v45, %v3869_v27  ;;  %v3879_v23 = vrot.slane %v3878_v50, 4  ;;  %v7887_v10 = vcombine.low %v4881_v19, %v4885_v54  ;;  %6672 = vmatprep.mubr.bf16.mxu0 %v6185_v51  ;;  %v5477_v30 = vrot.slane %v5475_v41, 5  ;;  %v4804_v38 = vld [vmem:[#allocation3 + $0x70] sm:$0xe]  ;;  %v4805_v2 = vld [vmem:[#allocation3 + $0x74] sm:$0x1] }
 0x37a   :  { %v5483_v9 = vrot.slane %v5481_v42, 5  ;;  %v5488_v31 = vrot.slane %v5486_v3, 4  ;;  %v5489_v14 = vshll.u32 %v5345_v28, 16  ;;  %v5495_v6 = vshll.u32 %v5346_v25, 16  ;;  %v5347_v34 = vld [vmem:[#allocation3 + $0x70] sm:$0xf] }
 0x37b   :  { %v3884_v49 = vsel %vm8661_vm12, %v3879_v23, %v3883_v13  ;;  %4946 = vst.msk [vmem:[#allocation5 + $0xb0] sm:$0xff] %vm3259_vm5, %v7887_v10  ;;  %v5478_v27 = vor.u32 %v5477_v30, %v5474_v59  ;;  %v7877_v37 = vrot.slane %v4802_v61, 9  ;;  %v4888_v56 = vrot.slane %v4803_v18, 5  ;;  %v5348_v46 = vld [vmem:[#allocation3 + $0x74] sm:$0x1]  ;;  %v10182_v18 = vpop.permute.xlu0 %5787 }
 0x37c   :  { %v5349_v52 = vld [vmem:[#allocation3 + $0x78] sm:$0xf]  ;;  %v7826_v55 = vcombine.low %v3870_v21, %v3884_v49  ;;  %5322 = vst.msk [vmem:[#allocation5 + $0xb0] sm:$0xff] %vm4101_vm9, %v5303_v8  ;;  %v5491_v58 = vrot.slane %v5489_v14, 5  ;;  %v5497_v17 = vrot.slane %v5495_v6, 5  ;;  %v7878_v48 = vrot.slane %v4804_v38, 9  ;;  %v5305_v8 = vpop.permute.xlu1 %5304 }
 0x37d   :  { %v5350_v0 = vld [vmem:[#allocation3 + $0x7c] sm:$0x1]  ;;  %v5479_v28 = vrot.slane %v5478_v27, 4  ;;  %v4889_v62 = vsel %vm8634_vm7, %v7877_v37, %v4888_v56  ;;  %v4892_v35 = vrot.slane %v4805_v2, 5  ;;  %v6184_v13 = vld [vmem:[#allocation5 + $0x88] sm:$0xff]  ;;  %v5500_v22 = vshrl.u32 %v5347_v34, 16 }
 0x37e   :  { %v4806_v45 = vld [vmem:[#allocation3 + $0x78] sm:$0xe]  ;;  %3924 = vst.msk [vmem:[#allocation5 + $0x118] sm:$0xff] %vm3259_vm5, %v7826_v55  ;;  %v5492_v50 = vor.u32 %v5491_v58, %v5488_v31  ;;  %6673 = vmatmul.mubr.bf16.gmra.mrb[44].mxu0 %v6184_v13  ;;  %v5503_v19 = vshll.u32 %v5347_v34, 16  ;;  %v5509_v25 = vshll.u32 %v5348_v46, 16  ;;  %v5514_v41 = vshrl.u32 %v5349_v52, 16 }
 0x37f   :  { %v4807_v61 = vld [vmem:[#allocation3 + $0x7c] sm:$0x1]  ;;  %4109 = vst.msk [vmem:[#allocation5 + $0x118] sm:$0xff] %vm4101_vm9, %v10140_v12  ;;  %v5484_v54 = vsel %vm8661_vm12, %v5479_v28, %v5483_v9  ;;  %v4893_v51 = vsel %vm8634_vm7, %v7878_v48, %v4892_v35  ;;  %v5502_v59 = vrot.slane %v5500_v22, 4  ;;  %v5517_v42 = vshll.u32 %v5349_v52, 16  ;;  %v6203_v21 = vld [vmem:[#allocation5 + $0x120] sm:$0xff] }
 0x380   :  { %v4808_v3 = vld [vmem:[#allocation3 + $0x80] sm:$0xe]  ;;  %v5493_v23 = vrot.slane %v5492_v50, 4  ;;  %v7888_v10 = vcombine.low %v4889_v62, %v4893_v51  ;;  %v5505_v30 = vrot.slane %v5503_v19, 5  ;;  %v5511_v38 = vrot.slane %v5509_v25, 5  ;;  %6607 = vmatprep.mubr.bf16.mxu1 %v6203_v21 }
 0x381   :  { %v4809_v2 = vld [vmem:[#allocation3 + $0x84] sm:$0x1]  ;;  %v5516_v12 = vrot.slane %v5514_v41, 4  ;;  %v5519_v31 = vrot.slane %v5517_v42, 5  ;;  %v5523_v14 = vshll.u32 %v5350_v0, 16  ;;  %v7879_v9 = vrot.slane %v4806_v45, 9 }
 0x382   :  { %v5351_v6 = vld [vmem:[#allocation3 + $0x80] sm:$0xf]  ;;  %v5498_v34 = vsel %vm8661_vm12, %v5493_v23, %v5497_v17  ;;  %4947 = vst.msk [vmem:[#allocation5 + $0xd8] sm:$0xff] %vm3259_vm5, %v7888_v10  ;;  %v5506_v49 = vor.u32 %v5505_v30, %v5502_v59  ;;  %v4896_v27 = vrot.slane %v4807_v61, 5  ;;  %v7880_v37 = vrot.slane %v4808_v3, 9  ;;  %v10193_v61 = vpop.permute.xlu0 %5789  ;;  %v5307_v59 = vpop.permute.xlu1 %5306 }
 0x383   :  { %v5352_v56 = vld [vmem:[#allocation3 + $0x84] sm:$0x1]  ;;  %v5353_v46 = vld [vmem:[#allocation3 + $0x88] sm:$0xf]  ;;  %v7903_v52 = vcombine.low %v5484_v54, %v5498_v34  ;;  %5323 = vst.msk [vmem:[#allocation5 + $0xd8] sm:$0xff] %vm4101_vm9, %v5305_v8  ;;  %v5520_v55 = vor.u32 %v5519_v31, %v5516_v12  ;;  %v5525_v58 = vrot.slane %v5523_v14, 5 }
 0x384   :  { %v4900_v48 = vrot.slane %v4809_v2, 5  ;;  %v5354_v28 = vld [vmem:[#allocation3 + $0x8c] sm:$0x1]  ;;  %v4810_v0 = vld [vmem:[#allocation3 + $0x88] sm:$0xe]  ;;  %v5507_v62 = vrot.slane %v5506_v49, 4  ;;  %v4897_v35 = vsel %vm8634_vm7, %v7879_v9, %v4896_v27 }
 0x385   :  { %v5528_v17 = vshrl.u32 %v5351_v6, 16  ;;  %v5531_v13 = vshll.u32 %v5351_v6, 16  ;;  %v4811_v22 = vld [vmem:[#allocation3 + $0x8c] sm:$0x1]  ;;  %5619 = vst.msk [vmem:[#allocation5 + $0xb8] sm:$0xff] %vm3259_vm5, %v7903_v52  ;;  %v5521_v45 = vrot.slane %v5520_v55, 4 }
 0x386   :  { %v4901_v50 = vsel %vm8634_vm7, %v7880_v37, %v4900_v48  ;;  %v5537_v19 = vshll.u32 %v5352_v56, 16  ;;  %v5542_v25 = vshrl.u32 %v5353_v46, 16  ;;  %v4812_v41 = vld [vmem:[#allocation3 + $0x90] sm:$0xe]  ;;  %5803 = vst.msk [vmem:[#allocation5 + $0xb8] sm:$0xff] %vm4101_vm9, %v10152_v39  ;;  %v5512_v54 = vsel %vm8661_vm12, %v5507_v62, %v5511_v38  ;;  %v6202_v23 = vld [vmem:[#allocation5 + $0x118] sm:$0xff] }
 0x387   :  { %v7889_v51 = vcombine.low %v4897_v35, %v4901_v50  ;;  %v5530_v42 = vrot.slane %v5528_v17, 4  ;;  %v5533_v3 = vrot.slane %v5531_v13, 5  ;;  %v4813_v21 = vld [vmem:[#allocation3 + $0x94] sm:$0x1]  ;;  %v5526_v10 = vsel %vm8661_vm12, %v5521_v45, %v5525_v58  ;;  %v5355_v12 = vld [vmem:[#allocation3 + $0x90] sm:$0xf]  ;;  %6608 = vmatmul.mubr.bf16.gmra.mrb[44].mxu1 %v6202_v23  ;;  %v10210_v35 = vpop.permute.xlu0 %3240 }
 0x388   :  { %v5539_v8 = vrot.slane %v5537_v19, 5  ;;  %v5544_v30 = vrot.slane %v5542_v25, 4  ;;  %v5545_v2 = vshll.u32 %v5353_v46, 16  ;;  %v7904_v31 = vcombine.low %v5512_v54, %v5526_v10  ;;  %v5356_v9 = vld [vmem:[#allocation3 + $0x94] sm:$0x1] }
 0x389   :  { %4948 = vst.msk [vmem:[#allocation5 + $0x100] sm:$0xff] %vm3259_vm5, %v7889_v51  ;;  %v5534_v39 = vor.u32 %v5533_v3, %v5530_v42  ;;  %v5551_v14 = vshll.u32 %v5354_v28, 16  ;;  %v7881_v38 = vrot.slane %v4810_v0, 9  ;;  %v4904_v34 = vrot.slane %v4811_v22, 5  ;;  %v5357_v46 = vld [vmem:[#allocation3 + $0x98] sm:$0xf]  ;;  %v5309_v22 = vpop.permute.xlu1 %5308 }
 0x38a   :  { %5324 = vst.msk [vmem:[#allocation5 + $0x100] sm:$0xff] %vm4101_vm9, %v5307_v59  ;;  %v5547_v6 = vrot.slane %v5545_v2, 5  ;;  %v7882_v49 = vrot.slane %v4812_v41, 9  ;;  %v4908_v27 = vrot.slane %v4813_v21, 5  ;;  %v5556_v52 = vshrl.u32 %v5355_v12, 16  ;;  %v6189_v44 = vld [vmem:[#allocation5 + $0xb0] sm:$0xff] }
 0x38b   :  { %5620 = vst.msk [vmem:[#allocation5 + $0xe0] sm:$0xff] %vm3259_vm5, %v7904_v31  ;;  %v5535_v37 = vrot.slane %v5534_v39, 4  ;;  %v5553_v56 = vrot.slane %v5551_v14, 5  ;;  %v5559_v55 = vshll.u32 %v5355_v12, 16  ;;  %v4905_v48 = vsel %vm8634_vm7, %v7881_v38, %v4904_v34  ;;  %v5358_v0 = vld [vmem:[#allocation3 + $0x9c] sm:$0x1] }
 0x38c   :  { %5804 = vst.msk [vmem:[#allocation5 + $0xe0] sm:$0xff] %vm4101_vm9, %v10167_v20  ;;  %v5548_v58 = vor.u32 %v5547_v6, %v5544_v30  ;;  %v4909_v28 = vsel %vm8634_vm7, %v7882_v49, %v4908_v27  ;;  %v5565_v62 = vshll.u32 %v5356_v9, 16  ;;  %v5558_v45 = vrot.slane %v5556_v52, 4  ;;  %v5807_v19 = vld [vmem:[#allocation3 + $0x10] sm:$0xe] }
 0x38d   :  { %v5540_v17 = vsel %vm8661_vm12, %v5535_v37, %v5539_v8  ;;  %v7890_v13 = vcombine.low %v4905_v48, %v4909_v28  ;;  %v5561_v50 = vrot.slane %v5559_v55, 5  ;;  %v6190_v25 = vld [vmem:[#allocation5 + $0xb8] sm:$0xff]  ;;  %v5570_v54 = vshrl.u32 %v5357_v46, 16  ;;  %v5808_v23 = vld [vmem:[#allocation3 + $0x14] sm:$0x3] }
 0x38e   :  { %v5549_v20 = vrot.slane %v5548_v58, 4  ;;  %v5567_v41 = vrot.slane %v5565_v62, 5  ;;  %v5573_v51 = vshll.u32 %v5357_v46, 16  ;;  %6680 = vmatprep.mubr.bf16.mxu0 %v6190_v25  ;;  %v5579_v42 = vshll.u32 %v5358_v0, 16  ;;  %v5809_v2 = vld [vmem:[#allocation3 + $0x18] sm:$0xe] }
 0x38f   :  { %4949 = vst.msk [vmem:[#allocation5 + $0x128] sm:$0xff] %vm3259_vm5, %v7890_v13  ;;  %v5562_v59 = vor.u32 %v5561_v50, %v5558_v45  ;;  %v3244_v3 = vadd.f32 %v10210_v35, %v9338_v40  ;;  %v3243_v21 = vadd.f32 %v10210_v35, %v9334_v47  ;;  %6681 = vmatmul.mubr.bf16.gmra.mrb[48].mxu0 %v6189_v44  ;;  %v5572_v8 = vrot.slane %v5570_v54, 4  ;;  %v5810_v40 = vld [vmem:[#allocation3 + $0x1c] sm:$0x3]  ;;  %v5811_v28 = vld [vmem:[#allocation3 + $0x20] sm:$0xe] }
 0x390   :  { %v5554_v10 = vsel %vm8661_vm12, %v5549_v20, %v5553_v56  ;;  %5325 = vst.msk [vmem:[#allocation5 + $0x128] sm:$0xff] %vm4101_vm9, %v5309_v22  ;;  %v5575_v30 = vrot.slane %v5573_v51, 5  ;;  %v5840_v12 = vshrl.u32 %v5807_v19, 16  ;;  %v5581_v14 = vrot.slane %v5579_v42, 5  ;;  %v5812_v22 = vld [vmem:[#allocation3 + $0x24] sm:$0x3] }
 0x391   :  { %v7905_v31 = vcombine.low %v5540_v17, %v5554_v10  ;;  %v5563_v39 = vrot.slane %v5562_v59, 4  ;;  %7252 = vrot.lane.b32.xlu0 %v3244_v3, %s8425_s23  ;;  %7250 = vrot.lane.b32.xlu1 %v3243_v21, %s8425_s23  ;;  %v5843_v47 = vshll.u32 %v5807_v19, 16  ;;  %v5849_v6 = vshrl.u32 %v5808_v23, 16  ;;  %v6194_v25 = vld [vmem:[#allocation5 + $0xd8] sm:$0xff]  ;;  %v5813_v44 = vld [vmem:[#allocation3 + $0x28] sm:$0xe] }
 0x392   :  { %v5576_v38 = vor.u32 %v5575_v30, %v5572_v8  ;;  %v5842_v9 = vrot.slane %v5840_v12, 5  ;;  %v5852_v34 = vshll.u32 %v5808_v23, 16  ;;  %v5858_v56 = vshrl.u32 %v5809_v2, 16  ;;  %v5814_v42 = vld [vmem:[#allocation3 + $0x2c] sm:$0x3] }
 0x393   :  { %5621 = vst.msk [vmem:[#allocation5 + $0x108] sm:$0xff] %vm3259_vm5, %v7905_v31  ;;  %v5568_v49 = vsel %vm8661_vm12, %v5563_v39, %v5567_v41  ;;  %v6195_v27 = vld [vmem:[#allocation5 + $0xe0] sm:$0xff]  ;;  %v5845_v37 = vrot.slane %v5843_v47, 6  ;;  %v5861_v46 = vshll.u32 %v5809_v2, 16  ;;  %v5851_v55 = vrot.slane %v5849_v6, 5 }
 0x394   :  { %5805 = vst.msk [vmem:[#allocation5 + $0x108] sm:$0xff] %vm4101_vm9, %v10182_v18  ;;  %v5577_v52 = vrot.slane %v5576_v38, 4  ;;  %6688 = vmatprep.mubr.bf16.mxu0 %v6195_v27  ;;  %v5854_v58 = vrot.slane %v5852_v34, 6  ;;  %v5867_v48 = vshrl.u32 %v5810_v40, 16  ;;  %v5860_v62 = vrot.slane %v5858_v56, 5 }
 0x395   :  { %v5846_v0 = vor.u32 %v5845_v37, %v5842_v9  ;;  %v5863_v17 = vrot.slane %v5861_v46, 6  ;;  %v5870_v13 = vshll.u32 %v5810_v40, 16  ;;  %v3252_v20 = vadd.f32 %v10210_v35, %v9406_v1  ;;  %v5815_v38 = vld [vmem:[#allocation3 + $0x30] sm:$0xe] }
 0x396   :  { %v5582_v45 = vsel %vm8661_vm12, %v5577_v52, %v5581_v14  ;;  %v5855_v50 = vor.u32 %v5854_v58, %v5851_v55  ;;  %v5869_v19 = vrot.slane %v5867_v48, 5  ;;  %v3251_v59 = vadd.f32 %v10210_v35, %v9396_v4  ;;  %v5817_v52 = vld [vmem:[#allocation3 + $0x38] sm:$0xe] }
 0x397   :  { %v7906_v18 = vcombine.low %v5568_v49, %v5582_v45  ;;  %v5847_v41 = vrot.slane %v5846_v0, 4  ;;  %v5864_v54 = vor.u32 %v5863_v17, %v5860_v62  ;;  %v5872_v51 = vrot.slane %v5870_v13, 6  ;;  %6689 = vmatmul.mubr.bf16.gmra.mrb[52].mxu0 %v6194_v25  ;;  %7268 = vrot.lane.b32.xlu0 %v3252_v20, %s8425_s23  ;;  %v6199_v0 = vld [vmem:[#allocation5 + $0x100] sm:$0xff]  ;;  %v5818_v17 = vld [vmem:[#allocation3 + $0x3c] sm:$0x3] }
 0x398   :  { %v5876_v53 = vshrl.u32 %v5811_v28, 16  ;;  %v5879_v3 = vshll.u32 %v5811_v28, 16  ;;  %v5885_v21 = vshrl.u32 %v5812_v22, 16  ;;  %v5888_v8 = vshll.u32 %v5812_v22, 16  ;;  %7266 = vrot.lane.b32.xlu1 %v3251_v59, %s8425_s23 }
 0x399   :  { %5622 = vst.msk [vmem:[#allocation5 + $0x130] sm:$0xff] %vm3259_vm5, %v7906_v18  ;;  %v5856_v1 = vsel %vm8681_vm13, %v5847_v41, %v5855_v50  ;;  %v5865_v23 = vrot.slane %v5864_v54, 4  ;;  %v5873_v10 = vor.u32 %v5872_v51, %v5869_v19  ;;  %v5894_v12 = vshrl.u32 %v5813_v44, 16 }
 0x39a   :  { %5806 = vst.msk [vmem:[#allocation5 + $0x130] sm:$0xff] %vm4101_vm9, %v10193_v61  ;;  %v5878_v30 = vrot.slane %v5876_v53, 5  ;;  %v5881_v2 = vrot.slane %v5879_v3, 6  ;;  %v5887_v4 = vrot.slane %v5885_v21, 5  ;;  %v5890_v14 = vrot.slane %v5888_v8, 6 }
 0x39b   :  { %v6200_v31 = vld [vmem:[#allocation5 + $0x108] sm:$0xff]  ;;  %v5874_v39 = vsel %vm8681_vm13, %v5865_v23, %v5873_v10  ;;  %v5897_v40 = vshll.u32 %v5813_v44, 16  ;;  %v5903_v47 = vshrl.u32 %v5814_v42, 16  ;;  %v5896_v34 = vrot.slane %v5894_v12, 5  ;;  %v5816_v61 = vld [vmem:[#allocation3 + $0x34] sm:$0x3] }
 0x39c   :  { %6696 = vmatprep.mubr.bf16.mxu0 %v6200_v31  ;;  %v7931_v9 = vcombine.low %v5856_v1, %v5874_v39  ;;  %v5882_v6 = vor.u32 %v5881_v2, %v5878_v30  ;;  %v5906_v49 = vshll.u32 %v5814_v42, 16  ;;  %v5891_v27 = vor.u32 %v5890_v14, %v5887_v4  ;;  %v5819_v53 = vld [vmem:[#allocation3 + $0x40] sm:$0xe]  ;;  %v5820_v10 = vld [vmem:[#allocation3 + $0x44] sm:$0x3] }
 0x39d   :  { %v5899_v37 = vrot.slane %v5897_v40, 6  ;;  %v5905_v56 = vrot.slane %v5903_v47, 5  ;;  %v3253_v46 = vadd.f32 %v10210_v35, %v9392_v15  ;;  %v3245_v48 = vadd.f32 %v10210_v35, %v9332_v36  ;;  %v5821_v12 = vld [vmem:[#allocation3 + $0x48] sm:$0xe] }
 0x39e   :  { %6159 = vst.msk [vmem:[#allocation5 + $0x20] sm:$0xff] %vm3259_vm5, %v7931_v9  ;;  %v5883_v55 = vrot.slane %v5882_v6, 4  ;;  %v5908_v58 = vrot.slane %v5906_v49, 6  ;;  %v5912_v28 = vshrl.u32 %v5815_v38, 16  ;;  %v5915_v13 = vshll.u32 %v5815_v38, 16 }
 0x39f   :  { %v5900_v62 = vor.u32 %v5899_v37, %v5896_v34  ;;  %7270 = vrot.lane.b32.xlu0 %v3253_v46, %s8425_s23  ;;  %v5921_v22 = vshrl.u32 %v5816_v61, 16  ;;  %v5924_v45 = vshll.u32 %v5816_v61, 16  ;;  %6697 = vmatmul.mubr.bf16.gmra.mrb[56].mxu0 %v6199_v0  ;;  %v5930_v20 = vshrl.u32 %v5817_v52, 16  ;;  %v5822_v9 = vld [vmem:[#allocation3 + $0x4c] sm:$0x3] }
 0x3a0   :  { %v5892_v15 = vsel %vm8681_vm13, %v5883_v55, %v5891_v27  ;;  %v5909_v50 = vor.u32 %v5908_v58, %v5905_v56  ;;  %7254 = vrot.lane.b32.xlu1 %v3245_v48, %s8425_s23  ;;  %v5914_v19 = vrot.slane %v5912_v28, 5  ;;  %v5917_v25 = vrot.slane %v5915_v13, 6  ;;  %v6204_v61 = vld [vmem:[#allocation5 + $0x128] sm:$0xff] }
 0x3a1   :  { %v5901_v18 = vrot.slane %v5900_v62, 4  ;;  %v6205_v36 = vld [vmem:[#allocation5 + $0x130] sm:$0xff]  ;;  %v5923_v41 = vrot.slane %v5921_v22, 5  ;;  %v5926_v54 = vrot.slane %v5924_v45, 6  ;;  %v5932_v51 = vrot.slane %v5930_v20, 5 }
 0x3a2   :  { %6704 = vmatprep.mubr.bf16.mxu0 %v6205_v36  ;;  %v5933_v44 = vshll.u32 %v5817_v52, 16  ;;  %v5939_v59 = vshrl.u32 %v5818_v17, 16  ;;  %v5942_v42 = vshll.u32 %v5818_v17, 16  ;;  %v5918_v21 = vor.u32 %v5917_v25, %v5914_v19  ;;  %v5823_v62 = vld [vmem:[#allocation3 + $0x60] sm:$0xe] }
 0x3a3   :  { %v5910_v3 = vsel %vm8681_vm13, %v5901_v18, %v5909_v50  ;;  %v5927_v1 = vor.u32 %v5926_v54, %v5923_v41  ;;  %v3254_v23 = vadd.f32 %v10210_v35, %v9398_v57  ;;  %v3246_v14 = vadd.f32 %v10210_v35, %v9336_v16  ;;  %v5825_v36 = vld [vmem:[#allocation3 + $0x68] sm:$0xe]  ;;  %v5826_v54 = vld [vmem:[#allocation3 + $0x6c] sm:$0x3] }
 0x3a4   :  { %v7932_v8 = vcombine.low %v5892_v15, %v5910_v3  ;;  %v5935_v30 = vrot.slane %v5933_v44, 6  ;;  %v5941_v2 = vrot.slane %v5939_v59, 5  ;;  %v5944_v4 = vrot.slane %v5942_v42, 6  ;;  %v5824_v15 = vld [vmem:[#allocation3 + $0x64] sm:$0x3] }
 0x3a5   :  { %v6171_v31 = vld [vmem:[#allocation5 + $0x20] sm:$0xff]  ;;  %v5919_v39 = vrot.slane %v5918_v21, 4  ;;  %7272 = vrot.lane.b32.xlu0 %v3254_v23, %s8425_s23  ;;  %v5948_v40 = vshrl.u32 %v5819_v53, 16  ;;  %v5951_v47 = vshll.u32 %v5819_v53, 16  ;;  %v5957_v6 = vshrl.u32 %v5820_v10, 16  ;;  %7256 = vrot.lane.b32.xlu1 %v3246_v14, %s8425_s23 }
 0x3a6   :  { %8274 = vmatprep.mubr.msk.bf16.mxu1 %vm3259_vm5, %v6171_v31  ;;  %6160 = vst.msk [vmem:[#allocation5 + $0x48] sm:$0xff] %vm3259_vm5, %v7932_v8  ;;  %v5936_v57 = vor.u32 %v5935_v30, %v5932_v51  ;;  %v5945_v38 = vor.u32 %v5944_v4, %v5941_v2  ;;  %v5960_v34 = vshll.u32 %v5820_v10, 16  ;;  %v5966_v16 = vshrl.u32 %v5821_v12, 16  ;;  %v5827_v14 = vld [vmem:[#allocation3 + $0x70] sm:$0xe] }
 0x3a7   :  { %v5928_v49 = vsel %vm8681_vm13, %v5919_v39, %v5927_v1  ;;  %v5950_v27 = vrot.slane %v5948_v40, 5  ;;  %v5953_v37 = vrot.slane %v5951_v47, 6  ;;  %6705 = vmatmul.mubr.bf16.gmra.mrb[60].mxu0 %v6204_v61  ;;  %v5959_v46 = vrot.slane %v5957_v6, 5  ;;  %v5828_v40 = vld [vmem:[#allocation3 + $0x74] sm:$0x3] }
 0x3a8   :  { %v5937_v56 = vrot.slane %v5936_v57, 4  ;;  %v5962_v52 = vrot.slane %v5960_v34, 6  ;;  %v5969_v55 = vshll.u32 %v5821_v12, 16  ;;  %v5968_v48 = vrot.slane %v5966_v16, 5  ;;  %v5829_v6 = vld [vmem:[#allocation3 + $0x78] sm:$0xe] }
 0x3a9   :  { %v5954_v58 = vor.u32 %v5953_v37, %v5950_v27  ;;  %v5975_v28 = vshrl.u32 %v5822_v9, 16  ;;  %v5978_v0 = vshll.u32 %v5822_v9, 16  ;;  %v3255_v45 = vadd.f32 %v10210_v35, %v9483_v33  ;;  %v5830_v16 = vld [vmem:[#allocation3 + $0x7c] sm:$0x3] }
 0x3aa   :  { %v5946_v17 = vsel %vm8681_vm13, %v5937_v56, %v5945_v38  ;;  %v5963_v13 = vor.u32 %v5962_v52, %v5959_v46  ;;  %v5971_v22 = vrot.slane %v5969_v55, 6  ;;  %v3247_v41 = vadd.f32 %v10210_v35, %v9386_v11 }
 0x3ab   :  { %v7933_v50 = vcombine.low %v5928_v49, %v5946_v17  ;;  %v5955_v19 = vrot.slane %v5954_v58, 4  ;;  %v5977_v20 = vrot.slane %v5975_v28, 5  ;;  %v5980_v18 = vrot.slane %v5978_v0, 6  ;;  %7274 = vrot.lane.b32.xlu0 %v3255_v45, %s8425_s23 }
 0x3ac   :  { %v5972_v25 = vor.u32 %v5971_v22, %v5968_v48  ;;  %v5984_v51 = vshrl.u32 %v5823_v62, 16  ;;  %v5987_v44 = vshll.u32 %v5823_v62, 16  ;;  %v5993_v53 = vshrl.u32 %v5824_v15, 16  ;;  %7258 = vrot.lane.b32.xlu1 %v3247_v41, %s8425_s23 }
 0x3ad   :  { %v6176_v59 = vld [vmem:[#allocation5 + $0x48] sm:$0xff]  ;;  %6161 = vst.msk [vmem:[#allocation5 + $0x70] sm:$0xff] %vm3259_vm5, %v7933_v50  ;;  %v5964_v33 = vsel %vm8681_vm13, %v5955_v19, %v5963_v13  ;;  %v5981_v42 = vor.u32 %v5980_v18, %v5977_v20  ;;  %v5996_v3 = vshll.u32 %v5824_v15, 16  ;;  %v6002_v11 = vshrl.u32 %v5825_v36, 16  ;;  %v5831_v50 = vld [vmem:[#allocation3 + $0x80] sm:$0xe] }
 0x3ae   :  { %8275 = vmatmul.mubr.msk.bf16.vlgmr.msra.gmra.mrb[48].mxu1 %vm3259_vm5, %v6176_v59  ;;  %v5973_v21 = vrot.slane %v5972_v25, 4  ;;  %v5986_v1 = vrot.slane %v5984_v51, 5  ;;  %v5989_v23 = vrot.slane %v5987_v44, 6  ;;  %v5995_v10 = vrot.slane %v5993_v53, 5  ;;  %v5832_v25 = vld [vmem:[#allocation3 + $0x84] sm:$0x3] }
 0x3af   :  { %v5998_v8 = vrot.slane %v5996_v3, 6  ;;  %v6005_v30 = vshll.u32 %v5825_v36, 16  ;;  %v6011_v2 = vshrl.u32 %v5826_v54, 16  ;;  %v6004_v31 = vrot.slane %v6002_v11, 5  ;;  %v5833_v59 = vld [vmem:[#allocation3 + $0x88] sm:$0xe] }
 0x3b0   :  { %v5982_v4 = vsel %vm8681_vm13, %v5973_v21, %v5981_v42  ;;  %v5990_v12 = vor.u32 %v5989_v23, %v5986_v1  ;;  %v6014_v39 = vshll.u32 %v5826_v54, 16  ;;  %v3256_v61 = vadd.f32 %v10210_v35, %v9488_v26  ;;  %v5834_v23 = vld [vmem:[#allocation3 + $0x8c] sm:$0x3] }
 0x3b1   :  { %v7934_v47 = vcombine.low %v5964_v33, %v5982_v4  ;;  %v5999_v57 = vor.u32 %v5998_v8, %v5995_v10  ;;  %v6007_v38 = vrot.slane %v6005_v30, 6  ;;  %v6013_v9 = vrot.slane %v6011_v2, 5 }
 0x3b2   :  { %v5991_v34 = vrot.slane %v5990_v12, 4  ;;  %v6016_v49 = vrot.slane %v6014_v39, 6  ;;  %v3248_v27 = vadd.f32 %v10210_v35, %v9390_v63  ;;  %v6020_v56 = vshrl.u32 %v5827_v14, 16  ;;  %7276 = vrot.lane.b32.xlu0 %v3256_v61, %s8425_s23  ;;  %v5836_v61 = vld [vmem:[#allocation3 + $0x94] sm:$0x3] }
 0x3b3   :  { %6162 = vst.msk [vmem:[#allocation5 + $0x98] sm:$0xff] %vm3259_vm5, %v7934_v47  ;;  %v6008_v37 = vor.u32 %v6007_v38, %v6004_v31  ;;  %v6023_v46 = vshll.u32 %v5827_v14, 16  ;;  %v6029_v52 = vshrl.u32 %v5828_v40, 16  ;;  %v6032_v26 = vshll.u32 %v5828_v40, 16  ;;  %v5835_v38 = vld [vmem:[#allocation3 + $0x90] sm:$0xe] }
 0x3b4   :  { %v6181_v55 = vld [vmem:[#allocation5 + $0x70] sm:$0xff]  ;;  %v6000_v58 = vsel %vm8681_vm13, %v5991_v34, %v5999_v57  ;;  %v6017_v48 = vor.u32 %v6016_v49, %v6013_v9  ;;  %7260 = vrot.lane.b32.xlu1 %v3248_v27, %s8425_s23  ;;  %v6038_v28 = vshrl.u32 %v5829_v6, 16  ;;  %v6022_v0 = vrot.slane %v6020_v56, 5 }
 0x3b5   :  { %8278 = vmatprep.mubr.msk.bf16.mxu1 %vm3259_vm5, %v6181_v55  ;;  %v6009_v63 = vrot.slane %v6008_v37, 4  ;;  %v6025_v62 = vrot.slane %v6023_v46, 6  ;;  %v6031_v17 = vrot.slane %v6029_v52, 5  ;;  %v6034_v13 = vrot.slane %v6032_v26, 6  ;;  %v5837_v46 = vld [vmem:[#allocation3 + $0x98] sm:$0xe] }
 0x3b6   :  { %v6040_v22 = vrot.slane %v6038_v28, 5  ;;  %v6041_v45 = vshll.u32 %v5829_v6, 16  ;;  %v6047_v15 = vshrl.u32 %v5830_v16, 16  ;;  %v6050_v18 = vshll.u32 %v5830_v16, 16 }
 0x3b7   :  { %v6018_v19 = vsel %vm8681_vm13, %v6009_v63, %v6017_v48  ;;  %v6026_v20 = vor.u32 %v6025_v62, %v6022_v0  ;;  %v3257_v36 = vadd.f32 %v10210_v35, %v9506_v24  ;;  %v6035_v54 = vor.u32 %v6034_v13, %v6031_v17 }
 0x3b8   :  { %v7935_v41 = vcombine.low %v6000_v58, %v6018_v19  ;;  %v6043_v51 = vrot.slane %v6041_v45, 6  ;;  %v6049_v44 = vrot.slane %v6047_v15, 5  ;;  %v6052_v42 = vrot.slane %v6050_v18, 6 }
 0x3b9   :  { %v6027_v33 = vrot.slane %v6026_v20, 4  ;;  %7278 = vrot.lane.b32.xlu0 %v3257_v36, %s8425_s23  ;;  %v3249_v53 = vadd.f32 %v10210_v35, %v9384_v60  ;;  %v6056_v3 = vshrl.u32 %v5831_v50, 16  ;;  %v6059_v24 = vshll.u32 %v5831_v50, 16 }
 0x3ba   :  { %v6186_v21 = vld [vmem:[#allocation5 + $0x98] sm:$0xff]  ;;  %6163 = vst.msk [vmem:[#allocation5 + $0xc0] sm:$0xff] %vm3259_vm5, %v7935_v41  ;;  %v6044_v1 = vor.u32 %v6043_v51, %v6040_v22  ;;  %v6065_v11 = vshrl.u32 %v5832_v25, 16  ;;  %v6068_v10 = vshll.u32 %v5832_v25, 16  ;;  %v6053_v30 = vor.u32 %v6052_v42, %v6049_v44 }
 0x3bb   :  { %8279 = vmatmul.mubr.msk.bf16.gmra.mrb[52].mxu1 %vm3259_vm5, %v6186_v21  ;;  %v6036_v8 = vsel %vm8681_vm13, %v6027_v33, %v6035_v54  ;;  %7262 = vrot.lane.b32.xlu1 %v3249_v53, %s8425_s23  ;;  %v6058_v2 = vrot.slane %v6056_v3, 5  ;;  %v6074_v4 = vshrl.u32 %v5833_v59, 16  ;;  %v6061_v12 = vrot.slane %v6059_v24, 6 }
 0x3bc   :  { %v6045_v60 = vrot.slane %v6044_v1, 4  ;;  %v6067_v31 = vrot.slane %v6065_v11, 5  ;;  %v6070_v39 = vrot.slane %v6068_v10, 6  ;;  %v6077_v40 = vshll.u32 %v5833_v59, 16 }
 0x3bd   :  { %v6076_v14 = vrot.slane %v6074_v4, 5  ;;  %v6083_v47 = vshrl.u32 %v5834_v23, 16  ;;  %v6086_v57 = vshll.u32 %v5834_v23, 16  ;;  %v6062_v6 = vor.u32 %v6061_v12, %v6058_v2 }
 0x3be   :  { %v6054_v9 = vsel %vm8681_vm13, %v6045_v60, %v6053_v30  ;;  %v6071_v34 = vor.u32 %v6070_v39, %v6067_v31  ;;  %v3258_v49 = vadd.f32 %v10210_v35, %v9512_v29  ;;  %v6079_v37 = vrot.slane %v6077_v40, 6  ;;  %v5838_v29 = vld [vmem:[#allocation3 + $0x9c] sm:$0x3] }
 0x3bf   :  { %v7936_v27 = vcombine.low %v6036_v8, %v6054_v9  ;;  %v6085_v16 = vrot.slane %v6083_v47, 5  ;;  %v6088_v56 = vrot.slane %v6086_v57, 6  ;;  %v6063_v52 = vrot.slane %v6062_v6, 4 }
 0x3c0   :  { %7280 = vrot.lane.b32.xlu0 %v3258_v49, %s8425_s23  ;;  %v3250_v55 = vadd.f32 %v10210_v35, %v9388_v5  ;;  %v6092_v58 = vshrl.u32 %v5835_v38, 16  ;;  %v6095_v48 = vshll.u32 %v5835_v38, 16  ;;  %v6080_v28 = vor.u32 %v6079_v37, %v6076_v14 }
 0x3c1   :  { %v6191_v26 = vld [vmem:[#allocation5 + $0xc0] sm:$0xff]  ;;  %6164 = vst.msk [vmem:[#allocation5 + $0xe8] sm:$0xff] %vm3259_vm5, %v7936_v27  ;;  %v6089_v63 = vor.u32 %v6088_v56, %v6085_v16  ;;  %v6101_v0 = vshrl.u32 %v5836_v61, 16  ;;  %v6104_v62 = vshll.u32 %v5836_v61, 16  ;;  %v6072_v17 = vsel %vm8681_vm13, %v6063_v52, %v6071_v34 }
 0x3c2   :  { %8282 = vmatprep.mubr.msk.bf16.mxu1 %vm3259_vm5, %v6191_v26  ;;  %7264 = vrot.lane.b32.xlu1 %v3250_v55, %s8425_s23  ;;  %v6094_v13 = vrot.slane %v6092_v58, 5  ;;  %v6097_v22 = vrot.slane %v6095_v48, 6  ;;  %v6110_v5 = vshrl.u32 %v5837_v46, 16  ;;  %v6081_v35 = vrot.slane %v6080_v28, 4 }
 0x3c3   :  { %v6103_v45 = vrot.slane %v6101_v0, 5  ;;  %v6106_v15 = vrot.slane %v6104_v62, 6  ;;  %v6113_v50 = vshll.u32 %v5837_v46, 16  ;;  %v6119_v18 = vshrl.u32 %v5838_v29, 16 }
 0x3c4   :  { %v6098_v19 = vor.u32 %v6097_v22, %v6094_v13  ;;  %v6112_v20 = vrot.slane %v6110_v5, 5  ;;  %v6122_v36 = vshll.u32 %v5838_v29, 16  ;;  %v6090_v25 = vsel %vm8681_vm13, %v6081_v35, %v6089_v63 }
 0x3c5   :  { %v6107_v41 = vor.u32 %v6106_v15, %v6103_v45  ;;  %v6115_v54 = vrot.slane %v6113_v50, 6  ;;  %v7937_v51 = vcombine.low %v6072_v17, %v6090_v25  ;;  %v6121_v59 = vrot.slane %v6119_v18, 5 }
 0x3c6   :  { %v6099_v44 = vrot.slane %v6098_v19, 4  ;;  %v6124_v33 = vrot.slane %v6122_v36, 6  ;;  %vm8427_vm7 = vmmov 0   ;;  %vm7101_vm12 = vcmask 31744  }
 0x3c7   :  { %v6116_v42 = vor.u32 %v6115_v54, %v6112_v20  ;;  %6165 = vst.msk [vmem:[#allocation5 + $0x110] sm:$0xff] %vm3259_vm5, %v7937_v51  ;;  %vm7364_vm2 = vcmask 1047559  }
 0x3c8   :  { %v6196_v53 = vld [vmem:[#allocation5 + $0xe8] sm:$0xff]  ;;  %v6125_v3 = vor.u32 %v6124_v33, %v6121_v59  ;;  %v6108_v21 = vsel %vm8681_vm13, %v6099_v44, %v6107_v41 }
 0x3c9   :  { %8283 = vmatmul.mubr.msk.bf16.gmra.mrb[56].mxu1 %vm3259_vm5, %v6196_v53  ;;  %v6117_v1 = vrot.slane %v6116_v42, 4 }
 0x3cb   :  { %v6126_v23 = vsel %vm8681_vm13, %v6117_v1, %v6125_v3  ;;  %vm7349_vm13 = vcmask 1042434  }
 0x3cc   :  { %v7938_v24 = vcombine.low %v6108_v21, %v6126_v23 }
 0x3ce   :  { %6166 = vst.msk [vmem:[#allocation5 + $0x138] sm:$0xff] %vm3259_vm5, %v7938_v24  ;;  %v6201_v11 = vld [vmem:[#allocation5 + $0x110] sm:$0xff] }
 0x3cf   :  { %8286 = vmatprep.mubr.msk.bf16.mxu1 %vm3259_vm5, %v6201_v11 }
 0x3d5   :  { %v6206_v10 = vld [vmem:[#allocation5 + $0x138] sm:$0xff] }
 0x3d6   :  { %8287 = vmatmul.mubr.msk.bf16.gmra.mrb[60].mxu1 %vm3259_vm5, %v6206_v10 }
 0x3f2   :  { %v8111_v8 = vpop.f32.mrb[16].mxu1 }
 0x3f3   :  { %v8112_v30 = vpop.f32.mrb[17].mxu1 }
 0x3f4   :  { %v8113_v2 = vadd.f32 %v8112_v30, %v8111_v8  ;;  %v8114_v4 = vpop.f32.mrb[18].mxu1 }
 0x3f5   :  { %v8115_v60 = vpop.f32.mrb[19].mxu1 }
 0x3f6   :  { %v8116_v12 = vadd.f32 %v8115_v60, %v8114_v4 }
 0x3fd   :  { %v8117_v31 = vpop.f32.mrb[20].mxu1 }
 0x3fe   :  { %v8118_v39 = vpop.f32.mrb[21].mxu1 }
 0x3ff   :  { %v8119_v14 = vadd.f32 %v8118_v39, %v8117_v31  ;;  %v8120_v32 = vpop.f32.mrb[22].mxu1 }
 0x400   :  { %v8121_v40 = vpop.f32.mrb[23].mxu1 }
 0x401   :  { %v8122_v47 = vadd.f32 %v8121_v40, %v8120_v32 }
 0x408   :  { %v8123_v57 = vpop.f32.mrb[24].mxu1 }
 0x409   :  { %v8124_v38 = vpop.f32.mrb[25].mxu1 }
 0x40a   :  { %v8125_v9 = vadd.f32 %v8124_v38, %v8123_v57  ;;  %v8126_v6 = vpop.f32.mrb[26].mxu1 }
 0x40b   :  { %v8127_v34 = vpop.f32.mrb[27].mxu1 }
 0x40c   :  { %v8128_v49 = vadd.f32 %v8127_v34, %v8126_v6 }
 0x413   :  { %v8129_v61 = vpop.f32.mrb[28].mxu1 }
 0x414   :  { %v8130_v27 = vpop.f32.mrb[29].mxu1 }
 0x415   :  { %v8131_v37 = vadd.f32 %v8130_v27, %v8129_v61  ;;  %v8132_v16 = vpop.f32.mrb[30].mxu1 }
 0x416   :  { %v8133_v56 = vpop.f32.mrb[31].mxu1 }
 0x417   :  { %v8134_v46 = vadd.f32 %v8133_v56, %v8132_v16 }
 0x41c   :  { %v8175_v52 = vpop.f32.mrb[32].mxu0 }
 0x41d   :  { %v8176_v55 = vpop.f32.mrb[33].mxu0 }
 0x41e   :  { %v8177_v58 = vadd.f32 %v8176_v55, %v8175_v52  ;;  %v8178_v48 = vpop.f32.mrb[34].mxu0 }
 0x41f   :  { %v8179_v26 = vpop.f32.mrb[35].mxu0 }
 0x420   :  { %v8180_v28 = vadd.f32 %v8179_v26, %v8178_v48  ;;  %v10324_v63 = vadd.f32 %v8177_v58, %v8113_v2 }
 0x422   :  { %v10326_v29 = vadd.f32 %v8180_v28, %v8116_v12 }
 0x425   :  { %v8135_v0 = vpop.f32.mrb[32].mxu1 }
 0x426   :  { %v8136_v62 = vpop.f32.mrb[33].mxu1 }
 0x427   :  { %v8137_v17 = vadd.f32 %v8136_v62, %v8135_v0  ;;  %v8138_v13 = vpop.f32.mrb[34].mxu1 }
 0x428   :  { %v8139_v22 = vpop.f32.mrb[35].mxu1 }
 0x429   :  { %v8140_v5 = vadd.f32 %v8139_v22, %v8138_v13 }
 0x42f   :  { %v8181_v35 = vpop.f32.mrb[36].mxu0 }
 0x430   :  { %v8182_v45 = vpop.f32.mrb[37].mxu0 }
 0x431   :  { %v8183_v15 = vadd.f32 %v8182_v45, %v8181_v35  ;;  %v8184_v50 = vpop.f32.mrb[38].mxu0  ;;  %v7001_v35 = vld [vmem:[%s10940_s8] sm:$0xff] }
 0x432   :  { %v8185_v19 = vpop.f32.mrb[39].mxu0 }
 0x433   :  { %v8186_v20 = vadd.f32 %v8185_v19, %v8184_v50  ;;  %v10328_v18 = vadd.f32 %v8183_v15, %v8119_v14  ;;  %v8426_v15 = vmov 0.0|0.0   ;;  %v7004_v19 = vld [vmem:[%s10940_s8 + $0x18] sm:$0xff] }
 0x434   :  { %8314 = vmatprep.subr.bf16.mxu1 %v8426_v15 }
 0x435   :  { %v10330_v36 = vadd.f32 %v8186_v20, %v8122_v47  ;;  %v8428_v20 = vmov 0.0  }
 0x436   :  { %8306 = vmatprep.mubr.msk.f32.mxu1 %vm8427_vm7, %v8428_v20 }
 0x437   :  { %v8141_v25 = vpop.f32.mrb[36].mxu1 }
 0x438   :  { %v8142_v41 = vpop.f32.mrb[37].mxu1 }
 0x439   :  { %v8143_v54 = vadd.f32 %v8142_v41, %v8141_v25  ;;  %v8144_v51 = vpop.f32.mrb[38].mxu1 }
 0x43a   :  { %v8145_v44 = vpop.f32.mrb[39].mxu1 }
 0x43b   :  { %v8146_v59 = vadd.f32 %v8145_v44, %v8144_v51 }
 0x43f   :  { %v8187_v33 = vpop.f32.mrb[40].mxu0 }
 0x440   :  { %v8188_v42 = vpop.f32.mrb[41].mxu0 }
 0x441   :  { %v8189_v53 = vadd.f32 %v8188_v42, %v8187_v33  ;;  %v8190_v3 = vpop.f32.mrb[42].mxu0  ;;  %v7006_v33 = vld [vmem:[%s10940_s8 + $0x28] sm:$0xff] }
 0x442   :  { %v8191_v21 = vpop.f32.mrb[43].mxu0 }
 0x443   :  { %v8192_v1 = vadd.f32 %v8191_v21, %v8190_v3  ;;  %v10332_v23 = vadd.f32 %v8189_v53, %v8125_v9 }
 0x445   :  { %v10334_v24 = vadd.f32 %v8192_v1, %v8128_v49  ;;  %v7007_v1 = vld [vmem:[%s10940_s8 + $0x30] sm:$0xff] }
 0x448   :  { %v8147_v11 = vpop.f32.mrb[40].mxu1 }
 0x449   :  { %v8148_v10 = vpop.f32.mrb[41].mxu1 }
 0x44a   :  { %v8149_v8 = vadd.f32 %v8148_v10, %v8147_v11  ;;  %v8150_v30 = vpop.f32.mrb[42].mxu1  ;;  %v7008_v11 = vld [vmem:[%s10940_s8 + $0x38] sm:$0xff] }
 0x44b   :  { %v8151_v2 = vpop.f32.mrb[43].mxu1 }
 0x44c   :  { %v8152_v4 = vadd.f32 %v8151_v2, %v8150_v30 }
 0x451   :  { %v8193_v60 = vpop.f32.mrb[44].mxu0 }
 0x452   :  { %v8194_v12 = vpop.f32.mrb[45].mxu0 }
 0x453   :  { %v8195_v31 = vadd.f32 %v8194_v12, %v8193_v60  ;;  %v8196_v39 = vpop.f32.mrb[46].mxu0 }
 0x454   :  { %v8197_v14 = vpop.f32.mrb[47].mxu0 }
 0x455   :  { %v8198_v32 = vadd.f32 %v8197_v14, %v8196_v39  ;;  %v10336_v40 = vadd.f32 %v8195_v31, %v8131_v37 }
 0x457   :  { %v10338_v47 = vadd.f32 %v8198_v32, %v8134_v46 }
 0x45a   :  { %v8153_v57 = vpop.f32.mrb[44].mxu1 }
 0x45b   :  { %v8154_v38 = vpop.f32.mrb[45].mxu1 }
 0x45c   :  { %v8155_v9 = vadd.f32 %v8154_v38, %v8153_v57  ;;  %v8156_v6 = vpop.f32.mrb[46].mxu1 }
 0x45d   :  { %v8157_v34 = vpop.f32.mrb[47].mxu1 }
 0x45e   :  { %v8158_v49 = vadd.f32 %v8157_v34, %v8156_v6 }
 0x462   :  { %v8199_v61 = vpop.f32.mrb[48].mxu0 }
 0x463   :  { %v8200_v27 = vpop.f32.mrb[49].mxu0 }
 0x464   :  { %v8201_v16 = vadd.f32 %v8200_v27, %v8199_v61  ;;  %v8202_v56 = vpop.f32.mrb[50].mxu0 }
 0x465   :  { %v8203_v52 = vpop.f32.mrb[51].mxu0 }
 0x466   :  { %v8204_v55 = vadd.f32 %v8203_v52, %v8202_v56  ;;  %v10340_v58 = vadd.f32 %v8201_v16, %v8137_v17  ;;  %v7002_v17 = vld [vmem:[%s10940_s8 + $0x8] sm:$0xff] }
 0x467   :  { %v8315_v50 = vpack.c.bf16 %v7002_v17, %v7001_v35 }
 0x468   :  { %v10342_v48 = vadd.f32 %v8204_v55, %v8140_v5  ;;  %v7003_v5 = vld [vmem:[%s10940_s8 + $0x10] sm:$0xff] }
 0x469   :  { %8316 = vmatpush3.bf16.msra.mxu1 %v8315_v50  ;;  %v8318_v51 = vpack.c.bf16 %v7004_v19, %v7003_v5 }
 0x46a   :  { %v8205_v37 = vpop.f32.mrb[52].mxu0  ;;  %8317 = vmatprep.subr.bf16.mxu1 %v8426_v15 }
 0x46b   :  { %v8206_v26 = vpop.f32.mrb[53].mxu0 }
 0x46c   :  { %v8207_v46 = vadd.f32 %v8206_v26, %v8205_v37  ;;  %v8208_v28 = vpop.f32.mrb[54].mxu0 }
 0x46d   :  { %v8209_v0 = vpop.f32.mrb[55].mxu0  ;;  %8319 = vmatpush3.bf16.msra.mxu1 %v8318_v51 }
 0x46e   :  { %v8210_v62 = vadd.f32 %v8209_v0, %v8208_v28  ;;  %v10344_v13 = vadd.f32 %v8207_v46, %v8143_v54  ;;  %8320 = vmatprep.subr.bf16.mxu1 %v8426_v15 }
 0x470   :  { %v10346_v22 = vadd.f32 %v8210_v62, %v8146_v59  ;;  %v7005_v59 = vld [vmem:[%s10940_s8 + $0x20] sm:$0xff] }
 0x471   :  { %v8321_v21 = vpack.c.bf16 %v7006_v33, %v7005_v59 }
 0x472   :  { %v8211_v45 = vpop.f32.mrb[56].mxu0 }
 0x473   :  { %v8212_v25 = vpop.f32.mrb[57].mxu0  ;;  %8322 = vmatpush3.bf16.msra.mxu1 %v8321_v21 }
 0x474   :  { %v8213_v41 = vadd.f32 %v8212_v25, %v8211_v45  ;;  %v8214_v54 = vpop.f32.mrb[58].mxu0  ;;  %8323 = vmatprep.subr.bf16.mxu1 %v8426_v15 }
 0x475   :  { %v8215_v44 = vpop.f32.mrb[59].mxu0 }
 0x476   :  { %v8216_v42 = vadd.f32 %v8215_v44, %v8214_v54  ;;  %v10368_v53 = vadd.f32 %v8213_v41, %v8149_v8  ;;  %v8324_v8 = vpack.c.bf16 %v7008_v11, %v7007_v1 }
 0x478   :  { %v10370_v3 = vadd.f32 %v8216_v42, %v8152_v4  ;;  %8325 = vmatpush3.bf16.msra.mxu1 %v8324_v8 }
 0x479   :  { %8309 = vmatprep.subr.mxu1 %v8428_v20 }
 0x47a   :  { %v8217_v10 = vpop.f32.mrb[60].mxu0 }
 0x47b   :  { %v8218_v30 = vpop.f32.mrb[61].mxu0 }
 0x47c   :  { %v8219_v2 = vadd.f32 %v8218_v30, %v8217_v10  ;;  %v8220_v60 = vpop.f32.mrb[62].mxu0 }
 0x47d   :  { %v8221_v12 = vpop.f32.mrb[63].mxu0 }
 0x47e   :  { %v8222_v4 = vadd.f32 %v8221_v12, %v8220_v60  ;;  %v10378_v31 = vadd.f32 %v8219_v2, %v8155_v9 }
 0x480   :  { %v10380_v14 = vadd.f32 %v8222_v4, %v8158_v49 }
 0x481   :  { %v8276_v39 = vpop.f32.mrb[48].mxu1 }
 0x482   :  { %v10383_v32 = vadd.f32 %v8276_v39, %v10328_v18  ;;  %v6747_v57 = vpop.f32.mrb[49].mxu1 }
 0x483   :  { %v10387_v38 = vadd.f32 %v6747_v57, %v10324_v63  ;;  %v8277_v6 = vpop.f32.mrb[50].mxu1 }
 0x484   :  { %v10390_v34 = vadd.f32 %v8277_v6, %v10330_v36  ;;  %v6750_v61 = vpop.f32.mrb[51].mxu1  ;;  %v6849_v36 = vmul.f32 %v10383_v32, %v10383_v32 }
 0x485   :  { %v6847_v9 = vmul.f32 %v10387_v38, %v10387_v38  ;;  %v10395_v49 = vadd.f32 %v6750_v61, %v10326_v29  ;;  %v6810_v18 = vsel %vm3259_vm5, %v10387_v38, 0.0  ;;  %v6813_v29 = vsel %vm3259_vm5, %v10383_v32, 0.0 }
 0x486   :  { %v6866_v26 = vsel %vm3259_vm5, %v6849_v36, 0.0  ;;  %v6850_v46 = vmul.f32 %v10390_v34, %v10390_v34  ;;  %v6815_v0 = vsel %vm3259_vm5, %v10390_v34, 0.0 }
 0x487   :  { %v6811_v27 = vsel %vm3259_vm5, %v10395_v49, 0.0  ;;  %v6848_v63 = vmul.f32 %v10395_v49, %v10395_v49  ;;  %v6863_v56 = vsel %vm3259_vm5, %v6847_v9, 0.0 }
 0x488   :  { %v6812_v16 = vadd.f32 %v6811_v27, %v6810_v18  ;;  %v6868_v45 = vsel %vm3259_vm5, %v6850_v46, 0.0 }
 0x489   :  { %v6864_v52 = vsel %vm3259_vm5, %v6848_v63, 0.0 }
 0x48a   :  { %v6865_v55 = vadd.f32 %v6864_v52, %v6863_v56  ;;  %v6814_v37 = vadd.f32 %v6813_v29, %v6812_v16 }
 0x48c   :  { %v6867_v28 = vadd.f32 %v6866_v26, %v6865_v55  ;;  %v6816_v5 = vadd.f32 %v6815_v0, %v6814_v37 }
 0x48e   :  { %v8280_v62 = vpop.f32.mrb[52].mxu1  ;;  %v6869_v19 = vadd.f32 %v6868_v45, %v6867_v28 }
 0x48f   :  { %v10415_v35 = vadd.f32 %v8280_v62, %v10336_v40  ;;  %v6763_v17 = vpop.f32.mrb[53].mxu1 }
 0x490   :  { %v10419_v15 = vadd.f32 %v6763_v17, %v10332_v23  ;;  %v8281_v50 = vpop.f32.mrb[54].mxu1 }
 0x491   :  { %v10422_v25 = vadd.f32 %v8281_v50, %v10338_v47  ;;  %v6766_v41 = vpop.f32.mrb[55].mxu1  ;;  %v6853_v21 = vmul.f32 %v10415_v35, %v10415_v35 }
 0x492   :  { %v6817_v54 = vsel %vm3259_vm5, %v10419_v15, 0.0  ;;  %v6851_v40 = vmul.f32 %v10419_v15, %v10419_v15  ;;  %v10429_v51 = vadd.f32 %v6766_v41, %v10334_v24  ;;  %v6821_v24 = vsel %vm3259_vm5, %v10415_v35, 0.0 }
 0x493   :  { %v6818_v44 = vadd.f32 %v6817_v54, %v6816_v5  ;;  %v6874_v30 = vsel %vm3259_vm5, %v6853_v21, 0.0  ;;  %v6854_v2 = vmul.f32 %v10422_v25, %v10422_v25  ;;  %v6823_v8 = vsel %vm3259_vm5, %v10422_v25, 0.0 }
 0x494   :  { %v6870_v59 = vsel %vm3259_vm5, %v6851_v40, 0.0  ;;  %v6819_v23 = vsel %vm3259_vm5, %v10429_v51, 0.0  ;;  %v6852_v47 = vmul.f32 %v10429_v51, %v10429_v51 }
 0x495   :  { %v6871_v33 = vadd.f32 %v6870_v59, %v6869_v19  ;;  %v6820_v42 = vadd.f32 %v6819_v23, %v6818_v44  ;;  %v6876_v6 = vsel %vm3259_vm5, %v6854_v2, 0.0 }
 0x496   :  { %v6872_v1 = vsel %vm3259_vm5, %v6852_v47, 0.0 }
 0x497   :  { %v6873_v11 = vadd.f32 %v6872_v1, %v6871_v33  ;;  %v6822_v10 = vadd.f32 %v6821_v24, %v6820_v42 }
 0x499   :  { %v6875_v60 = vadd.f32 %v6874_v30, %v6873_v11  ;;  %v6824_v57 = vadd.f32 %v6823_v8, %v6822_v10 }
 0x49b   :  { %v6877_v18 = vadd.f32 %v6876_v6, %v6875_v60 }
 0x49c   :  { %v8284_v12 = vpop.f32.mrb[56].mxu1 }
 0x49d   :  { %v10447_v4 = vadd.f32 %v8284_v12, %v10344_v13  ;;  %v6779_v39 = vpop.f32.mrb[57].mxu1 }
 0x49e   :  { %v10451_v61 = vadd.f32 %v6779_v39, %v10340_v58  ;;  %v8285_v9 = vpop.f32.mrb[58].mxu1 }
 0x49f   :  { %v10454_v27 = vadd.f32 %v8285_v9, %v10346_v22  ;;  %v6782_v63 = vpop.f32.mrb[59].mxu1  ;;  %v6857_v58 = vmul.f32 %v10447_v4, %v10447_v4  ;;  %v6829_v26 = vsel %vm3259_vm5, %v10447_v4, 0.0 }
 0x4a0   :  { %v6825_v36 = vsel %vm3259_vm5, %v10451_v61, 0.0  ;;  %v6855_v13 = vmul.f32 %v10451_v61, %v10451_v61  ;;  %v10461_v16 = vadd.f32 %v6782_v63, %v10342_v48 }
 0x4a1   :  { %v6826_v56 = vadd.f32 %v6825_v36, %v6824_v57  ;;  %v6858_v48 = vmul.f32 %v10454_v27, %v10454_v27  ;;  %v6882_v62 = vsel %vm3259_vm5, %v6857_v58, 0.0  ;;  %v6831_v17 = vsel %vm3259_vm5, %v10454_v27, 0.0 }
 0x4a2   :  { %v6878_v52 = vsel %vm3259_vm5, %v6855_v13, 0.0  ;;  %v6827_v22 = vsel %vm3259_vm5, %v10461_v16, 0.0  ;;  %v6856_v29 = vmul.f32 %v10461_v16, %v10461_v16 }
 0x4a3   :  { %v6879_v55 = vadd.f32 %v6878_v52, %v6877_v18  ;;  %v6828_v37 = vadd.f32 %v6827_v22, %v6826_v56  ;;  %v6884_v50 = vsel %vm3259_vm5, %v6858_v48, 0.0 }
 0x4a4   :  { %v6880_v46 = vsel %vm3259_vm5, %v6856_v29, 0.0 }
 0x4a5   :  { %v6830_v28 = vadd.f32 %v6829_v26, %v6828_v37  ;;  %v6881_v0 = vadd.f32 %v6880_v46, %v6879_v55 }
 0x4a7   :  { %v6883_v5 = vadd.f32 %v6882_v62, %v6881_v0  ;;  %v6832_v45 = vadd.f32 %v6831_v17, %v6830_v28 }
 0x4a9   :  { %v8288_v19 = vpop.f32.mrb[60].mxu1  ;;  %v6885_v41 = vadd.f32 %v6884_v50, %v6883_v5 }
 0x4aa   :  { %v6804_v54 = vadd.f32 %v8288_v19, %v10378_v31  ;;  %v6795_v40 = vpop.f32.mrb[61].mxu1 }
 0x4ab   :  { %v6796_v44 = vadd.f32 %v6795_v40, %v10368_v53  ;;  %v8289_v59 = vpop.f32.mrb[62].mxu1 }
 0x4ac   :  { %v6807_v23 = vadd.f32 %v8289_v59, %v10380_v14  ;;  %v6798_v47 = vpop.f32.mrb[63].mxu1  ;;  %v6861_v11 = vmul.f32 %v6804_v54, %v6804_v54  ;;  %v6837_v53 = vsel %vm3259_vm5, %v6804_v54, 0.0 }
 0x4ad   :  { %v6833_v33 = vsel %vm3259_vm5, %v6796_v44, 0.0  ;;  %v6859_v42 = vmul.f32 %v6796_v44, %v6796_v44  ;;  %v6799_v21 = vadd.f32 %v6798_v47, %v10370_v3 }
 0x4ae   :  { %v6834_v1 = vadd.f32 %v6833_v33, %v6832_v45  ;;  %v6862_v60 = vmul.f32 %v6807_v23, %v6807_v23  ;;  %v6890_v39 = vsel %vm3259_vm5, %v6861_v11, 0.0  ;;  %v6839_v3 = vsel %vm3259_vm5, %v6807_v23, 0.0  ;;  %v6905_v45 = vld [vmem:[%s10937_s5] sm:$0x1] }
 0x4af   :  { %v6886_v24 = vsel %vm3259_vm5, %v6859_v42, 0.0  ;;  %v6835_v10 = vsel %vm3259_vm5, %v6799_v21, 0.0  ;;  %v6860_v30 = vmul.f32 %v6799_v21, %v6799_v21 }
 0x4b0   :  { %v6887_v31 = vadd.f32 %v6886_v24, %v6885_v41  ;;  %v6836_v2 = vadd.f32 %v6835_v10, %v6834_v1  ;;  %v6892_v9 = vsel %vm3259_vm5, %v6862_v60, 0.0  ;;  %v6909_v41 = vld [vmem:[%s10938_s6] sm:$0x1] }
 0x4b1   :  { %v6888_v14 = vsel %vm3259_vm5, %v6860_v30, 0.0 }
 0x4b2   :  { %v6838_v8 = vadd.f32 %v6837_v53, %v6836_v2  ;;  %v6889_v12 = vadd.f32 %v6888_v14, %v6887_v31 }
 0x4b4   :  { %v6840_v57 = vadd.f32 %v6839_v3, %v6838_v8  ;;  %v6891_v6 = vadd.f32 %v6890_v39, %v6889_v12 }
 0x4b6   :  { %v6841_v18 = vrot.slane %v6840_v57, 4  ;;  %v6893_v63 = vadd.f32 %v6892_v9, %v6891_v6 }
 0x4b8   :  { %v6842_v36 = vadd.f32 %v6841_v18, %v6840_v57  ;;  %v6894_v13 = vrot.slane %v6893_v63, 4 }
 0x4ba   :  { %v6843_v56 = vrot.slane %v6842_v36, 2  ;;  %v6895_v58 = vadd.f32 %v6894_v13, %v6893_v63 }
 0x4bc   :  { %v6844_v52 = vadd.f32 %v6843_v56, %v6842_v36  ;;  %v6896_v22 = vrot.slane %v6895_v58, 2 }
 0x4be   :  { %v6845_v29 = vrot.slane %v6844_v52, 1  ;;  %v6897_v55 = vadd.f32 %v6896_v22, %v6895_v58 }
 0x4c0   :  { %v6846_v37 = vadd.f32 %v6845_v29, %v6844_v52  ;;  %v6898_v26 = vrot.slane %v6897_v55, 1 }
 0x4c2   :  { %v6899_v48 = vadd.f32 %v6898_v26, %v6897_v55  ;;  %v6900_v46 = vmul.f32 0.0078125, %v6846_v37 }
 0x4c4   :  { %v6901_v28 = vmul.f32 0.0078125, %v6899_v48  ;;  %v6902_v0 = vmul.f32 %v6900_v46, %v6900_v46 }
 0x4c6   :  { %v6903_v62 = vsub.f32 %v6901_v28, %v6902_v0 }
 0x4c8   :  { %v6904_v17 = vmax.f32 %v6903_v62, 0.0 }
 0x4ca   :  { %v6906_v5 = vadd.f32 1e-05, %v6904_v17 }
 0x4cc   :  { %8392 = vrsqrt.f32 %v6906_v5 }
 0x4d6   :  { %v8393_v50 = vpop.eup %8392 }
 0x4d7   :  { %v6908_v19 = vmul.f32 %v8393_v50, %v6905_v45 }
 0x4d9   :  { %v6910_v40 = vmul.f32 %v6908_v19, %v6900_v46  ;;  %v6916_v59 = vrot.slane %v6908_v19, %v9526_v43 }
 0x4db   :  { %v6911_v47 = vsub.f32 %v6909_v41, %v6910_v40  ;;  %v6926_v33 = vmul.f32 %v6916_v59, %v10451_v61  ;;  %v6927_v42 = vmul.f32 %v6916_v59, %v10461_v16  ;;  %v6928_v1 = vmul.f32 %v6916_v59, %v10447_v4 }
 0x4dc   :  { %v6929_v11 = vmul.f32 %v6916_v59, %v10454_v27  ;;  %v6930_v24 = vmul.f32 %v6916_v59, %v6796_v44  ;;  %v6931_v10 = vmul.f32 %v6916_v59, %v6799_v21  ;;  %v6932_v30 = vmul.f32 %v6916_v59, %v6804_v54 }
 0x4dd   :  { %v6933_v31 = vmul.f32 %v6916_v59, %v6807_v23  ;;  %v6938_v2 = vrot.slane %v6911_v47, %v9526_v43  ;;  %v6918_v53 = vmul.f32 %v6916_v59, %v10387_v38  ;;  %v6919_v60 = vmul.f32 %v6916_v59, %v10395_v49 }
 0x4de   :  { %v6920_v23 = vmul.f32 %v6916_v59, %v10383_v32  ;;  %v6921_v21 = vmul.f32 %v6916_v59, %v10390_v34  ;;  %v6922_v3 = vmul.f32 %v6916_v59, %v10419_v15  ;;  %v6923_v57 = vmul.f32 %v6916_v59, %v10429_v51 }
 0x4df   :  { %v10505_v14 = vadd.f32 %v6938_v2, %v6926_v33  ;;  %v10507_v8 = vadd.f32 %v6938_v2, %v6927_v42  ;;  %v10509_v61 = vadd.f32 %v6938_v2, %v6928_v1  ;;  %v10511_v16 = vadd.f32 %v6938_v2, %v6929_v11 }
 0x4e0   :  { %v10513_v4 = vadd.f32 %v6938_v2, %v6930_v24  ;;  %v10515_v27 = vadd.f32 %v6938_v2, %v6931_v10  ;;  %v10517_v54 = vadd.f32 %v6938_v2, %v6932_v30  ;;  %v10519_v44 = vadd.f32 %v6938_v2, %v6933_v31 }
 0x4e1   :  { %v6977_v38 = vsel %vm3259_vm5, %v10505_v14, 0.0  ;;  %v6978_v49 = vsel %vm3259_vm5, %v10507_v8, 0.0  ;;  %v6980_v39 = vsel %vm3259_vm5, %v10509_v61, 0.0  ;;  %v6982_v6 = vsel %vm3259_vm5, %v10511_v16, 0.0 }
 0x4e2   :  { %v6979_v12 = vadd.f32 %v6978_v49, %v6977_v38  ;;  %v6924_v9 = vmul.f32 %v6916_v59, %v10415_v35  ;;  %v6925_v18 = vmul.f32 %v6916_v59, %v10422_v25  ;;  %v10535_v63 = vadd.f32 %v6938_v2, %v6918_v53 }
 0x4e3   :  { %v10537_v36 = vadd.f32 %v6938_v2, %v6919_v60  ;;  %v10539_v34 = vadd.f32 %v6938_v2, %v6920_v23  ;;  %v10541_v13 = vadd.f32 %v6938_v2, %v6921_v21  ;;  %v10543_v56 = vadd.f32 %v6938_v2, %v6922_v3  ;;  %v7093_v3 = vld [vmem:[%s10942_s10] sm:$0xf] }
 0x4e4   :  { %v6981_v32 = vadd.f32 %v6980_v39, %v6979_v12  ;;  %v10545_v15 = vadd.f32 %v6938_v2, %v6923_v57  ;;  %v10547_v51 = vadd.f32 %v6938_v2, %v6924_v9  ;;  %v10549_v58 = vadd.f32 %v6938_v2, %v6925_v18  ;;  %v7983_v57 = vld [vmem:[%s10941_s9] ss:$0 sm:$0xff]  ;;  %s8430_s9 = smov [#allocation6]  }
 0x4e5   :  { %v6956_v25 = vsel %vm3259_vm5, %v10535_v63, 0.0  ;;  %v6957_v52 = vsel %vm3259_vm5, %v10537_v36, 0.0  ;;  %v6984_v22 = vsel %vm3259_vm5, %v10513_v4, 0.0  ;;  %v6959_v37 = vsel %vm3259_vm5, %v10539_v34, 0.0  ;;  %s7629_s10 = sshll.u32 %s8430_s9, 4  ;;  %s7630_s10 = int_to_ptr.vmem [resolvable:$true] %s7629_s10 }
 0x4e6   :  { %v6983_v35 = vadd.f32 %v6982_v6, %v6981_v32  ;;  %v6958_v29 = vadd.f32 %v6957_v52, %v6956_v25  ;;  %v6986_v26 = vsel %vm3259_vm5, %v10515_v27, 0.0  ;;  %v6961_v28 = vsel %vm3259_vm5, %v10541_v13, 0.0  ;;  %p8403_p1 = scmp.lt.s32.totalorder %s7630_s10, %s7630_s10 }
 0x4e7   :  { %v6988_v0 = vsel %vm3259_vm5, %v10517_v54, 0.0  ;;  %v6963_v5 = vsel %vm3259_vm5, %v10543_v56, 0.0  ;;  %v6990_v45 = vsel %vm3259_vm5, %v10519_v44, 0.0  ;;  %v6965_v41 = vsel %vm3259_vm5, %v10545_v15, 0.0 }
 0x4e8   :  { %v6985_v55 = vadd.f32 %v6984_v22, %v6983_v35  ;;  %v6960_v48 = vadd.f32 %v6959_v37, %v6958_v29  ;;  %v6967_v47 = vsel %vm3259_vm5, %v10547_v51, 0.0  ;;  %v6969_v1 = vsel %vm3259_vm5, %v10549_v58, 0.0  ;;  %v7251_v35 = vpop.permute.xlu1 %7250  ;;  %v7253_v37 = vpop.permute.xlu0 %7252 }
 0x4ea   :  { %v6987_v46 = vadd.f32 %v6986_v26, %v6985_v55  ;;  %v6962_v62 = vadd.f32 %v6961_v28, %v6960_v48 }
 0x4ec   :  { %v6989_v17 = vadd.f32 %v6988_v0, %v6987_v46  ;;  %v6964_v50 = vadd.f32 %v6963_v5, %v6962_v62  ;;  %v10588_v29 = vpop.permute.xlu1 %7266  ;;  %v10590_v48 = vpop.permute.xlu0 %7268 }
 0x4ee   :  { %v6991_v19 = vadd.f32 %v6990_v45, %v6989_v17  ;;  %v6966_v40 = vadd.f32 %v6965_v41, %v6964_v50  ;;  %v8429_v17 = vmov 1966171168  }
 0x4ef   :  { %v7187_v5 = vunpack.c.l.s4 %v8429_v17 }
 0x4f0   :  { %v6992_v59 = vrot.slane %v6991_v19, 4  ;;  %v6968_v33 = vadd.f32 %v6967_v47, %v6966_v40  ;;  %v7255_v26 = vpop.permute.xlu1 %7254  ;;  %v10592_v62 = vpop.permute.xlu0 %7270 }
 0x4f1   :  { %v7188_v50 = vunpack.c.0.s8 %v7187_v5 }
 0x4f2   :  { %v6993_v42 = vadd.f32 %v6992_v59, %v6991_v19  ;;  %v6970_v11 = vadd.f32 %v6969_v1, %v6968_v33 }
 0x4f3   :  { %v7191_v41 = vsub.s32 %v7188_v50, %v9520_v7 }
 0x4f4   :  { %v6994_v24 = vrot.slane %v6993_v42, 2  ;;  %v6971_v10 = vrot.slane %v6970_v11, 4  ;;  %v7257_v46 = vpop.permute.xlu1 %7256  ;;  %v10594_v19 = vpop.permute.xlu0 %7272 }
 0x4f6   :  { %v6995_v30 = vadd.f32 %v6994_v24, %v6993_v42  ;;  %v6972_v31 = vadd.f32 %v6971_v10, %v6970_v11 }
 0x4f8   :  { %v6996_v2 = vrot.slane %v6995_v30, 1  ;;  %v6973_v53 = vrot.slane %v6972_v31, 2  ;;  %v7259_v45 = vpop.permute.xlu1 %7258  ;;  %v10597_v47 = vpop.permute.xlu0 %7274 }
 0x4fa   :  { %v6974_v60 = vadd.f32 %v6973_v53, %v6972_v31  ;;  %v6997_v38 = vadd.f32 %v6996_v2, %v6995_v30 }
 0x4fc   :  { %v6975_v49 = vrot.slane %v6974_v60, 1  ;;  %v7000_v21 = vmul.f32 0.015625, %v6997_v38  ;;  %v7261_v40 = vpop.permute.xlu1 %7260  ;;  %v7277_v30 = vpop.permute.xlu0 %7276 }
 0x4fe   :  { %v6976_v23 = vadd.f32 %v6975_v49, %v6974_v60 }
 0x500   :  { %v6999_v12 = vmul.f32 0.015625, %v6976_v23  ;;  %v7263_v11 = vpop.permute.xlu1 %7262 }
 0x502   :  { %v7019_v39 = vsel %vm7018_vm10, %v7000_v21, %v6999_v12 }
 0x503   :  { %8307 = vmatmul.mubr.msk.f32.vlgmr.msra.gmra.mrb[64].mxu1 %vm3259_vm5, %v7019_v39 }
 0x504   :  { %8311 = vmatprep.mubr.msk.f32.mxu1 %vm8427_vm7, %v8428_v20  ;;  %8310 = vmatpush3.msk.msra.mxu1 %vm7105_vm11, %v7093_v3  ;;  %v7985_v20 = vld [vmem:[%s10943_s11] ss:$0 sm:$0xff]  ;;  %s8398_s11 = scalar_lea.vmem %s7630_s10, 1024 }
 0x505   :  { %p8399_p0 = scmp.ne.s32.totalorder %s7630_s10, %s8398_s11  ;;  %p8404_p2 = scmp.lt.s32.totalorder %s8398_s11, %s8398_s11 }
 0x507   :  { %p8405_p3 = por %p8404_p2, %p8403_p1 }
 0x509   :  { %p8406_p4 = pnand %p8405_p3, %p8399_p0 }
 0x5d6   :  { %v7088_v6 = vpop.f32.mrb[64].mxu1 }
 0x5d7   :  { %v7089_v9 = vadd.f32 %v7983_v57, %v7088_v6  ;;  %v8308_v18 = vpop.f32.mrb[65].mxu1 }
 0x5d8   :  { %v7279_v18 = vpop.permute.xlu0 %7278 }
 0x5d9   :  { %v7092_v32 = vmax.f32 %v7089_v9, 0.0 }
 0x5db   :  { %8312 = vmatmul.mubr.msk.f32.vlgmr.msra.gmra.mrb[66].mxu1 %vm7101_vm12, %v7092_v32 }
 0x6ae   :  { %v7175_v25 = vpop.f32.mrb[66].mxu1 }
 0x6af   :  { %v7176_v52 = vadd.f32 %v7985_v20, %v7175_v25  ;;  %v8313_v22 = vpop.f32.mrb[67].mxu1 }
 0x6b1   :  { %v7988_v55 = vmul.f32 -1.442695, %v7176_v52 }
 0x6b3   :  { %8394 = vpow2.f32 %v7988_v55 }
 0x6bd   :  { %v8395_v28 = vpop.eup %8394 }
 0x6be   :  { %v7182_v0 = vadd.f32 1.0, %v8395_v28 }
 0x6c0   :  { %8396 = vrcp.f32 %v7182_v0 }
 0x6ca   :  { %v8397_v59 = vpop.eup %8396 }
 0x6cb   :  { %v7192_v33 = vrot.slane %v8397_v59, %v7191_v41 }
 0x6cd   :  { %v7193_v42 = vcombine.high %v7192_v33, %v7192_v33  ;;  %v7200_v1 = vrot.slane %v7192_v33, %v7191_v41 }
 0x6cf   :  { %v7207_v24 = vrot.slane %v7193_v42, %v7191_v41  ;;  %v7211_v10 = vrot.slane %v7200_v1, %v9526_v43  ;;  %v7281_v1 = vpop.permute.xlu0 %7280 }
 0x6d1   :  { %v7215_v31 = vrot.slane %v7207_v24, %v9526_v43  ;;  %v7218_v2 = vmul.f32 %v7211_v10, %v10535_v63  ;;  %v7220_v7 = vmul.f32 %v7211_v10, %v10539_v34  ;;  %v7219_v53 = vmul.f32 %v7211_v10, %v10537_v36  ;;  %v7265_v34 = vpop.permute.xlu1 %7264 }
 0x6d2   :  { %v7221_v60 = vmul.f32 %v7211_v10, %v10541_v13  ;;  %v7222_v38 = vmul.f32 %v7211_v10, %v10543_v56  ;;  %v7223_v49 = vmul.f32 %v7211_v10, %v10545_v15  ;;  %v7224_v23 = vmul.f32 %v7211_v10, %v10547_v51 }
 0x6d3   :  { %v7226_v21 = vmul.f32 %v7215_v31, %v10505_v14  ;;  %v7225_v43 = vmul.f32 %v7211_v10, %v10549_v58  ;;  %v7298_v12 = vadd.f32 %v7251_v35, %v7218_v2  ;;  %v7299_v63 = vadd.f32 %v7253_v37, %v7219_v53 }
 0x6d4   :  { %v7300_v39 = vadd.f32 %v7255_v26, %v7220_v7  ;;  %v7301_v36 = vadd.f32 %v7257_v46, %v7221_v60  ;;  %v7302_v3 = vadd.f32 %v7259_v45, %v7222_v38  ;;  %v7303_v57 = vadd.f32 %v7261_v40, %v7223_v49 }
 0x6d5   :  { %v7304_v13 = vadd.f32 %v7263_v11, %v7224_v23  ;;  %v7305_v56 = vadd.f32 %v7265_v34, %v7225_v43  ;;  %v10610_v6 = vmax.f32 %v7298_v12, 0.0  ;;  %v10612_v15 = vmax.f32 %v7299_v63, 0.0 }
 0x6d6   :  { %v10614_v51 = vmax.f32 %v7300_v39, 0.0  ;;  %v10616_v14 = vmax.f32 %v7301_v36, 0.0  ;;  %v10618_v58 = vmax.f32 %v7302_v3, 0.0  ;;  %v10620_v9 = vmax.f32 %v7303_v57, 0.0 }
 0x6d7   :  { %v10622_v32 = vmax.f32 %v7304_v13, 0.0  ;;  %v10624_v35 = vmax.f32 %v7305_v56, 0.0  ;;  %v7382_v20 = vrot.slane %v10610_v6, 1  ;;  %v7227_v25 = vmul.f32 %v7215_v31, %v10507_v8 }
 0x6d8   :  { %v7384_v52 = vrot.slane %v10614_v51, 7  ;;  %v7386_v22 = vrot.slane %v10616_v14, 6  ;;  %v7388_v55 = vrot.slane %v10618_v58, 5  ;;  %v7390_v37 = vrot.slane %v10620_v9, 4 }
 0x6d9   :  { %v7383_v26 = vsel %vm7018_vm10, %v10612_v15, %v7382_v20  ;;  %v7392_v46 = vrot.slane %v10622_v32, 3  ;;  %v7394_v28 = vrot.slane %v10624_v35, 2  ;;  %v7228_v0 = vmul.f32 %v7215_v31, %v10509_v61 }
 0x6da   :  { %v7385_v17 = vsel %vm7349_vm13, %v7384_v52, %v7383_v26  ;;  %v7229_v8 = vmul.f32 %v7215_v31, %v10511_v16  ;;  %v7230_v5 = vmul.f32 %v7215_v31, %v10513_v4  ;;  %v7231_v45 = vmul.f32 %v7215_v31, %v10515_v27 }
 0x6db   :  { %v7387_v50 = vsel %vm7352_vm14, %v7386_v22, %v7385_v17  ;;  %v7232_v41 = vmul.f32 %v7215_v31, %v10517_v54  ;;  %v7233_v40 = vmul.f32 %v7215_v31, %v10519_v44  ;;  %v7306_v59 = vadd.f32 %v10588_v29, %v7226_v21 }
 0x6dc   :  { %v7389_v33 = vsel %vm7355_vm15, %v7388_v55, %v7387_v50  ;;  %v7307_v61 = vadd.f32 %v10590_v48, %v7227_v25  ;;  %v7308_v42 = vadd.f32 %v10592_v62, %v7228_v0  ;;  %v7309_v16 = vadd.f32 %v10594_v19, %v7229_v8 }
 0x6dd   :  { %v7391_v4 = vsel %vm7358_vm0, %v7390_v37, %v7389_v33  ;;  %v7310_v27 = vadd.f32 %v10597_v47, %v7230_v5  ;;  %v7311_v11 = vadd.f32 %v7277_v30, %v7231_v45  ;;  %v7312_v24 = vadd.f32 %v7279_v18, %v7232_v41 }
 0x6de   :  { %v7393_v54 = vsel %vm7361_vm1, %v7392_v46, %v7391_v4  ;;  %v7313_v44 = vadd.f32 %v7281_v1, %v7233_v40  ;;  %v10652_v10 = vmax.f32 %v7306_v59, 0.0  ;;  %v10654_v29 = vmax.f32 %v7307_v61, 0.0 }
 0x6df   :  { %v7395_v48 = vsel %vm7364_vm2, %v7394_v28, %v7393_v54  ;;  %v10657_v31 = vmax.f32 %v7308_v42, 0.0  ;;  %v10659_v62 = vmax.f32 %v7309_v16, 0.0  ;;  %v10661_v19 = vmax.f32 %v7310_v27, 0.0 }
 0x6e0   :  { %7410 = vrot.lane.b32.xlu1 %v7395_v48, %s8425_s23  ;;  %v10664_v47 = vmax.f32 %v7311_v11, 0.0  ;;  %v10666_v30 = vmax.f32 %v7312_v24, 0.0  ;;  %v10668_v2 = vmax.f32 %v7313_v44, 0.0  ;;  %v7396_v7 = vrot.slane %v10652_v10, 1 }
 0x6e1   :  { %v7398_v53 = vrot.slane %v10657_v31, 7  ;;  %v7400_v60 = vrot.slane %v10659_v62, 6  ;;  %v7446_v38 = vrot.slane %v10610_v6, 3  ;;  %v7402_v23 = vrot.slane %v10661_v19, 5 }
 0x6e2   :  { %v7397_v49 = vsel %vm7018_vm10, %v10654_v29, %v7396_v7  ;;  %v7404_v21 = vrot.slane %v10664_v47, 4  ;;  %v7406_v43 = vrot.slane %v10666_v30, 3  ;;  %v7408_v63 = vrot.slane %v10668_v2, 2 }
 0x6e3   :  { %v7399_v12 = vsel %vm7349_vm13, %v7398_v53, %v7397_v49  ;;  %v7447_v34 = vrot.slane %v10612_v15, 2  ;;  %v7449_v39 = vrot.slane %v10614_v51, 1  ;;  %v7452_v3 = vrot.slane %v10618_v58, 7 }
 0x6e4   :  { %v7401_v36 = vsel %vm7352_vm14, %v7400_v60, %v7399_v12  ;;  %v7454_v57 = vrot.slane %v10620_v9, 6  ;;  %v7456_v13 = vrot.slane %v10622_v32, 5  ;;  %v7460_v20 = vrot.slane %v10652_v10, 3 }
 0x6e5   :  { %v7403_v56 = vsel %vm7355_vm15, %v7402_v23, %v7401_v36  ;;  %v7448_v18 = vsel %vm7018_vm10, %v7447_v34, %v7446_v38  ;;  %v7461_v25 = vrot.slane %v10654_v29, 2  ;;  %v7458_v55 = vrot.slane %v10624_v35, 4 }
 0x6e6   :  { %v7405_v52 = vsel %vm7358_vm0, %v7404_v21, %v7403_v56  ;;  %v7450_v22 = vsel %vm7349_vm13, %v7449_v39, %v7448_v18  ;;  %v7463_v37 = vrot.slane %v10657_v31, 1  ;;  %v7466_v0 = vrot.slane %v10661_v19, 7 }
 0x6e7   :  { %v7407_v26 = vsel %vm7361_vm1, %v7406_v43, %v7405_v52  ;;  %v7451_v46 = vsel %vm7352_vm14, %v10616_v14, %v7450_v22  ;;  %v7462_v28 = vsel %vm7018_vm10, %v7461_v25, %v7460_v20  ;;  %v7468_v45 = vrot.slane %v10664_v47, 6 }
 0x6e8   :  { %v7409_v17 = vsel %vm7364_vm2, %v7408_v63, %v7407_v26  ;;  %v7453_v8 = vsel %vm7355_vm15, %v7452_v3, %v7451_v46  ;;  %v7464_v5 = vsel %vm7349_vm13, %v7463_v37, %v7462_v28  ;;  %v7470_v40 = vrot.slane %v10666_v30, 5 }
 0x6e9   :  { %7412 = vrot.lane.b32.xlu0 %v7409_v17, %s8425_s23  ;;  %v7455_v50 = vsel %vm7358_vm0, %v7454_v57, %v7453_v8  ;;  %v7465_v41 = vsel %vm7352_vm14, %v10659_v62, %v7464_v5  ;;  %v7510_v59 = vrot.slane %v10610_v6, 5  ;;  %v7511_v42 = vrot.slane %v10612_v15, 4 }
 0x6ea   :  { %v7457_v33 = vsel %vm7361_vm1, %v7456_v13, %v7455_v50  ;;  %v7467_v61 = vsel %vm7355_vm15, %v7466_v0, %v7465_v41  ;;  %v7513_v16 = vrot.slane %v10614_v51, 3  ;;  %v7472_v27 = vrot.slane %v10668_v2, 4 }
 0x6eb   :  { %v7459_v1 = vsel %vm7364_vm2, %v7458_v55, %v7457_v33  ;;  %v7469_v4 = vsel %vm7358_vm0, %v7468_v45, %v7467_v61  ;;  %v7515_v11 = vrot.slane %v10616_v14, 2  ;;  %v7512_v54 = vsel %vm7018_vm10, %v7511_v42, %v7510_v59 }
 0x6ec   :  { %7474 = vrot.lane.b32.xlu1 %v7459_v1, %s8425_s23  ;;  %v7471_v24 = vsel %vm7361_vm1, %v7470_v40, %v7469_v4  ;;  %v7517_v44 = vrot.slane %v10618_v58, 1  ;;  %v7520_v48 = vrot.slane %v10622_v32, 7  ;;  %v7514_v53 = vsel %vm7349_vm13, %v7513_v16, %v7512_v54 }
 0x6ed   :  { %v7473_v7 = vsel %vm7364_vm2, %v7472_v27, %v7471_v24  ;;  %v7524_v60 = vrot.slane %v10652_v10, 5  ;;  %v7525_v38 = vrot.slane %v10654_v29, 4  ;;  %v7516_v49 = vsel %vm7352_vm14, %v7515_v11, %v7514_v53 }
 0x6ee   :  { %7476 = vrot.lane.b32.xlu0 %v7473_v7, %s8425_s23  ;;  %v7522_v23 = vrot.slane %v10624_v35, 6  ;;  %v7527_v21 = vrot.slane %v10657_v31, 3  ;;  %v7529_v43 = vrot.slane %v10659_v62, 2  ;;  %v7518_v12 = vsel %vm7355_vm15, %v7517_v44, %v7516_v49 }
 0x6ef   :  { %v7526_v63 = vsel %vm7018_vm10, %v7525_v38, %v7524_v60  ;;  %v7531_v34 = vrot.slane %v10661_v19, 1  ;;  %v7534_v39 = vrot.slane %v10666_v30, 7  ;;  %v7519_v36 = vsel %vm7358_vm0, %v10620_v9, %v7518_v12 }
 0x6f0   :  { %v7528_v3 = vsel %vm7349_vm13, %v7527_v21, %v7526_v63  ;;  %v7574_v57 = vrot.slane %v10610_v6, 7  ;;  %v7575_v13 = vrot.slane %v10612_v15, 6  ;;  %v7521_v56 = vsel %vm7361_vm1, %v7520_v48, %v7519_v36 }
 0x6f1   :  { %v7530_v18 = vsel %vm7352_vm14, %v7529_v43, %v7528_v3  ;;  %v7536_v20 = vrot.slane %v10668_v2, 6  ;;  %v7577_v25 = vrot.slane %v10614_v51, 5  ;;  %v7523_v52 = vsel %vm7364_vm2, %v7522_v23, %v7521_v56 }
 0x6f2   :  { %v7532_v22 = vsel %vm7355_vm15, %v7531_v34, %v7530_v18  ;;  %v7576_v55 = vsel %vm7018_vm10, %v7575_v13, %v7574_v57  ;;  %v7579_v37 = vrot.slane %v10616_v14, 4  ;;  %7538 = vrot.lane.b32.xlu1 %v7523_v52, %s8425_s23  ;;  %v7581_v28 = vrot.slane %v10618_v58, 3 }
 0x6f3   :  { %v7533_v26 = vsel %vm7358_vm0, %v10664_v47, %v7532_v22  ;;  %v7578_v46 = vsel %vm7349_vm13, %v7577_v25, %v7576_v55  ;;  %v7583_v0 = vrot.slane %v10620_v9, 2  ;;  %v7588_v5 = vrot.slane %v10652_v10, 7 }
 0x6f4   :  { %v7535_v17 = vsel %vm7361_vm1, %v7534_v39, %v7533_v26  ;;  %v7580_v8 = vsel %vm7352_vm14, %v7579_v37, %v7578_v46  ;;  %v7589_v45 = vrot.slane %v10654_v29, 6  ;;  %v7585_v40 = vrot.slane %v10622_v32, 1 }
 0x6f5   :  { %v7537_v50 = vsel %vm7364_vm2, %v7536_v20, %v7535_v17  ;;  %v7582_v41 = vsel %vm7355_vm15, %v7581_v28, %v7580_v8  ;;  %v7591_v59 = vrot.slane %v10657_v31, 5  ;;  %v7593_v42 = vrot.slane %v10659_v62, 4 }
 0x6f6   :  { %7540 = vrot.lane.b32.xlu0 %v7537_v50, %s8425_s23  ;;  %v7584_v33 = vsel %vm7358_vm0, %v7583_v0, %v7582_v41  ;;  %v7590_v61 = vsel %vm7018_vm10, %v7589_v45, %v7588_v5  ;;  %v7595_v16 = vrot.slane %v10661_v19, 3  ;;  %v7597_v27 = vrot.slane %v10664_v47, 2 }
 0x6f7   :  { %v7586_v1 = vsel %vm7361_vm1, %v7585_v40, %v7584_v33  ;;  %v7592_v4 = vsel %vm7349_vm13, %v7591_v59, %v7590_v61  ;;  %v7346_v11 = vrot.slane %v10612_v15, 7  ;;  %v7599_v44 = vrot.slane %v10666_v30, 1 }
 0x6f8   :  { %v7587_v24 = vsel %vm7364_vm2, %v10624_v35, %v7586_v1  ;;  %v7594_v54 = vsel %vm7352_vm14, %v7593_v42, %v7592_v4  ;;  %v7348_v48 = vrot.slane %v10614_v51, 6  ;;  %v7351_v53 = vrot.slane %v10616_v14, 5 }
 0x6f9   :  { %7602 = vrot.lane.b32.xlu1 %v7587_v24, %s8425_s23  ;;  %v7596_v7 = vsel %vm7355_vm15, %v7595_v16, %v7594_v54  ;;  %v7354_v60 = vrot.slane %v10618_v58, 4  ;;  %v7357_v38 = vrot.slane %v10620_v9, 3  ;;  %v7360_v23 = vrot.slane %v10622_v32, 2 }
 0x6fa   :  { %v7598_v49 = vsel %vm7358_vm0, %v7597_v27, %v7596_v7  ;;  %v7347_v21 = vsel %vm7018_vm10, %v7346_v11, %v10610_v6  ;;  %v7366_v43 = vrot.slane %v10654_v29, 7  ;;  %v7363_v63 = vrot.slane %v10624_v35, 1 }
 0x6fb   :  { %v7600_v12 = vsel %vm7361_vm1, %v7599_v44, %v7598_v49  ;;  %v7350_v34 = vsel %vm7349_vm13, %v7348_v48, %v7347_v21  ;;  %v7368_v39 = vrot.slane %v10657_v31, 6  ;;  %v7370_v57 = vrot.slane %v10659_v62, 5 }
 0x6fc   :  { %v7601_v36 = vsel %vm7364_vm2, %v10668_v2, %v7600_v12  ;;  %v7353_v3 = vsel %vm7352_vm14, %v7351_v53, %v7350_v34  ;;  %v7372_v13 = vrot.slane %v10661_v19, 4  ;;  %v7374_v18 = vrot.slane %v10664_v47, 3 }
 0x6fd   :  { %7604 = vrot.lane.b32.xlu0 %v7601_v36, %s8425_s23  ;;  %v7356_v56 = vsel %vm7355_vm15, %v7354_v60, %v7353_v3  ;;  %v7376_v20 = vrot.slane %v10666_v30, 2  ;;  %v7367_v25 = vsel %vm7018_vm10, %v7366_v43, %v10652_v10  ;;  %v7416_v55 = vrot.slane %v10610_v6, 2 }
 0x6fe   :  { %v7359_v52 = vsel %vm7358_vm0, %v7357_v38, %v7356_v56  ;;  %v7369_v22 = vsel %vm7349_vm13, %v7368_v39, %v7367_v25  ;;  %v7417_v37 = vrot.slane %v10612_v15, 1  ;;  %v7378_v46 = vrot.slane %v10668_v2, 1 }
 0x6ff   :  { %v7362_v26 = vsel %vm7361_vm1, %v7360_v23, %v7359_v52  ;;  %v7371_v28 = vsel %vm7352_vm14, %v7370_v57, %v7369_v22  ;;  %v7420_v0 = vrot.slane %v10616_v14, 7  ;;  %v7422_v45 = vrot.slane %v10618_v58, 6 }
 0x700   :  { %v10811_v17 = vsel %vm7364_vm2, %v7363_v63, %v7362_v26  ;;  %v7373_v8 = vsel %vm7355_vm15, %v7372_v13, %v7371_v28  ;;  %v7418_v5 = vsel %vm7018_vm10, %v7417_v37, %v7416_v55  ;;  %v7424_v40 = vrot.slane %v10620_v9, 5 }
 0x701   :  { %v7375_v50 = vsel %vm7358_vm0, %v7374_v18, %v7373_v8  ;;  %v7419_v41 = vsel %vm7349_vm13, %v10614_v51, %v7418_v5  ;;  %v7426_v59 = vrot.slane %v10622_v32, 4  ;;  %v7430_v42 = vrot.slane %v10652_v10, 2 }
 0x702   :  { %v7377_v33 = vsel %vm7361_vm1, %v7376_v20, %v7375_v50  ;;  %v7421_v61 = vsel %vm7352_vm14, %v7420_v0, %v7419_v41  ;;  %v7431_v16 = vrot.slane %v10654_v29, 1  ;;  %v7428_v27 = vrot.slane %v10624_v35, 3 }
 0x703   :  { %v10826_v1 = vsel %vm7364_vm2, %v7378_v46, %v7377_v33  ;;  %v7423_v4 = vsel %vm7355_vm15, %v7422_v45, %v7421_v61  ;;  %v7434_v11 = vrot.slane %v10659_v62, 7  ;;  %v7436_v44 = vrot.slane %v10661_v19, 6 }
 0x704   :  { %v7425_v24 = vsel %vm7358_vm0, %v7424_v40, %v7423_v4  ;;  %v7432_v54 = vsel %vm7018_vm10, %v7431_v16, %v7430_v42  ;;  %v7438_v48 = vrot.slane %v10664_v47, 5  ;;  %v7440_v60 = vrot.slane %v10666_v30, 4 }
 0x705   :  { %v7427_v7 = vsel %vm7361_vm1, %v7426_v59, %v7425_v24  ;;  %v7433_v53 = vsel %vm7349_vm13, %v10657_v31, %v7432_v54  ;;  %v7480_v38 = vrot.slane %v10610_v6, 4  ;;  %v7481_v21 = vrot.slane %v10612_v15, 3 }
 0x706   :  { %v10841_v49 = vsel %vm7364_vm2, %v7428_v27, %v7427_v7  ;;  %v7435_v23 = vsel %vm7352_vm14, %v7434_v11, %v7433_v53  ;;  %v7483_v43 = vrot.slane %v10614_v51, 2  ;;  %v7442_v63 = vrot.slane %v10668_v2, 3 }
 0x707   :  { %v7437_v12 = vsel %vm7355_vm15, %v7436_v44, %v7435_v23  ;;  %v7485_v34 = vrot.slane %v10616_v14, 1  ;;  %v7488_v39 = vrot.slane %v10620_v9, 7  ;;  %v7482_v3 = vsel %vm7018_vm10, %v7481_v21, %v7480_v38 }
 0x708   :  { %v7439_v36 = vsel %vm7358_vm0, %v7438_v48, %v7437_v12  ;;  %v7490_v57 = vrot.slane %v10622_v32, 6  ;;  %v7494_v13 = vrot.slane %v10652_v10, 4  ;;  %v7484_v18 = vsel %vm7349_vm13, %v7483_v43, %v7482_v3 }
 0x709   :  { %v7441_v56 = vsel %vm7361_vm1, %v7440_v60, %v7439_v36  ;;  %v7495_v20 = vrot.slane %v10654_v29, 3  ;;  %v7497_v25 = vrot.slane %v10657_v31, 2  ;;  %v7486_v22 = vsel %vm7352_vm14, %v7485_v34, %v7484_v18 }
 0x70a   :  { %v7443_v52 = vsel %vm7364_vm2, %v7442_v63, %v7441_v56  ;;  %v7492_v55 = vrot.slane %v10624_v35, 5  ;;  %v7499_v37 = vrot.slane %v10659_v62, 1  ;;  %v7487_v26 = vsel %vm7355_vm15, %v10618_v58, %v7486_v22 }
 0x70b   :  { %v7496_v46 = vsel %vm7018_vm10, %v7495_v20, %v7494_v13  ;;  %v7502_v28 = vrot.slane %v10664_v47, 7  ;;  %v7504_v0 = vrot.slane %v10666_v30, 6  ;;  %v7489_v8 = vsel %vm7358_vm0, %v7488_v39, %v7487_v26 }
 0x70c   :  { %v7498_v5 = vsel %vm7349_vm13, %v7497_v25, %v7496_v46  ;;  %v7544_v45 = vrot.slane %v10610_v6, 6  ;;  %v7545_v50 = vrot.slane %v10612_v15, 5  ;;  %v7491_v41 = vsel %vm7361_vm1, %v7490_v57, %v7489_v8 }
 0x70d   :  { %v7500_v40 = vsel %vm7352_vm14, %v7499_v37, %v7498_v5  ;;  %v7506_v59 = vrot.slane %v10668_v2, 5  ;;  %v7547_v33 = vrot.slane %v10614_v51, 4  ;;  %v7493_v61 = vsel %vm7364_vm2, %v7492_v55, %v7491_v41 }
 0x70e   :  { %v7501_v42 = vsel %vm7355_vm15, %v10661_v19, %v7500_v40  ;;  %v7546_v16 = vsel %vm7018_vm10, %v7545_v50, %v7544_v45  ;;  %v7549_v4 = vrot.slane %v10616_v14, 3  ;;  %v7551_v27 = vrot.slane %v10618_v58, 2 }
 0x70f   :  { %v7503_v6 = vsel %vm7358_vm0, %v7502_v28, %v7501_v42  ;;  %v7548_v15 = vsel %vm7349_vm13, %v7547_v33, %v7546_v16  ;;  %v7553_v11 = vrot.slane %v10620_v9, 1  ;;  %v7558_v54 = vrot.slane %v10652_v10, 6 }
 0x710   :  { %v7505_v24 = vsel %vm7361_vm1, %v7504_v0, %v7503_v6  ;;  %v7550_v51 = vsel %vm7352_vm14, %v7549_v4, %v7548_v15  ;;  %v7559_v44 = vrot.slane %v10654_v29, 5  ;;  %v7561_v7 = vrot.slane %v10657_v31, 4 }
 0x711   :  { %v7507_v48 = vsel %vm7364_vm2, %v7506_v59, %v7505_v24  ;;  %v7552_v14 = vsel %vm7355_vm15, %v7551_v27, %v7550_v51  ;;  %v7556_v58 = vrot.slane %v10624_v35, 7  ;;  %v7563_v60 = vrot.slane %v10659_v62, 3 }
 0x712   :  { %v7554_v53 = vsel %vm7358_vm0, %v7553_v11, %v7552_v14  ;;  %v7560_v9 = vsel %vm7018_vm10, %v7559_v44, %v7558_v54  ;;  %v7565_v29 = vrot.slane %v10661_v19, 2  ;;  %v7567_v31 = vrot.slane %v10664_v47, 1 }
 0x713   :  { %v7555_v38 = vsel %vm7361_vm1, %v10622_v32, %v7554_v53  ;;  %v7562_v10 = vsel %vm7349_vm13, %v7561_v7, %v7560_v9  ;;  %v7570_v12 = vrot.slane %v10668_v2, 7 }
 0x714   :  { %v7557_v23 = vsel %vm7364_vm2, %v7556_v58, %v7555_v38  ;;  %v7564_v21 = vsel %vm7352_vm14, %v7563_v60, %v7562_v10 }
 0x715   :  { %v7566_v43 = vsel %vm7355_vm15, %v7565_v29, %v7564_v21 }
 0x716   :  { %v7568_v35 = vsel %vm7358_vm0, %v7567_v31, %v7566_v43 }
 0x717   :  { %v7569_v62 = vsel %vm7361_vm1, %v10666_v30, %v7568_v35 }
 0x718   :  { %v7571_v32 = vsel %vm7364_vm2, %v7570_v12, %v7569_v62 }
 0x752   :  { %v7411_v63 = vpop.permute.xlu1 %7410 }
 0x753   :  { %v7608_v19 = vsel %vm3259_vm5, %v10811_v17, %v7411_v63 }
 0x754   :  { %7616 = vst [vmem:[#allocation6] sm:$0xff] %v7608_v19 }
 0x75b   :  { %v7413_v34 = vpop.permute.xlu0 %7412 }
 0x75c   :  { %v7609_v47 = vsel %vm3259_vm5, %v10826_v1, %v7413_v34 }
 0x75d   :  { %7620 = vst [vmem:[#allocation6 + $0x20] sm:$0xff] %v7609_v47 }
 0x75e   :  { %v7475_v39 = vpop.permute.xlu1 %7474 }
 0x75f   :  { %v7610_v36 = vsel %vm3259_vm5, %v10841_v49, %v7475_v39 }
 0x760   :  { %7617 = vst [vmem:[#allocation6 + $0x8] sm:$0xff] %v7610_v36  ;;  %v7477_v2 = vpop.permute.xlu0 %7476 }
 0x761   :  { %v7611_v30 = vsel %vm3259_vm5, %v7443_v52, %v7477_v2 }
 0x762   :  { %7621 = vst [vmem:[#allocation6 + $0x28] sm:$0xff] %v7611_v30 }
 0x764   :  { %v7539_v3 = vpop.permute.xlu1 %7538 }
 0x765   :  { %v7612_v57 = vsel %vm3259_vm5, %v7493_v61, %v7539_v3 }
 0x766   :  { %7618 = vst [vmem:[#allocation6 + $0x10] sm:$0xff] %v7612_v57 }
 0x768   :  { %v7541_v17 = vpop.permute.xlu0 %7540 }
 0x769   :  { %v7613_v13 = vsel %vm3259_vm5, %v7507_v48, %v7541_v17 }
 0x76a   :  { %7622 = vst [vmem:[#allocation6 + $0x30] sm:$0xff] %v7613_v13 }
 0x76b   :  { %v7603_v56 = vpop.permute.xlu1 %7602 }
 0x76c   :  { %v7614_v1 = vsel %vm3259_vm5, %v7557_v23, %v7603_v56 }
 0x76d   :  { %7619 = vst [vmem:[#allocation6 + $0x18] sm:$0xff] %v7614_v1 }
 0x76f   :  { %v7605_v49 = vpop.permute.xlu0 %7604 }
 0x770   :  { %v7615_v18 = vsel %vm3259_vm5, %v7571_v32, %v7605_v49 }
 0x771   :  { %7623 = vst [vmem:[#allocation6 + $0x38] sm:$0xff] %v7615_v18 }
 0x772   :  { %8409 = shalt.err (!%p8406_p4)
}
 0x773   :  { %s8410_s26 = scalar_lea.hbm %s10944_s12, 1024 }
 0x774   :  { %p8411_p5 = scmp.ne.s32.totalorder %s10944_s12, %s8410_s26  ;;  %p8414_p6 = scmp.lt.u32.totalorder %s8410_s26, %s10944_s12 }
 0x776   :  { %p8416_p7 = pnand %p8414_p6, %p8411_p5 }
 0x778   :  { %8419 = shalt.err (!%p8416_p7)
}
 0x779   :  { %s8431_s29 = smov 512  }
 0x77a   :  { %7635 = dma.vmem_to_hbm [thread:$0]  %s7630_s10, 1024, %s10944_s12, [#allocation7], %s8431_s29, %s8431_s29, %s8423_s21  }
 0x77b   :  { %8420 = dma.done.wait [#allocation7], 1024  }
 0x77c   :  { %8421 = vsyncadd [#allocation7], 4294966272 }
 0x77d   :  { %7639 = vsyncpa [#allocation7], 1 }

</bundles_post_ra>
